<compile_context>
chip_gen: v5e
topology: v5e:2x2
jax: 0.10.0
libtpu: 0.0.40
codegen_flags: <defaults>
</compile_context>

<pallas_src>
import functools

import jax
import jax.numpy as jnp
from jax.experimental import pallas as pl
from jax.experimental.pallas import tpu as pltpu


# ----------------------------------------------------------------------------
# Kernel 1: fused 3x3 conv (9 shifted matmuls) + folded-BN bias + ReLU
# ----------------------------------------------------------------------------
def _conv3x3_bn_relu_kernel(x_ref, w_ref, b_ref, o_ref, *, wp):
    # x_ref: ((H+2)*(W+2)+2, Cin) bf16 — zero-halo-padded image, row-flattened with one
    #        extra pad row front/back so every 3x3 tap is a contiguous row slice at a
    #        constant offset kh*(W+2)+kw.
    # w_ref: (9, Cin, Cout) bf16 — BN scale already folded into the weights.
    # b_ref: (1, Cout) f32   — folded BN bias.
    # o_ref: (H*(W+2), Cout) bf16 — contains 2 junk halo columns/row, stripped in JAX.
    M, Cout = o_ref.shape
    acc = jnp.zeros((M, Cout), jnp.float32)
    for kh in range(3):
        for kw in range(3):
            start = kh * wp + kw
            patch = x_ref[start:start + M, :]                     # (M, Cin) bf16
            acc = acc + jnp.dot(patch, w_ref[kh * 3 + kw],
                                preferred_element_type=jnp.float32)
    o_ref[...] = jnp.maximum(acc + b_ref[...], 0.0).astype(o_ref.dtype)


def conv3x3_bn_relu(x_nhwc, w9, bias):
    """x_nhwc: (B, H, W, Cin) bf16 -> (B, H, W, Cout) bf16."""
    B, H, W, Cin = x_nhwc.shape
    Cout = w9.shape[-1]
    Wp = W + 2
    M = H * Wp
    # Cheap halo pad (+ ~30% elements) replaces the old 9x im2col materialization;
    # the 9-tap gather now happens inside the kernel in VMEM.
    xp = jnp.pad(x_nhwc, ((0, 0), (1, 1), (1, 1), (0, 0)))        # (B, H+2, W+2, Cin)
    xf = xp.reshape(B, (H + 2) * Wp, Cin)
    xf = jnp.pad(xf, ((0, 0), (1, 1), (0, 0)))                    # (B, (H+2)*Wp+2, Cin)
    y = pl.pallas_call(
        functools.partial(_conv3x3_bn_relu_kernel, wp=Wp),
        out_shape=jax.ShapeDtypeStruct((B, M, Cout), jnp.bfloat16),
        grid=(B,),
        in_specs=[
            pl.BlockSpec((None, (H + 2) * Wp + 2, Cin), lambda b: (b, 0, 0)),
            pl.BlockSpec((9, Cin, Cout), lambda b: (0, 0, 0)),
            pl.BlockSpec((1, Cout), lambda b: (0, 0)),
        ],
        out_specs=pl.BlockSpec((None, M, Cout), lambda b: (b, 0, 0)),
        compiler_params=pltpu.CompilerParams(dimension_semantics=("parallel",)),
    )(xf, w9, bias)
    # strip the junk left/right halo columns: (B, H, W+2, Cout) -> (B, H, W, Cout)
    return y.reshape(B, H, Wp, Cout)[:, :, 1:W + 1, :]


# ----------------------------------------------------------------------------
# Kernel 2: final 1x1 conv (+bias) + sigmoid, output channel-major (B, C, T*F)
# ----------------------------------------------------------------------------
def _final_conv_sigmoid_kernel(x_ref, wt_ref, b_ref, o_ref):
    # x_ref: (L, Cin) bf16; wt_ref: (C, Cin) f32; b_ref: (C, 1) f32; o_ref: (C, L) f32
    xt = x_ref[...].astype(jnp.float32).T                         # (Cin, L) XLU transpose
    y = jnp.dot(wt_ref[...], xt, preferred_element_type=jnp.float32)   # (C, L)
    o_ref[...] = jax.nn.sigmoid(y + b_ref[...]).astype(o_ref.dtype)


def final_conv_sigmoid(x_flat, w_t, bias):
    """x_flat: (B, L, 128) bf16 -> (B, C, L) f32 bottleneck, already channel-major."""
    B, L, Cin = x_flat.shape
    C = w_t.shape[0]
    return pl.pallas_call(
        _final_conv_sigmoid_kernel,
        out_shape=jax.ShapeDtypeStruct((B, C, L), jnp.float32),
        grid=(B,),
        in_specs=[
            pl.BlockSpec((None, L, Cin), lambda b: (b, 0, 0)),
            pl.BlockSpec((C, Cin), lambda b: (0, 0)),
            pl.BlockSpec((C, 1), lambda b: (0, 0)),
        ],
        out_specs=pl.BlockSpec((None, C, L), lambda b: (b, 0, 0)),
        compiler_params=pltpu.CompilerParams(dimension_semantics=("parallel",)),
    )(x_flat, w_t, bias)


# ----------------------------------------------------------------------------
# Kernel 3: GWRP weighted sum, tiled over L with a resident (B, C) accumulator
# ----------------------------------------------------------------------------
def _gwrp_kernel(xs_ref, w_ref, o_ref):
    # xs_ref: (B, C, tL) sorted-descending slice; w_ref: (1, 1, tL) pre-normalized
    # weights (gwrp_w / sum(gwrp_w)); o_ref: (B, C) accumulator over the L grid axis.
    @pl.when(pl.program_id(0) == 0)
    def _():
        o_ref[...] = jnp.zeros_like(o_ref)
    o_ref[...] += jnp.sum(xs_ref[...] * w_ref[...], axis=-1)


def gwrp_weighted_sum(x_sorted, w_norm, tl=128):
    """x_sorted: (B, C, L) descending-sorted; w_norm: (L,) normalized GWRP weights."""
    B, C, L = x_sorted.shape
    n_l = -(-L // tl)
    Lp = n_l * tl
    if Lp != L:  # zero-pad the reduction axis (zero weights -> zero contribution)
        x_sorted = jnp.pad(x_sorted, ((0, 0), (0, 0), (0, Lp - L)))
        w_norm = jnp.pad(w_norm, (0, Lp - L))
    return pl.pallas_call(
        _gwrp_kernel,
        out_shape=jax.ShapeDtypeStruct((B, C), jnp.float32),
        grid=(n_l,),
        in_specs=[
            pl.BlockSpec((B, C, tl), lambda l: (0, 0, l)),
            pl.BlockSpec((1, 1, tl), lambda l: (0, 0, l)),
        ],
        out_specs=pl.BlockSpec((B, C), lambda l: (0, 0)),
        compiler_params=pltpu.CompilerParams(dimension_semantics=("arbitrary",)),
    )(x_sorted, w_norm.reshape(1, 1, Lp))


# ----------------------------------------------------------------------------
# Parameters and forward pass
# ----------------------------------------------------------------------------
def init_params(key, classes_num):
    """Deterministic synthetic init (shapes follow VggishBottleneck.__init__).
    BatchNorm (eval mode, init_bn: gamma=1, beta=0, mean=0, var=1) is folded into
    the conv weights (scale) and a per-channel bias."""
    chans = [(1, 32), (32, 32), (32, 64), (64, 64),
             (64, 128), (128, 128), (128, 128), (128, 128)]
    eps = 1e-5
    bn_scale = 1.0 / (1.0 + eps) ** 0.5
    conv_params = []
    for cin, cout in chans:
        key, k = jax.random.split(key)
        fan_in = 9 * cin
        w = jax.random.normal(k, (3, 3, cin, cout), jnp.float32) * (2.0 / fan_in) ** 0.5
        w = w * bn_scale                               # fold BN scale into the weights
        if cin == 1:                                   # pad degenerate K=1 first layer
            w = jnp.pad(w, ((0, 0), (0, 0), (0, 7), (0, 0)))
            cin = 8
        w9 = w.reshape(9, cin, cout).astype(jnp.bfloat16)
        bias = jnp.zeros((1, cout), jnp.float32)       # folded BN bias (beta - mean*scale)
        conv_params.append((w9, bias))
    key, k1, k2 = jax.random.split(key, 3)
    # final 1x1 conv weight stored pre-transposed (C, 128) for the channel-major matmul
    w_final_t = jax.random.normal(k1, (classes_num, 128), jnp.float32) * (2.0 / 128) ** 0.5
    b_final = jax.random.normal(k2, (classes_num, 1), jnp.float32) * 0.01
    return conv_params, w_final_t, b_final


def vggish_gwrp_forward(x_btf, params, gwrp_w_norm):
    """x_btf: (batch, time_steps, freq_bins) -> {'y_pred': (batch, classes_num)}."""
    conv_params, w_final_t, b_final = params
    B, T, Fr = x_btf.shape

    # (B, T, F) -> NHWC (B, T, F, 1); pad the degenerate channel dim to 8 lanes and
    # cast to bf16 for the MXU (accumulation stays f32 inside the kernels).
    x = x_btf.reshape(B, T, Fr, 1).astype(jnp.bfloat16)
    x = jnp.pad(x, ((0, 0), (0, 0), (0, 0), (0, 7)))

    for w9, bias in conv_params:           # 4 VggishConvBlocks = 8 conv+BN+ReLU layers
        x = conv3x3_bn_relu(x, w9, bias)

    # final 1x1 conv (with bias) + sigmoid, emitted channel-major (B, C, T*F)
    bottleneck = final_conv_sigmoid(x.reshape(B, T * Fr, 128), w_final_t, b_final)

    # Global weighted rank pooling.
    # TODO(synk): torch.sort has no Pallas TPU lowering; the descending sort runs in
    # plain JAX, the tiled weighted reduction runs in the Pallas kernel.
    flat_sorted = -jnp.sort(-bottleneck, axis=-1)
    out = gwrp_weighted_sum(flat_sorted, gwrp_w_norm)             # (B, C)
    return {"y_pred": out}


# ----------------------------------------------------------------------------
if __name__ == "__main__":
    classes_num, batch, seq_len, freq_bins = 4, 2, 8, 16

    key = jax.random.PRNGKey(0)
    key, kin = jax.random.split(key)
    x = jax.random.normal(kin, (batch, seq_len, freq_bins), jnp.float32)

    params = init_params(key, classes_num)
    decay = 0.9998
    gwrp_w = jnp.power(decay, jnp.arange(seq_len * freq_bins, dtype=jnp.float32))
    gwrp_w_norm = gwrp_w / jnp.sum(gwrp_w)   # hoist 1/sum(w) out of the kernel

    fwd = jax.jit(lambda a: vggish_gwrp_forward(a, params, gwrp_w_norm))
    out = fwd(x)
    jax.block_until_ready(out["y_pred"])
    assert out["y_pred"].shape == (batch, classes_num)
    print("KERNEL_OK")
</pallas_src>

<mosaic_0001>
module attributes {stable_mosaic.version = 11 : i64} {
  func.func @_conv3x3_bn_relu_kernel(%arg0: i32, %arg1: memref<1x182x8xbf16, #tpu.memory_space<vmem>>, %arg2: memref<9x8x32xbf16, #tpu.memory_space<vmem>>, %arg3: memref<1x32xf32, #tpu.memory_space<vmem>>, %arg4: memref<1x144x32xbf16, #tpu.memory_space<vmem>>) attributes {dimension_semantics = [#tpu.dimension_semantics<parallel>], iteration_bounds = array<i64: 2>, scalar_prefetch = 0 : i64, scratch_operands = 0 : i64, tpu.core_type = #tpu.core_type<tc>, window_params = [{transform_indices = @transform_0, window_bounds = array<i64: 1, 182, 8>}, {pipeline_mode = #tpu.pipeline_mode<synchronous>, transform_indices = @transform_1, window_bounds = array<i64: 9, 8, 32>}, {pipeline_mode = #tpu.pipeline_mode<synchronous>, transform_indices = @transform_2, window_bounds = array<i64: 1, 32>}, {transform_indices = @transform_3, window_bounds = array<i64: 1, 144, 32>}]} {
    %cst = arith.constant 0.000000e+00 : f32
    %0 = vector.broadcast %cst : f32 to vector<144x32xf32>
    %c0 = arith.constant 0 : index
    %c0_0 = arith.constant 0 : index
    %c0_1 = arith.constant 0 : index
    %1 = vector.load %arg1[%c0, %c0_0, %c0_1] : memref<1x182x8xbf16, #tpu.memory_space<vmem>>, vector<1x144x8xbf16>
    %2 = vector.shape_cast %1 : vector<1x144x8xbf16> to vector<144x8xbf16>
    %c0_2 = arith.constant 0 : index
    %c0_3 = arith.constant 0 : index
    %c0_4 = arith.constant 0 : index
    %3 = vector.load %arg2[%c0_2, %c0_3, %c0_4] : memref<9x8x32xbf16, #tpu.memory_space<vmem>>, vector<1x8x32xbf16>
    %4 = vector.shape_cast %3 : vector<1x8x32xbf16> to vector<8x32xbf16>
    %cst_5 = arith.constant dense<0.000000e+00> : vector<144x32xf32>
    %5 = tpu.matmul %2, %4, %cst_5 {dimension_numbers = #tpu.dot_dimension_numbers<[1], [0], [0], [1], [0, 0, 1, 1], [], []>} : vector<144x8xbf16>, vector<8x32xbf16>, vector<144x32xf32> -> vector<144x32xf32>
    %6 = arith.addf %0, %5 : vector<144x32xf32>
    %c0_6 = arith.constant 0 : index
    %c1 = arith.constant 1 : index
    %c0_7 = arith.constant 0 : index
    %7 = vector.load %arg1[%c0_6, %c1, %c0_7] : memref<1x182x8xbf16, #tpu.memory_space<vmem>>, vector<1x144x8xbf16>
    %8 = vector.shape_cast %7 : vector<1x144x8xbf16> to vector<144x8xbf16>
    %c1_8 = arith.constant 1 : index
    %c0_9 = arith.constant 0 : index
    %c0_10 = arith.constant 0 : index
    %9 = vector.load %arg2[%c1_8, %c0_9, %c0_10] : memref<9x8x32xbf16, #tpu.memory_space<vmem>>, vector<1x8x32xbf16>
    %10 = vector.shape_cast %9 : vector<1x8x32xbf16> to vector<8x32xbf16>
    %cst_11 = arith.constant dense<0.000000e+00> : vector<144x32xf32>
    %11 = tpu.matmul %8, %10, %cst_11 {dimension_numbers = #tpu.dot_dimension_numbers<[1], [0], [0], [1], [0, 0, 1, 1], [], []>} : vector<144x8xbf16>, vector<8x32xbf16>, vector<144x32xf32> -> vector<144x32xf32>
    %12 = arith.addf %6, %11 : vector<144x32xf32>
    %c0_12 = arith.constant 0 : index
    %c2 = arith.constant 2 : index
    %c0_13 = arith.constant 0 : index
    %13 = vector.load %arg1[%c0_12, %c2, %c0_13] : memref<1x182x8xbf16, #tpu.memory_space<vmem>>, vector<1x144x8xbf16>
    %14 = vector.shape_cast %13 : vector<1x144x8xbf16> to vector<144x8xbf16>
    %c2_14 = arith.constant 2 : index
    %c0_15 = arith.constant 0 : index
    %c0_16 = arith.constant 0 : index
    %15 = vector.load %arg2[%c2_14, %c0_15, %c0_16] : memref<9x8x32xbf16, #tpu.memory_space<vmem>>, vector<1x8x32xbf16>
    %16 = vector.shape_cast %15 : vector<1x8x32xbf16> to vector<8x32xbf16>
    %cst_17 = arith.constant dense<0.000000e+00> : vector<144x32xf32>
    %17 = tpu.matmul %14, %16, %cst_17 {dimension_numbers = #tpu.dot_dimension_numbers<[1], [0], [0], [1], [0, 0, 1, 1], [], []>} : vector<144x8xbf16>, vector<8x32xbf16>, vector<144x32xf32> -> vector<144x32xf32>
    %18 = arith.addf %12, %17 : vector<144x32xf32>
    %c0_18 = arith.constant 0 : index
    %c18 = arith.constant 18 : index
    %c0_19 = arith.constant 0 : index
    %19 = vector.load %arg1[%c0_18, %c18, %c0_19] : memref<1x182x8xbf16, #tpu.memory_space<vmem>>, vector<1x144x8xbf16>
    %20 = vector.shape_cast %19 : vector<1x144x8xbf16> to vector<144x8xbf16>
    %c3 = arith.constant 3 : index
    %c0_20 = arith.constant 0 : index
    %c0_21 = arith.constant 0 : index
    %21 = vector.load %arg2[%c3, %c0_20, %c0_21] : memref<9x8x32xbf16, #tpu.memory_space<vmem>>, vector<1x8x32xbf16>
    %22 = vector.shape_cast %21 : vector<1x8x32xbf16> to vector<8x32xbf16>
    %cst_22 = arith.constant dense<0.000000e+00> : vector<144x32xf32>
    %23 = tpu.matmul %20, %22, %cst_22 {dimension_numbers = #tpu.dot_dimension_numbers<[1], [0], [0], [1], [0, 0, 1, 1], [], []>} : vector<144x8xbf16>, vector<8x32xbf16>, vector<144x32xf32> -> vector<144x32xf32>
    %24 = arith.addf %18, %23 : vector<144x32xf32>
    %c0_23 = arith.constant 0 : index
    %c19 = arith.constant 19 : index
    %c0_24 = arith.constant 0 : index
    %25 = vector.load %arg1[%c0_23, %c19, %c0_24] : memref<1x182x8xbf16, #tpu.memory_space<vmem>>, vector<1x144x8xbf16>
    %26 = vector.shape_cast %25 : vector<1x144x8xbf16> to vector<144x8xbf16>
    %c4 = arith.constant 4 : index
    %c0_25 = arith.constant 0 : index
    %c0_26 = arith.constant 0 : index
    %27 = vector.load %arg2[%c4, %c0_25, %c0_26] : memref<9x8x32xbf16, #tpu.memory_space<vmem>>, vector<1x8x32xbf16>
    %28 = vector.shape_cast %27 : vector<1x8x32xbf16> to vector<8x32xbf16>
    %cst_27 = arith.constant dense<0.000000e+00> : vector<144x32xf32>
    %29 = tpu.matmul %26, %28, %cst_27 {dimension_numbers = #tpu.dot_dimension_numbers<[1], [0], [0], [1], [0, 0, 1, 1], [], []>} : vector<144x8xbf16>, vector<8x32xbf16>, vector<144x32xf32> -> vector<144x32xf32>
    %30 = arith.addf %24, %29 : vector<144x32xf32>
    %c0_28 = arith.constant 0 : index
    %c20 = arith.constant 20 : index
    %c0_29 = arith.constant 0 : index
    %31 = vector.load %arg1[%c0_28, %c20, %c0_29] : memref<1x182x8xbf16, #tpu.memory_space<vmem>>, vector<1x144x8xbf16>
    %32 = vector.shape_cast %31 : vector<1x144x8xbf16> to vector<144x8xbf16>
    %c5 = arith.constant 5 : index
    %c0_30 = arith.constant 0 : index
    %c0_31 = arith.constant 0 : index
    %33 = vector.load %arg2[%c5, %c0_30, %c0_31] : memref<9x8x32xbf16, #tpu.memory_space<vmem>>, vector<1x8x32xbf16>
    %34 = vector.shape_cast %33 : vector<1x8x32xbf16> to vector<8x32xbf16>
    %cst_32 = arith.constant dense<0.000000e+00> : vector<144x32xf32>
    %35 = tpu.matmul %32, %34, %cst_32 {dimension_numbers = #tpu.dot_dimension_numbers<[1], [0], [0], [1], [0, 0, 1, 1], [], []>} : vector<144x8xbf16>, vector<8x32xbf16>, vector<144x32xf32> -> vector<144x32xf32>
    %36 = arith.addf %30, %35 : vector<144x32xf32>
    %c0_33 = arith.constant 0 : index
    %c36 = arith.constant 36 : index
    %c0_34 = arith.constant 0 : index
    %37 = vector.load %arg1[%c0_33, %c36, %c0_34] : memref<1x182x8xbf16, #tpu.memory_space<vmem>>, vector<1x144x8xbf16>
    %38 = vector.shape_cast %37 : vector<1x144x8xbf16> to vector<144x8xbf16>
    %c6 = arith.constant 6 : index
    %c0_35 = arith.constant 0 : index
    %c0_36 = arith.constant 0 : index
    %39 = vector.load %arg2[%c6, %c0_35, %c0_36] : memref<9x8x32xbf16, #tpu.memory_space<vmem>>, vector<1x8x32xbf16>
    %40 = vector.shape_cast %39 : vector<1x8x32xbf16> to vector<8x32xbf16>
    %cst_37 = arith.constant dense<0.000000e+00> : vector<144x32xf32>
    %41 = tpu.matmul %38, %40, %cst_37 {dimension_numbers = #tpu.dot_dimension_numbers<[1], [0], [0], [1], [0, 0, 1, 1], [], []>} : vector<144x8xbf16>, vector<8x32xbf16>, vector<144x32xf32> -> vector<144x32xf32>
    %42 = arith.addf %36, %41 : vector<144x32xf32>
    %c0_38 = arith.constant 0 : index
    %c37 = arith.constant 37 : index
    %c0_39 = arith.constant 0 : index
    %43 = vector.load %arg1[%c0_38, %c37, %c0_39] : memref<1x182x8xbf16, #tpu.memory_space<vmem>>, vector<1x144x8xbf16>
    %44 = vector.shape_cast %43 : vector<1x144x8xbf16> to vector<144x8xbf16>
    %c7 = arith.constant 7 : index
    %c0_40 = arith.constant 0 : index
    %c0_41 = arith.constant 0 : index
    %45 = vector.load %arg2[%c7, %c0_40, %c0_41] : memref<9x8x32xbf16, #tpu.memory_space<vmem>>, vector<1x8x32xbf16>
    %46 = vector.shape_cast %45 : vector<1x8x32xbf16> to vector<8x32xbf16>
    %cst_42 = arith.constant dense<0.000000e+00> : vector<144x32xf32>
    %47 = tpu.matmul %44, %46, %cst_42 {dimension_numbers = #tpu.dot_dimension_numbers<[1], [0], [0], [1], [0, 0, 1, 1], [], []>} : vector<144x8xbf16>, vector<8x32xbf16>, vector<144x32xf32> -> vector<144x32xf32>
    %48 = arith.addf %42, %47 : vector<144x32xf32>
    %c0_43 = arith.constant 0 : index
    %c38 = arith.constant 38 : index
    %c0_44 = arith.constant 0 : index
    %49 = vector.load %arg1[%c0_43, %c38, %c0_44] : memref<1x182x8xbf16, #tpu.memory_space<vmem>>, vector<1x144x8xbf16>
    %50 = vector.shape_cast %49 : vector<1x144x8xbf16> to vector<144x8xbf16>
    %c8 = arith.constant 8 : index
    %c0_45 = arith.constant 0 : index
    %c0_46 = arith.constant 0 : index
    %51 = vector.load %arg2[%c8, %c0_45, %c0_46] : memref<9x8x32xbf16, #tpu.memory_space<vmem>>, vector<1x8x32xbf16>
    %52 = vector.shape_cast %51 : vector<1x8x32xbf16> to vector<8x32xbf16>
    %cst_47 = arith.constant dense<0.000000e+00> : vector<144x32xf32>
    %53 = tpu.matmul %50, %52, %cst_47 {dimension_numbers = #tpu.dot_dimension_numbers<[1], [0], [0], [1], [0, 0, 1, 1], [], []>} : vector<144x8xbf16>, vector<8x32xbf16>, vector<144x32xf32> -> vector<144x32xf32>
    %54 = arith.addf %48, %53 : vector<144x32xf32>
    %c0_48 = arith.constant 0 : index
    %c0_49 = arith.constant 0 : index
    %55 = vector.load %arg3[%c0_48, %c0_49] : memref<1x32xf32, #tpu.memory_space<vmem>>, vector<1x32xf32>
    %56 = vector.broadcast %55 : vector<1x32xf32> to vector<144x32xf32>
    %57 = arith.addf %54, %56 : vector<144x32xf32>
    %cst_50 = arith.constant 0.000000e+00 : f32
    %58 = vector.broadcast %cst_50 : f32 to vector<144x32xf32>
    %59 = arith.maximumf %57, %58 : vector<144x32xf32>
    %60 = arith.truncf %59 : vector<144x32xf32> to vector<144x32xbf16>
    %c0_51 = arith.constant 0 : index
    %c0_52 = arith.constant 0 : index
    %c0_53 = arith.constant 0 : index
    %61 = vector.load %arg4[%c0_51, %c0_52, %c0_53] : memref<1x144x32xbf16, #tpu.memory_space<vmem>>, vector<1x144x32xbf16>
    %62 = vector.shape_cast %61 : vector<1x144x32xbf16> to vector<144x32xbf16>
    %63 = vector.shape_cast %60 : vector<144x32xbf16> to vector<1x144x32xbf16>
    tpu.vector_store %arg4[%c0_51, %c0_52, %c0_53], %63 {strides = array<i32>} : memref<1x144x32xbf16, #tpu.memory_space<vmem>>, vector<1x144x32xbf16>,
    return
  }
  func.func @transform_0(%arg0: i32) -> (i32, i32, i32) {
    %c0_i32 = arith.constant 0 : i32
    %c0_i32_0 = arith.constant 0 : i32
    %c0_i32_1 = arith.constant 0 : i32
    return %arg0, %c0_i32, %c0_i32_0 : i32, i32, i32
  }
  func.func @transform_1(%arg0: i32) -> (i32, i32, i32) {
    %c0_i32 = arith.constant 0 : i32
    %c0_i32_0 = arith.constant 0 : i32
    %c0_i32_1 = arith.constant 0 : i32
    %c0_i32_2 = arith.constant 0 : i32
    return %c0_i32, %c0_i32_0, %c0_i32_1 : i32, i32, i32
  }
  func.func @transform_2(%arg0: i32) -> (i32, i32) {
    %c0_i32 = arith.constant 0 : i32
    %c0_i32_0 = arith.constant 0 : i32
    %c0_i32_1 = arith.constant 0 : i32
    return %c0_i32, %c0_i32_0 : i32, i32
  }
  func.func @transform_3(%arg0: i32) -> (i32, i32, i32) {
    %c0_i32 = arith.constant 0 : i32
    %c0_i32_0 = arith.constant 0 : i32
    %c0_i32_1 = arith.constant 0 : i32
    return %arg0, %c0_i32, %c0_i32_0 : i32, i32, i32
  }
}

module attributes {stable_mosaic.version = 11 : i64} {
  func.func @_conv3x3_bn_relu_kernel(%arg0: i32, %arg1: memref<1x182x32xbf16, #tpu.memory_space<vmem>>, %arg2: memref<9x32x32xbf16, #tpu.memory_space<vmem>>, %arg3: memref<1x32xf32, #tpu.memory_space<vmem>>, %arg4: memref<1x144x32xbf16, #tpu.memory_space<vmem>>) attributes {dimension_semantics = [#tpu.dimension_semantics<parallel>], iteration_bounds = array<i64: 2>, scalar_prefetch = 0 : i64, scratch_operands = 0 : i64, tpu.core_type = #tpu.core_type<tc>, window_params = [{transform_indices = @transform_0, window_bounds = array<i64: 1, 182, 32>}, {pipeline_mode = #tpu.pipeline_mode<synchronous>, transform_indices = @transform_1, window_bounds = array<i64: 9, 32, 32>}, {pipeline_mode = #tpu.pipeline_mode<synchronous>, transform_indices = @transform_2, window_bounds = array<i64: 1, 32>}, {transform_indices = @transform_3, window_bounds = array<i64: 1, 144, 32>}]} {
    %cst = arith.constant 0.000000e+00 : f32
    %0 = vector.broadcast %cst : f32 to vector<144x32xf32>
    %c0 = arith.constant 0 : index
    %c0_0 = arith.constant 0 : index
    %c0_1 = arith.constant 0 : index
    %1 = vector.load %arg1[%c0, %c0_0, %c0_1] : memref<1x182x32xbf16, #tpu.memory_space<vmem>>, vector<1x144x32xbf16>
    %2 = vector.shape_cast %1 : vector<1x144x32xbf16> to vector<144x32xbf16>
    %c0_2 = arith.constant 0 : index
    %c0_3 = arith.constant 0 : index
    %c0_4 = arith.constant 0 : index
    %3 = vector.load %arg2[%c0_2, %c0_3, %c0_4] : memref<9x32x32xbf16, #tpu.memory_space<vmem>>, vector<1x32x32xbf16>
    %4 = vector.shape_cast %3 : vector<1x32x32xbf16> to vector<32x32xbf16>
    %cst_5 = arith.constant dense<0.000000e+00> : vector<144x32xf32>
    %5 = tpu.matmul %2, %4, %cst_5 {dimension_numbers = #tpu.dot_dimension_numbers<[1], [0], [0], [1], [0, 0, 1, 1], [], []>} : vector<144x32xbf16>, vector<32x32xbf16>, vector<144x32xf32> -> vector<144x32xf32>
    %6 = arith.addf %0, %5 : vector<144x32xf32>
    %c0_6 = arith.constant 0 : index
    %c1 = arith.constant 1 : index
    %c0_7 = arith.constant 0 : index
    %7 = vector.load %arg1[%c0_6, %c1, %c0_7] : memref<1x182x32xbf16, #tpu.memory_space<vmem>>, vector<1x144x32xbf16>
    %8 = vector.shape_cast %7 : vector<1x144x32xbf16> to vector<144x32xbf16>
    %c1_8 = arith.constant 1 : index
    %c0_9 = arith.constant 0 : index
    %c0_10 = arith.constant 0 : index
    %9 = vector.load %arg2[%c1_8, %c0_9, %c0_10] : memref<9x32x32xbf16, #tpu.memory_space<vmem>>, vector<1x32x32xbf16>
    %10 = vector.shape_cast %9 : vector<1x32x32xbf16> to vector<32x32xbf16>
    %cst_11 = arith.constant dense<0.000000e+00> : vector<144x32xf32>
    %11 = tpu.matmul %8, %10, %cst_11 {dimension_numbers = #tpu.dot_dimension_numbers<[1], [0], [0], [1], [0, 0, 1, 1], [], []>} : vector<144x32xbf16>, vector<32x32xbf16>, vector<144x32xf32> -> vector<144x32xf32>
    %12 = arith.addf %6, %11 : vector<144x32xf32>
    %c0_12 = arith.constant 0 : index
    %c2 = arith.constant 2 : index
    %c0_13 = arith.constant 0 : index
    %13 = vector.load %arg1[%c0_12, %c2, %c0_13] : memref<1x182x32xbf16, #tpu.memory_space<vmem>>, vector<1x144x32xbf16>
    %14 = vector.shape_cast %13 : vector<1x144x32xbf16> to vector<144x32xbf16>
    %c2_14 = arith.constant 2 : index
    %c0_15 = arith.constant 0 : index
    %c0_16 = arith.constant 0 : index
    %15 = vector.load %arg2[%c2_14, %c0_15, %c0_16] : memref<9x32x32xbf16, #tpu.memory_space<vmem>>, vector<1x32x32xbf16>
    %16 = vector.shape_cast %15 : vector<1x32x32xbf16> to vector<32x32xbf16>
    %cst_17 = arith.constant dense<0.000000e+00> : vector<144x32xf32>
    %17 = tpu.matmul %14, %16, %cst_17 {dimension_numbers = #tpu.dot_dimension_numbers<[1], [0], [0], [1], [0, 0, 1, 1], [], []>} : vector<144x32xbf16>, vector<32x32xbf16>, vector<144x32xf32> -> vector<144x32xf32>
    %18 = arith.addf %12, %17 : vector<144x32xf32>
    %c0_18 = arith.constant 0 : index
    %c18 = arith.constant 18 : index
    %c0_19 = arith.constant 0 : index
    %19 = vector.load %arg1[%c0_18, %c18, %c0_19] : memref<1x182x32xbf16, #tpu.memory_space<vmem>>, vector<1x144x32xbf16>
    %20 = vector.shape_cast %19 : vector<1x144x32xbf16> to vector<144x32xbf16>
    %c3 = arith.constant 3 : index
    %c0_20 = arith.constant 0 : index
    %c0_21 = arith.constant 0 : index
    %21 = vector.load %arg2[%c3, %c0_20, %c0_21] : memref<9x32x32xbf16, #tpu.memory_space<vmem>>, vector<1x32x32xbf16>
    %22 = vector.shape_cast %21 : vector<1x32x32xbf16> to vector<32x32xbf16>
    %cst_22 = arith.constant dense<0.000000e+00> : vector<144x32xf32>
    %23 = tpu.matmul %20, %22, %cst_22 {dimension_numbers = #tpu.dot_dimension_numbers<[1], [0], [0], [1], [0, 0, 1, 1], [], []>} : vector<144x32xbf16>, vector<32x32xbf16>, vector<144x32xf32> -> vector<144x32xf32>
    %24 = arith.addf %18, %23 : vector<144x32xf32>
    %c0_23 = arith.constant 0 : index
    %c19 = arith.constant 19 : index
    %c0_24 = arith.constant 0 : index
    %25 = vector.load %arg1[%c0_23, %c19, %c0_24] : memref<1x182x32xbf16, #tpu.memory_space<vmem>>, vector<1x144x32xbf16>
    %26 = vector.shape_cast %25 : vector<1x144x32xbf16> to vector<144x32xbf16>
    %c4 = arith.constant 4 : index
    %c0_25 = arith.constant 0 : index
    %c0_26 = arith.constant 0 : index
    %27 = vector.load %arg2[%c4, %c0_25, %c0_26] : memref<9x32x32xbf16, #tpu.memory_space<vmem>>, vector<1x32x32xbf16>
    %28 = vector.shape_cast %27 : vector<1x32x32xbf16> to vector<32x32xbf16>
    %cst_27 = arith.constant dense<0.000000e+00> : vector<144x32xf32>
    %29 = tpu.matmul %26, %28, %cst_27 {dimension_numbers = #tpu.dot_dimension_numbers<[1], [0], [0], [1], [0, 0, 1, 1], [], []>} : vector<144x32xbf16>, vector<32x32xbf16>, vector<144x32xf32> -> vector<144x32xf32>
    %30 = arith.addf %24, %29 : vector<144x32xf32>
    %c0_28 = arith.constant 0 : index
    %c20 = arith.constant 20 : index
    %c0_29 = arith.constant 0 : index
    %31 = vector.load %arg1[%c0_28, %c20, %c0_29] : memref<1x182x32xbf16, #tpu.memory_space<vmem>>, vector<1x144x32xbf16>
    %32 = vector.shape_cast %31 : vector<1x144x32xbf16> to vector<144x32xbf16>
    %c5 = arith.constant 5 : index
    %c0_30 = arith.constant 0 : index
    %c0_31 = arith.constant 0 : index
    %33 = vector.load %arg2[%c5, %c0_30, %c0_31] : memref<9x32x32xbf16, #tpu.memory_space<vmem>>, vector<1x32x32xbf16>
    %34 = vector.shape_cast %33 : vector<1x32x32xbf16> to vector<32x32xbf16>
    %cst_32 = arith.constant dense<0.000000e+00> : vector<144x32xf32>
    %35 = tpu.matmul %32, %34, %cst_32 {dimension_numbers = #tpu.dot_dimension_numbers<[1], [0], [0], [1], [0, 0, 1, 1], [], []>} : vector<144x32xbf16>, vector<32x32xbf16>, vector<144x32xf32> -> vector<144x32xf32>
    %36 = arith.addf %30, %35 : vector<144x32xf32>
    %c0_33 = arith.constant 0 : index
    %c36 = arith.constant 36 : index
    %c0_34 = arith.constant 0 : index
    %37 = vector.load %arg1[%c0_33, %c36, %c0_34] : memref<1x182x32xbf16, #tpu.memory_space<vmem>>, vector<1x144x32xbf16>
    %38 = vector.shape_cast %37 : vector<1x144x32xbf16> to vector<144x32xbf16>
    %c6 = arith.constant 6 : index
    %c0_35 = arith.constant 0 : index
    %c0_36 = arith.constant 0 : index
    %39 = vector.load %arg2[%c6, %c0_35, %c0_36] : memref<9x32x32xbf16, #tpu.memory_space<vmem>>, vector<1x32x32xbf16>
    %40 = vector.shape_cast %39 : vector<1x32x32xbf16> to vector<32x32xbf16>
    %cst_37 = arith.constant dense<0.000000e+00> : vector<144x32xf32>
    %41 = tpu.matmul %38, %40, %cst_37 {dimension_numbers = #tpu.dot_dimension_numbers<[1], [0], [0], [1], [0, 0, 1, 1], [], []>} : vector<144x32xbf16>, vector<32x32xbf16>, vector<144x32xf32> -> vector<144x32xf32>
    %42 = arith.addf %36, %41 : vector<144x32xf32>
    %c0_38 = arith.constant 0 : index
    %c37 = arith.constant 37 : index
    %c0_39 = arith.constant 0 : index
    %43 = vector.load %arg1[%c0_38, %c37, %c0_39] : memref<1x182x32xbf16, #tpu.memory_space<vmem>>, vector<1x144x32xbf16>
    %44 = vector.shape_cast %43 : vector<1x144x32xbf16> to vector<144x32xbf16>
    %c7 = arith.constant 7 : index
    %c0_40 = arith.constant 0 : index
    %c0_41 = arith.constant 0 : index
    %45 = vector.load %arg2[%c7, %c0_40, %c0_41] : memref<9x32x32xbf16, #tpu.memory_space<vmem>>, vector<1x32x32xbf16>
    %46 = vector.shape_cast %45 : vector<1x32x32xbf16> to vector<32x32xbf16>
    %cst_42 = arith.constant dense<0.000000e+00> : vector<144x32xf32>
    %47 = tpu.matmul %44, %46, %cst_42 {dimension_numbers = #tpu.dot_dimension_numbers<[1], [0], [0], [1], [0, 0, 1, 1], [], []>} : vector<144x32xbf16>, vector<32x32xbf16>, vector<144x32xf32> -> vector<144x32xf32>
    %48 = arith.addf %42, %47 : vector<144x32xf32>
    %c0_43 = arith.constant 0 : index
    %c38 = arith.constant 38 : index
    %c0_44 = arith.constant 0 : index
    %49 = vector.load %arg1[%c0_43, %c38, %c0_44] : memref<1x182x32xbf16, #tpu.memory_space<vmem>>, vector<1x144x32xbf16>
    %50 = vector.shape_cast %49 : vector<1x144x32xbf16> to vector<144x32xbf16>
    %c8 = arith.constant 8 : index
    %c0_45 = arith.constant 0 : index
    %c0_46 = arith.constant 0 : index
    %51 = vector.load %arg2[%c8, %c0_45, %c0_46] : memref<9x32x32xbf16, #tpu.memory_space<vmem>>, vector<1x32x32xbf16>
    %52 = vector.shape_cast %51 : vector<1x32x32xbf16> to vector<32x32xbf16>
    %cst_47 = arith.constant dense<0.000000e+00> : vector<144x32xf32>
    %53 = tpu.matmul %50, %52, %cst_47 {dimension_numbers = #tpu.dot_dimension_numbers<[1], [0], [0], [1], [0, 0, 1, 1], [], []>} : vector<144x32xbf16>, vector<32x32xbf16>, vector<144x32xf32> -> vector<144x32xf32>
    %54 = arith.addf %48, %53 : vector<144x32xf32>
    %c0_48 = arith.constant 0 : index
    %c0_49 = arith.constant 0 : index
    %55 = vector.load %arg3[%c0_48, %c0_49] : memref<1x32xf32, #tpu.memory_space<vmem>>, vector<1x32xf32>
    %56 = vector.broadcast %55 : vector<1x32xf32> to vector<144x32xf32>
    %57 = arith.addf %54, %56 : vector<144x32xf32>
    %cst_50 = arith.constant 0.000000e+00 : f32
    %58 = vector.broadcast %cst_50 : f32 to vector<144x32xf32>
    %59 = arith.maximumf %57, %58 : vector<144x32xf32>
    %60 = arith.truncf %59 : vector<144x32xf32> to vector<144x32xbf16>
    %c0_51 = arith.constant 0 : index
    %c0_52 = arith.constant 0 : index
    %c0_53 = arith.constant 0 : index
    %61 = vector.load %arg4[%c0_51, %c0_52, %c0_53] : memref<1x144x32xbf16, #tpu.memory_space<vmem>>, vector<1x144x32xbf16>
    %62 = vector.shape_cast %61 : vector<1x144x32xbf16> to vector<144x32xbf16>
    %63 = vector.shape_cast %60 : vector<144x32xbf16> to vector<1x144x32xbf16>
    tpu.vector_store %arg4[%c0_51, %c0_52, %c0_53], %63 {strides = array<i32>} : memref<1x144x32xbf16, #tpu.memory_space<vmem>>, vector<1x144x32xbf16>,
    return
  }
  func.func @transform_0(%arg0: i32) -> (i32, i32, i32) {
    %c0_i32 = arith.constant 0 : i32
    %c0_i32_0 = arith.constant 0 : i32
    %c0_i32_1 = arith.constant 0 : i32
    return %arg0, %c0_i32, %c0_i32_0 : i32, i32, i32
  }
  func.func @transform_1(%arg0: i32) -> (i32, i32, i32) {
    %c0_i32 = arith.constant 0 : i32
    %c0_i32_0 = arith.constant 0 : i32
    %c0_i32_1 = arith.constant 0 : i32
    %c0_i32_2 = arith.constant 0 : i32
    return %c0_i32, %c0_i32_0, %c0_i32_1 : i32, i32, i32
  }
  func.func @transform_2(%arg0: i32) -> (i32, i32) {
    %c0_i32 = arith.constant 0 : i32
    %c0_i32_0 = arith.constant 0 : i32
    %c0_i32_1 = arith.constant 0 : i32
    return %c0_i32, %c0_i32_0 : i32, i32
  }
  func.func @transform_3(%arg0: i32) -> (i32, i32, i32) {
    %c0_i32 = arith.constant 0 : i32
    %c0_i32_0 = arith.constant 0 : i32
    %c0_i32_1 = arith.constant 0 : i32
    return %arg0, %c0_i32, %c0_i32_0 : i32, i32, i32
  }
}

module attributes {stable_mosaic.version = 11 : i64} {
  func.func @_conv3x3_bn_relu_kernel(%arg0: i32, %arg1: memref<1x182x32xbf16, #tpu.memory_space<vmem>>, %arg2: memref<9x32x64xbf16, #tpu.memory_space<vmem>>, %arg3: memref<1x64xf32, #tpu.memory_space<vmem>>, %arg4: memref<1x144x64xbf16, #tpu.memory_space<vmem>>) attributes {dimension_semantics = [#tpu.dimension_semantics<parallel>], iteration_bounds = array<i64: 2>, scalar_prefetch = 0 : i64, scratch_operands = 0 : i64, tpu.core_type = #tpu.core_type<tc>, window_params = [{transform_indices = @transform_0, window_bounds = array<i64: 1, 182, 32>}, {pipeline_mode = #tpu.pipeline_mode<synchronous>, transform_indices = @transform_1, window_bounds = array<i64: 9, 32, 64>}, {pipeline_mode = #tpu.pipeline_mode<synchronous>, transform_indices = @transform_2, window_bounds = array<i64: 1, 64>}, {transform_indices = @transform_3, window_bounds = array<i64: 1, 144, 64>}]} {
    %cst = arith.constant 0.000000e+00 : f32
    %0 = vector.broadcast %cst : f32 to vector<144x64xf32>
    %c0 = arith.constant 0 : index
    %c0_0 = arith.constant 0 : index
    %c0_1 = arith.constant 0 : index
    %1 = vector.load %arg1[%c0, %c0_0, %c0_1] : memref<1x182x32xbf16, #tpu.memory_space<vmem>>, vector<1x144x32xbf16>
    %2 = vector.shape_cast %1 : vector<1x144x32xbf16> to vector<144x32xbf16>
    %c0_2 = arith.constant 0 : index
    %c0_3 = arith.constant 0 : index
    %c0_4 = arith.constant 0 : index
    %3 = vector.load %arg2[%c0_2, %c0_3, %c0_4] : memref<9x32x64xbf16, #tpu.memory_space<vmem>>, vector<1x32x64xbf16>
    %4 = vector.shape_cast %3 : vector<1x32x64xbf16> to vector<32x64xbf16>
    %cst_5 = arith.constant dense<0.000000e+00> : vector<144x64xf32>
    %5 = tpu.matmul %2, %4, %cst_5 {dimension_numbers = #tpu.dot_dimension_numbers<[1], [0], [0], [1], [0, 0, 1, 1], [], []>} : vector<144x32xbf16>, vector<32x64xbf16>, vector<144x64xf32> -> vector<144x64xf32>
    %6 = arith.addf %0, %5 : vector<144x64xf32>
    %c0_6 = arith.constant 0 : index
    %c1 = arith.constant 1 : index
    %c0_7 = arith.constant 0 : index
    %7 = vector.load %arg1[%c0_6, %c1, %c0_7] : memref<1x182x32xbf16, #tpu.memory_space<vmem>>, vector<1x144x32xbf16>
    %8 = vector.shape_cast %7 : vector<1x144x32xbf16> to vector<144x32xbf16>
    %c1_8 = arith.constant 1 : index
    %c0_9 = arith.constant 0 : index
    %c0_10 = arith.constant 0 : index
    %9 = vector.load %arg2[%c1_8, %c0_9, %c0_10] : memref<9x32x64xbf16, #tpu.memory_space<vmem>>, vector<1x32x64xbf16>
    %10 = vector.shape_cast %9 : vector<1x32x64xbf16> to vector<32x64xbf16>
    %cst_11 = arith.constant dense<0.000000e+00> : vector<144x64xf32>
    %11 = tpu.matmul %8, %10, %cst_11 {dimension_numbers = #tpu.dot_dimension_numbers<[1], [0], [0], [1], [0, 0, 1, 1], [], []>} : vector<144x32xbf16>, vector<32x64xbf16>, vector<144x64xf32> -> vector<144x64xf32>
    %12 = arith.addf %6, %11 : vector<144x64xf32>
    %c0_12 = arith.constant 0 : index
    %c2 = arith.constant 2 : index
    %c0_13 = arith.constant 0 : index
    %13 = vector.load %arg1[%c0_12, %c2, %c0_13] : memref<1x182x32xbf16, #tpu.memory_space<vmem>>, vector<1x144x32xbf16>
    %14 = vector.shape_cast %13 : vector<1x144x32xbf16> to vector<144x32xbf16>
    %c2_14 = arith.constant 2 : index
    %c0_15 = arith.constant 0 : index
    %c0_16 = arith.constant 0 : index
    %15 = vector.load %arg2[%c2_14, %c0_15, %c0_16] : memref<9x32x64xbf16, #tpu.memory_space<vmem>>, vector<1x32x64xbf16>
    %16 = vector.shape_cast %15 : vector<1x32x64xbf16> to vector<32x64xbf16>
    %cst_17 = arith.constant dense<0.000000e+00> : vector<144x64xf32>
    %17 = tpu.matmul %14, %16, %cst_17 {dimension_numbers = #tpu.dot_dimension_numbers<[1], [0], [0], [1], [0, 0, 1, 1], [], []>} : vector<144x32xbf16>, vector<32x64xbf16>, vector<144x64xf32> -> vector<144x64xf32>
    %18 = arith.addf %12, %17 : vector<144x64xf32>
    %c0_18 = arith.constant 0 : index
    %c18 = arith.constant 18 : index
    %c0_19 = arith.constant 0 : index
    %19 = vector.load %arg1[%c0_18, %c18, %c0_19] : memref<1x182x32xbf16, #tpu.memory_space<vmem>>, vector<1x144x32xbf16>
    %20 = vector.shape_cast %19 : vector<1x144x32xbf16> to vector<144x32xbf16>
    %c3 = arith.constant 3 : index
    %c0_20 = arith.constant 0 : index
    %c0_21 = arith.constant 0 : index
    %21 = vector.load %arg2[%c3, %c0_20, %c0_21] : memref<9x32x64xbf16, #tpu.memory_space<vmem>>, vector<1x32x64xbf16>
    %22 = vector.shape_cast %21 : vector<1x32x64xbf16> to vector<32x64xbf16>
    %cst_22 = arith.constant dense<0.000000e+00> : vector<144x64xf32>
    %23 = tpu.matmul %20, %22, %cst_22 {dimension_numbers = #tpu.dot_dimension_numbers<[1], [0], [0], [1], [0, 0, 1, 1], [], []>} : vector<144x32xbf16>, vector<32x64xbf16>, vector<144x64xf32> -> vector<144x64xf32>
    %24 = arith.addf %18, %23 : vector<144x64xf32>
    %c0_23 = arith.constant 0 : index
    %c19 = arith.constant 19 : index
    %c0_24 = arith.constant 0 : index
    %25 = vector.load %arg1[%c0_23, %c19, %c0_24] : memref<1x182x32xbf16, #tpu.memory_space<vmem>>, vector<1x144x32xbf16>
    %26 = vector.shape_cast %25 : vector<1x144x32xbf16> to vector<144x32xbf16>
    %c4 = arith.constant 4 : index
    %c0_25 = arith.constant 0 : index
    %c0_26 = arith.constant 0 : index
    %27 = vector.load %arg2[%c4, %c0_25, %c0_26] : memref<9x32x64xbf16, #tpu.memory_space<vmem>>, vector<1x32x64xbf16>
    %28 = vector.shape_cast %27 : vector<1x32x64xbf16> to vector<32x64xbf16>
    %cst_27 = arith.constant dense<0.000000e+00> : vector<144x64xf32>
    %29 = tpu.matmul %26, %28, %cst_27 {dimension_numbers = #tpu.dot_dimension_numbers<[1], [0], [0], [1], [0, 0, 1, 1], [], []>} : vector<144x32xbf16>, vector<32x64xbf16>, vector<144x64xf32> -> vector<144x64xf32>
    %30 = arith.addf %24, %29 : vector<144x64xf32>
    %c0_28 = arith.constant 0 : index
    %c20 = arith.constant 20 : index
    %c0_29 = arith.constant 0 : index
    %31 = vector.load %arg1[%c0_28, %c20, %c0_29] : memref<1x182x32xbf16, #tpu.memory_space<vmem>>, vector<1x144x32xbf16>
    %32 = vector.shape_cast %31 : vector<1x144x32xbf16> to vector<144x32xbf16>
    %c5 = arith.constant 5 : index
    %c0_30 = arith.constant 0 : index
    %c0_31 = arith.constant 0 : index
    %33 = vector.load %arg2[%c5, %c0_30, %c0_31] : memref<9x32x64xbf16, #tpu.memory_space<vmem>>, vector<1x32x64xbf16>
    %34 = vector.shape_cast %33 : vector<1x32x64xbf16> to vector<32x64xbf16>
    %cst_32 = arith.constant dense<0.000000e+00> : vector<144x64xf32>
    %35 = tpu.matmul %32, %34, %cst_32 {dimension_numbers = #tpu.dot_dimension_numbers<[1], [0], [0], [1], [0, 0, 1, 1], [], []>} : vector<144x32xbf16>, vector<32x64xbf16>, vector<144x64xf32> -> vector<144x64xf32>
    %36 = arith.addf %30, %35 : vector<144x64xf32>
    %c0_33 = arith.constant 0 : index
    %c36 = arith.constant 36 : index
    %c0_34 = arith.constant 0 : index
    %37 = vector.load %arg1[%c0_33, %c36, %c0_34] : memref<1x182x32xbf16, #tpu.memory_space<vmem>>, vector<1x144x32xbf16>
    %38 = vector.shape_cast %37 : vector<1x144x32xbf16> to vector<144x32xbf16>
    %c6 = arith.constant 6 : index
    %c0_35 = arith.constant 0 : index
    %c0_36 = arith.constant 0 : index
    %39 = vector.load %arg2[%c6, %c0_35, %c0_36] : memref<9x32x64xbf16, #tpu.memory_space<vmem>>, vector<1x32x64xbf16>
    %40 = vector.shape_cast %39 : vector<1x32x64xbf16> to vector<32x64xbf16>
    %cst_37 = arith.constant dense<0.000000e+00> : vector<144x64xf32>
    %41 = tpu.matmul %38, %40, %cst_37 {dimension_numbers = #tpu.dot_dimension_numbers<[1], [0], [0], [1], [0, 0, 1, 1], [], []>} : vector<144x32xbf16>, vector<32x64xbf16>, vector<144x64xf32> -> vector<144x64xf32>
    %42 = arith.addf %36, %41 : vector<144x64xf32>
    %c0_38 = arith.constant 0 : index
    %c37 = arith.constant 37 : index
    %c0_39 = arith.constant 0 : index
    %43 = vector.load %arg1[%c0_38, %c37, %c0_39] : memref<1x182x32xbf16, #tpu.memory_space<vmem>>, vector<1x144x32xbf16>
    %44 = vector.shape_cast %43 : vector<1x144x32xbf16> to vector<144x32xbf16>
    %c7 = arith.constant 7 : index
    %c0_40 = arith.constant 0 : index
    %c0_41 = arith.constant 0 : index
    %45 = vector.load %arg2[%c7, %c0_40, %c0_41] : memref<9x32x64xbf16, #tpu.memory_space<vmem>>, vector<1x32x64xbf16>
    %46 = vector.shape_cast %45 : vector<1x32x64xbf16> to vector<32x64xbf16>
    %cst_42 = arith.constant dense<0.000000e+00> : vector<144x64xf32>
    %47 = tpu.matmul %44, %46, %cst_42 {dimension_numbers = #tpu.dot_dimension_numbers<[1], [0], [0], [1], [0, 0, 1, 1], [], []>} : vector<144x32xbf16>, vector<32x64xbf16>, vector<144x64xf32> -> vector<144x64xf32>
    %48 = arith.addf %42, %47 : vector<144x64xf32>
    %c0_43 = arith.constant 0 : index
    %c38 = arith.constant 38 : index
    %c0_44 = arith.constant 0 : index
    %49 = vector.load %arg1[%c0_43, %c38, %c0_44] : memref<1x182x32xbf16, #tpu.memory_space<vmem>>, vector<1x144x32xbf16>
    %50 = vector.shape_cast %49 : vector<1x144x32xbf16> to vector<144x32xbf16>
    %c8 = arith.constant 8 : index
    %c0_45 = arith.constant 0 : index
    %c0_46 = arith.constant 0 : index
    %51 = vector.load %arg2[%c8, %c0_45, %c0_46] : memref<9x32x64xbf16, #tpu.memory_space<vmem>>, vector<1x32x64xbf16>
    %52 = vector.shape_cast %51 : vector<1x32x64xbf16> to vector<32x64xbf16>
    %cst_47 = arith.constant dense<0.000000e+00> : vector<144x64xf32>
    %53 = tpu.matmul %50, %52, %cst_47 {dimension_numbers = #tpu.dot_dimension_numbers<[1], [0], [0], [1], [0, 0, 1, 1], [], []>} : vector<144x32xbf16>, vector<32x64xbf16>, vector<144x64xf32> -> vector<144x64xf32>
    %54 = arith.addf %48, %53 : vector<144x64xf32>
    %c0_48 = arith.constant 0 : index
    %c0_49 = arith.constant 0 : index
    %55 = vector.load %arg3[%c0_48, %c0_49] : memref<1x64xf32, #tpu.memory_space<vmem>>, vector<1x64xf32>
    %56 = vector.broadcast %55 : vector<1x64xf32> to vector<144x64xf32>
    %57 = arith.addf %54, %56 : vector<144x64xf32>
    %cst_50 = arith.constant 0.000000e+00 : f32
    %58 = vector.broadcast %cst_50 : f32 to vector<144x64xf32>
    %59 = arith.maximumf %57, %58 : vector<144x64xf32>
    %60 = arith.truncf %59 : vector<144x64xf32> to vector<144x64xbf16>
    %c0_51 = arith.constant 0 : index
    %c0_52 = arith.constant 0 : index
    %c0_53 = arith.constant 0 : index
    %61 = vector.load %arg4[%c0_51, %c0_52, %c0_53] : memref<1x144x64xbf16, #tpu.memory_space<vmem>>, vector<1x144x64xbf16>
    %62 = vector.shape_cast %61 : vector<1x144x64xbf16> to vector<144x64xbf16>
    %63 = vector.shape_cast %60 : vector<144x64xbf16> to vector<1x144x64xbf16>
    tpu.vector_store %arg4[%c0_51, %c0_52, %c0_53], %63 {strides = array<i32>} : memref<1x144x64xbf16, #tpu.memory_space<vmem>>, vector<1x144x64xbf16>,
    return
  }
  func.func @transform_0(%arg0: i32) -> (i32, i32, i32) {
    %c0_i32 = arith.constant 0 : i32
    %c0_i32_0 = arith.constant 0 : i32
    %c0_i32_1 = arith.constant 0 : i32
    return %arg0, %c0_i32, %c0_i32_0 : i32, i32, i32
  }
  func.func @transform_1(%arg0: i32) -> (i32, i32, i32) {
    %c0_i32 = arith.constant 0 : i32
    %c0_i32_0 = arith.constant 0 : i32
    %c0_i32_1 = arith.constant 0 : i32
    %c0_i32_2 = arith.constant 0 : i32
    return %c0_i32, %c0_i32_0, %c0_i32_1 : i32, i32, i32
  }
  func.func @transform_2(%arg0: i32) -> (i32, i32) {
    %c0_i32 = arith.constant 0 : i32
    %c0_i32_0 = arith.constant 0 : i32
    %c0_i32_1 = arith.constant 0 : i32
    return %c0_i32, %c0_i32_0 : i32, i32
  }
  func.func @transform_3(%arg0: i32) -> (i32, i32, i32) {
    %c0_i32 = arith.constant 0 : i32
    %c0_i32_0 = arith.constant 0 : i32
    %c0_i32_1 = arith.constant 0 : i32
    return %arg0, %c0_i32, %c0_i32_0 : i32, i32, i32
  }
}

module attributes {stable_mosaic.version = 11 : i64} {
  func.func @_conv3x3_bn_relu_kernel(%arg0: i32, %arg1: memref<1x182x64xbf16, #tpu.memory_space<vmem>>, %arg2: memref<9x64x128xbf16, #tpu.memory_space<vmem>>, %arg3: memref<1x128xf32, #tpu.memory_space<vmem>>, %arg4: memref<1x144x128xbf16, #tpu.memory_space<vmem>>) attributes {dimension_semantics = [#tpu.dimension_semantics<parallel>], iteration_bounds = array<i64: 2>, scalar_prefetch = 0 : i64, scratch_operands = 0 : i64, tpu.core_type = #tpu.core_type<tc>, window_params = [{transform_indices = @transform_0, window_bounds = array<i64: 1, 182, 64>}, {pipeline_mode = #tpu.pipeline_mode<synchronous>, transform_indices = @transform_1, window_bounds = array<i64: 9, 64, 128>}, {pipeline_mode = #tpu.pipeline_mode<synchronous>, transform_indices = @transform_2, window_bounds = array<i64: 1, 128>}, {transform_indices = @transform_3, window_bounds = array<i64: 1, 144, 128>}]} {
    %cst = arith.constant 0.000000e+00 : f32
    %0 = vector.broadcast %cst : f32 to vector<144x128xf32>
    %c0 = arith.constant 0 : index
    %c0_0 = arith.constant 0 : index
    %c0_1 = arith.constant 0 : index
    %1 = vector.load %arg1[%c0, %c0_0, %c0_1] : memref<1x182x64xbf16, #tpu.memory_space<vmem>>, vector<1x144x64xbf16>
    %2 = vector.shape_cast %1 : vector<1x144x64xbf16> to vector<144x64xbf16>
    %c0_2 = arith.constant 0 : index
    %c0_3 = arith.constant 0 : index
    %c0_4 = arith.constant 0 : index
    %3 = vector.load %arg2[%c0_2, %c0_3, %c0_4] : memref<9x64x128xbf16, #tpu.memory_space<vmem>>, vector<1x64x128xbf16>
    %4 = vector.shape_cast %3 : vector<1x64x128xbf16> to vector<64x128xbf16>
    %cst_5 = arith.constant dense<0.000000e+00> : vector<144x128xf32>
    %5 = tpu.matmul %2, %4, %cst_5 {dimension_numbers = #tpu.dot_dimension_numbers<[1], [0], [0], [1], [0, 0, 1, 1], [], []>} : vector<144x64xbf16>, vector<64x128xbf16>, vector<144x128xf32> -> vector<144x128xf32>
    %6 = arith.addf %0, %5 : vector<144x128xf32>
    %c0_6 = arith.constant 0 : index
    %c1 = arith.constant 1 : index
    %c0_7 = arith.constant 0 : index
    %7 = vector.load %arg1[%c0_6, %c1, %c0_7] : memref<1x182x64xbf16, #tpu.memory_space<vmem>>, vector<1x144x64xbf16>
    %8 = vector.shape_cast %7 : vector<1x144x64xbf16> to vector<144x64xbf16>
    %c1_8 = arith.constant 1 : index
    %c0_9 = arith.constant 0 : index
    %c0_10 = arith.constant 0 : index
    %9 = vector.load %arg2[%c1_8, %c0_9, %c0_10] : memref<9x64x128xbf16, #tpu.memory_space<vmem>>, vector<1x64x128xbf16>
    %10 = vector.shape_cast %9 : vector<1x64x128xbf16> to vector<64x128xbf16>
    %cst_11 = arith.constant dense<0.000000e+00> : vector<144x128xf32>
    %11 = tpu.matmul %8, %10, %cst_11 {dimension_numbers = #tpu.dot_dimension_numbers<[1], [0], [0], [1], [0, 0, 1, 1], [], []>} : vector<144x64xbf16>, vector<64x128xbf16>, vector<144x128xf32> -> vector<144x128xf32>
    %12 = arith.addf %6, %11 : vector<144x128xf32>
    %c0_12 = arith.constant 0 : index
    %c2 = arith.constant 2 : index
    %c0_13 = arith.constant 0 : index
    %13 = vector.load %arg1[%c0_12, %c2, %c0_13] : memref<1x182x64xbf16, #tpu.memory_space<vmem>>, vector<1x144x64xbf16>
    %14 = vector.shape_cast %13 : vector<1x144x64xbf16> to vector<144x64xbf16>
    %c2_14 = arith.constant 2 : index
    %c0_15 = arith.constant 0 : index
    %c0_16 = arith.constant 0 : index
    %15 = vector.load %arg2[%c2_14, %c0_15, %c0_16] : memref<9x64x128xbf16, #tpu.memory_space<vmem>>, vector<1x64x128xbf16>
    %16 = vector.shape_cast %15 : vector<1x64x128xbf16> to vector<64x128xbf16>
    %cst_17 = arith.constant dense<0.000000e+00> : vector<144x128xf32>
    %17 = tpu.matmul %14, %16, %cst_17 {dimension_numbers = #tpu.dot_dimension_numbers<[1], [0], [0], [1], [0, 0, 1, 1], [], []>} : vector<144x64xbf16>, vector<64x128xbf16>, vector<144x128xf32> -> vector<144x128xf32>
    %18 = arith.addf %12, %17 : vector<144x128xf32>
    %c0_18 = arith.constant 0 : index
    %c18 = arith.constant 18 : index
    %c0_19 = arith.constant 0 : index
    %19 = vector.load %arg1[%c0_18, %c18, %c0_19] : memref<1x182x64xbf16, #tpu.memory_space<vmem>>, vector<1x144x64xbf16>
    %20 = vector.shape_cast %19 : vector<1x144x64xbf16> to vector<144x64xbf16>
    %c3 = arith.constant 3 : index
    %c0_20 = arith.constant 0 : index
    %c0_21 = arith.constant 0 : index
    %21 = vector.load %arg2[%c3, %c0_20, %c0_21] : memref<9x64x128xbf16, #tpu.memory_space<vmem>>, vector<1x64x128xbf16>
    %22 = vector.shape_cast %21 : vector<1x64x128xbf16> to vector<64x128xbf16>
    %cst_22 = arith.constant dense<0.000000e+00> : vector<144x128xf32>
    %23 = tpu.matmul %20, %22, %cst_22 {dimension_numbers = #tpu.dot_dimension_numbers<[1], [0], [0], [1], [0, 0, 1, 1], [], []>} : vector<144x64xbf16>, vector<64x128xbf16>, vector<144x128xf32> -> vector<144x128xf32>
    %24 = arith.addf %18, %23 : vector<144x128xf32>
    %c0_23 = arith.constant 0 : index
    %c19 = arith.constant 19 : index
    %c0_24 = arith.constant 0 : index
    %25 = vector.load %arg1[%c0_23, %c19, %c0_24] : memref<1x182x64xbf16, #tpu.memory_space<vmem>>, vector<1x144x64xbf16>
    %26 = vector.shape_cast %25 : vector<1x144x64xbf16> to vector<144x64xbf16>
    %c4 = arith.constant 4 : index
    %c0_25 = arith.constant 0 : index
    %c0_26 = arith.constant 0 : index
    %27 = vector.load %arg2[%c4, %c0_25, %c0_26] : memref<9x64x128xbf16, #tpu.memory_space<vmem>>, vector<1x64x128xbf16>
    %28 = vector.shape_cast %27 : vector<1x64x128xbf16> to vector<64x128xbf16>
    %cst_27 = arith.constant dense<0.000000e+00> : vector<144x128xf32>
    %29 = tpu.matmul %26, %28, %cst_27 {dimension_numbers = #tpu.dot_dimension_numbers<[1], [0], [0], [1], [0, 0, 1, 1], [], []>} : vector<144x64xbf16>, vector<64x128xbf16>, vector<144x128xf32> -> vector<144x128xf32>
    %30 = arith.addf %24, %29 : vector<144x128xf32>
    %c0_28 = arith.constant 0 : index
    %c20 = arith.constant 20 : index
    %c0_29 = arith.constant 0 : index
    %31 = vector.load %arg1[%c0_28, %c20, %c0_29] : memref<1x182x64xbf16, #tpu.memory_space<vmem>>, vector<1x144x64xbf16>
    %32 = vector.shape_cast %31 : vector<1x144x64xbf16> to vector<144x64xbf16>
    %c5 = arith.constant 5 : index
    %c0_30 = arith.constant 0 : index
    %c0_31 = arith.constant 0 : index
    %33 = vector.load %arg2[%c5, %c0_30, %c0_31] : memref<9x64x128xbf16, #tpu.memory_space<vmem>>, vector<1x64x128xbf16>
    %34 = vector.shape_cast %33 : vector<1x64x128xbf16> to vector<64x128xbf16>
    %cst_32 = arith.constant dense<0.000000e+00> : vector<144x128xf32>
    %35 = tpu.matmul %32, %34, %cst_32 {dimension_numbers = #tpu.dot_dimension_numbers<[1], [0], [0], [1], [0, 0, 1, 1], [], []>} : vector<144x64xbf16>, vector<64x128xbf16>, vector<144x128xf32> -> vector<144x128xf32>
    %36 = arith.addf %30, %35 : vector<144x128xf32>
    %c0_33 = arith.constant 0 : index
    %c36 = arith.constant 36 : index
    %c0_34 = arith.constant 0 : index
    %37 = vector.load %arg1[%c0_33, %c36, %c0_34] : memref<1x182x64xbf16, #tpu.memory_space<vmem>>, vector<1x144x64xbf16>
    %38 = vector.shape_cast %37 : vector<1x144x64xbf16> to vector<144x64xbf16>
    %c6 = arith.constant 6 : index
    %c0_35 = arith.constant 0 : index
    %c0_36 = arith.constant 0 : index
    %39 = vector.load %arg2[%c6, %c0_35, %c0_36] : memref<9x64x128xbf16, #tpu.memory_space<vmem>>, vector<1x64x128xbf16>
    %40 = vector.shape_cast %39 : vector<1x64x128xbf16> to vector<64x128xbf16>
    %cst_37 = arith.constant dense<0.000000e+00> : vector<144x128xf32>
    %41 = tpu.matmul %38, %40, %cst_37 {dimension_numbers = #tpu.dot_dimension_numbers<[1], [0], [0], [1], [0, 0, 1, 1], [], []>} : vector<144x64xbf16>, vector<64x128xbf16>, vector<144x128xf32> -> vector<144x128xf32>
    %42 = arith.addf %36, %41 : vector<144x128xf32>
    %c0_38 = arith.constant 0 : index
    %c37 = arith.constant 37 : index
    %c0_39 = arith.constant 0 : index
    %43 = vector.load %arg1[%c0_38, %c37, %c0_39] : memref<1x182x64xbf16, #tpu.memory_space<vmem>>, vector<1x144x64xbf16>
    %44 = vector.shape_cast %43 : vector<1x144x64xbf16> to vector<144x64xbf16>
    %c7 = arith.constant 7 : index
    %c0_40 = arith.constant 0 : index
    %c0_41 = arith.constant 0 : index
    %45 = vector.load %arg2[%c7, %c0_40, %c0_41] : memref<9x64x128xbf16, #tpu.memory_space<vmem>>, vector<1x64x128xbf16>
    %46 = vector.shape_cast %45 : vector<1x64x128xbf16> to vector<64x128xbf16>
    %cst_42 = arith.constant dense<0.000000e+00> : vector<144x128xf32>
    %47 = tpu.matmul %44, %46, %cst_42 {dimension_numbers = #tpu.dot_dimension_numbers<[1], [0], [0], [1], [0, 0, 1, 1], [], []>} : vector<144x64xbf16>, vector<64x128xbf16>, vector<144x128xf32> -> vector<144x128xf32>
    %48 = arith.addf %42, %47 : vector<144x128xf32>
    %c0_43 = arith.constant 0 : index
    %c38 = arith.constant 38 : index
    %c0_44 = arith.constant 0 : index
    %49 = vector.load %arg1[%c0_43, %c38, %c0_44] : memref<1x182x64xbf16, #tpu.memory_space<vmem>>, vector<1x144x64xbf16>
    %50 = vector.shape_cast %49 : vector<1x144x64xbf16> to vector<144x64xbf16>
    %c8 = arith.constant 8 : index
    %c0_45 = arith.constant 0 : index
    %c0_46 = arith.constant 0 : index
    %51 = vector.load %arg2[%c8, %c0_45, %c0_46] : memref<9x64x128xbf16, #tpu.memory_space<vmem>>, vector<1x64x128xbf16>
    %52 = vector.shape_cast %51 : vector<1x64x128xbf16> to vector<64x128xbf16>
    %cst_47 = arith.constant dense<0.000000e+00> : vector<144x128xf32>
    %53 = tpu.matmul %50, %52, %cst_47 {dimension_numbers = #tpu.dot_dimension_numbers<[1], [0], [0], [1], [0, 0, 1, 1], [], []>} : vector<144x64xbf16>, vector<64x128xbf16>, vector<144x128xf32> -> vector<144x128xf32>
    %54 = arith.addf %48, %53 : vector<144x128xf32>
    %c0_48 = arith.constant 0 : index
    %c0_49 = arith.constant 0 : index
    %55 = vector.load %arg3[%c0_48, %c0_49] : memref<1x128xf32, #tpu.memory_space<vmem>>, vector<1x128xf32>
    %56 = vector.broadcast %55 : vector<1x128xf32> to vector<144x128xf32>
    %57 = arith.addf %54, %56 : vector<144x128xf32>
    %cst_50 = arith.constant 0.000000e+00 : f32
    %58 = vector.broadcast %cst_50 : f32 to vector<144x128xf32>
    %59 = arith.maximumf %57, %58 : vector<144x128xf32>
    %60 = arith.truncf %59 : vector<144x128xf32> to vector<144x128xbf16>
    %c0_51 = arith.constant 0 : index
    %c0_52 = arith.constant 0 : index
    %c0_53 = arith.constant 0 : index
    %61 = vector.load %arg4[%c0_51, %c0_52, %c0_53] : memref<1x144x128xbf16, #tpu.memory_space<vmem>>, vector<1x144x128xbf16>
    %62 = vector.shape_cast %61 : vector<1x144x128xbf16> to vector<144x128xbf16>
    %63 = vector.shape_cast %60 : vector<144x128xbf16> to vector<1x144x128xbf16>
    tpu.vector_store %arg4[%c0_51, %c0_52, %c0_53], %63 {strides = array<i32>} : memref<1x144x128xbf16, #tpu.memory_space<vmem>>, vector<1x144x128xbf16>,
    return
  }
  func.func @transform_0(%arg0: i32) -> (i32, i32, i32) {
    %c0_i32 = arith.constant 0 : i32
    %c0_i32_0 = arith.constant 0 : i32
    %c0_i32_1 = arith.constant 0 : i32
    return %arg0, %c0_i32, %c0_i32_0 : i32, i32, i32
  }
  func.func @transform_1(%arg0: i32) -> (i32, i32, i32) {
    %c0_i32 = arith.constant 0 : i32
    %c0_i32_0 = arith.constant 0 : i32
    %c0_i32_1 = arith.constant 0 : i32
    %c0_i32_2 = arith.constant 0 : i32
    return %c0_i32, %c0_i32_0, %c0_i32_1 : i32, i32, i32
  }
  func.func @transform_2(%arg0: i32) -> (i32, i32) {
    %c0_i32 = arith.constant 0 : i32
    %c0_i32_0 = arith.constant 0 : i32
    %c0_i32_1 = arith.constant 0 : i32
    return %c0_i32, %c0_i32_0 : i32, i32
  }
  func.func @transform_3(%arg0: i32) -> (i32, i32, i32) {
    %c0_i32 = arith.constant 0 : i32
    %c0_i32_0 = arith.constant 0 : i32
    %c0_i32_1 = arith.constant 0 : i32
    return %arg0, %c0_i32, %c0_i32_0 : i32, i32, i32
  }
}

module attributes {stable_mosaic.version = 11 : i64} {
  func.func @_conv3x3_bn_relu_kernel(%arg0: i32, %arg1: memref<1x182x64xbf16, #tpu.memory_space<vmem>>, %arg2: memref<9x64x64xbf16, #tpu.memory_space<vmem>>, %arg3: memref<1x64xf32, #tpu.memory_space<vmem>>, %arg4: memref<1x144x64xbf16, #tpu.memory_space<vmem>>) attributes {dimension_semantics = [#tpu.dimension_semantics<parallel>], iteration_bounds = array<i64: 2>, scalar_prefetch = 0 : i64, scratch_operands = 0 : i64, tpu.core_type = #tpu.core_type<tc>, window_params = [{transform_indices = @transform_0, window_bounds = array<i64: 1, 182, 64>}, {pipeline_mode = #tpu.pipeline_mode<synchronous>, transform_indices = @transform_1, window_bounds = array<i64: 9, 64, 64>}, {pipeline_mode = #tpu.pipeline_mode<synchronous>, transform_indices = @transform_2, window_bounds = array<i64: 1, 64>}, {transform_indices = @transform_3, window_bounds = array<i64: 1, 144, 64>}]} {
    %cst = arith.constant 0.000000e+00 : f32
    %0 = vector.broadcast %cst : f32 to vector<144x64xf32>
    %c0 = arith.constant 0 : index
    %c0_0 = arith.constant 0 : index
    %c0_1 = arith.constant 0 : index
    %1 = vector.load %arg1[%c0, %c0_0, %c0_1] : memref<1x182x64xbf16, #tpu.memory_space<vmem>>, vector<1x144x64xbf16>
    %2 = vector.shape_cast %1 : vector<1x144x64xbf16> to vector<144x64xbf16>
    %c0_2 = arith.constant 0 : index
    %c0_3 = arith.constant 0 : index
    %c0_4 = arith.constant 0 : index
    %3 = vector.load %arg2[%c0_2, %c0_3, %c0_4] : memref<9x64x64xbf16, #tpu.memory_space<vmem>>, vector<1x64x64xbf16>
    %4 = vector.shape_cast %3 : vector<1x64x64xbf16> to vector<64x64xbf16>
    %cst_5 = arith.constant dense<0.000000e+00> : vector<144x64xf32>
    %5 = tpu.matmul %2, %4, %cst_5 {dimension_numbers = #tpu.dot_dimension_numbers<[1], [0], [0], [1], [0, 0, 1, 1], [], []>} : vector<144x64xbf16>, vector<64x64xbf16>, vector<144x64xf32> -> vector<144x64xf32>
    %6 = arith.addf %0, %5 : vector<144x64xf32>
    %c0_6 = arith.constant 0 : index
    %c1 = arith.constant 1 : index
    %c0_7 = arith.constant 0 : index
    %7 = vector.load %arg1[%c0_6, %c1, %c0_7] : memref<1x182x64xbf16, #tpu.memory_space<vmem>>, vector<1x144x64xbf16>
    %8 = vector.shape_cast %7 : vector<1x144x64xbf16> to vector<144x64xbf16>
    %c1_8 = arith.constant 1 : index
    %c0_9 = arith.constant 0 : index
    %c0_10 = arith.constant 0 : index
    %9 = vector.load %arg2[%c1_8, %c0_9, %c0_10] : memref<9x64x64xbf16, #tpu.memory_space<vmem>>, vector<1x64x64xbf16>
    %10 = vector.shape_cast %9 : vector<1x64x64xbf16> to vector<64x64xbf16>
    %cst_11 = arith.constant dense<0.000000e+00> : vector<144x64xf32>
    %11 = tpu.matmul %8, %10, %cst_11 {dimension_numbers = #tpu.dot_dimension_numbers<[1], [0], [0], [1], [0, 0, 1, 1], [], []>} : vector<144x64xbf16>, vector<64x64xbf16>, vector<144x64xf32> -> vector<144x64xf32>
    %12 = arith.addf %6, %11 : vector<144x64xf32>
    %c0_12 = arith.constant 0 : index
    %c2 = arith.constant 2 : index
    %c0_13 = arith.constant 0 : index
    %13 = vector.load %arg1[%c0_12, %c2, %c0_13] : memref<1x182x64xbf16, #tpu.memory_space<vmem>>, vector<1x144x64xbf16>
    %14 = vector.shape_cast %13 : vector<1x144x64xbf16> to vector<144x64xbf16>
    %c2_14 = arith.constant 2 : index
    %c0_15 = arith.constant 0 : index
    %c0_16 = arith.constant 0 : index
    %15 = vector.load %arg2[%c2_14, %c0_15, %c0_16] : memref<9x64x64xbf16, #tpu.memory_space<vmem>>, vector<1x64x64xbf16>
    %16 = vector.shape_cast %15 : vector<1x64x64xbf16> to vector<64x64xbf16>
    %cst_17 = arith.constant dense<0.000000e+00> : vector<144x64xf32>
    %17 = tpu.matmul %14, %16, %cst_17 {dimension_numbers = #tpu.dot_dimension_numbers<[1], [0], [0], [1], [0, 0, 1, 1], [], []>} : vector<144x64xbf16>, vector<64x64xbf16>, vector<144x64xf32> -> vector<144x64xf32>
    %18 = arith.addf %12, %17 : vector<144x64xf32>
    %c0_18 = arith.constant 0 : index
    %c18 = arith.constant 18 : index
    %c0_19 = arith.constant 0 : index
    %19 = vector.load %arg1[%c0_18, %c18, %c0_19] : memref<1x182x64xbf16, #tpu.memory_space<vmem>>, vector<1x144x64xbf16>
    %20 = vector.shape_cast %19 : vector<1x144x64xbf16> to vector<144x64xbf16>
    %c3 = arith.constant 3 : index
    %c0_20 = arith.constant 0 : index
    %c0_21 = arith.constant 0 : index
    %21 = vector.load %arg2[%c3, %c0_20, %c0_21] : memref<9x64x64xbf16, #tpu.memory_space<vmem>>, vector<1x64x64xbf16>
    %22 = vector.shape_cast %21 : vector<1x64x64xbf16> to vector<64x64xbf16>
    %cst_22 = arith.constant dense<0.000000e+00> : vector<144x64xf32>
    %23 = tpu.matmul %20, %22, %cst_22 {dimension_numbers = #tpu.dot_dimension_numbers<[1], [0], [0], [1], [0, 0, 1, 1], [], []>} : vector<144x64xbf16>, vector<64x64xbf16>, vector<144x64xf32> -> vector<144x64xf32>
    %24 = arith.addf %18, %23 : vector<144x64xf32>
    %c0_23 = arith.constant 0 : index
    %c19 = arith.constant 19 : index
    %c0_24 = arith.constant 0 : index
    %25 = vector.load %arg1[%c0_23, %c19, %c0_24] : memref<1x182x64xbf16, #tpu.memory_space<vmem>>, vector<1x144x64xbf16>
    %26 = vector.shape_cast %25 : vector<1x144x64xbf16> to vector<144x64xbf16>
    %c4 = arith.constant 4 : index
    %c0_25 = arith.constant 0 : index
    %c0_26 = arith.constant 0 : index
    %27 = vector.load %arg2[%c4, %c0_25, %c0_26] : memref<9x64x64xbf16, #tpu.memory_space<vmem>>, vector<1x64x64xbf16>
    %28 = vector.shape_cast %27 : vector<1x64x64xbf16> to vector<64x64xbf16>
    %cst_27 = arith.constant dense<0.000000e+00> : vector<144x64xf32>
    %29 = tpu.matmul %26, %28, %cst_27 {dimension_numbers = #tpu.dot_dimension_numbers<[1], [0], [0], [1], [0, 0, 1, 1], [], []>} : vector<144x64xbf16>, vector<64x64xbf16>, vector<144x64xf32> -> vector<144x64xf32>
    %30 = arith.addf %24, %29 : vector<144x64xf32>
    %c0_28 = arith.constant 0 : index
    %c20 = arith.constant 20 : index
    %c0_29 = arith.constant 0 : index
    %31 = vector.load %arg1[%c0_28, %c20, %c0_29] : memref<1x182x64xbf16, #tpu.memory_space<vmem>>, vector<1x144x64xbf16>
    %32 = vector.shape_cast %31 : vector<1x144x64xbf16> to vector<144x64xbf16>
    %c5 = arith.constant 5 : index
    %c0_30 = arith.constant 0 : index
    %c0_31 = arith.constant 0 : index
    %33 = vector.load %arg2[%c5, %c0_30, %c0_31] : memref<9x64x64xbf16, #tpu.memory_space<vmem>>, vector<1x64x64xbf16>
    %34 = vector.shape_cast %33 : vector<1x64x64xbf16> to vector<64x64xbf16>
    %cst_32 = arith.constant dense<0.000000e+00> : vector<144x64xf32>
    %35 = tpu.matmul %32, %34, %cst_32 {dimension_numbers = #tpu.dot_dimension_numbers<[1], [0], [0], [1], [0, 0, 1, 1], [], []>} : vector<144x64xbf16>, vector<64x64xbf16>, vector<144x64xf32> -> vector<144x64xf32>
    %36 = arith.addf %30, %35 : vector<144x64xf32>
    %c0_33 = arith.constant 0 : index
    %c36 = arith.constant 36 : index
    %c0_34 = arith.constant 0 : index
    %37 = vector.load %arg1[%c0_33, %c36, %c0_34] : memref<1x182x64xbf16, #tpu.memory_space<vmem>>, vector<1x144x64xbf16>
    %38 = vector.shape_cast %37 : vector<1x144x64xbf16> to vector<144x64xbf16>
    %c6 = arith.constant 6 : index
    %c0_35 = arith.constant 0 : index
    %c0_36 = arith.constant 0 : index
    %39 = vector.load %arg2[%c6, %c0_35, %c0_36] : memref<9x64x64xbf16, #tpu.memory_space<vmem>>, vector<1x64x64xbf16>
    %40 = vector.shape_cast %39 : vector<1x64x64xbf16> to vector<64x64xbf16>
    %cst_37 = arith.constant dense<0.000000e+00> : vector<144x64xf32>
    %41 = tpu.matmul %38, %40, %cst_37 {dimension_numbers = #tpu.dot_dimension_numbers<[1], [0], [0], [1], [0, 0, 1, 1], [], []>} : vector<144x64xbf16>, vector<64x64xbf16>, vector<144x64xf32> -> vector<144x64xf32>
    %42 = arith.addf %36, %41 : vector<144x64xf32>
    %c0_38 = arith.constant 0 : index
    %c37 = arith.constant 37 : index
    %c0_39 = arith.constant 0 : index
    %43 = vector.load %arg1[%c0_38, %c37, %c0_39] : memref<1x182x64xbf16, #tpu.memory_space<vmem>>, vector<1x144x64xbf16>
    %44 = vector.shape_cast %43 : vector<1x144x64xbf16> to vector<144x64xbf16>
    %c7 = arith.constant 7 : index
    %c0_40 = arith.constant 0 : index
    %c0_41 = arith.constant 0 : index
    %45 = vector.load %arg2[%c7, %c0_40, %c0_41] : memref<9x64x64xbf16, #tpu.memory_space<vmem>>, vector<1x64x64xbf16>
    %46 = vector.shape_cast %45 : vector<1x64x64xbf16> to vector<64x64xbf16>
    %cst_42 = arith.constant dense<0.000000e+00> : vector<144x64xf32>
    %47 = tpu.matmul %44, %46, %cst_42 {dimension_numbers = #tpu.dot_dimension_numbers<[1], [0], [0], [1], [0, 0, 1, 1], [], []>} : vector<144x64xbf16>, vector<64x64xbf16>, vector<144x64xf32> -> vector<144x64xf32>
    %48 = arith.addf %42, %47 : vector<144x64xf32>
    %c0_43 = arith.constant 0 : index
    %c38 = arith.constant 38 : index
    %c0_44 = arith.constant 0 : index
    %49 = vector.load %arg1[%c0_43, %c38, %c0_44] : memref<1x182x64xbf16, #tpu.memory_space<vmem>>, vector<1x144x64xbf16>
    %50 = vector.shape_cast %49 : vector<1x144x64xbf16> to vector<144x64xbf16>
    %c8 = arith.constant 8 : index
    %c0_45 = arith.constant 0 : index
    %c0_46 = arith.constant 0 : index
    %51 = vector.load %arg2[%c8, %c0_45, %c0_46] : memref<9x64x64xbf16, #tpu.memory_space<vmem>>, vector<1x64x64xbf16>
    %52 = vector.shape_cast %51 : vector<1x64x64xbf16> to vector<64x64xbf16>
    %cst_47 = arith.constant dense<0.000000e+00> : vector<144x64xf32>
    %53 = tpu.matmul %50, %52, %cst_47 {dimension_numbers = #tpu.dot_dimension_numbers<[1], [0], [0], [1], [0, 0, 1, 1], [], []>} : vector<144x64xbf16>, vector<64x64xbf16>, vector<144x64xf32> -> vector<144x64xf32>
    %54 = arith.addf %48, %53 : vector<144x64xf32>
    %c0_48 = arith.constant 0 : index
    %c0_49 = arith.constant 0 : index
    %55 = vector.load %arg3[%c0_48, %c0_49] : memref<1x64xf32, #tpu.memory_space<vmem>>, vector<1x64xf32>
    %56 = vector.broadcast %55 : vector<1x64xf32> to vector<144x64xf32>
    %57 = arith.addf %54, %56 : vector<144x64xf32>
    %cst_50 = arith.constant 0.000000e+00 : f32
    %58 = vector.broadcast %cst_50 : f32 to vector<144x64xf32>
    %59 = arith.maximumf %57, %58 : vector<144x64xf32>
    %60 = arith.truncf %59 : vector<144x64xf32> to vector<144x64xbf16>
    %c0_51 = arith.constant 0 : index
    %c0_52 = arith.constant 0 : index
    %c0_53 = arith.constant 0 : index
    %61 = vector.load %arg4[%c0_51, %c0_52, %c0_53] : memref<1x144x64xbf16, #tpu.memory_space<vmem>>, vector<1x144x64xbf16>
    %62 = vector.shape_cast %61 : vector<1x144x64xbf16> to vector<144x64xbf16>
    %63 = vector.shape_cast %60 : vector<144x64xbf16> to vector<1x144x64xbf16>
    tpu.vector_store %arg4[%c0_51, %c0_52, %c0_53], %63 {strides = array<i32>} : memref<1x144x64xbf16, #tpu.memory_space<vmem>>, vector<1x144x64xbf16>,
    return
  }
  func.func @transform_0(%arg0: i32) -> (i32, i32, i32) {
    %c0_i32 = arith.constant 0 : i32
    %c0_i32_0 = arith.constant 0 : i32
    %c0_i32_1 = arith.constant 0 : i32
    return %arg0, %c0_i32, %c0_i32_0 : i32, i32, i32
  }
  func.func @transform_1(%arg0: i32) -> (i32, i32, i32) {
    %c0_i32 = arith.constant 0 : i32
    %c0_i32_0 = arith.constant 0 : i32
    %c0_i32_1 = arith.constant 0 : i32
    %c0_i32_2 = arith.constant 0 : i32
    return %c0_i32, %c0_i32_0, %c0_i32_1 : i32, i32, i32
  }
  func.func @transform_2(%arg0: i32) -> (i32, i32) {
    %c0_i32 = arith.constant 0 : i32
    %c0_i32_0 = arith.constant 0 : i32
    %c0_i32_1 = arith.constant 0 : i32
    return %c0_i32, %c0_i32_0 : i32, i32
  }
  func.func @transform_3(%arg0: i32) -> (i32, i32, i32) {
    %c0_i32 = arith.constant 0 : i32
    %c0_i32_0 = arith.constant 0 : i32
    %c0_i32_1 = arith.constant 0 : i32
    return %arg0, %c0_i32, %c0_i32_0 : i32, i32, i32
  }
}

module attributes {stable_mosaic.version = 11 : i64} {
  func.func @_conv3x3_bn_relu_kernel(%arg0: i32, %arg1: memref<1x182x128xbf16, #tpu.memory_space<vmem>>, %arg2: memref<9x128x128xbf16, #tpu.memory_space<vmem>>, %arg3: memref<1x128xf32, #tpu.memory_space<vmem>>, %arg4: memref<1x144x128xbf16, #tpu.memory_space<vmem>>) attributes {dimension_semantics = [#tpu.dimension_semantics<parallel>], iteration_bounds = array<i64: 2>, scalar_prefetch = 0 : i64, scratch_operands = 0 : i64, tpu.core_type = #tpu.core_type<tc>, window_params = [{transform_indices = @transform_0, window_bounds = array<i64: 1, 182, 128>}, {pipeline_mode = #tpu.pipeline_mode<synchronous>, transform_indices = @transform_1, window_bounds = array<i64: 9, 128, 128>}, {pipeline_mode = #tpu.pipeline_mode<synchronous>, transform_indices = @transform_2, window_bounds = array<i64: 1, 128>}, {transform_indices = @transform_3, window_bounds = array<i64: 1, 144, 128>}]} {
    %cst = arith.constant 0.000000e+00 : f32
    %0 = vector.broadcast %cst : f32 to vector<144x128xf32>
    %c0 = arith.constant 0 : index
    %c0_0 = arith.constant 0 : index
    %c0_1 = arith.constant 0 : index
    %1 = vector.load %arg1[%c0, %c0_0, %c0_1] : memref<1x182x128xbf16, #tpu.memory_space<vmem>>, vector<1x144x128xbf16>
    %2 = vector.shape_cast %1 : vector<1x144x128xbf16> to vector<144x128xbf16>
    %c0_2 = arith.constant 0 : index
    %c0_3 = arith.constant 0 : index
    %c0_4 = arith.constant 0 : index
    %3 = vector.load %arg2[%c0_2, %c0_3, %c0_4] : memref<9x128x128xbf16, #tpu.memory_space<vmem>>, vector<1x128x128xbf16>
    %4 = vector.shape_cast %3 : vector<1x128x128xbf16> to vector<128x128xbf16>
    %cst_5 = arith.constant dense<0.000000e+00> : vector<144x128xf32>
    %5 = tpu.matmul %2, %4, %cst_5 {dimension_numbers = #tpu.dot_dimension_numbers<[1], [0], [0], [1], [0, 0, 1, 1], [], []>} : vector<144x128xbf16>, vector<128x128xbf16>, vector<144x128xf32> -> vector<144x128xf32>
    %6 = arith.addf %0, %5 : vector<144x128xf32>
    %c0_6 = arith.constant 0 : index
    %c1 = arith.constant 1 : index
    %c0_7 = arith.constant 0 : index
    %7 = vector.load %arg1[%c0_6, %c1, %c0_7] : memref<1x182x128xbf16, #tpu.memory_space<vmem>>, vector<1x144x128xbf16>
    %8 = vector.shape_cast %7 : vector<1x144x128xbf16> to vector<144x128xbf16>
    %c1_8 = arith.constant 1 : index
    %c0_9 = arith.constant 0 : index
    %c0_10 = arith.constant 0 : index
    %9 = vector.load %arg2[%c1_8, %c0_9, %c0_10] : memref<9x128x128xbf16, #tpu.memory_space<vmem>>, vector<1x128x128xbf16>
    %10 = vector.shape_cast %9 : vector<1x128x128xbf16> to vector<128x128xbf16>
    %cst_11 = arith.constant dense<0.000000e+00> : vector<144x128xf32>
    %11 = tpu.matmul %8, %10, %cst_11 {dimension_numbers = #tpu.dot_dimension_numbers<[1], [0], [0], [1], [0, 0, 1, 1], [], []>} : vector<144x128xbf16>, vector<128x128xbf16>, vector<144x128xf32> -> vector<144x128xf32>
    %12 = arith.addf %6, %11 : vector<144x128xf32>
    %c0_12 = arith.constant 0 : index
    %c2 = arith.constant 2 : index
    %c0_13 = arith.constant 0 : index
    %13 = vector.load %arg1[%c0_12, %c2, %c0_13] : memref<1x182x128xbf16, #tpu.memory_space<vmem>>, vector<1x144x128xbf16>
    %14 = vector.shape_cast %13 : vector<1x144x128xbf16> to vector<144x128xbf16>
    %c2_14 = arith.constant 2 : index
    %c0_15 = arith.constant 0 : index
    %c0_16 = arith.constant 0 : index
    %15 = vector.load %arg2[%c2_14, %c0_15, %c0_16] : memref<9x128x128xbf16, #tpu.memory_space<vmem>>, vector<1x128x128xbf16>
    %16 = vector.shape_cast %15 : vector<1x128x128xbf16> to vector<128x128xbf16>
    %cst_17 = arith.constant dense<0.000000e+00> : vector<144x128xf32>
    %17 = tpu.matmul %14, %16, %cst_17 {dimension_numbers = #tpu.dot_dimension_numbers<[1], [0], [0], [1], [0, 0, 1, 1], [], []>} : vector<144x128xbf16>, vector<128x128xbf16>, vector<144x128xf32> -> vector<144x128xf32>
    %18 = arith.addf %12, %17 : vector<144x128xf32>
    %c0_18 = arith.constant 0 : index
    %c18 = arith.constant 18 : index
    %c0_19 = arith.constant 0 : index
    %19 = vector.load %arg1[%c0_18, %c18, %c0_19] : memref<1x182x128xbf16, #tpu.memory_space<vmem>>, vector<1x144x128xbf16>
    %20 = vector.shape_cast %19 : vector<1x144x128xbf16> to vector<144x128xbf16>
    %c3 = arith.constant 3 : index
    %c0_20 = arith.constant 0 : index
    %c0_21 = arith.constant 0 : index
    %21 = vector.load %arg2[%c3, %c0_20, %c0_21] : memref<9x128x128xbf16, #tpu.memory_space<vmem>>, vector<1x128x128xbf16>
    %22 = vector.shape_cast %21 : vector<1x128x128xbf16> to vector<128x128xbf16>
    %cst_22 = arith.constant dense<0.000000e+00> : vector<144x128xf32>
    %23 = tpu.matmul %20, %22, %cst_22 {dimension_numbers = #tpu.dot_dimension_numbers<[1], [0], [0], [1], [0, 0, 1, 1], [], []>} : vector<144x128xbf16>, vector<128x128xbf16>, vector<144x128xf32> -> vector<144x128xf32>
    %24 = arith.addf %18, %23 : vector<144x128xf32>
    %c0_23 = arith.constant 0 : index
    %c19 = arith.constant 19 : index
    %c0_24 = arith.constant 0 : index
    %25 = vector.load %arg1[%c0_23, %c19, %c0_24] : memref<1x182x128xbf16, #tpu.memory_space<vmem>>, vector<1x144x128xbf16>
    %26 = vector.shape_cast %25 : vector<1x144x128xbf16> to vector<144x128xbf16>
    %c4 = arith.constant 4 : index
    %c0_25 = arith.constant 0 : index
    %c0_26 = arith.constant 0 : index
    %27 = vector.load %arg2[%c4, %c0_25, %c0_26] : memref<9x128x128xbf16, #tpu.memory_space<vmem>>, vector<1x128x128xbf16>
    %28 = vector.shape_cast %27 : vector<1x128x128xbf16> to vector<128x128xbf16>
    %cst_27 = arith.constant dense<0.000000e+00> : vector<144x128xf32>
    %29 = tpu.matmul %26, %28, %cst_27 {dimension_numbers = #tpu.dot_dimension_numbers<[1], [0], [0], [1], [0, 0, 1, 1], [], []>} : vector<144x128xbf16>, vector<128x128xbf16>, vector<144x128xf32> -> vector<144x128xf32>
    %30 = arith.addf %24, %29 : vector<144x128xf32>
    %c0_28 = arith.constant 0 : index
    %c20 = arith.constant 20 : index
    %c0_29 = arith.constant 0 : index
    %31 = vector.load %arg1[%c0_28, %c20, %c0_29] : memref<1x182x128xbf16, #tpu.memory_space<vmem>>, vector<1x144x128xbf16>
    %32 = vector.shape_cast %31 : vector<1x144x128xbf16> to vector<144x128xbf16>
    %c5 = arith.constant 5 : index
    %c0_30 = arith.constant 0 : index
    %c0_31 = arith.constant 0 : index
    %33 = vector.load %arg2[%c5, %c0_30, %c0_31] : memref<9x128x128xbf16, #tpu.memory_space<vmem>>, vector<1x128x128xbf16>
    %34 = vector.shape_cast %33 : vector<1x128x128xbf16> to vector<128x128xbf16>
    %cst_32 = arith.constant dense<0.000000e+00> : vector<144x128xf32>
    %35 = tpu.matmul %32, %34, %cst_32 {dimension_numbers = #tpu.dot_dimension_numbers<[1], [0], [0], [1], [0, 0, 1, 1], [], []>} : vector<144x128xbf16>, vector<128x128xbf16>, vector<144x128xf32> -> vector<144x128xf32>
    %36 = arith.addf %30, %35 : vector<144x128xf32>
    %c0_33 = arith.constant 0 : index
    %c36 = arith.constant 36 : index
    %c0_34 = arith.constant 0 : index
    %37 = vector.load %arg1[%c0_33, %c36, %c0_34] : memref<1x182x128xbf16, #tpu.memory_space<vmem>>, vector<1x144x128xbf16>
    %38 = vector.shape_cast %37 : vector<1x144x128xbf16> to vector<144x128xbf16>
    %c6 = arith.constant 6 : index
    %c0_35 = arith.constant 0 : index
    %c0_36 = arith.constant 0 : index
    %39 = vector.load %arg2[%c6, %c0_35, %c0_36] : memref<9x128x128xbf16, #tpu.memory_space<vmem>>, vector<1x128x128xbf16>
    %40 = vector.shape_cast %39 : vector<1x128x128xbf16> to vector<128x128xbf16>
    %cst_37 = arith.constant dense<0.000000e+00> : vector<144x128xf32>
    %41 = tpu.matmul %38, %40, %cst_37 {dimension_numbers = #tpu.dot_dimension_numbers<[1], [0], [0], [1], [0, 0, 1, 1], [], []>} : vector<144x128xbf16>, vector<128x128xbf16>, vector<144x128xf32> -> vector<144x128xf32>
    %42 = arith.addf %36, %41 : vector<144x128xf32>
    %c0_38 = arith.constant 0 : index
    %c37 = arith.constant 37 : index
    %c0_39 = arith.constant 0 : index
    %43 = vector.load %arg1[%c0_38, %c37, %c0_39] : memref<1x182x128xbf16, #tpu.memory_space<vmem>>, vector<1x144x128xbf16>
    %44 = vector.shape_cast %43 : vector<1x144x128xbf16> to vector<144x128xbf16>
    %c7 = arith.constant 7 : index
    %c0_40 = arith.constant 0 : index
    %c0_41 = arith.constant 0 : index
    %45 = vector.load %arg2[%c7, %c0_40, %c0_41] : memref<9x128x128xbf16, #tpu.memory_space<vmem>>, vector<1x128x128xbf16>
    %46 = vector.shape_cast %45 : vector<1x128x128xbf16> to vector<128x128xbf16>
    %cst_42 = arith.constant dense<0.000000e+00> : vector<144x128xf32>
    %47 = tpu.matmul %44, %46, %cst_42 {dimension_numbers = #tpu.dot_dimension_numbers<[1], [0], [0], [1], [0, 0, 1, 1], [], []>} : vector<144x128xbf16>, vector<128x128xbf16>, vector<144x128xf32> -> vector<144x128xf32>
    %48 = arith.addf %42, %47 : vector<144x128xf32>
    %c0_43 = arith.constant 0 : index
    %c38 = arith.constant 38 : index
    %c0_44 = arith.constant 0 : index
    %49 = vector.load %arg1[%c0_43, %c38, %c0_44] : memref<1x182x128xbf16, #tpu.memory_space<vmem>>, vector<1x144x128xbf16>
    %50 = vector.shape_cast %49 : vector<1x144x128xbf16> to vector<144x128xbf16>
    %c8 = arith.constant 8 : index
    %c0_45 = arith.constant 0 : index
    %c0_46 = arith.constant 0 : index
    %51 = vector.load %arg2[%c8, %c0_45, %c0_46] : memref<9x128x128xbf16, #tpu.memory_space<vmem>>, vector<1x128x128xbf16>
    %52 = vector.shape_cast %51 : vector<1x128x128xbf16> to vector<128x128xbf16>
    %cst_47 = arith.constant dense<0.000000e+00> : vector<144x128xf32>
    %53 = tpu.matmul %50, %52, %cst_47 {dimension_numbers = #tpu.dot_dimension_numbers<[1], [0], [0], [1], [0, 0, 1, 1], [], []>} : vector<144x128xbf16>, vector<128x128xbf16>, vector<144x128xf32> -> vector<144x128xf32>
    %54 = arith.addf %48, %53 : vector<144x128xf32>
    %c0_48 = arith.constant 0 : index
    %c0_49 = arith.constant 0 : index
    %55 = vector.load %arg3[%c0_48, %c0_49] : memref<1x128xf32, #tpu.memory_space<vmem>>, vector<1x128xf32>
    %56 = vector.broadcast %55 : vector<1x128xf32> to vector<144x128xf32>
    %57 = arith.addf %54, %56 : vector<144x128xf32>
    %cst_50 = arith.constant 0.000000e+00 : f32
    %58 = vector.broadcast %cst_50 : f32 to vector<144x128xf32>
    %59 = arith.maximumf %57, %58 : vector<144x128xf32>
    %60 = arith.truncf %59 : vector<144x128xf32> to vector<144x128xbf16>
    %c0_51 = arith.constant 0 : index
    %c0_52 = arith.constant 0 : index
    %c0_53 = arith.constant 0 : index
    %61 = vector.load %arg4[%c0_51, %c0_52, %c0_53] : memref<1x144x128xbf16, #tpu.memory_space<vmem>>, vector<1x144x128xbf16>
    %62 = vector.shape_cast %61 : vector<1x144x128xbf16> to vector<144x128xbf16>
    %63 = vector.shape_cast %60 : vector<144x128xbf16> to vector<1x144x128xbf16>
    tpu.vector_store %arg4[%c0_51, %c0_52, %c0_53], %63 {strides = array<i32>} : memref<1x144x128xbf16, #tpu.memory_space<vmem>>, vector<1x144x128xbf16>,
    return
  }
  func.func @transform_0(%arg0: i32) -> (i32, i32, i32) {
    %c0_i32 = arith.constant 0 : i32
    %c0_i32_0 = arith.constant 0 : i32
    %c0_i32_1 = arith.constant 0 : i32
    return %arg0, %c0_i32, %c0_i32_0 : i32, i32, i32
  }
  func.func @transform_1(%arg0: i32) -> (i32, i32, i32) {
    %c0_i32 = arith.constant 0 : i32
    %c0_i32_0 = arith.constant 0 : i32
    %c0_i32_1 = arith.constant 0 : i32
    %c0_i32_2 = arith.constant 0 : i32
    return %c0_i32, %c0_i32_0, %c0_i32_1 : i32, i32, i32
  }
  func.func @transform_2(%arg0: i32) -> (i32, i32) {
    %c0_i32 = arith.constant 0 : i32
    %c0_i32_0 = arith.constant 0 : i32
    %c0_i32_1 = arith.constant 0 : i32
    return %c0_i32, %c0_i32_0 : i32, i32
  }
  func.func @transform_3(%arg0: i32) -> (i32, i32, i32) {
    %c0_i32 = arith.constant 0 : i32
    %c0_i32_0 = arith.constant 0 : i32
    %c0_i32_1 = arith.constant 0 : i32
    return %arg0, %c0_i32, %c0_i32_0 : i32, i32, i32
  }
}

module attributes {stable_mosaic.version = 11 : i64} {
  func.func @_final_conv_sigmoid_kernel(%arg0: i32, %arg1: memref<1x128x128xbf16, #tpu.memory_space<vmem>>, %arg2: memref<4x128xf32, #tpu.memory_space<vmem>>, %arg3: memref<4x1xf32, #tpu.memory_space<vmem>>, %arg4: memref<1x4x128xf32, #tpu.memory_space<vmem>>) attributes {dimension_semantics = [#tpu.dimension_semantics<parallel>], iteration_bounds = array<i64: 2>, scalar_prefetch = 0 : i64, scratch_operands = 0 : i64, tpu.core_type = #tpu.core_type<tc>, window_params = [{transform_indices = @transform_0, window_bounds = array<i64: 1, 128, 128>}, {pipeline_mode = #tpu.pipeline_mode<synchronous>, transform_indices = @transform_1, window_bounds = array<i64: 4, 128>}, {pipeline_mode = #tpu.pipeline_mode<synchronous>, transform_indices = @transform_2, window_bounds = array<i64: 4, 1>}, {transform_indices = @transform_3, window_bounds = array<i64: 1, 4, 128>}]} {
    %c0 = arith.constant 0 : index
    %c0_0 = arith.constant 0 : index
    %c0_1 = arith.constant 0 : index
    %0 = vector.load %arg1[%c0, %c0_0, %c0_1] : memref<1x128x128xbf16, #tpu.memory_space<vmem>>, vector<1x128x128xbf16>
    %1 = vector.shape_cast %0 : vector<1x128x128xbf16> to vector<128x128xbf16>
    %2 = arith.extf %1 : vector<128x128xbf16> to vector<128x128xf32>
    %3 = tpu.transpose %2, [1, 0] : vector<128x128xf32> -> vector<128x128xf32>
    %c0_2 = arith.constant 0 : index
    %c0_3 = arith.constant 0 : index
    %4 = vector.load %arg2[%c0_2, %c0_3] : memref<4x128xf32, #tpu.memory_space<vmem>>, vector<4x128xf32>
    %cst = arith.constant dense<0.000000e+00> : vector<4x128xf32>
    %5 = tpu.matmul %4, %3, %cst {dimension_numbers = #tpu.dot_dimension_numbers<[1], [0], [0], [1], [0, 0, 1, 1], [], []>} : vector<4x128xf32>, vector<128x128xf32>, vector<4x128xf32> -> vector<4x128xf32>
    %c0_4 = arith.constant 0 : index
    %c0_5 = arith.constant 0 : index
    %6 = vector.load %arg3[%c0_4, %c0_5] : memref<4x1xf32, #tpu.memory_space<vmem>>, vector<4x1xf32>
    %7 = vector.broadcast %6 : vector<4x1xf32> to vector<4x128xf32>
    %8 = arith.addf %5, %7 : vector<4x128xf32>
    %9 = arith.negf %8 : vector<4x128xf32>
    %10 = math.exp %9 : vector<4x128xf32>
    %cst_6 = arith.constant 1.000000e+00 : f32
    %11 = vector.broadcast %cst_6 : f32 to vector<4x128xf32>
    %12 = arith.addf %11, %10 : vector<4x128xf32>
    %13 = arith.divf %11, %12 : vector<4x128xf32>
    %c0_7 = arith.constant 0 : index
    %c0_8 = arith.constant 0 : index
    %c0_9 = arith.constant 0 : index
    %14 = vector.load %arg4[%c0_7, %c0_8, %c0_9] : memref<1x4x128xf32, #tpu.memory_space<vmem>>, vector<1x4x128xf32>
    %15 = vector.shape_cast %14 : vector<1x4x128xf32> to vector<4x128xf32>
    %16 = vector.shape_cast %13 : vector<4x128xf32> to vector<1x4x128xf32>
    tpu.vector_store %arg4[%c0_7, %c0_8, %c0_9], %16 {strides = array<i32>} : memref<1x4x128xf32, #tpu.memory_space<vmem>>, vector<1x4x128xf32>,
    return
  }
  func.func @transform_0(%arg0: i32) -> (i32, i32, i32) {
    %c0_i32 = arith.constant 0 : i32
    %c0_i32_0 = arith.constant 0 : i32
    %c0_i32_1 = arith.constant 0 : i32
    return %arg0, %c0_i32, %c0_i32_0 : i32, i32, i32
  }
  func.func @transform_1(%arg0: i32) -> (i32, i32) {
    %c0_i32 = arith.constant 0 : i32
    %c0_i32_0 = arith.constant 0 : i32
    %c0_i32_1 = arith.constant 0 : i32
    return %c0_i32, %c0_i32_0 : i32, i32
  }
  func.func @transform_2(%arg0: i32) -> (i32, i32) {
    %c0_i32 = arith.constant 0 : i32
    %c0_i32_0 = arith.constant 0 : i32
    %c0_i32_1 = arith.constant 0 : i32
    return %c0_i32, %c0_i32_0 : i32, i32
  }
  func.func @transform_3(%arg0: i32) -> (i32, i32, i32) {
    %c0_i32 = arith.constant 0 : i32
    %c0_i32_0 = arith.constant 0 : i32
    %c0_i32_1 = arith.constant 0 : i32
    return %arg0, %c0_i32, %c0_i32_0 : i32, i32, i32
  }
}

module attributes {stable_mosaic.version = 11 : i64} {
  func.func @_gwrp_kernel(%arg0: i32, %arg1: memref<2x4x128xf32, #tpu.memory_space<vmem>>, %arg2: memref<1x1x128xf32, #tpu.memory_space<vmem>>, %arg3: memref<2x4xf32, #tpu.memory_space<vmem>>) attributes {dimension_semantics = [#tpu.dimension_semantics<arbitrary>], iteration_bounds = array<i64: 1>, scalar_prefetch = 0 : i64, scratch_operands = 0 : i64, tpu.core_type = #tpu.core_type<tc>, window_params = [{transform_indices = @transform_0, window_bounds = array<i64: 2, 4, 128>}, {transform_indices = @transform_1, window_bounds = array<i64: 1, 1, 128>}, {pipeline_mode = #tpu.pipeline_mode<synchronous>, transform_indices = @transform_2, window_bounds = array<i64: 2, 4>}]} {
    %c0_i32 = arith.constant 0 : i32
    %0 = arith.cmpi eq, %arg0, %c0_i32 : i32
    %1 = arith.extui %0 : i1 to i32
    %c0_i32_0 = arith.constant 0 : i32
    %2 = arith.cmpi ne, %1, %c0_i32_0 : i32
    scf.if %2 {
      %cst_10 = arith.constant 0.000000e+00 : f32
      %11 = vector.broadcast %cst_10 : f32 to vector<2x4xf32>
      %c0_11 = arith.constant 0 : index
      %c0_12 = arith.constant 0 : index
      %12 = vector.load %arg3[%c0_11, %c0_12] : memref<2x4xf32, #tpu.memory_space<vmem>>, vector<2x4xf32>
      tpu.vector_store %arg3[%c0_11, %c0_12], %11 {strides = array<i32>} : memref<2x4xf32, #tpu.memory_space<vmem>>, vector<2x4xf32>,
    } else {
    }
    %c0 = arith.constant 0 : index
    %c0_1 = arith.constant 0 : index
    %3 = vector.load %arg3[%c0, %c0_1] : memref<2x4xf32, #tpu.memory_space<vmem>>, vector<2x4xf32>
    %c0_2 = arith.constant 0 : index
    %c0_3 = arith.constant 0 : index
    %c0_4 = arith.constant 0 : index
    %4 = vector.load %arg1[%c0_2, %c0_3, %c0_4] : memref<2x4x128xf32, #tpu.memory_space<vmem>>, vector<2x4x128xf32>
    %c0_5 = arith.constant 0 : index
    %c0_6 = arith.constant 0 : index
    %c0_7 = arith.constant 0 : index
    %5 = vector.load %arg2[%c0_5, %c0_6, %c0_7] : memref<1x1x128xf32, #tpu.memory_space<vmem>>, vector<1x1x128xf32>
    %6 = vector.broadcast %5 : vector<1x1x128xf32> to vector<2x4x128xf32>
    %7 = arith.mulf %4, %6 : vector<2x4x128xf32>
    %cst = arith.constant dense<0.000000e+00> : vector<2x4xf32>
    %8 = vector.multi_reduction <add>, %7, %cst [2] : vector<2x4x128xf32> to vector<2x4xf32>
    %9 = arith.addf %3, %8 : vector<2x4xf32>
    %c0_8 = arith.constant 0 : index
    %c0_9 = arith.constant 0 : index
    %10 = vector.load %arg3[%c0_8, %c0_9] : memref<2x4xf32, #tpu.memory_space<vmem>>, vector<2x4xf32>
    tpu.vector_store %arg3[%c0_8, %c0_9], %9 {strides = array<i32>} : memref<2x4xf32, #tpu.memory_space<vmem>>, vector<2x4xf32>,
    return
  }
  func.func @transform_0(%arg0: i32) -> (i32, i32, i32) {
    %c0_i32 = arith.constant 0 : i32
    %c0_i32_0 = arith.constant 0 : i32
    %c0_i32_1 = arith.constant 0 : i32
    return %c0_i32, %c0_i32_0, %arg0 : i32, i32, i32
  }
  func.func @transform_1(%arg0: i32) -> (i32, i32, i32) {
    %c0_i32 = arith.constant 0 : i32
    %c0_i32_0 = arith.constant 0 : i32
    %c0_i32_1 = arith.constant 0 : i32
    return %c0_i32, %c0_i32_0, %arg0 : i32, i32, i32
  }
  func.func @transform_2(%arg0: i32) -> (i32, i32) {
    %c0_i32 = arith.constant 0 : i32
    %c0_i32_0 = arith.constant 0 : i32
    %c0_i32_1 = arith.constant 0 : i32
    return %c0_i32, %c0_i32_0 : i32, i32
  }
}

</mosaic_0001>

<bundles_post_ra>
// kernel: _lambda_.11
= control target key start
LH: loop header
LB: loop body
LE: loop exit
PB: predicated region body
PF: predicated region fallthrough
CT: control target
= control target key end

     0   :  { %s2263_s12 = smov 0   ;;  %s2929_s0 = inlined_call_operand.vmem [shape: bf16[2,182,32], index: 0, kind: input, shape index: {}]   ;;  %s2930_s1 = inlined_call_operand.vmem [shape: bf16[9,32,32], index: 1, kind: input, shape index: {}]   ;;  %s2931_s2 = inlined_call_operand.vmem [shape: f32[1,32], index: 2, kind: input, shape index: {}]   ;;  %s2932_s3 = inlined_call_operand.vmem [shape: bf16[2,144,32], index: 3, kind: output, shape index: {}]  }
   0x1 LB: > { %s1879_s13 = sadd.s32 4294967295, %s2241_s12   ;;  %p1883_p0 = scmp.ge.s32.totalorder %s2241_s12, 1  ;;  %s2241_s12 = sphi %s2263_s12, %s13_s12  }
   0x2   : > { %p137_p1 = scmp.lt.s32.totalorder %s2241_s12, 3 }
   0x4   : > { %p138_p2 = pnand %p1883_p0, %p137_p1 }
   0x5   : > { %p161_p3 = scmp.lt.s32.totalorder (!%p138_p2), %s1879_s13, 1 }
   0x6   : > { %141 = sbr.rel (%p138_p2) target bundleno = 498 (0x1f2), region = 32 }
   0xb   : > { %v2180_v0 = vld [vmem:[%s2930_s1 + $0x18] sm:$0xff]  ;;  %v2179_v1 = vld [vmem:[%s2930_s1 + $0x10] sm:$0xff]  ;;  %s2934_s13 = smov (!%p161_p3, %s1879_s13), 1  ;;  %v2182_v2 = vld [vmem:[%s2930_s1 + $0x28] sm:$0xff]  ;;  %vm248_vm0 = vsmask.f32 7424 }
   0xc   : > { %2218 = vmatpush.bf16.msra.mxu1 %v2180_v0  ;;  %2219 = vmatpush.bf16.msra.mxu2 %v2180_v0  ;;  %v2178_v3 = vld [vmem:[%s2930_s1 + $0x8] sm:$0xff]  ;;  %s2224_s22 = smul.u32 92, %s2934_s13  ;;  %v2192_v4 = vld [vmem:[%s2930_s1 + $0x38] sm:$0xff]  ;;  %v2181_v5 = vld [vmem:[%s2930_s1 + $0x20] sm:$0xff]  ;;  %vm337_vm1 = vcmask 261120   ;;  %vm512_vm3 = vcmask 1046528  }
   0xd   : > { %2220 = vmatpush.bf16.msra.mxu3 %v2180_v0  ;;  %371 = vmatpush.bf16.msra.mxu0 %v2180_v0  ;;  %v2177_v6 = vld [vmem:[%s2930_s1] sm:$0xff]  ;;  %v2191_v39 = vld [vmem:[%s2930_s1 + $0x30] sm:$0xff]  ;;  %v2194_v41 = vld [vmem:[%s2930_s1 + $0x48] sm:$0xff]  ;;  %vm854_vm2 = vsmask.f32 6400  ;;  %vm1616_vm4 = vcmask 1044480  }
   0xe   : > { %s2292_s27 = scalar_lea.vmem %s2929_s0, %s2224_s22  ;;  %v2193_v47 = vld [vmem:[%s2930_s1 + $0x40] sm:$0xff]  ;;  %vm1406_vm5 = vsmask.f32 5376  ;;  %vm1064_vm6 = vcmask 1045504   ;;  %s2225_s4 = smul.u32 72, %s2934_s13  ;;  %vm1805_vm7 = vcmask 257024  }
   0xf   : > { %v2301_v7 = vld [vmem:[%s2292_s27 + $0x8] sm:$0xff]  ;;  %v2304_v8 = vld [vmem:[%s2292_s27 + $0x10] sm:$0xff]  ;;  %v2307_v9 = vld [vmem:[%s2292_s27 + $0x20] sm:$0xff] }
  0x10   : > { %2221 = vmatpush.bf16.msra.mxu1 %v2179_v1  ;;  %2222 = vmatpush.bf16.msra.mxu2 %v2179_v1  ;;  %v2310_v10 = vld [vmem:[%s2292_s27 + $0x28] sm:$0xff]  ;;  %v2313_v11 = vld [vmem:[%s2292_s27 + $0x38] sm:$0xff]  ;;  %v2316_v12 = vld [vmem:[%s2292_s27 + $0x40] sm:$0xff]  ;;  %v257_v13 = vshll.u32 %v2301_v7, 16  ;;  %v261_v14 = vshrl.u32 %v2301_v7, 16  ;;  %v265_v15 = vshll.u32 %v2304_v8, 16  ;;  %s2855_s7 = scalar_lea.vmem %s2932_s3, %s2225_s4 }
  0x11   : > { %2223 = vmatpush.bf16.msra.mxu3 %v2179_v1  ;;  %372 = vmatpush.bf16.msra.mxu0 %v2179_v1  ;;  %v281_v16 = vshll.u32 %v2307_v9, 16  ;;  %v285_v17 = vshrl.u32 %v2307_v9, 16  ;;  %v289_v18 = vshll.u32 %v2310_v10, 16  ;;  %v305_v19 = vshll.u32 %v2313_v11, 16  ;;  %v194_v27 = vld [vmem:[%s2292_s27 + $0x48] sm:$0x1] }
  0x12   : > { %v309_v20 = vshrl.u32 %v2313_v11, 16  ;;  %v259_v21 = vrot.slane %v257_v13, 1  ;;  %v267_v22 = vrot.slane %v265_v15, 1  ;;  %v313_v24 = vshll.u32 %v2316_v12, 16  ;;  %v2337_v35 = vld [vmem:[%s2292_s27] sm:$0xff]   ;;  %v2343_v37 = vld [vmem:[%s2292_s27 + $0x18] sm:$0xff] }
  0x13   : > { %v2326_v23 = vrot.slane %v281_v16, 1  ;;  %v291_v25 = vrot.slane %v289_v18, 1  ;;  %v2329_v26 = vrot.slane %v305_v19, 1  ;;  %v237_v34 = vunpack.c.l.b16 %v194_v27  ;;  %v2346_v38 = vld [vmem:[%s2292_s27 + $0x30] sm:$0xff]  ;;  %v643_v44 = vld [vmem:[%s2292_s27 + $0x8] sm:$0xe] }
  0x14   : > { %577 = vmatpush.bf16.msrb.mxu2 %v2182_v2  ;;  %455 = vmatpush.bf16.msrb.mxu1 %v2178_v3  ;;  %v263_v28 = vor.u32 %v261_v14, %v259_v21  ;;  %v315_v30 = vrot.slane %v313_v24, 1  ;;  %v250_v42 = vshrl.u32 %v2337_v35, 16  ;;  %v252_v43 = vshll.u32 %v2337_v35, 16  ;;  %v2361_v45 = vld [vmem:[%s2292_s27 + $0xc] sm:$0xf]  ;;  %v2376_v0 = vld [vmem:[%s2292_s27 + $0x10] sm:$0xff] }
  0x15   : > { %779 = vmatpush.bf16.msrb.mxu3 %v2192_v4  ;;  %v287_v29 = vor.u32 %v285_v17, %v2326_v23  ;;  %v311_v31 = vor.u32 %v309_v20, %v2329_v26  ;;  %v2352_v40 = vpack.c.b16 %v237_v34, %v237_v34  ;;  %v269_v46 = vshrl.u32 %v2304_v8, 16  ;;  %989 = vmatpush.bf16.msrb.mxu0 %v2194_v41  ;;  %v2206_v19 = vld [vmem:[%s2930_s1 + $0x68] sm:$0xff]  ;;  %v2208_v20 = vld [vmem:[%s2930_s1 + $0x78] sm:$0xff] }
  0x16   : > { %v268_v32 = vsel %vm248_vm0, %v263_v28, %v267_v22  ;;  %v273_v48 = vshll.u32 %v2343_v37, 16  ;;  %v293_v49 = vshrl.u32 %v2310_v10, 16  ;;  %v297_v50 = vshll.u32 %v2346_v38, 16 }
  0x17   : > { %v292_v33 = vsel %vm248_vm0, %v287_v29, %v291_v25  ;;  %1931 = vmatmul.msk.bf16.vlgmr.msra.gmra.mxu1 %vm337_vm1, %v268_v32  ;;  %v316_v36 = vsel %vm248_vm0, %v311_v31, %v315_v30  ;;  %v254_v51 = vrot.slane %v252_v43, 1  ;;  %v317_v52 = vshrl.u32 %v2316_v12, 16  ;;  %v2405_v32 = vld [vmem:[%s2292_s27 + $0x18] sm:$0xff] }
  0x18   : > { %578 = vmatpush.bf16.msrb.mxu2 %v2181_v5  ;;  %456 = vmatpush.bf16.msrb.mxu1 %v2177_v6  ;;  %v321_v53 = vshll.u32 %v2352_v40, 16  ;;  %v686_v54 = vunpack.c.l.b16 %v643_v44  ;;  %v687_v55 = vunpack.c.l.b16 %v2361_v45  ;;  %v271_v57 = vor.u32 %v269_v46, %v267_v22  ;;  %v2210_v22 = vld [vmem:[%s2930_s1 + $0x88] sm:$0xff] }
  0x19   : > { %1934 = vmatmul.msk.bf16.vlgmr.msra.gmra.mxu2 %vm337_vm1, %v292_v33  ;;  %1937 = vmatmul.msk.bf16.vlgmr.msra.gmra.mxu3 %vm337_vm1, %v316_v36  ;;  %v255_v56 = vor.u32 %v254_v51, %v250_v42  ;;  %v275_v58 = vrot.slane %v273_v48, 1  ;;  %v295_v59 = vor.u32 %v293_v49, %v291_v25  ;;  %v299_v61 = vrot.slane %v297_v50, 1  ;;  %v2216_v48 = vld [vmem:[%s2292_s27] sm:$0xe] }
  0x1a   : > { %780 = vmatpush.bf16.msrb.mxu3 %v2191_v39  ;;  %990 = vmatpush.bf16.msrb.mxu0 %v2193_v47  ;;  %v319_v62 = vor.u32 %v317_v52, %v315_v30  ;;  %v323_v63 = vrot.slane %v321_v53, 1  ;;  %v705_v1 = vpack.c.b16 %v687_v55, %v686_v54  ;;  %v864_v4 = vshrl.u32 %v2376_v0, 16  ;;  %v2215_v47 = vld [vmem:[%s2292_s27] sm:$0xf0] }
  0x1b   : > { %v260_v60 = vsel %vm248_vm0, %v255_v56, %v259_v21  ;;  %v867_v5 = vshll.u32 %v2376_v0, 16  ;;  %v276_v6 = vsel %vm248_vm0, %v271_v57, %v275_v58  ;;  %v300_v13 = vsel %vm248_vm0, %v295_v59, %v299_v61  ;;  %v2196_v21 = vld [vmem:[%s2930_s1 + $0x58] sm:$0xff] }
  0x1c   : > { %1930 = vmatmul.msk.bf16.vlgmr.msra.gmra.mxu0 %vm337_vm1, %v260_v60  ;;  %v856_v2 = vshrl.u32 %v705_v1, 16  ;;  %v859_v3 = vshll.u32 %v705_v1, 16  ;;  %v324_v14 = vsel %vm248_vm0, %v319_v62, %v323_v63  ;;  %v866_v17 = vrot.slane %v864_v4, 1  ;;  %1331 = vmatpush.bf16.msra.mxu2 %v2206_v19 }
  0x1d   : > { %v869_v18 = vrot.slane %v867_v5, 2  ;;  %1129 = vmatpush.bf16.msra.mxu1 %v2196_v21  ;;  %v277_v27 = vshrl.u32 %v2343_v37, 16  ;;  %v301_v28 = vshrl.u32 %v2346_v38, 16  ;;  %v715_v33 = vrot.slane %v705_v1, 1  ;;  %v2439_v1 = vld [vmem:[%s2292_s27 + $0x28] sm:$0xff] }
  0x1e   : > { %v858_v15 = vrot.slane %v856_v2, 1  ;;  %v861_v16 = vrot.slane %v859_v3, 2  ;;  %1541 = vmatpush.bf16.msra.mxu3 %v2208_v20  ;;  %1681 = vmatpush.bf16.msra.mxu0 %v2210_v22  ;;  %v716_v34 = vrot.slane %v2376_v0, 1  ;;  %v873_v36 = vshrl.u32 %v2405_v32, 16 }
  0x1f   : > { %v870_v25 = vor.u32 %v869_v18, %v866_v17  ;;  %v279_v30 = vor.u32 %v277_v27, %v275_v58  ;;  %v303_v31 = vor.u32 %v301_v28, %v299_v61  ;;  %v876_v39 = vshll.u32 %v2405_v32, 16  ;;  %v2454_v17 = vld [vmem:[%s2292_s27 + $0x30] sm:$0xff] }
  0x20   : > { %v862_v24 = vor.u32 %v861_v16, %v858_v15  ;;  %v717_v43 = vsel %vm512_vm3, %v715_v33, %v716_v34  ;;  %v875_v44 = vrot.slane %v873_v36, 1  ;;  %v2217_v50 = vor.u32 %v2216_v48, %v2215_v47  ;;  %v2207_v27 = vld [vmem:[%s2930_s1 + $0x70] sm:$0xff] }
  0x21   : > { %v284_v41 = vsel %vm248_vm0, %v279_v30, %v2326_v23  ;;  %v308_v42 = vsel %vm248_vm0, %v303_v31, %v2329_v26  ;;  %v878_v46 = vrot.slane %v876_v39, 2  ;;  %v514_v52 = vrot.slane %v2301_v7, 1  ;;  %v2424_v26 = vld [vmem:[%s2292_s27 + $0x20] sm:$0xff]  ;;  %v2195_v28 = vld [vmem:[%s2930_s1 + $0x50] sm:$0xff]  ;;  %v2478_v31 = vld [vmem:[%s2292_s27 + $0x38] sm:$0xff] }
  0x22   : > { %v871_v29 = vsel %vm854_vm2, %v862_v24, %v870_v25  ;;  %v513_v51 = vrot.slane %v2217_v50, 1  ;;  %v718_v53 = vrot.slane %v2405_v32, 1  ;;  %v882_v54 = vshrl.u32 %v2424_v26, 16  ;;  %1542 = vmatpush.bf16.msra.mxu3 %v2207_v27  ;;  %1130 = vmatpush.bf16.msra.mxu1 %v2195_v28 }
  0x23   : > { %v879_v49 = vor.u32 %v878_v46, %v875_v44  ;;  %v885_v56 = vshll.u32 %v2424_v26, 16  ;;  %v516_v63 = vrot.slane %v2304_v8, 1  ;;  %v720_v2 = vrot.slane %v2424_v26, 1  ;;  %v2209_v44 = vld [vmem:[%s2930_s1 + $0x80] sm:$0xff] }
  0x24   : > { %v515_v57 = vsel %vm512_vm3, %v513_v51, %v514_v52  ;;  %v719_v58 = vsel %vm512_vm3, %v716_v34, %v718_v53  ;;  %v884_v59 = vrot.slane %v882_v54, 1  ;;  %v891_v3 = vshrl.u32 %v2439_v1, 16  ;;  %1682 = vmatpush.bf16.msra.mxu0 %v2209_v44 }
  0x25   : > { %v880_v23 = vsel %vm854_vm2, %v870_v25, %v879_v49  ;;  %v887_v60 = vrot.slane %v885_v56, 2  ;;  %v517_v4 = vsel %vm512_vm3, %v514_v52, %v516_v63  ;;  %v721_v5 = vsel %vm512_vm3, %v718_v53, %v720_v2  ;;  %v2205_v25 = vld [vmem:[%s2930_s1 + $0x60] sm:$0xff] }
  0x26   : > { %v518_v16 = vrot.slane %v2343_v37, 1  ;;  %v722_v18 = vrot.slane %v2439_v1, 1  ;;  %v900_v19 = vshrl.u32 %v2454_v17, 16  ;;  %v903_v20 = vshll.u32 %v2454_v17, 16  ;;  %1332 = vmatpush.bf16.msra.mxu2 %v2205_v25 }
  0x27   : > { %1932 = vmatmul.msk.bf16.gmra.mxu1 %vm337_vm1, %v276_v6  ;;  %v888_v61 = vor.u32 %v887_v60, %v884_v59  ;;  %v893_v6 = vrot.slane %v891_v3, 1  ;;  %v520_v30 = vrot.slane %v2307_v9, 1  ;;  %v724_v33 = vrot.slane %v2454_v17, 1  ;;  %v2511_v59 = vld [vmem:[%s2292_s27 + $0x48] sm:$0xff] }
  0x28   : > { %v723_v21 = vsel %vm512_vm3, %v720_v2, %v722_v18  ;;  %v902_v22 = vrot.slane %v900_v19, 1  ;;  %v905_v24 = vrot.slane %v903_v20, 2  ;;  %v909_v34 = vshrl.u32 %v2478_v31, 16 }
  0x29   : > { %1935 = vmatmul.msk.bf16.gmra.mxu2 %vm337_vm1, %v300_v13  ;;  %1938 = vmatmul.msk.bf16.gmra.mxu3 %vm337_vm1, %v324_v14  ;;  %v889_v62 = vsel %vm854_vm2, %v879_v49, %v888_v61  ;;  %v912_v36 = vshll.u32 %v2478_v31, 16  ;;  %v521_v39 = vsel %vm512_vm3, %v518_v16, %v520_v30  ;;  %v522_v48 = vrot.slane %v2310_v10, 1  ;;  %v2496_v49 = vld [vmem:[%s2292_s27 + $0x40] sm:$0xff] }
  0x2a   : > { %v918_v50 = vshrl.u32 %v2496_v49, 16  ;;  %v728_v60 = vrot.slane %v2496_v49, 1  ;;  %v730_v20 = vrot.slane %v2511_v59, 1 }
  0x2b   : > { %v523_v51 = vsel %vm512_vm3, %v520_v30, %v522_v48 }
  0x2c   : > { %2042 = vmatmul.msk.bf16.vlgmr.msrb.gmra.mxu0 %vm337_vm1, %v871_v29  ;;  %v906_v29 = vor.u32 %v905_v24, %v902_v22  ;;  %v920_v53 = vrot.slane %v918_v50, 1  ;;  %v731_v28 = vsel %vm512_vm3, %v728_v60, %v730_v20 }
  0x37   : > { %1933 = vmatmul.msk.bf16.gmra.mxu1 %vm337_vm1, %v284_v41  ;;  %v725_v41 = vsel %vm512_vm3, %v722_v18, %v724_v33 }
  0x39   : > { %1936 = vmatmul.msk.bf16.gmra.mxu2 %vm337_vm1, %v308_v42  ;;  %2021 = vmatmul.msk.bf16.vlgmr.msrb.gmra.mxu3 %vm337_vm1, %v717_v43  ;;  %v911_v42 = vrot.slane %v909_v34, 1  ;;  %v914_v43 = vrot.slane %v912_v36, 2 }
  0x3b   : > { %v915_v46 = vor.u32 %v914_v43, %v911_v42 }
  0x3c   : > { %2043 = vmatmul.msk.bf16.gmra.mxu0 %vm337_vm1, %v880_v23  ;;  %v921_v23 = vshll.u32 %v2496_v49, 16 }
  0x3d   : > { %v916_v47 = vsel %vm854_vm2, %v906_v29, %v915_v46 }
  0x3e   : > { %v923_v54 = vrot.slane %v921_v23, 2 }
  0x40   : > { %v924_v56 = vor.u32 %v923_v54, %v920_v53 }
  0x47   : > { %1947 = vmatmul.msk.bf16.vlgmr.msrb.gmra.mxu1 %vm337_vm1, %v2337_v35  ;;  %v894_v35 = vshll.u32 %v2439_v1, 16 }
  0x49   : > { %1968 = vmatmul.msk.bf16.vlgmr.msrb.gmra.mxu2 %vm337_vm1, %v515_v57  ;;  %2022 = vmatmul.msk.bf16.gmra.mxu3 %vm337_vm1, %v719_v58  ;;  %v896_v13 = vrot.slane %v894_v35, 2  ;;  %v925_v57 = vsel %vm854_vm2, %v915_v46, %v924_v56  ;;  %v524_v58 = vrot.slane %v2346_v38, 1 }
  0x4b   : > { %v897_v14 = vor.u32 %v896_v13, %v893_v6 }
  0x4c   : > { %2044 = vmatmul.msk.bf16.gmra.mxu0 %vm337_vm1, %v889_v62 }
  0x4d   : > { %v898_v15 = vsel %vm854_vm2, %v888_v61, %v897_v14  ;;  %v927_v61 = vshrl.u32 %v2511_v59, 16 }
  0x4f   : > { %v929_v3 = vrot.slane %v927_v61, 1 }
  0x57   : > { %1948 = vmatmul.msk.bf16.gmra.mxu1 %vm337_vm1, %v2301_v7  ;;  %v519_v7 = vsel %vm512_vm3, %v516_v63, %v518_v16  ;;  %v525_v63 = vsel %vm512_vm3, %v522_v48, %v524_v58  ;;  %v845_v16 = vld [vmem:[%s2292_s27 + $0x50] sm:$0x3]  ;;  %v528_v48 = vrot.slane %v2316_v12, 1 }
  0x58   : > { %v852_v18 = vunpack.c.l.b16 %v845_v16 }
  0x59   : > { %1969 = vmatmul.msk.bf16.gmra.mxu2 %vm337_vm1, %v517_v4  ;;  %2023 = vmatmul.msk.bf16.gmra.mxu3 %vm337_vm1, %v721_v5 }
  0x5a   : > { %v2536_v19 = vpack.c.b16 %v852_v18, %v852_v18 }
  0x5c   : > { %2045 = vmatmul.msk.bf16.gmra.mxu0 %vm337_vm1, %v898_v15  ;;  %v939_v22 = vshll.u32 %v2536_v19, 16 }
  0x5e   : > { %v941_v30 = vrot.slane %v939_v22, 2 }
  0x67   : > { %1949 = vmatmul.msk.bf16.gmra.mxu1 %vm337_vm1, %v2304_v8  ;;  %v907_v8 = vsel %vm854_vm2, %v897_v14, %v906_v29 }
  0x69   : > { %1970 = vmatmul.msk.bf16.gmra.mxu2 %vm337_vm1, %v519_v7  ;;  %2024 = vmatmul.msk.bf16.gmra.mxu3 %vm337_vm1, %v723_v21  ;;  %v936_v21 = vshrl.u32 %v2536_v19, 16 }
  0x6c   : > { %2046 = vmatmul.msk.bf16.gmra.mxu0 %vm337_vm1, %v907_v8  ;;  %v938_v8 = vrot.slane %v936_v21, 1 }
  0x6e   : > { %v942_v36 = vor.u32 %v941_v30, %v938_v8  ;;  %v530_v30 = vrot.slane %v2352_v40, 1 }
  0x77   : > { %1950 = vmatmul.msk.bf16.gmra.mxu1 %vm337_vm1, %v2343_v37  ;;  %v726_v37 = vrot.slane %v2478_v31, 1 }
  0x79   : > { %1971 = vmatmul.msk.bf16.gmra.mxu2 %vm337_vm1, %v521_v39  ;;  %2025 = vmatmul.msk.bf16.gmra.mxu3 %vm337_vm1, %v725_v41  ;;  %v727_v52 = vsel %vm512_vm3, %v724_v33, %v726_v37  ;;  %v729_v2 = vsel %vm512_vm3, %v726_v37, %v728_v60  ;;  %v661_v33 = vld [vmem:[%s2292_s27 + $0x50] sm:$0x1] }
  0x7a   : > { %v704_v34 = vunpack.c.l.b16 %v661_v33 }
  0x7c   : > { %2047 = vmatmul.msk.bf16.gmra.mxu0 %vm337_vm1, %v916_v47  ;;  %v714_v43 = vpack.c.b16 %v704_v34, %v704_v34  ;;  %v1195_v47 = vld [vmem:[%s2292_s27 + $0x10] sm:$0xc] }
  0x7d   : > { %v1238_v37 = vunpack.c.l.b16 %v1195_v47  ;;  %v531_v47 = vsel %vm512_vm3, %v528_v48, %v530_v30 }
  0x7e   : > { %v732_v23 = vrot.slane %v714_v43, 1 }
  0x80   : > { %v733_v60 = vsel %vm512_vm3, %v730_v20, %v732_v23  ;;  %v1055_v23 = vld [vmem:[%s2292_s27 + $0x8] sm:$0xc] }
  0x81   : > { %v1062_v40 = vunpack.c.l.b16 %v1055_v23 }
  0x87   : > { %1951 = vmatmul.msk.bf16.gmra.mxu1 %vm337_vm1, %v2307_v9  ;;  %v930_v9 = vshll.u32 %v2511_v59, 16 }
  0x89   : > { %1972 = vmatmul.msk.bf16.gmra.mxu2 %vm337_vm1, %v523_v51  ;;  %2026 = vmatmul.msk.bf16.gmra.mxu3 %vm337_vm1, %v727_v52  ;;  %v932_v35 = vrot.slane %v930_v9, 2  ;;  %v1607_v51 = vld [vmem:[%s2292_s27 + $0x10] sm:$0x8]  ;;  %v2583_v9 = vld [vmem:[%s2292_s27 + $0x18] sm:$0xff] }
  0x8a   : > { %v1614_v53 = vunpack.c.l.b16 %v1607_v51  ;;  %v1618_v16 = vrot.slane %v2583_v9, 3  ;;  %v1268_v45 = vrot.slane %v2583_v9, 2 }
  0x8b   : > { %v933_v4 = vor.u32 %v932_v35, %v929_v3  ;;  %v1416_v35 = vshrl.u32 %v2583_v9, 16 }
  0x8c   : > { %2048 = vmatmul.msk.bf16.gmra.mxu0 %vm337_vm1, %v925_v57 }
  0x8d   : > { %v934_v15 = vsel %vm854_vm2, %v924_v56, %v933_v4  ;;  %v943_v46 = vsel %vm854_vm2, %v933_v4, %v942_v36  ;;  %v1419_v4 = vshll.u32 %v2583_v9, 16  ;;  %v1418_v22 = vrot.slane %v1416_v35, 2 }
  0x94   : > { %v2516_v62 = vpop.f32.mrf.mxu1 }
  0x97   : > { %1952 = vmatmul.msk.bf16.gmra.mxu1 %vm337_vm1, %v2310_v10  ;;  %v526_v10 = vrot.slane %v2313_v11, 1 }
  0x99   : > { %1973 = vmatmul.msk.bf16.gmra.mxu2 %vm337_vm1, %v525_v63  ;;  %2027 = vmatmul.msk.bf16.gmra.mxu3 %vm337_vm1, %v729_v2  ;;  %v2530_v14 = vpop.f32.mrf.mxu0  ;;  %v527_v27 = vsel %vm512_vm3, %v524_v58, %v526_v10  ;;  %v529_v57 = vsel %vm512_vm3, %v526_v10, %v528_v48 }
  0x9c   : > { %v2524_v5 = vpop.f32.mrf.mxu2  ;;  %v2526_v6 = vpop.f32.mrf.mxu3  ;;  %2049 = vmatmul.msk.bf16.gmra.mxu0 %vm337_vm1, %v934_v15 }
  0x9d   : > { %v2528_v13 = vpop.f32.mrf.mxu1 }
  0xa1   : > { %v2549_v29 = vpop.f32.mrf.mxu0 }
  0xa4   : > { %v2539_v7 = vpop.f32.mrf.mxu2  ;;  %v2543_v24 = vpop.f32.mrf.mxu3 }
  0xa5   : > { %v2545_v25 = vpop.f32.mrf.mxu1 }
  0xa7   : > { %1953 = vmatmul.msk.bf16.gmra.mxu1 %vm337_vm1, %v2346_v38  ;;  %v1196_v38 = vld [vmem:[%s2292_s27 + $0x14] sm:$0xf] }
  0xa8   : > { %v1239_v50 = vunpack.c.l.b16 %v1196_v38  ;;  %v2607_v38 = vld [vmem:[%s2292_s27 + $0x20] sm:$0xff] }
  0xa9   : > { %1974 = vmatmul.msk.bf16.gmra.mxu2 %vm337_vm1, %v527_v27  ;;  %2028 = vmatmul.msk.bf16.gmra.mxu3 %vm337_vm1, %v731_v28  ;;  %v2562_v44 = vpop.f32.mrf.mxu0  ;;  %v1421_v27 = vrot.slane %v1419_v4, 3  ;;  %v1428_v48 = vshll.u32 %v2607_v38, 16 }
  0xaa   : > { %v2577_v58 = vpack.c.b16 %v1239_v50, %v1238_v37  ;;  %v1615_v63 = vpack.c.b16 %v1239_v50, %v1614_v53  ;;  %v1425_v53 = vshrl.u32 %v2607_v38, 16 }
  0xab   : > { %v1422_v34 = vor.u32 %v1421_v27, %v1418_v22 }
  0xac   : > { %v2556_v39 = vpop.f32.mrf.mxu2  ;;  %v2558_v41 = vpop.f32.mrf.mxu3  ;;  %2050 = vmatmul.msk.bf16.gmra.mxu0 %vm337_vm1, %v943_v46  ;;  %v1408_v2 = vshrl.u32 %v2577_v58, 16  ;;  %v1411_v3 = vshll.u32 %v2577_v58, 16  ;;  %v1617_v15 = vrot.slane %v1615_v63, 3  ;;  %v1427_v35 = vrot.slane %v1425_v53, 2 }
  0xad   : > { %v2560_v42 = vpop.f32.mrf.mxu1  ;;  %v1267_v30 = vrot.slane %v2577_v58, 2 }
  0xae   : > { %v1410_v20 = vrot.slane %v1408_v2, 2  ;;  %v1413_v21 = vrot.slane %v1411_v3, 3  ;;  %v1619_v8 = vsel %vm1616_vm4, %v1617_v15, %v1618_v16  ;;  %v1063_v3 = vpack.c.b16 %v687_v55, %v1062_v40 }
  0xaf   : > { %v1430_v15 = vrot.slane %v1428_v48, 3 }
  0xb0   : > { %v1414_v33 = vor.u32 %v1413_v21, %v1410_v20  ;;  %v1065_v27 = vrot.slane %v1063_v3, 2 }
  0xb1   : > { %v2580_v61 = vpop.f32.mrf.mxu0  ;;  %v1431_v55 = vor.u32 %v1430_v15, %v1427_v35  ;;  %v1270_v15 = vrot.slane %v2607_v38, 2 }
  0xb2   : > { %v1423_v50 = vsel %vm1406_vm5, %v1414_v33, %v1422_v34 }
  0xb3   : > { %v1432_v58 = vsel %vm1406_vm5, %v1422_v34, %v1431_v55 }
  0xb4   : > { %v2570_v52 = vpop.f32.mrf.mxu2  ;;  %v2572_v54 = vpop.f32.mrf.mxu3 }
  0xb5   : > { %v2574_v56 = vpop.f32.mrf.mxu1 }
  0xb7   : > { %1954 = vmatmul.msk.bf16.gmra.mxu1 %vm337_vm1, %v2313_v11 }
  0xb9   : > { %1975 = vmatmul.msk.bf16.gmra.mxu2 %vm337_vm1, %v529_v57  ;;  %2029 = vmatmul.msk.bf16.gmra.mxu3 %vm337_vm1, %v733_v60  ;;  %v2598_v28 = vpop.f32.mrf.mxu0  ;;  %v1620_v57 = vrot.slane %v2607_v38, 3 }
  0xbb   : > { %v1621_v21 = vsel %vm1616_vm4, %v1618_v16, %v1620_v57 }
  0xbc   : > { %v2594_v18 = vpop.f32.mrf.mxu2  ;;  %v782_v10 = vpop.f32.mrf.mxu3  ;;  %2158 = vmatmul.msk.bf16.vlgmr.msra.gmra.mxu0 %vm337_vm1, %v1619_v8  ;;  %v1066_v8 = vrot.slane %v2376_v0, 2 }
  0xbd   : > { %v2596_v11 = vpop.f32.mrf.mxu1 }
  0xbe   : > { %v1067_v16 = vsel %vm1064_vm6, %v1065_v27, %v1066_v8 }
  0xc1   : > { %v2612_v51 = vpop.f32.mrf.mxu0 }
  0xc4   : > { %v2603_v36 = vpop.f32.mrf.mxu2  ;;  %v784_v43 = vpop.f32.mrf.mxu3 }
  0xc5   : > { %v458_v46 = vpop.f32.mrf.mxu1 }
  0xc6   : > { %v459_v37 = vadd.f32 %v458_v46, %v2530_v14 }
  0xc7   : > { %1955 = vmatmul.msk.bf16.gmra.mxu1 %vm337_vm1, %v2316_v12 }
  0xc9   : > { %1976 = vmatmul.msk.bf16.gmra.mxu2 %vm337_vm1, %v531_v47  ;;  %2137 = vmatmul.msk.bf16.vlgmr.msra.gmra.mxu3 %vm337_vm1, %v1423_v50  ;;  %v2624_v20 = vpop.f32.mrf.mxu0  ;;  %v2637_v47 = vld [vmem:[%s2292_s27 + $0x28] sm:$0xff] }
  0xca   : > { %v1434_v23 = vshrl.u32 %v2637_v47, 16  ;;  %v1437_v40 = vshll.u32 %v2637_v47, 16 }
  0xcc   : > { %v580_v14 = vpop.f32.mrf.mxu2  ;;  %v787_v63 = vpop.f32.mrf.mxu3  ;;  %2159 = vmatmul.msk.bf16.gmra.mxu0 %vm337_vm1, %v1621_v21  ;;  %v1439_v3 = vrot.slane %v1437_v40, 3 }
  0xcd   : > { %v625_v60 = vadd.f32 %v580_v14, %v459_v37  ;;  %v460_v2 = vpop.f32.mrf.mxu1  ;;  %v1436_v14 = vrot.slane %v1434_v23, 2 }
  0xce   : > { %v461_v4 = vadd.f32 %v460_v2, %v2549_v29 }
  0xcf   : > { %v827_v12 = vadd.f32 %v782_v10, %v625_v60  ;;  %v1440_v21 = vor.u32 %v1439_v3, %v1436_v14  ;;  %v1272_v14 = vrot.slane %v2637_v47, 2 }
  0xd1   : > { %v2628_v22 = vadd.f32 %v2562_v44, %v827_v12  ;;  %v1269_v44 = vsel %vm1064_vm6, %v1267_v30, %v1268_v45  ;;  %v2641_v9 = vpop.f32.mrf.mxu0 }
  0xd4   : > { %v582_v29 = vpop.f32.mrf.mxu2  ;;  %v789_v33 = vpop.f32.mrf.mxu3 }
  0xd5   : > { %v626_v10 = vadd.f32 %v582_v29, %v461_v4  ;;  %v463_v46 = vpop.f32.mrf.mxu1  ;;  %v1068_v4 = vrot.slane %v2405_v32, 2  ;;  %v1441_v32 = vsel %vm1406_vm5, %v1431_v55, %v1440_v21 }
  0xd6   : > { %v464_v0 = vadd.f32 %v463_v46, %v2516_v62  ;;  %v2665_v46 = vld [vmem:[%s2292_s27 + $0x30] sm:$0xff] }
  0xd7   : > { %v828_v37 = vadd.f32 %v784_v43, %v626_v10  ;;  %2063 = vmatmul.msk.bf16.vlgmr.msra.gmra.mxu1 %vm337_vm1, %v1067_v16  ;;  %v1622_v43 = vrot.slane %v2637_v47, 3  ;;  %v1271_v10 = vsel %vm1064_vm6, %v1268_v45, %v1270_v15  ;;  %v1446_v45 = vshll.u32 %v2665_v46, 16 }
  0xd9   : > { %2116 = vmatmul.msk.bf16.vlgmr.msra.gmra.mxu2 %vm337_vm1, %v1269_v44  ;;  %v2646_v50 = vadd.f32 %v2580_v61, %v828_v37  ;;  %2138 = vmatmul.msk.bf16.gmra.mxu3 %vm337_vm1, %v1432_v58  ;;  %v2653_v61 = vpop.f32.mrf.mxu0  ;;  %v1623_v35 = vsel %vm1616_vm4, %v1620_v57, %v1622_v43  ;;  %v1448_v40 = vrot.slane %v1446_v45, 3 }
  0xdc   : > { %v585_v62 = vpop.f32.mrf.mxu2  ;;  %v792_v34 = vpop.f32.mrf.mxu3  ;;  %2160 = vmatmul.msk.bf16.gmra.mxu0 %vm337_vm1, %v1623_v35 }
  0xdd   : > { %v627_v53 = vadd.f32 %v585_v62, %v464_v0  ;;  %v465_v48 = vpop.f32.mrf.mxu1 }
  0xde   : > { %v466_v2 = vadd.f32 %v465_v48, %v2528_v13  ;;  %v1069_v13 = vsel %vm1064_vm6, %v1066_v8, %v1068_v4  ;;  %v1443_v8 = vshrl.u32 %v2665_v46, 16  ;;  %v1070_v48 = vrot.slane %v2424_v26, 2 }
  0xdf   : > { %v829_v60 = vadd.f32 %v787_v63, %v627_v53 }
  0xe0   : > { %v1445_v0 = vrot.slane %v1443_v8, 2 }
  0xe1   : > { %v2657_v12 = vadd.f32 %v2598_v28, %v829_v60  ;;  %v2669_v16 = vpop.f32.mrf.mxu0 }
  0xe2   : > { %v1449_v60 = vor.u32 %v1448_v40, %v1445_v0 }
  0xe4   : > { %v587_v27 = vpop.f32.mrf.mxu2  ;;  %v794_v30 = vpop.f32.mrf.mxu3  ;;  %v1450_v26 = vsel %vm1406_vm5, %v1440_v21, %v1449_v60 }
  0xe5   : > { %v628_v63 = vadd.f32 %v587_v27, %v466_v2  ;;  %v468_v29 = vpop.f32.mrf.mxu1  ;;  %v1273_v27 = vsel %vm1064_vm6, %v1270_v15, %v1272_v14 }
  0xe6   : > { %v469_v28 = vadd.f32 %v468_v29, %v2545_v25 }
  0xe7   : > { %v830_v57 = vadd.f32 %v789_v33, %v628_v63  ;;  %2064 = vmatmul.msk.bf16.gmra.mxu1 %vm337_vm1, %v1069_v13  ;;  %v1624_v33 = vrot.slane %v2665_v46, 3  ;;  %v2693_v63 = vld [vmem:[%s2292_s27 + $0x38] sm:$0xff] }
  0xe8   : > { %v1455_v15 = vshll.u32 %v2693_v63, 16 }
  0xe9   : > { %2117 = vmatmul.msk.bf16.gmra.mxu2 %vm337_vm1, %v1271_v10  ;;  %v2674_v38 = vadd.f32 %v2612_v51, %v830_v57  ;;  %2139 = vmatmul.msk.bf16.gmra.mxu3 %vm337_vm1, %v1441_v32  ;;  %v2681_v51 = vpop.f32.mrf.mxu0  ;;  %v1625_v62 = vsel %vm1616_vm4, %v1622_v43, %v1624_v33 }
  0xea   : > { %v1457_v8 = vrot.slane %v1455_v15, 3  ;;  %v1074_v15 = vrot.slane %v2454_v17, 2  ;;  %v2752_v17 = vld [vmem:[%s2292_s27 + $0x48] sm:$0xff] }
  0xec   : > { %v590_v25 = vpop.f32.mrf.mxu2  ;;  %v797_v55 = vpop.f32.mrf.mxu3  ;;  %2161 = vmatmul.msk.bf16.gmra.mxu0 %vm337_vm1, %v1625_v62 }
  0xed   : > { %v629_v44 = vadd.f32 %v590_v25, %v469_v28  ;;  %v470_v37 = vpop.f32.mrf.mxu1 }
  0xee   : > { %v471_v23 = vadd.f32 %v470_v37, %v2560_v42  ;;  %v1071_v42 = vsel %vm1064_vm6, %v1068_v4, %v1070_v48  ;;  %v1452_v4 = vshrl.u32 %v2693_v63, 16  ;;  %v1274_v37 = vrot.slane %v2665_v46, 2 }
  0xef   : > { %v831_v58 = vadd.f32 %v792_v34, %v629_v44  ;;  %v1072_v44 = vrot.slane %v2439_v1, 2 }
  0xf0   : > { %v1454_v57 = vrot.slane %v1452_v4, 2  ;;  %v1275_v62 = vsel %vm1064_vm6, %v1272_v14, %v1274_v37 }
  0xf1   : > { %v2685_v53 = vadd.f32 %v2624_v20, %v831_v58  ;;  %v2697_v29 = vpop.f32.mrf.mxu0  ;;  %v1073_v40 = vsel %vm1064_vm6, %v1070_v48, %v1072_v44 }
  0xf2   : > { %v1458_v0 = vor.u32 %v1457_v8, %v1454_v57  ;;  %v1075_v8 = vsel %vm1064_vm6, %v1072_v44, %v1074_v15  ;;  %v1470_v44 = vshrl.u32 %v2752_v17, 16 }
  0xf4   : > { %v592_v2 = vpop.f32.mrf.mxu2  ;;  %v799_v3 = vpop.f32.mrf.mxu3 }
  0xf5   : > { %v630_v34 = vadd.f32 %v592_v2, %v471_v23  ;;  %v473_v35 = vpop.f32.mrf.mxu1 }
  0xf6   : > { %v474_v20 = vadd.f32 %v473_v35, %v2574_v56 }
  0xf7   : > { %v832_v43 = vadd.f32 %v794_v30, %v630_v34  ;;  %2065 = vmatmul.msk.bf16.gmra.mxu1 %vm337_vm1, %v1071_v42  ;;  %v1626_v30 = vrot.slane %v2693_v63, 3  ;;  %v2724_v34 = vld [vmem:[%s2292_s27 + $0x40] sm:$0xff] }
  0xf8   : > { %v1461_v48 = vshrl.u32 %v2724_v34, 16  ;;  %v1464_v14 = vshll.u32 %v2724_v34, 16 }
  0xf9   : > { %2118 = vmatmul.msk.bf16.gmra.mxu2 %vm337_vm1, %v1273_v27  ;;  %v2702_v47 = vadd.f32 %v2641_v9, %v832_v43  ;;  %2140 = vmatmul.msk.bf16.gmra.mxu3 %vm337_vm1, %v1450_v26  ;;  %v2709_v45 = vpop.f32.mrf.mxu0  ;;  %v1627_v9 = vsel %vm1616_vm4, %v1624_v33, %v1626_v30  ;;  %v1459_v33 = vsel %vm1406_vm5, %v1449_v60, %v1458_v0  ;;  %v1628_v60 = vrot.slane %v2724_v34, 3 }
  0xfa   : > { %v1466_v26 = vrot.slane %v1464_v14, 3  ;;  %v1278_v14 = vrot.slane %v2724_v34, 2 }
  0xfc   : > { %v595_v56 = vpop.f32.mrf.mxu2  ;;  %v802_v21 = vpop.f32.mrf.mxu3  ;;  %2162 = vmatmul.msk.bf16.gmra.mxu0 %vm337_vm1, %v1627_v9 }
  0xfd   : > { %v631_v13 = vadd.f32 %v595_v56, %v474_v20  ;;  %v475_v10 = vpop.f32.mrf.mxu1  ;;  %v1463_v20 = vrot.slane %v1461_v48, 2  ;;  %v1276_v56 = vrot.slane %v2693_v63, 2  ;;  %v1076_v48 = vrot.slane %v2478_v31, 2  ;;  %v2780_v31 = vld [vmem:[%s2292_s27 + $0x50] sm:$0xff] }
  0xfe   : > { %v476_v32 = vadd.f32 %v475_v10, %v2596_v11 }
  0xff   : > { %v833_v28 = vadd.f32 %v797_v55, %v631_v13  ;;  %v1467_v10 = vor.u32 %v1466_v26, %v1463_v20  ;;  %v1077_v26 = vsel %vm1064_vm6, %v1074_v15, %v1076_v48  ;;  %v1479_v15 = vshrl.u32 %v2780_v31, 16 }
 0x101   : > { %v2713_v25 = vadd.f32 %v2653_v61, %v833_v28  ;;  %v2721_v61 = vpop.f32.mrf.mxu0 }
 0x104   : > { %v597_v58 = vpop.f32.mrf.mxu2  ;;  %v804_v23 = vpop.f32.mrf.mxu3 }
 0x105   : > { %v632_v55 = vadd.f32 %v597_v58, %v476_v32  ;;  %v478_v11 = vpop.f32.mrf.mxu1 }
 0x106   : > { %v479_v46 = vadd.f32 %v478_v11, %v2524_v5 }
 0x107   : > { %v834_v2 = vadd.f32 %v799_v3, %v632_v55  ;;  %2066 = vmatmul.msk.bf16.gmra.mxu1 %vm337_vm1, %v1073_v40 }
 0x109   : > { %2119 = vmatmul.msk.bf16.gmra.mxu2 %vm337_vm1, %v1275_v62  ;;  %v2729_v1 = vadd.f32 %v2669_v16, %v834_v2  ;;  %2141 = vmatmul.msk.bf16.gmra.mxu3 %vm337_vm1, %v1459_v33  ;;  %v2736_v4 = vpop.f32.mrf.mxu0  ;;  %v1629_v16 = vsel %vm1616_vm4, %v1626_v30, %v1628_v60  ;;  %v1277_v30 = vsel %vm1064_vm6, %v1274_v37, %v1276_v56  ;;  %v1473_v37 = vshll.u32 %v2752_v17, 16 }
 0x10a   : > { %v1472_v2 = vrot.slane %v1470_v44, 2  ;;  %v1078_v44 = vrot.slane %v2496_v49, 2 }
 0x10b   : > { %v1475_v33 = vrot.slane %v1473_v37, 3  ;;  %v1280_v37 = vrot.slane %v2752_v17, 2 }
 0x10c   : > { %v600_v3 = vpop.f32.mrf.mxu2  ;;  %v807_v42 = vpop.f32.mrf.mxu3  ;;  %2163 = vmatmul.msk.bf16.gmra.mxu0 %vm337_vm1, %v1629_v16 }
 0x10d   : > { %v633_v35 = vadd.f32 %v600_v3, %v479_v46  ;;  %v480_v27 = vpop.f32.mrf.mxu1 }
 0x10e   : > { %v481_v13 = vadd.f32 %v480_v27, %v2539_v7 }
 0x10f   : > { %v835_v43 = vadd.f32 %v802_v21, %v633_v35  ;;  %v1476_v35 = vor.u32 %v1475_v33, %v1472_v2 }
 0x111   : > { %v2740_v5 = vadd.f32 %v2681_v51, %v835_v43  ;;  %v1468_v51 = vsel %vm1406_vm5, %v1458_v0, %v1467_v10  ;;  %v2749_v58 = vpop.f32.mrf.mxu0  ;;  %v1630_v0 = vrot.slane %v2752_v17, 3 }
 0x114   : > { %v602_v21 = vpop.f32.mrf.mxu2  ;;  %v809_v28 = vpop.f32.mrf.mxu3 }
 0x115   : > { %v634_v57 = vadd.f32 %v602_v21, %v481_v13  ;;  %v483_v32 = vpop.f32.mrf.mxu1 }
 0x116   : > { %v484_v63 = vadd.f32 %v483_v32, %v2556_v39 }
 0x117   : > { %v836_v9 = vadd.f32 %v804_v23, %v634_v57  ;;  %2067 = vmatmul.msk.bf16.gmra.mxu1 %vm337_vm1, %v1075_v8 }
 0x119   : > { %2120 = vmatmul.msk.bf16.gmra.mxu2 %vm337_vm1, %v1277_v30  ;;  %v2757_v7 = vadd.f32 %v2697_v29, %v836_v9  ;;  %2142 = vmatmul.msk.bf16.gmra.mxu3 %vm337_vm1, %v1468_v51  ;;  %v2764_v46 = vpop.f32.mrf.mxu0  ;;  %v1631_v29 = vsel %vm1616_vm4, %v1628_v60, %v1630_v0  ;;  %v1279_v60 = vsel %vm1064_vm6, %v1276_v56, %v1278_v14  ;;  %v1482_v56 = vshll.u32 %v2780_v31, 16 }
 0x11a   : > { %v1481_v30 = vrot.slane %v1479_v15, 2 }
 0x11b   : > { %v1484_v9 = vrot.slane %v1482_v56, 3  ;;  %v1080_v56 = vrot.slane %v2511_v59, 2 }
 0x11c   : > { %v605_v55 = vpop.f32.mrf.mxu2  ;;  %v812_v11 = vpop.f32.mrf.mxu3  ;;  %2164 = vmatmul.msk.bf16.gmra.mxu0 %vm337_vm1, %v1631_v29  ;;  %v1281_v29 = vsel %vm1064_vm6, %v1278_v14, %v1280_v37 }
 0x11d   : > { %v635_v23 = vadd.f32 %v605_v55, %v484_v63  ;;  %v485_v40 = vpop.f32.mrf.mxu1  ;;  %v1397_v63 = vld [vmem:[%s2292_s27 + $0x58] sm:$0x7] }
 0x11e   : > { %v486_v3 = vadd.f32 %v485_v40, %v2570_v52 }
 0x11f   : > { %v837_v62 = vadd.f32 %v807_v42, %v635_v23  ;;  %v1485_v23 = vor.u32 %v1484_v9, %v1481_v30  ;;  %v1081_v9 = vsel %vm1064_vm6, %v1078_v44, %v1080_v56 }
 0x121   : > { %v2768_v39 = vadd.f32 %v2709_v45, %v837_v62  ;;  %v1477_v45 = vsel %vm1406_vm5, %v1467_v10, %v1476_v35  ;;  %v2777_v13 = vpop.f32.mrf.mxu0  ;;  %v1632_v10 = vrot.slane %v2780_v31, 3 }
 0x124   : > { %v607_v42 = vpop.f32.mrf.mxu2  ;;  %v814_v43 = vpop.f32.mrf.mxu3 }
 0x125   : > { %v636_v27 = vadd.f32 %v607_v42, %v486_v3  ;;  %v488_v20 = vpop.f32.mrf.mxu1  ;;  %v1486_v3 = vsel %vm1406_vm5, %v1476_v35, %v1485_v23 }
 0x126   : > { %v489_v34 = vadd.f32 %v488_v20, %v2594_v18 }
 0x127   : > { %v838_v16 = vadd.f32 %v809_v28, %v636_v27  ;;  %2068 = vmatmul.msk.bf16.gmra.mxu1 %vm337_vm1, %v1077_v26 }
 0x129   : > { %2121 = vmatmul.msk.bf16.gmra.mxu2 %vm337_vm1, %v1279_v60  ;;  %v2785_v52 = vadd.f32 %v2721_v61, %v838_v16  ;;  %2143 = vmatmul.msk.bf16.gmra.mxu3 %vm337_vm1, %v1477_v45  ;;  %v2792_v51 = vpop.f32.mrf.mxu0  ;;  %v1633_v61 = vsel %vm1616_vm4, %v1630_v0, %v1632_v10  ;;  %v1079_v0 = vsel %vm1064_vm6, %v1076_v48, %v1078_v44 }
 0x12c   : > { %v610_v21 = vpop.f32.mrf.mxu2  ;;  %v817_v28 = vpop.f32.mrf.mxu3  ;;  %2165 = vmatmul.msk.bf16.gmra.mxu0 %vm337_vm1, %v1633_v61 }
 0x12d   : > { %v637_v57 = vadd.f32 %v610_v21, %v489_v34  ;;  %v490_v32 = vpop.f32.mrf.mxu1 }
 0x12e   : > { %v491_v55 = vadd.f32 %v490_v32, %v2603_v36 }
 0x12f   : > { %v839_v8 = vadd.f32 %v812_v11, %v637_v57  ;;  %v1404_v11 = vunpack.c.l.b16 %v1397_v63  ;;  %v1213_v63 = vld [vmem:[%s2292_s27 + $0x58] sm:$0x3] }
 0x131   : > { %v2797_v18 = vadd.f32 %v2736_v4, %v839_v8  ;;  %v1034_v49 = vpop.f32.mrf.mxu0  ;;  %v1405_v42 = vpack.c.b16 %v1404_v11, %v1404_v11 }
 0x133   : > { %v1488_v27 = vshrl.u32 %v1405_v42, 16  ;;  %v1491_v48 = vshll.u32 %v1405_v42, 16  ;;  %v1634_v20 = vrot.slane %v1405_v42, 3 }
 0x134   : > { %v612_v40 = vpop.f32.mrf.mxu2  ;;  %v819_v2 = vpop.f32.mrf.mxu3 }
 0x135   : > { %v638_v62 = vadd.f32 %v612_v40, %v491_v55  ;;  %v493_v33 = vpop.f32.mrf.mxu1  ;;  %v1490_v16 = vrot.slane %v1488_v27, 2  ;;  %v1493_v45 = vrot.slane %v1491_v48, 3  ;;  %v1635_v15 = vsel %vm1616_vm4, %v1632_v10, %v1634_v20 }
 0x136   : > { %v494_v17 = vadd.f32 %v493_v33, %v2526_v6  ;;  %v1282_v6 = vrot.slane %v2780_v31, 2  ;;  %v1256_v31 = vunpack.c.l.b16 %v1213_v63  ;;  %v1082_v33 = vrot.slane %v2536_v19, 2 }
 0x137   : > { %v840_v4 = vadd.f32 %v814_v43, %v638_v62  ;;  %2069 = vmatmul.msk.bf16.gmra.mxu1 %vm337_vm1, %v1079_v0  ;;  %v1494_v57 = vor.u32 %v1493_v45, %v1490_v16 }
 0x138   : > { %v1283_v10 = vsel %vm1064_vm6, %v1280_v37, %v1282_v6  ;;  %v1266_v62 = vpack.c.b16 %v1256_v31, %v1256_v31 }
 0x139   : > { %2122 = vmatmul.msk.bf16.gmra.mxu2 %vm337_vm1, %v1281_v29  ;;  %v2809_v36 = vadd.f32 %v2749_v58, %v840_v4  ;;  %2144 = vmatmul.msk.bf16.gmra.mxu3 %vm337_vm1, %v1486_v3  ;;  %v1684_v34 = vpop.f32.mrf.mxu0 }
 0x13a   : > { %v1284_v0 = vrot.slane %v1266_v62, 2 }
 0x13c   : > { %v615_v14 = vpop.f32.mrf.mxu2  ;;  %v822_v26 = vpop.f32.mrf.mxu3  ;;  %2166 = vmatmul.msk.bf16.gmra.mxu0 %vm337_vm1, %v1635_v15  ;;  %v1285_v27 = vsel %vm1064_vm6, %v1282_v6, %v1284_v0 }
 0x13d   : > { %v639_v43 = vadd.f32 %v615_v14, %v494_v17  ;;  %v495_v35 = vpop.f32.mrf.mxu1 }
 0x13e   : > { %v496_v21 = vadd.f32 %v495_v35, %v2543_v24 }
 0x13f   : > { %v841_v60 = vadd.f32 %v817_v28, %v639_v43 }
 0x141   : > { %v2815_v58 = vadd.f32 %v2764_v46, %v841_v60  ;;  %v1495_v46 = vsel %vm1406_vm5, %v1485_v23, %v1494_v57  ;;  %v1686_v59 = vpop.f32.mrf.mxu0  ;;  %v2847_v60 = vld [vmem:[%s2931_s2] ss:$0 sm:$0xff] }
 0x144   : > { %v617_v32 = vpop.f32.mrf.mxu2  ;;  %v824_v8 = vpop.f32.mrf.mxu3 }
 0x145   : > { %v640_v28 = vadd.f32 %v617_v32, %v496_v21  ;;  %v498_v30 = vpop.f32.mrf.mxu1 }
 0x146   : > { %v499_v55 = vadd.f32 %v498_v30, %v2558_v41  ;;  %v1083_v41 = vsel %vm1064_vm6, %v1080_v56, %v1082_v33 }
 0x147   : > { %v842_v61 = vadd.f32 %v819_v2, %v640_v28  ;;  %2070 = vmatmul.msk.bf16.gmra.mxu1 %vm337_vm1, %v1081_v9 }
 0x149   : > { %2123 = vmatmul.msk.bf16.gmra.mxu2 %vm337_vm1, %v1283_v10  ;;  %v2828_v24 = vadd.f32 %v2777_v13, %v842_v61  ;;  %2145 = vmatmul.msk.bf16.gmra.mxu3 %vm337_vm1, %v1495_v46  ;;  %v1689_v29 = vpop.f32.mrf.mxu0 }
 0x14c   : > { %v620_v44 = vpop.f32.mrf.mxu2  ;;  %v1544_v37 = vpop.f32.mrf.mxu3 }
 0x14d   : > { %v641_v11 = vadd.f32 %v620_v44, %v499_v55  ;;  %v500_v40 = vpop.f32.mrf.mxu1 }
 0x14e   : > { %v501_v13 = vadd.f32 %v500_v40, %v2572_v54 }
 0x14f   : > { %v843_v23 = vadd.f32 %v822_v26, %v641_v11 }
 0x151   : > { %v2833_v2 = vadd.f32 %v2792_v51, %v843_v23  ;;  %v1691_v54 = vpop.f32.mrf.mxu0 }
 0x154   : > { %v622_v4 = vpop.f32.mrf.mxu2  ;;  %v1546_v42 = vpop.f32.mrf.mxu3 }
 0x155   : > { %v642_v3 = vadd.f32 %v622_v4, %v501_v13  ;;  %v1132_v17 = vpop.f32.mrf.mxu1 }
 0x156   : > { %v1177_v19 = vadd.f32 %v1132_v17, %v2628_v22 }
 0x157   : > { %v844_v48 = vadd.f32 %v824_v8, %v642_v3  ;;  %2071 = vmatmul.msk.bf16.gmra.mxu1 %vm337_vm1, %v1083_v41 }
 0x159   : > { %2124 = vmatmul.msk.bf16.gmra.mxu2 %vm337_vm1, %v1285_v27  ;;  %v2841_v51 = vadd.f32 %v1034_v49, %v844_v48  ;;  %v1694_v57 = vpop.f32.mrf.mxu0 }
 0x15c   : > { %v1334_v20 = vpop.f32.mrf.mxu2  ;;  %v1549_v43 = vpop.f32.mrf.mxu3 }
 0x15d   : > { %v1379_v14 = vadd.f32 %v1334_v20, %v1177_v19  ;;  %v1134_v26 = vpop.f32.mrf.mxu1 }
 0x15e   : > { %v1178_v49 = vadd.f32 %v1134_v26, %v2646_v50 }
 0x15f   : > { %v1589_v35 = vadd.f32 %v1544_v37, %v1379_v14 }
 0x161   : > { %v1729_v16 = vadd.f32 %v1684_v34, %v1589_v35  ;;  %v1696_v55 = vpop.f32.mrf.mxu0 }
 0x163   : > { %v1751_v45 = vadd.f32 %v2847_v60, %v1729_v16 }
 0x164   : > { %v1336_v15 = vpop.f32.mrf.mxu2  ;;  %v1551_v6 = vpop.f32.mrf.mxu3 }
 0x165   : > { %v1769_v56 = vmax.f32 %v1751_v45, 0.0  ;;  %v1380_v22 = vadd.f32 %v1336_v15, %v1178_v49  ;;  %v1137_v21 = vpop.f32.mrf.mxu1 }
 0x166   : > { %v1179_v8 = vadd.f32 %v1137_v21, %v2657_v12 }
 0x167   : > { %v1787_v34 = vpack.c.bf16 %v1769_v56, %v1769_v56  ;;  %v1590_v32 = vadd.f32 %v1546_v42, %v1380_v22 }
 0x169   : > { %1806 = vst.msk [vmem:[%s2855_s7] sm:$0xf] %vm1805_vm7, %v1787_v34  ;;  %v1730_v28 = vadd.f32 %v1686_v59, %v1590_v32  ;;  %v1699_v4 = vpop.f32.mrf.mxu0 }
 0x16b   : > { %v1752_v50 = vadd.f32 %v2847_v60, %v1730_v28 }
 0x16c   : > { %v1339_v30 = vpop.f32.mrf.mxu2  ;;  %v1554_v61 = vpop.f32.mrf.mxu3 }
 0x16d   : > { %v1770_v9 = vmax.f32 %v1752_v50, 0.0  ;;  %v1381_v10 = vadd.f32 %v1339_v30, %v1179_v8  ;;  %v1139_v46 = vpop.f32.mrf.mxu1 }
 0x16e   : > { %v1180_v59 = vadd.f32 %v1139_v46, %v2674_v38 }
 0x16f   : > { %v1788_v63 = vpack.c.bf16 %v1770_v9, %v1770_v9  ;;  %v1591_v31 = vadd.f32 %v1549_v43, %v1381_v10 }
 0x171   : > { %1807 = vst.msk [vmem:[%s2855_s7 + $0x4] sm:$0xf] %vm1805_vm7, %v1788_v63  ;;  %v1731_v44 = vadd.f32 %v1689_v29, %v1591_v31  ;;  %v1701_v26 = vpop.f32.mrf.mxu0 }
 0x173   : > { %v1753_v11 = vadd.f32 %v2847_v60, %v1731_v44 }
 0x174   : > { %v1341_v37 = vpop.f32.mrf.mxu2  ;;  %v1556_v12 = vpop.f32.mrf.mxu3 }
 0x175   : > { %v1771_v40 = vmax.f32 %v1753_v11, 0.0  ;;  %v1382_v62 = vadd.f32 %v1341_v37, %v1180_v59  ;;  %v1142_v23 = vpop.f32.mrf.mxu1 }
 0x176   : > { %v1181_v29 = vadd.f32 %v1142_v23, %v2685_v53 }
 0x177   : > { %v1789_v33 = vpack.c.bf16 %v1771_v40, %v1771_v40  ;;  %v1592_v0 = vadd.f32 %v1551_v6, %v1382_v62 }
 0x179   : > { %1808 = vst.msk [vmem:[%s2855_s7 + $0x8] sm:$0xf] %vm1805_vm7, %v1789_v33  ;;  %v1732_v13 = vadd.f32 %v1691_v54, %v1592_v0  ;;  %v1704_v28 = vpop.f32.mrf.mxu0 }
 0x17b   : > { %v1754_v3 = vadd.f32 %v2847_v60, %v1732_v13 }
 0x17c   : > { %v1344_v42 = vpop.f32.mrf.mxu2  ;;  %v1559_v38 = vpop.f32.mrf.mxu3 }
 0x17d   : > { %v1772_v17 = vmax.f32 %v1754_v3, 0.0  ;;  %v1383_v41 = vadd.f32 %v1344_v42, %v1181_v29  ;;  %v1144_v27 = vpop.f32.mrf.mxu1 }
 0x17e   : > { %v1182_v54 = vadd.f32 %v1144_v27, %v2702_v47 }
 0x17f   : > { %v1790_v48 = vpack.c.bf16 %v1772_v17, %v1772_v17  ;;  %v1593_v19 = vadd.f32 %v1554_v61, %v1383_v41 }
 0x181   : > { %1809 = vst.msk [vmem:[%s2855_s7 + $0xc] sm:$0xf] %vm1805_vm7, %v1790_v48  ;;  %v1733_v20 = vadd.f32 %v1694_v57, %v1593_v19  ;;  %v1706_v11 = vpop.f32.mrf.mxu0 }
 0x183   : > { %v1755_v14 = vadd.f32 %v2847_v60, %v1733_v20 }
 0x184   : > { %v1346_v43 = vpop.f32.mrf.mxu2  ;;  %v1561_v53 = vpop.f32.mrf.mxu3 }
 0x185   : > { %v1773_v35 = vmax.f32 %v1755_v14, 0.0  ;;  %v1384_v16 = vadd.f32 %v1346_v43, %v1182_v54  ;;  %v1147_v45 = vpop.f32.mrf.mxu1 }
 0x186   : > { %v1183_v6 = vadd.f32 %v1147_v45, %v2713_v25 }
 0x187   : > { %v1791_v49 = vpack.c.bf16 %v1773_v35, %v1773_v35  ;;  %v1594_v15 = vadd.f32 %v1556_v12, %v1384_v16 }
 0x189   : > { %1810 = vst.msk [vmem:[%s2855_s7 + $0x10] sm:$0xf] %vm1805_vm7, %v1791_v49  ;;  %v1734_v56 = vadd.f32 %v1696_v55, %v1594_v15  ;;  %v1709_v3 = vpop.f32.mrf.mxu0 }
 0x18b   : > { %v1756_v22 = vadd.f32 %v2847_v60, %v1734_v56 }
 0x18c   : > { %v1349_v21 = vpop.f32.mrf.mxu2  ;;  %v1564_v47 = vpop.f32.mrf.mxu3 }
 0x18d   : > { %v1774_v57 = vmax.f32 %v1756_v22, 0.0  ;;  %v1385_v34 = vadd.f32 %v1349_v21, %v1183_v6  ;;  %v1149_v32 = vpop.f32.mrf.mxu1 }
 0x18e   : > { %v1184_v10 = vadd.f32 %v1149_v32, %v2729_v1 }
 0x18f   : > { %v1792_v50 = vpack.c.bf16 %v1774_v57, %v1774_v57  ;;  %v1595_v8 = vadd.f32 %v1559_v38, %v1385_v34 }
 0x191   : > { %1811 = vst.msk [vmem:[%s2855_s7 + $0x14] sm:$0xf] %vm1805_vm7, %v1792_v50  ;;  %v1735_v30 = vadd.f32 %v1699_v4, %v1595_v8 }
 0x193   : > { %v1757_v9 = vadd.f32 %v2847_v60, %v1735_v30 }
 0x194   : > { %v1351_v61 = vpop.f32.mrf.mxu2  ;;  %v1566_v31 = vpop.f32.mrf.mxu3 }
 0x195   : > { %v1775_v46 = vmax.f32 %v1757_v9, 0.0  ;;  %v1386_v63 = vadd.f32 %v1351_v61, %v1184_v10  ;;  %v1152_v25 = vpop.f32.mrf.mxu1 }
 0x196   : > { %v1185_v40 = vadd.f32 %v1152_v25, %v2740_v5 }
 0x197   : > { %v1793_v55 = vpack.c.bf16 %v1775_v46, %v1775_v46  ;;  %v1596_v44 = vadd.f32 %v1561_v53, %v1386_v63 }
 0x199   : > { %1812 = vst.msk [vmem:[%s2855_s7 + $0x18] sm:$0xf] %vm1805_vm7, %v1793_v55  ;;  %v1736_v59 = vadd.f32 %v1701_v26, %v1596_v44  ;;  %v1711_v26 = vpop.f32.mrf.mxu0 }
 0x19b   : > { %v1758_v37 = vadd.f32 %v2847_v60, %v1736_v59 }
 0x19c   : > { %v1354_v62 = vpop.f32.mrf.mxu2  ;;  %v1569_v13 = vpop.f32.mrf.mxu3 }
 0x19d   : > { %v1776_v12 = vmax.f32 %v1758_v37, 0.0  ;;  %v1387_v23 = vadd.f32 %v1354_v62, %v1185_v40  ;;  %v1154_v1 = vpop.f32.mrf.mxu1 }
 0x19e   : > { %v1186_v42 = vadd.f32 %v1154_v1, %v2757_v7 }
 0x19f   : > { %v1794_v33 = vpack.c.bf16 %v1776_v12, %v1776_v12  ;;  %v1597_v0 = vadd.f32 %v1564_v47, %v1387_v23 }
 0x1a1   : > { %1813 = vst.msk [vmem:[%s2855_s7 + $0x1c] sm:$0xf] %vm1805_vm7, %v1794_v33  ;;  %v1737_v4 = vadd.f32 %v1704_v28, %v1597_v0  ;;  %v1714_v34 = vpop.f32.mrf.mxu0 }
 0x1a3   : > { %v1759_v29 = vadd.f32 %v2847_v60, %v1737_v4 }
 0x1a4   : > { %v1356_v17 = vpop.f32.mrf.mxu2  ;;  %v1571_v20 = vpop.f32.mrf.mxu3 }
 0x1a5   : > { %v1777_v41 = vmax.f32 %v1759_v29, 0.0  ;;  %v1388_v38 = vadd.f32 %v1356_v17, %v1186_v42  ;;  %v1157_v5 = vpop.f32.mrf.mxu1 }
 0x1a6   : > { %v1187_v54 = vadd.f32 %v1157_v5, %v2768_v39 }
 0x1a7   : > { %v1795_v27 = vpack.c.bf16 %v1777_v41, %v1777_v41  ;;  %v1598_v48 = vadd.f32 %v1566_v31, %v1388_v38 }
 0x1a9   : > { %1814 = vst.msk [vmem:[%s2855_s7 + $0x20] sm:$0xf] %vm1805_vm7, %v1795_v27  ;;  %v1738_v19 = vadd.f32 %v1706_v11, %v1598_v48  ;;  %v1716_v25 = vpop.f32.mrf.mxu0 }
 0x1ab   : > { %v1760_v14 = vadd.f32 %v2847_v60, %v1738_v19 }
 0x1ac   : > { %v1359_v43 = vpop.f32.mrf.mxu2  ;;  %v1574_v6 = vpop.f32.mrf.mxu3 }
 0x1ad   : > { %v1778_v35 = vmax.f32 %v1760_v14, 0.0  ;;  %v1389_v16 = vadd.f32 %v1359_v43, %v1187_v54  ;;  %v1159_v7 = vpop.f32.mrf.mxu1 }
 0x1ae   : > { %v1188_v56 = vadd.f32 %v1159_v7, %v2785_v52 }
 0x1af   : > { %v1796_v53 = vpack.c.bf16 %v1778_v35, %v1778_v35  ;;  %v1599_v45 = vadd.f32 %v1569_v13, %v1389_v16 }
 0x1b1   : > { %1815 = vst.msk [vmem:[%s2855_s7 + $0x24] sm:$0xf] %vm1805_vm7, %v1796_v53  ;;  %v1739_v49 = vadd.f32 %v1709_v3, %v1599_v45  ;;  %v1719_v1 = vpop.f32.mrf.mxu0 }
 0x1b3   : > { %v1761_v15 = vadd.f32 %v2847_v60, %v1739_v49 }
 0x1b4   : > { %v1361_v22 = vpop.f32.mrf.mxu2  ;;  %v1576_v61 = vpop.f32.mrf.mxu3 }
 0x1b5   : > { %v1779_v21 = vmax.f32 %v1761_v15, 0.0  ;;  %v1390_v57 = vadd.f32 %v1361_v22, %v1188_v56  ;;  %v1162_v39 = vpop.f32.mrf.mxu1 }
 0x1b6   : > { %v1189_v8 = vadd.f32 %v1162_v39, %v2797_v18 }
 0x1b7   : > { %v1797_v47 = vpack.c.bf16 %v1779_v21, %v1779_v21  ;;  %v1600_v32 = vadd.f32 %v1571_v20, %v1390_v57 }
 0x1b9   : > { %1816 = vst.msk [vmem:[%s2855_s7 + $0x28] sm:$0xf] %vm1805_vm7, %v1797_v47  ;;  %v1740_v28 = vadd.f32 %v1711_v26, %v1600_v32  ;;  %v1721_v27 = vpop.f32.mrf.mxu0 }
 0x1bb   : > { %v1762_v50 = vadd.f32 %v2847_v60, %v1740_v28 }
 0x1bc   : > { %v1364_v30 = vpop.f32.mrf.mxu2  ;;  %v1579_v12 = vpop.f32.mrf.mxu3 }
 0x1bd   : > { %v1780_v9 = vmax.f32 %v1762_v50, 0.0  ;;  %v1391_v10 = vadd.f32 %v1364_v30, %v1189_v8  ;;  %v1164_v52 = vpop.f32.mrf.mxu1 }
 0x1be   : > { %v1190_v44 = vadd.f32 %v1164_v52, %v2809_v36 }
 0x1bf   : > { %v1798_v46 = vpack.c.bf16 %v1780_v9, %v1780_v9  ;;  %v1601_v63 = vadd.f32 %v1574_v6, %v1391_v10 }
 0x1c1   : > { %1817 = vst.msk [vmem:[%s2855_s7 + $0x2c] sm:$0xf] %vm1805_vm7, %v1798_v46  ;;  %v1741_v31 = vadd.f32 %v1714_v34, %v1601_v63 }
 0x1c3   : > { %v1763_v55 = vadd.f32 %v2847_v60, %v1741_v31 }
 0x1c4   : > { %v1366_v11 = vpop.f32.mrf.mxu2  ;;  %v1581_v41 = vpop.f32.mrf.mxu3 }
 0x1c5   : > { %v1781_v59 = vmax.f32 %v1763_v55, 0.0  ;;  %v1392_v37 = vadd.f32 %v1366_v11, %v1190_v44  ;;  %v1167_v18 = vpop.f32.mrf.mxu1 }
 0x1c6   : > { %v1191_v0 = vadd.f32 %v1167_v18, %v2815_v58 }
 0x1c7   : > { %v1799_v40 = vpack.c.bf16 %v1781_v59, %v1781_v59  ;;  %v1602_v62 = vadd.f32 %v1576_v61, %v1392_v37 }
 0x1c9   : > { %1818 = vst.msk [vmem:[%s2855_s7 + $0x30] sm:$0xf] %vm1805_vm7, %v1799_v40  ;;  %v1742_v23 = vadd.f32 %v1716_v25, %v1602_v62 }
 0x1cb   : > { %v1764_v33 = vadd.f32 %v2847_v60, %v1742_v23 }
 0x1cc   : > { %v1369_v13 = vpop.f32.mrf.mxu2  ;;  %v1584_v16 = vpop.f32.mrf.mxu3 }
 0x1cd   : > { %v1782_v4 = vmax.f32 %v1764_v33, 0.0  ;;  %v1393_v3 = vadd.f32 %v1369_v13, %v1191_v0  ;;  %v1169_v36 = vpop.f32.mrf.mxu1 }
 0x1ce   : > { %v1192_v5 = vadd.f32 %v1169_v36, %v2828_v24  ;;  %v1724_v24 = vpop.f32.mrf.mxu0 }
 0x1cf   : > { %v1800_v29 = vpack.c.bf16 %v1782_v4, %v1782_v4  ;;  %v1603_v42 = vadd.f32 %v1579_v12, %v1393_v3 }
 0x1d1   : > { %1819 = vst.msk [vmem:[%s2855_s7 + $0x34] sm:$0xf] %vm1805_vm7, %v1800_v29  ;;  %v1743_v17 = vadd.f32 %v1719_v1, %v1603_v42 }
 0x1d3   : > { %v1765_v38 = vadd.f32 %v2847_v60, %v1743_v17 }
 0x1d4   : > { %v1371_v48 = vpop.f32.mrf.mxu2  ;;  %v1586_v34 = vpop.f32.mrf.mxu3 }
 0x1d5   : > { %v1783_v19 = vmax.f32 %v1765_v38, 0.0  ;;  %v1394_v20 = vadd.f32 %v1371_v48, %v1192_v5  ;;  %v1172_v58 = vpop.f32.mrf.mxu1 }
 0x1d6   : > { %v1193_v35 = vadd.f32 %v1172_v58, %v2833_v2  ;;  %v1726_v28 = vpop.f32.mrf.mxu0 }
 0x1d7   : > { %v1801_v14 = vpack.c.bf16 %v1783_v19, %v1783_v19  ;;  %v1604_v54 = vadd.f32 %v1581_v41, %v1394_v20 }
 0x1d9   : > { %1820 = vst.msk [vmem:[%s2855_s7 + $0x38] sm:$0xf] %vm1805_vm7, %v1801_v14  ;;  %v1744_v43 = vadd.f32 %v1721_v27, %v1604_v54 }
 0x1db   : > { %v1766_v26 = vadd.f32 %v2847_v60, %v1744_v43 }
 0x1dc   : > { %v1374_v7 = vpop.f32.mrf.mxu2 }
 0x1dd   : > { %v1784_v53 = vmax.f32 %v1766_v26, 0.0  ;;  %v1395_v45 = vadd.f32 %v1374_v7, %v1193_v35  ;;  %v1174_v56 = vpop.f32.mrf.mxu1 }
 0x1de   : > { %v1194_v21 = vadd.f32 %v1174_v56, %v2841_v51 }
 0x1df   : > { %v1802_v49 = vpack.c.bf16 %v1784_v53, %v1784_v53  ;;  %v1605_v15 = vadd.f32 %v1584_v16, %v1395_v45 }
 0x1e1   : > { %1821 = vst.msk [vmem:[%s2855_s7 + $0x3c] sm:$0xf] %vm1805_vm7, %v1802_v49  ;;  %v1745_v22 = vadd.f32 %v1724_v24, %v1605_v15 }
 0x1e3   : > { %v1767_v6 = vadd.f32 %v2847_v60, %v1745_v22 }
 0x1e4   : > { %v1376_v57 = vpop.f32.mrf.mxu2 }
 0x1e5   : > { %v1785_v39 = vmax.f32 %v1767_v6, 0.0  ;;  %v1396_v2 = vadd.f32 %v1376_v57, %v1194_v21 }
 0x1e7   : > { %v1803_v47 = vpack.c.bf16 %v1785_v39, %v1785_v39  ;;  %v1606_v32 = vadd.f32 %v1586_v34, %v1396_v2 }
 0x1e9   : > { %1822 = vst.msk [vmem:[%s2855_s7 + $0x40] sm:$0xf] %vm1805_vm7, %v1803_v47  ;;  %v1746_v50 = vadd.f32 %v1726_v28, %v1606_v32 }
 0x1eb   : > { %v1768_v8 = vadd.f32 %v2847_v60, %v1746_v50 }
 0x1ed   : > { %v1786_v30 = vmax.f32 %v1768_v8, 0.0 }
 0x1ef   : > { %v1804_v9 = vpack.c.bf16 %v1786_v30, %v1786_v30 }
 0x1f1   : > { %1823 = vst.msk [vmem:[%s2855_s7 + $0x44] sm:$0xf] %vm1805_vm7, %v1804_v9 }
 0x1f2 PF: > { %s13_s12 = sadd.s32 1, %s2241_s12  }
 0x1f3   : > { %p10_p4 = scmp.ge.s32.totalorder %s13_s12, 4  }
 0x1f5   :  { %12 = sbr.rel (!%p10_p4) target bundleno = 1 (0x1), region = 70 }

// kernel: _lambda_.10
= control target key start
LH: loop header
LB: loop body
LE: loop exit
PB: predicated region body
PF: predicated region fallthrough
CT: control target
= control target key end

     0   :  { %s2039_s12 = smov 0   ;;  %s2687_s0 = inlined_call_operand.vmem [shape: bf16[2,182,8], index: 0, kind: input, shape index: {}]   ;;  %s2688_s1 = inlined_call_operand.vmem [shape: bf16[9,8,32], index: 1, kind: input, shape index: {}]   ;;  %s2689_s2 = inlined_call_operand.vmem [shape: f32[1,32], index: 2, kind: input, shape index: {}]   ;;  %s2690_s3 = inlined_call_operand.vmem [shape: bf16[2,144,32], index: 3, kind: output, shape index: {}]  }
   0x1 LB: > { %s1772_s13 = sadd.s32 4294967295, %s2017_s12   ;;  %p1776_p0 = scmp.ge.s32.totalorder %s2017_s12, 1  ;;  %s2017_s12 = sphi %s2039_s12, %s13_s12  }
   0x2   : > { %p137_p1 = scmp.lt.s32.totalorder %s2017_s12, 3 }
   0x4   : > { %p138_p2 = pnand %p1776_p0, %p137_p1 }
   0x5   : > { %p161_p3 = scmp.lt.s32.totalorder (!%p138_p2), %s1772_s13, 1 }
   0x6   : > { %141 = sbr.rel (%p138_p2) target bundleno = 498 (0x1f2), region = 32 }
   0xb   : > { %v1779_v0 = vld [vmem:[%s2688_s1 + $0x4] sm:$0xf]  ;;  %vm347_vm0 = vcmask 1043456   ;;  %v1830_v2 = vld [vmem:[%s2688_s1 + $0x8] sm:$0xf]  ;;  %s2692_s13 = smov (!%p161_p3, %s1772_s13), 1 }
   0xc   : > { %v349_v1 = vsel %vm347_vm0, %v1779_v0, 0  ;;  %v190_v3 = vld [vmem:[%s2688_s1] sm:$0xf]  ;;  %v534_v4 = vsel %vm347_vm0, %v1830_v2, 0  ;;  %v1840_v6 = vld [vmem:[%s2688_s1 + $0xc] sm:$0xf] }
   0xd   : > { %1997 = vmatpush.bf16.msra.mxu1 %v349_v1  ;;  %1998 = vmatpush.bf16.msra.mxu2 %v349_v1  ;;  %v424_v5 = vsel %vm347_vm0, %v190_v3, 0  ;;  %v724_v7 = vsel %vm347_vm0, %v1840_v6, 0  ;;  %s2000_s22 = smul.u32 92, %s2692_s13  ;;  %vm242_vm1 = vsmask.f32 7424  ;;  %vm319_vm2 = vcmask 64512  }
   0xe   : > { %1999 = vmatpush.bf16.msra.mxu3 %v349_v1  ;;  %358 = vmatpush.bf16.msra.mxu0 %v349_v1  ;;  %v1882_v41 = vld [vmem:[%s2688_s1 + $0x10] sm:$0xf]  ;;  %vm804_vm3 = vsmask.f32 6400  ;;  %vm486_vm4 = vcmask 1046528   ;;  %vm1518_vm5 = vcmask 1044480  }
   0xf   : > { %s2069_s25 = scalar_lea.vmem %s2687_s0, %s2000_s22  ;;  %v922_v51 = vsel %vm347_vm0, %v1882_v41, 0  ;;  %vm1320_vm6 = vsmask.f32 5376  ;;  %vm1002_vm7 = vcmask 1045504   ;;  %s2001_s11 = smul.u32 72, %s2692_s13  ;;  %vm1698_vm8 = vcmask 257024  }
  0x10   : > { %v2072_v8 = vld [vmem:[%s2069_s25 + $0x8] sm:$0xff]  ;;  %v2075_v9 = vld [vmem:[%s2069_s25 + $0x10] sm:$0xff]  ;;  %v2078_v10 = vld [vmem:[%s2069_s25 + $0x20] sm:$0xff] }
  0x11   : > { %543 = vmatpush.bf16.msrb.mxu2 %v534_v4  ;;  %433 = vmatpush.bf16.msrb.mxu1 %v424_v5  ;;  %v2081_v11 = vld [vmem:[%s2069_s25 + $0x28] sm:$0xff]  ;;  %v2084_v12 = vld [vmem:[%s2069_s25 + $0x38] sm:$0xff]  ;;  %v2087_v13 = vld [vmem:[%s2069_s25 + $0x40] sm:$0xff]  ;;  %v251_v14 = vshll.u32 %v2072_v8, 16  ;;  %v255_v15 = vshrl.u32 %v2072_v8, 16  ;;  %v259_v16 = vshll.u32 %v2075_v9, 16  ;;  %s2613_s16 = scalar_lea.vmem %s2690_s3, %s2001_s11 }
  0x12   : > { %733 = vmatpush.bf16.msrb.mxu3 %v724_v7  ;;  %v275_v17 = vshll.u32 %v2078_v10, 16  ;;  %v279_v18 = vshrl.u32 %v2078_v10, 16  ;;  %v283_v19 = vshll.u32 %v2081_v11, 16  ;;  %v299_v20 = vshll.u32 %v2084_v12, 16  ;;  %v191_v28 = vld [vmem:[%s2069_s25 + $0x48] sm:$0x1]  ;;  %931 = vmatpush.bf16.msrb.mxu0 %v922_v51 }
  0x13   : > { %v303_v21 = vshrl.u32 %v2084_v12, 16  ;;  %v253_v22 = vrot.slane %v251_v14, 1  ;;  %v261_v23 = vrot.slane %v259_v16, 1  ;;  %v307_v25 = vshll.u32 %v2087_v13, 16  ;;  %v2108_v35 = vld [vmem:[%s2069_s25 + $0x18] sm:$0xff]  ;;  %v2111_v37 = vld [vmem:[%s2069_s25] sm:$0xff]  }
  0x14   : > { %v2097_v24 = vrot.slane %v275_v17, 1  ;;  %v285_v26 = vrot.slane %v283_v19, 1  ;;  %v2100_v27 = vrot.slane %v299_v20, 1  ;;  %v231_v36 = vunpack.c.l.b16 %v191_v28  ;;  %v2117_v39 = vld [vmem:[%s2069_s25 + $0x30] sm:$0xff]  ;;  %v608_v44 = vld [vmem:[%s2069_s25 + $0x8] sm:$0xe] }
  0x15   : > { %v257_v29 = vor.u32 %v255_v15, %v253_v22  ;;  %v309_v31 = vrot.slane %v307_v25, 1  ;;  %v244_v42 = vshrl.u32 %v2111_v37, 16  ;;  %v246_v43 = vshll.u32 %v2111_v37, 16  ;;  %v2129_v45 = vld [vmem:[%s2069_s25 + $0xc] sm:$0xf]  ;;  %v2142_v0 = vld [vmem:[%s2069_s25 + $0x10] sm:$0xff] }
  0x16   : > { %v281_v30 = vor.u32 %v279_v18, %v2097_v24  ;;  %v305_v32 = vor.u32 %v303_v21, %v2100_v27  ;;  %v2120_v40 = vpack.c.b16 %v231_v36, %v231_v36  ;;  %v263_v46 = vshrl.u32 %v2075_v9, 16  ;;  %v1902_v19 = vld [vmem:[%s2688_s1 + $0x18] sm:$0xf]  ;;  %v1944_v20 = vld [vmem:[%s2688_s1 + $0x1c] sm:$0xf] }
  0x17   : > { %v262_v33 = vsel %vm242_vm1, %v257_v29, %v261_v23  ;;  %v267_v47 = vshll.u32 %v2108_v35, 16  ;;  %v287_v48 = vshrl.u32 %v2081_v11, 16  ;;  %v291_v49 = vshll.u32 %v2117_v39, 16  ;;  %v1954_v29 = vld [vmem:[%s2688_s1 + $0x20] sm:$0xf] }
  0x18   : > { %v286_v34 = vsel %vm242_vm1, %v281_v30, %v285_v26  ;;  %1813 = vmatmul.msk.bf16.vlgmr.msra.gmra.mxu1 %vm319_vm2, %v262_v33  ;;  %v310_v38 = vsel %vm242_vm1, %v305_v32, %v309_v31  ;;  %v248_v50 = vrot.slane %v246_v43, 1  ;;  %v311_v52 = vshrl.u32 %v2087_v13, 16  ;;  %v1994_v51 = vld [vmem:[%s2069_s25] sm:$0xf0] }
  0x19   : > { %1816 = vmatmul.msk.bf16.vlgmr.msra.gmra.mxu2 %vm319_vm2, %v286_v34  ;;  %1819 = vmatmul.msk.bf16.vlgmr.msra.gmra.mxu3 %vm319_vm2, %v310_v38  ;;  %v315_v53 = vshll.u32 %v2120_v40, 16  ;;  %v648_v54 = vunpack.c.l.b16 %v608_v44  ;;  %v649_v55 = vunpack.c.l.b16 %v2129_v45  ;;  %v265_v57 = vor.u32 %v263_v46, %v261_v23  ;;  %v1892_v23 = vld [vmem:[%s2688_s1 + $0x14] sm:$0xf]  ;;  %v2175_v38 = vld [vmem:[%s2069_s25 + $0x18] sm:$0xff] }
  0x1a   : > { %v249_v56 = vor.u32 %v248_v50, %v244_v42  ;;  %v269_v58 = vrot.slane %v267_v47, 1  ;;  %v289_v59 = vor.u32 %v287_v48, %v285_v26  ;;  %v293_v61 = vrot.slane %v291_v49, 1 }
  0x1b   : > { %v313_v62 = vor.u32 %v311_v52, %v309_v31  ;;  %v317_v63 = vrot.slane %v315_v53, 1  ;;  %v667_v1 = vpack.c.b16 %v649_v55, %v648_v54  ;;  %v814_v4 = vshrl.u32 %v2142_v0, 16  ;;  %v1995_v52 = vld [vmem:[%s2069_s25] sm:$0xe] }
  0x1c   : > { %v254_v60 = vsel %vm242_vm1, %v249_v56, %v253_v22  ;;  %v817_v5 = vshll.u32 %v2142_v0, 16  ;;  %v270_v6 = vsel %vm242_vm1, %v265_v57, %v269_v58  ;;  %v294_v7 = vsel %vm242_vm1, %v289_v59, %v293_v61 }
  0x1d   : > { %1812 = vmatmul.msk.bf16.vlgmr.msra.gmra.mxu0 %vm319_vm2, %v254_v60  ;;  %v806_v2 = vshrl.u32 %v667_v1, 16  ;;  %v809_v3 = vshll.u32 %v667_v1, 16  ;;  %v318_v14 = vsel %vm242_vm1, %v313_v62, %v317_v63  ;;  %v816_v17 = vrot.slane %v814_v4, 1 }
  0x1e   : > { %v819_v18 = vrot.slane %v817_v5, 2  ;;  %v1240_v21 = vsel %vm347_vm0, %v1902_v19, 0  ;;  %v1438_v22 = vsel %vm347_vm0, %v1944_v20, 0  ;;  %v1050_v28 = vsel %vm347_vm0, %v1892_v23, 0  ;;  %v2209_v5 = vld [vmem:[%s2069_s25 + $0x28] sm:$0xff] }
  0x1f   : > { %v808_v15 = vrot.slane %v806_v2, 1  ;;  %v811_v16 = vrot.slane %v809_v3, 2  ;;  %1249 = vmatpush.bf16.msra.mxu2 %v1240_v21  ;;  %1447 = vmatpush.bf16.msra.mxu3 %v1438_v22  ;;  %v1566_v30 = vsel %vm347_vm0, %v1954_v29, 0  ;;  %v271_v31 = vshrl.u32 %v2108_v35, 16  ;;  %v2224_v21 = vld [vmem:[%s2069_s25 + $0x30] sm:$0xff] }
  0x20   : > { %v820_v26 = vor.u32 %v819_v18, %v816_v17  ;;  %1059 = vmatpush.bf16.msra.mxu1 %v1050_v28  ;;  %1575 = vmatpush.bf16.msra.mxu0 %v1566_v30  ;;  %v295_v32 = vshrl.u32 %v2117_v39, 16  ;;  %v677_v41 = vrot.slane %v667_v1, 1  ;;  %v678_v42 = vrot.slane %v2142_v0, 1 }
  0x21   : > { %v812_v25 = vor.u32 %v811_v16, %v808_v15  ;;  %v273_v34 = vor.u32 %v271_v31, %v269_v58  ;;  %v823_v43 = vshrl.u32 %v2175_v38, 16  ;;  %v826_v44 = vshll.u32 %v2175_v38, 16 }
  0x22   : > { %v297_v36 = vor.u32 %v295_v32, %v293_v61  ;;  %v679_v48 = vsel %vm486_vm4, %v677_v41, %v678_v42  ;;  %v1996_v54 = vor.u32 %v1995_v52, %v1994_v51  ;;  %v488_v57 = vrot.slane %v2072_v8, 1 }
  0x23   : > { %v821_v33 = vsel %vm804_vm3, %v812_v25, %v820_v26  ;;  %v278_v46 = vsel %vm242_vm1, %v273_v34, %v2097_v24  ;;  %v825_v49 = vrot.slane %v823_v43, 1  ;;  %v828_v50 = vrot.slane %v826_v44, 2 }
  0x24   : > { %v302_v47 = vsel %vm242_vm1, %v297_v36, %v2100_v27  ;;  %v487_v56 = vrot.slane %v1996_v54, 1  ;;  %v2194_v27 = vld [vmem:[%s2069_s25 + $0x20] sm:$0xff]  ;;  %v680_v58 = vrot.slane %v2175_v38, 1  ;;  %v490_v4 = vrot.slane %v2075_v9, 1 }
  0x25   : > { %v829_v53 = vor.u32 %v828_v50, %v825_v49  ;;  %v832_v59 = vshrl.u32 %v2194_v27, 16  ;;  %v835_v60 = vshll.u32 %v2194_v27, 16  ;;  %v492_v20 = vrot.slane %v2108_v35, 1  ;;  %v2254_v49 = vld [vmem:[%s2069_s25 + $0x40] sm:$0xff] }
  0x26   : > { %v489_v61 = vsel %vm486_vm4, %v487_v56, %v488_v57  ;;  %v681_v62 = vsel %vm486_vm4, %v678_v42, %v680_v58  ;;  %v684_v22 = vrot.slane %v2209_v5, 1  ;;  %v850_v23 = vshrl.u32 %v2224_v21, 16 }
  0x27   : > { %v830_v24 = vsel %vm804_vm3, %v820_v26, %v829_v53  ;;  %v834_v63 = vrot.slane %v832_v59, 1  ;;  %v837_v1 = vrot.slane %v835_v60, 2  ;;  %v493_v25 = vsel %vm486_vm4, %v490_v4, %v492_v20  ;;  %v2269_v59 = vld [vmem:[%s2069_s25 + $0x48] sm:$0xff] }
  0x28   : > { %1814 = vmatmul.msk.bf16.gmra.mxu1 %vm319_vm2, %v270_v6  ;;  %v682_v6 = vrot.slane %v2194_v27, 1  ;;  %v852_v28 = vrot.slane %v850_v23, 1  ;;  %v494_v32 = vrot.slane %v2078_v10, 1  ;;  %v686_v34 = vrot.slane %v2224_v21, 1 }
  0x29   : > { %1817 = vmatmul.msk.bf16.gmra.mxu2 %vm319_vm2, %v294_v7  ;;  %1820 = vmatmul.msk.bf16.gmra.mxu3 %vm319_vm2, %v318_v14  ;;  %v838_v2 = vor.u32 %v837_v1, %v834_v63  ;;  %v841_v7 = vshrl.u32 %v2209_v5, 16  ;;  %v491_v14 = vsel %vm486_vm4, %v488_v57, %v490_v4  ;;  %v868_v51 = vshrl.u32 %v2254_v49, 16 }
  0x2a   : > { %v683_v15 = vsel %vm486_vm4, %v680_v58, %v682_v6  ;;  %v685_v26 = vsel %vm486_vm4, %v682_v6, %v684_v22  ;;  %v495_v41 = vsel %vm486_vm4, %v492_v20, %v494_v32  ;;  %v687_v42 = vsel %vm486_vm4, %v684_v22, %v686_v34 }
  0x2b   : > { %v839_v3 = vsel %vm804_vm3, %v829_v53, %v838_v2  ;;  %v843_v16 = vrot.slane %v841_v7, 1  ;;  %v870_v54 = vrot.slane %v868_v51, 1  ;;  %v498_v58 = vrot.slane %v2117_v39, 1 }
  0x2c   : > { %v690_v60 = vrot.slane %v2254_v49, 1 }
  0x2d   : > { %1883 = vmatmul.msk.bf16.vlgmr.msrb.gmra.mxu0 %vm319_vm2, %v821_v33  ;;  %v2239_v33 = vld [vmem:[%s2069_s25 + $0x38] sm:$0xff] }
  0x2e   : > { %v859_v36 = vshrl.u32 %v2239_v33, 16  ;;  %v688_v50 = vrot.slane %v2239_v33, 1 }
  0x30   : > { %v861_v43 = vrot.slane %v859_v36, 1  ;;  %v689_v53 = vsel %vm486_vm4, %v686_v34, %v688_v50  ;;  %v691_v1 = vsel %vm486_vm4, %v688_v50, %v690_v60 }
  0x38   : > { %1815 = vmatmul.msk.bf16.gmra.mxu1 %vm319_vm2, %v278_v46 }
  0x39   : > { %1818 = vmatmul.msk.bf16.gmra.mxu2 %vm319_vm2, %v302_v47  ;;  %1873 = vmatmul.msk.bf16.vlgmr.msrb.gmra.mxu3 %vm319_vm2, %v679_v48  ;;  %v496_v48 = vrot.slane %v2081_v11, 1 }
  0x3b   : > { %v497_v52 = vsel %vm486_vm4, %v494_v32, %v496_v48  ;;  %v499_v63 = vsel %vm486_vm4, %v496_v48, %v498_v58  ;;  %v626_v32 = vld [vmem:[%s2069_s25 + $0x50] sm:$0x1]  ;;  %v502_v48 = vrot.slane %v2087_v13, 1 }
  0x3c   : > { %v666_v34 = vunpack.c.l.b16 %v626_v32 }
  0x3d   : > { %1884 = vmatmul.msk.bf16.gmra.mxu0 %vm319_vm2, %v830_v24 }
  0x48   : > { %1821 = vmatmul.msk.bf16.vlgmr.msrb.gmra.mxu1 %vm319_vm2, %v2111_v37  ;;  %v844_v37 = vshll.u32 %v2209_v5, 16 }
  0x49   : > { %1831 = vmatmul.msk.bf16.vlgmr.msrb.gmra.mxu2 %vm319_vm2, %v489_v61  ;;  %1874 = vmatmul.msk.bf16.gmra.mxu3 %vm319_vm2, %v681_v62  ;;  %v877_v61 = vshrl.u32 %v2269_v59, 16 }
  0x4a   : > { %v846_v17 = vrot.slane %v844_v37, 2 }
  0x4c   : > { %v847_v18 = vor.u32 %v846_v17, %v843_v16  ;;  %v798_v16 = vld [vmem:[%s2069_s25 + $0x50] sm:$0x3] }
  0x4d   : > { %1885 = vmatmul.msk.bf16.gmra.mxu0 %vm319_vm2, %v839_v3  ;;  %v802_v17 = vunpack.c.l.b16 %v798_v16 }
  0x4e   : > { %v848_v19 = vsel %vm804_vm3, %v838_v2, %v847_v18  ;;  %v879_v2 = vrot.slane %v877_v61, 1 }
  0x58   : > { %1822 = vmatmul.msk.bf16.gmra.mxu1 %vm319_vm2, %v2072_v8  ;;  %v853_v8 = vshll.u32 %v2224_v21, 16 }
  0x59   : > { %1832 = vmatmul.msk.bf16.gmra.mxu2 %vm319_vm2, %v491_v14  ;;  %1875 = vmatmul.msk.bf16.gmra.mxu3 %vm319_vm2, %v683_v15 }
  0x5a   : > { %v855_v29 = vrot.slane %v853_v8, 2 }
  0x5c   : > { %v856_v30 = vor.u32 %v855_v29, %v852_v28 }
  0x5d   : > { %1886 = vmatmul.msk.bf16.gmra.mxu0 %vm319_vm2, %v848_v19  ;;  %v692_v19 = vrot.slane %v2269_v59, 1 }
  0x5e   : > { %v857_v31 = vsel %vm804_vm3, %v847_v18, %v856_v30  ;;  %v2294_v18 = vpack.c.b16 %v802_v17, %v802_v17 }
  0x5f   : > { %v693_v28 = vsel %vm486_vm4, %v690_v60, %v692_v19 }
  0x60   : > { %v886_v22 = vshrl.u32 %v2294_v18, 16  ;;  %v889_v23 = vshll.u32 %v2294_v18, 16 }
  0x68   : > { %1823 = vmatmul.msk.bf16.gmra.mxu1 %vm319_vm2, %v2075_v9  ;;  %v862_v9 = vshll.u32 %v2239_v33, 16 }
  0x69   : > { %1833 = vmatmul.msk.bf16.gmra.mxu2 %vm319_vm2, %v493_v25  ;;  %1876 = vmatmul.msk.bf16.gmra.mxu3 %vm319_vm2, %v685_v26 }
  0x6a   : > { %v864_v44 = vrot.slane %v862_v9, 2 }
  0x6c   : > { %v865_v46 = vor.u32 %v864_v44, %v861_v43  ;;  %v676_v43 = vpack.c.b16 %v666_v34, %v666_v34 }
  0x6d   : > { %1887 = vmatmul.msk.bf16.gmra.mxu0 %vm319_vm2, %v857_v31  ;;  %v891_v31 = vrot.slane %v889_v23, 2 }
  0x6e   : > { %v866_v47 = vsel %vm804_vm3, %v856_v30, %v865_v46  ;;  %v888_v30 = vrot.slane %v886_v22, 1 }
  0x70   : > { %v892_v36 = vor.u32 %v891_v31, %v888_v30  ;;  %v504_v31 = vrot.slane %v2120_v40, 1 }
  0x78   : > { %1824 = vmatmul.msk.bf16.gmra.mxu1 %vm319_vm2, %v2108_v35  ;;  %v871_v35 = vshll.u32 %v2254_v49, 16 }
  0x79   : > { %1834 = vmatmul.msk.bf16.gmra.mxu2 %vm319_vm2, %v495_v41  ;;  %1877 = vmatmul.msk.bf16.gmra.mxu3 %vm319_vm2, %v687_v42 }
  0x7a   : > { %v873_v24 = vrot.slane %v871_v35, 2  ;;  %v694_v35 = vrot.slane %v676_v43, 1 }
  0x7c   : > { %v874_v56 = vor.u32 %v873_v24, %v870_v54  ;;  %v695_v60 = vsel %vm486_vm4, %v692_v19, %v694_v35  ;;  %v996_v35 = vld [vmem:[%s2069_s25 + $0x8] sm:$0xc] }
  0x7d   : > { %1888 = vmatmul.msk.bf16.gmra.mxu0 %vm319_vm2, %v866_v47  ;;  %v1124_v47 = vld [vmem:[%s2069_s25 + $0x10] sm:$0xc]  ;;  %v1000_v40 = vunpack.c.l.b16 %v996_v35 }
  0x7e   : > { %v875_v57 = vsel %vm804_vm3, %v865_v46, %v874_v56  ;;  %v1164_v50 = vunpack.c.l.b16 %v1124_v47  ;;  %v505_v47 = vsel %vm486_vm4, %v502_v48, %v504_v31 }
  0x88   : > { %1825 = vmatmul.msk.bf16.gmra.mxu1 %vm319_vm2, %v2078_v10  ;;  %v880_v10 = vshll.u32 %v2269_v59, 16 }
  0x89   : > { %1835 = vmatmul.msk.bf16.gmra.mxu2 %vm319_vm2, %v497_v52  ;;  %1878 = vmatmul.msk.bf16.gmra.mxu3 %vm319_vm2, %v689_v53  ;;  %v1512_v52 = vld [vmem:[%s2069_s25 + $0x10] sm:$0x8] }
  0x8a   : > { %v882_v3 = vrot.slane %v880_v10, 2  ;;  %v1516_v54 = vunpack.c.l.b16 %v1512_v52  ;;  %v2341_v10 = vld [vmem:[%s2069_s25 + $0x18] sm:$0xff] }
  0x8b   : > { %v1520_v16 = vrot.slane %v2341_v10, 3  ;;  %v1194_v45 = vrot.slane %v2341_v10, 2 }
  0x8c   : > { %v883_v4 = vor.u32 %v882_v3, %v879_v2  ;;  %v1330_v3 = vshrl.u32 %v2341_v10, 16 }
  0x8d   : > { %1889 = vmatmul.msk.bf16.gmra.mxu0 %vm319_vm2, %v875_v57 }
  0x8e   : > { %v884_v15 = vsel %vm804_vm3, %v874_v56, %v883_v4  ;;  %v893_v46 = vsel %vm804_vm3, %v883_v4, %v892_v36  ;;  %v1333_v4 = vshll.u32 %v2341_v10, 16  ;;  %v1332_v23 = vrot.slane %v1330_v3, 2 }
  0x95   : > { %v2274_v62 = vpop.f32.mrf.mxu1 }
  0x98   : > { %1826 = vmatmul.msk.bf16.gmra.mxu1 %vm319_vm2, %v2081_v11  ;;  %v500_v11 = vrot.slane %v2084_v12, 1 }
  0x99   : > { %1836 = vmatmul.msk.bf16.gmra.mxu2 %vm319_vm2, %v499_v63  ;;  %1879 = vmatmul.msk.bf16.gmra.mxu3 %vm319_vm2, %v691_v1 }
  0x9a   : > { %v2288_v14 = vpop.f32.mrf.mxu0  ;;  %v501_v26 = vsel %vm486_vm4, %v498_v58, %v500_v11  ;;  %v503_v57 = vsel %vm486_vm4, %v500_v11, %v502_v48 }
  0x9c   : > { %v2282_v6 = vpop.f32.mrf.mxu2  ;;  %v2284_v7 = vpop.f32.mrf.mxu3 }
  0x9d   : > { %v2286_v37 = vpop.f32.mrf.mxu1  ;;  %1890 = vmatmul.msk.bf16.gmra.mxu0 %vm319_vm2, %v884_v15 }
  0xa2   : > { %v2307_v29 = vpop.f32.mrf.mxu0 }
  0xa4   : > { %v2297_v20 = vpop.f32.mrf.mxu2  ;;  %v2301_v8 = vpop.f32.mrf.mxu3 }
  0xa5   : > { %v2303_v25 = vpop.f32.mrf.mxu1 }
  0xa8   : > { %1827 = vmatmul.msk.bf16.gmra.mxu1 %vm319_vm2, %v2117_v39  ;;  %v1125_v39 = vld [vmem:[%s2069_s25 + $0x14] sm:$0xf] }
  0xa9   : > { %1837 = vmatmul.msk.bf16.gmra.mxu2 %vm319_vm2, %v501_v26  ;;  %1880 = vmatmul.msk.bf16.gmra.mxu3 %vm319_vm2, %v693_v28  ;;  %v1165_v51 = vunpack.c.l.b16 %v1125_v39  ;;  %v1335_v26 = vrot.slane %v1333_v4, 3  ;;  %v2365_v39 = vld [vmem:[%s2069_s25 + $0x20] sm:$0xff] }
  0xaa   : > { %v2320_v44 = vpop.f32.mrf.mxu0  ;;  %v1342_v48 = vshll.u32 %v2365_v39, 16 }
  0xab   : > { %v2335_v58 = vpack.c.b16 %v1165_v51, %v1164_v50  ;;  %v1517_v63 = vpack.c.b16 %v1165_v51, %v1516_v54  ;;  %v1336_v34 = vor.u32 %v1335_v26, %v1332_v23  ;;  %v1339_v54 = vshrl.u32 %v2365_v39, 16 }
  0xac   : > { %v2314_v9 = vpop.f32.mrf.mxu2  ;;  %v2316_v41 = vpop.f32.mrf.mxu3 }
  0xad   : > { %v2318_v42 = vpop.f32.mrf.mxu1  ;;  %1891 = vmatmul.msk.bf16.gmra.mxu0 %vm319_vm2, %v893_v46  ;;  %v1322_v1 = vshrl.u32 %v2335_v58, 16  ;;  %v1325_v2 = vshll.u32 %v2335_v58, 16  ;;  %v1519_v15 = vrot.slane %v1517_v63, 3  ;;  %v1341_v3 = vrot.slane %v1339_v54, 2 }
  0xae   : > { %v1193_v31 = vrot.slane %v2335_v58, 2 }
  0xaf   : > { %v1324_v19 = vrot.slane %v1322_v1, 2  ;;  %v1327_v22 = vrot.slane %v1325_v2, 3  ;;  %v1521_v30 = vsel %vm1518_vm5, %v1519_v15, %v1520_v16  ;;  %v1001_v2 = vpack.c.b16 %v649_v55, %v1000_v40 }
  0xb0   : > { %v1344_v15 = vrot.slane %v1342_v48, 3 }
  0xb1   : > { %v1328_v32 = vor.u32 %v1327_v22, %v1324_v19  ;;  %v1003_v26 = vrot.slane %v1001_v2, 2 }
  0xb2   : > { %v2338_v61 = vpop.f32.mrf.mxu0  ;;  %v1345_v55 = vor.u32 %v1344_v15, %v1341_v3  ;;  %v1196_v15 = vrot.slane %v2365_v39, 2 }
  0xb3   : > { %v1337_v51 = vsel %vm1320_vm6, %v1328_v32, %v1336_v34 }
  0xb4   : > { %v2328_v53 = vpop.f32.mrf.mxu2  ;;  %v2330_v24 = vpop.f32.mrf.mxu3  ;;  %v1346_v58 = vsel %vm1320_vm6, %v1336_v34, %v1345_v55 }
  0xb5   : > { %v2332_v56 = vpop.f32.mrf.mxu1 }
  0xb8   : > { %1828 = vmatmul.msk.bf16.gmra.mxu1 %vm319_vm2, %v2084_v12 }
  0xb9   : > { %1838 = vmatmul.msk.bf16.gmra.mxu2 %vm319_vm2, %v503_v57  ;;  %1881 = vmatmul.msk.bf16.gmra.mxu3 %vm319_vm2, %v695_v60  ;;  %v1522_v57 = vrot.slane %v2365_v39, 3 }
  0xba   : > { %v2356_v28 = vpop.f32.mrf.mxu0 }
  0xbb   : > { %v1523_v22 = vsel %vm1518_vm5, %v1520_v16, %v1522_v57 }
  0xbc   : > { %v2352_v17 = vpop.f32.mrf.mxu2  ;;  %v735_v11 = vpop.f32.mrf.mxu3 }
  0xbd   : > { %v2354_v12 = vpop.f32.mrf.mxu1  ;;  %1955 = vmatmul.msk.bf16.vlgmr.msra.gmra.mxu0 %vm319_vm2, %v1521_v30  ;;  %v1004_v30 = vrot.slane %v2142_v0, 2 }
  0xbf   : > { %v1005_v16 = vsel %vm1002_vm7, %v1003_v26, %v1004_v30 }
  0xc2   : > { %v2370_v52 = vpop.f32.mrf.mxu0 }
  0xc4   : > { %v2361_v36 = vpop.f32.mrf.mxu2  ;;  %v737_v43 = vpop.f32.mrf.mxu3 }
  0xc5   : > { %v435_v46 = vpop.f32.mrf.mxu1 }
  0xc6   : > { %v436_v50 = vadd.f32 %v435_v46, %v2288_v14 }
  0xc8   : > { %1829 = vmatmul.msk.bf16.gmra.mxu1 %vm319_vm2, %v2087_v13 }
  0xc9   : > { %1839 = vmatmul.msk.bf16.gmra.mxu2 %vm319_vm2, %v505_v47  ;;  %1945 = vmatmul.msk.bf16.vlgmr.msra.gmra.mxu3 %vm319_vm2, %v1337_v51  ;;  %v2395_v47 = vld [vmem:[%s2069_s25 + $0x28] sm:$0xff] }
  0xca   : > { %v2382_v19 = vpop.f32.mrf.mxu0  ;;  %v1348_v35 = vshrl.u32 %v2395_v47, 16  ;;  %v1351_v40 = vshll.u32 %v2395_v47, 16 }
  0xcc   : > { %v545_v14 = vpop.f32.mrf.mxu2  ;;  %v740_v63 = vpop.f32.mrf.mxu3  ;;  %v1353_v2 = vrot.slane %v1351_v40, 3 }
  0xcd   : > { %v590_v60 = vadd.f32 %v545_v14, %v436_v50  ;;  %v437_v1 = vpop.f32.mrf.mxu1  ;;  %1956 = vmatmul.msk.bf16.gmra.mxu0 %vm319_vm2, %v1523_v22  ;;  %v1350_v14 = vrot.slane %v1348_v35, 2 }
  0xce   : > { %v438_v4 = vadd.f32 %v437_v1, %v2307_v29 }
  0xcf   : > { %v780_v13 = vadd.f32 %v735_v11, %v590_v60  ;;  %v1354_v22 = vor.u32 %v1353_v2, %v1350_v14  ;;  %v1198_v14 = vrot.slane %v2395_v47, 2 }
  0xd1   : > { %v2386_v23 = vadd.f32 %v2320_v44, %v780_v13  ;;  %v1195_v44 = vsel %vm1002_vm7, %v1193_v31, %v1194_v45 }
  0xd2   : > { %v2399_v10 = vpop.f32.mrf.mxu0 }
  0xd4   : > { %v547_v29 = vpop.f32.mrf.mxu2  ;;  %v742_v32 = vpop.f32.mrf.mxu3 }
  0xd5   : > { %v591_v11 = vadd.f32 %v547_v29, %v438_v4  ;;  %v440_v46 = vpop.f32.mrf.mxu1  ;;  %v1006_v4 = vrot.slane %v2175_v38, 2  ;;  %v1355_v38 = vsel %vm1320_vm6, %v1345_v55, %v1354_v22 }
  0xd6   : > { %v441_v0 = vadd.f32 %v440_v46, %v2274_v62  ;;  %v2423_v46 = vld [vmem:[%s2069_s25 + $0x30] sm:$0xff] }
  0xd7   : > { %v781_v50 = vadd.f32 %v737_v43, %v591_v11  ;;  %v1524_v43 = vrot.slane %v2395_v47, 3  ;;  %v1197_v11 = vsel %vm1002_vm7, %v1194_v45, %v1196_v15  ;;  %v1360_v45 = vshll.u32 %v2423_v46, 16 }
  0xd8   : > { %1893 = vmatmul.msk.bf16.vlgmr.msra.gmra.mxu1 %vm319_vm2, %v1005_v16 }
  0xd9   : > { %1935 = vmatmul.msk.bf16.vlgmr.msra.gmra.mxu2 %vm319_vm2, %v1195_v44  ;;  %v2404_v51 = vadd.f32 %v2338_v61, %v781_v50  ;;  %1946 = vmatmul.msk.bf16.gmra.mxu3 %vm319_vm2, %v1346_v58  ;;  %v1525_v3 = vsel %vm1518_vm5, %v1522_v57, %v1524_v43  ;;  %v1362_v40 = vrot.slane %v1360_v45, 3 }
  0xda   : > { %v2411_v61 = vpop.f32.mrf.mxu0 }
  0xdc   : > { %v550_v62 = vpop.f32.mrf.mxu2  ;;  %v745_v34 = vpop.f32.mrf.mxu3 }
  0xdd   : > { %v592_v54 = vadd.f32 %v550_v62, %v441_v0  ;;  %v442_v48 = vpop.f32.mrf.mxu1  ;;  %1957 = vmatmul.msk.bf16.gmra.mxu0 %vm319_vm2, %v1525_v3 }
  0xde   : > { %v443_v1 = vadd.f32 %v442_v48, %v2286_v37  ;;  %v1007_v37 = vsel %vm1002_vm7, %v1004_v30, %v1006_v4  ;;  %v1357_v30 = vshrl.u32 %v2423_v46, 16  ;;  %v1008_v48 = vrot.slane %v2194_v27, 2 }
  0xdf   : > { %v782_v60 = vadd.f32 %v740_v63, %v592_v54 }
  0xe0   : > { %v1359_v0 = vrot.slane %v1357_v30, 2 }
  0xe1   : > { %v2415_v13 = vadd.f32 %v2356_v28, %v782_v60 }
  0xe2   : > { %v2427_v16 = vpop.f32.mrf.mxu0  ;;  %v1363_v60 = vor.u32 %v1362_v40, %v1359_v0 }
  0xe4   : > { %v552_v26 = vpop.f32.mrf.mxu2  ;;  %v747_v31 = vpop.f32.mrf.mxu3  ;;  %v1364_v27 = vsel %vm1320_vm6, %v1354_v22, %v1363_v60 }
  0xe5   : > { %v593_v63 = vadd.f32 %v552_v26, %v443_v1  ;;  %v445_v29 = vpop.f32.mrf.mxu1  ;;  %v1199_v26 = vsel %vm1002_vm7, %v1196_v15, %v1198_v14 }
  0xe6   : > { %v446_v28 = vadd.f32 %v445_v29, %v2303_v25 }
  0xe7   : > { %v783_v57 = vadd.f32 %v742_v32, %v593_v63  ;;  %v1526_v32 = vrot.slane %v2423_v46, 3  ;;  %v2451_v63 = vld [vmem:[%s2069_s25 + $0x38] sm:$0xff] }
  0xe8   : > { %1894 = vmatmul.msk.bf16.gmra.mxu1 %vm319_vm2, %v1007_v37  ;;  %v1369_v15 = vshll.u32 %v2451_v63, 16 }
  0xe9   : > { %1936 = vmatmul.msk.bf16.gmra.mxu2 %vm319_vm2, %v1197_v11  ;;  %v2432_v39 = vadd.f32 %v2370_v52, %v783_v57  ;;  %1947 = vmatmul.msk.bf16.gmra.mxu3 %vm319_vm2, %v1355_v38  ;;  %v1527_v62 = vsel %vm1518_vm5, %v1524_v43, %v1526_v32 }
  0xea   : > { %v2439_v52 = vpop.f32.mrf.mxu0  ;;  %v1371_v30 = vrot.slane %v1369_v15, 3  ;;  %v1012_v15 = vrot.slane %v2224_v21, 2  ;;  %v2510_v21 = vld [vmem:[%s2069_s25 + $0x48] sm:$0xff] }
  0xec   : > { %v555_v25 = vpop.f32.mrf.mxu2  ;;  %v750_v55 = vpop.f32.mrf.mxu3 }
  0xed   : > { %v594_v44 = vadd.f32 %v555_v25, %v446_v28  ;;  %v447_v50 = vpop.f32.mrf.mxu1  ;;  %1958 = vmatmul.msk.bf16.gmra.mxu0 %vm319_vm2, %v1527_v62 }
  0xee   : > { %v448_v35 = vadd.f32 %v447_v50, %v2318_v42  ;;  %v1009_v42 = vsel %vm1002_vm7, %v1006_v4, %v1008_v48  ;;  %v1366_v4 = vshrl.u32 %v2451_v63, 16  ;;  %v1200_v50 = vrot.slane %v2423_v46, 2 }
  0xef   : > { %v784_v58 = vadd.f32 %v745_v34, %v594_v44  ;;  %v1010_v44 = vrot.slane %v2209_v5, 2 }
  0xf0   : > { %v1368_v57 = vrot.slane %v1366_v4, 2  ;;  %v1201_v62 = vsel %vm1002_vm7, %v1198_v14, %v1200_v50 }
  0xf1   : > { %v2443_v54 = vadd.f32 %v2382_v19, %v784_v58  ;;  %v1011_v40 = vsel %vm1002_vm7, %v1008_v48, %v1010_v44 }
  0xf2   : > { %v2455_v29 = vpop.f32.mrf.mxu0  ;;  %v1372_v0 = vor.u32 %v1371_v30, %v1368_v57  ;;  %v1013_v30 = vsel %vm1002_vm7, %v1010_v44, %v1012_v15  ;;  %v1384_v44 = vshrl.u32 %v2510_v21, 16 }
  0xf4   : > { %v557_v1 = vpop.f32.mrf.mxu2  ;;  %v752_v2 = vpop.f32.mrf.mxu3 }
  0xf5   : > { %v595_v34 = vadd.f32 %v557_v1, %v448_v35  ;;  %v450_v3 = vpop.f32.mrf.mxu1 }
  0xf6   : > { %v451_v19 = vadd.f32 %v450_v3, %v2332_v56 }
  0xf7   : > { %v785_v43 = vadd.f32 %v747_v31, %v595_v34  ;;  %v1528_v31 = vrot.slane %v2451_v63, 3  ;;  %v2482_v34 = vld [vmem:[%s2069_s25 + $0x40] sm:$0xff] }
  0xf8   : > { %1895 = vmatmul.msk.bf16.gmra.mxu1 %vm319_vm2, %v1009_v42  ;;  %v1375_v48 = vshrl.u32 %v2482_v34, 16  ;;  %v1378_v14 = vshll.u32 %v2482_v34, 16 }
  0xf9   : > { %1937 = vmatmul.msk.bf16.gmra.mxu2 %vm319_vm2, %v1199_v26  ;;  %v2460_v47 = vadd.f32 %v2399_v10, %v785_v43  ;;  %1948 = vmatmul.msk.bf16.gmra.mxu3 %vm319_vm2, %v1364_v27  ;;  %v1529_v10 = vsel %vm1518_vm5, %v1526_v32, %v1528_v31  ;;  %v1373_v32 = vsel %vm1320_vm6, %v1363_v60, %v1372_v0  ;;  %v1530_v60 = vrot.slane %v2482_v34, 3 }
  0xfa   : > { %v2467_v45 = vpop.f32.mrf.mxu0  ;;  %v1380_v27 = vrot.slane %v1378_v14, 3  ;;  %v1204_v14 = vrot.slane %v2482_v34, 2 }
  0xfc   : > { %v560_v56 = vpop.f32.mrf.mxu2  ;;  %v755_v22 = vpop.f32.mrf.mxu3 }
  0xfd   : > { %v596_v37 = vadd.f32 %v560_v56, %v451_v19  ;;  %v452_v11 = vpop.f32.mrf.mxu1  ;;  %1959 = vmatmul.msk.bf16.gmra.mxu0 %vm319_vm2, %v1529_v10  ;;  %v1377_v19 = vrot.slane %v1375_v48, 2  ;;  %v1202_v56 = vrot.slane %v2451_v63, 2  ;;  %v1014_v48 = vrot.slane %v2239_v33, 2  ;;  %v2538_v33 = vld [vmem:[%s2069_s25 + $0x50] sm:$0xff] }
  0xfe   : > { %v453_v38 = vadd.f32 %v452_v11, %v2354_v12 }
  0xff   : > { %v786_v28 = vadd.f32 %v750_v55, %v596_v37  ;;  %v1381_v11 = vor.u32 %v1380_v27, %v1377_v19  ;;  %v1015_v27 = vsel %vm1002_vm7, %v1012_v15, %v1014_v48  ;;  %v1393_v15 = vshrl.u32 %v2538_v33, 16 }
 0x101   : > { %v2471_v25 = vadd.f32 %v2411_v61, %v786_v28 }
 0x102   : > { %v2479_v61 = vpop.f32.mrf.mxu0 }
 0x104   : > { %v562_v58 = vpop.f32.mrf.mxu2  ;;  %v757_v35 = vpop.f32.mrf.mxu3 }
 0x105   : > { %v597_v55 = vadd.f32 %v562_v58, %v453_v38  ;;  %v455_v12 = vpop.f32.mrf.mxu1 }
 0x106   : > { %v456_v46 = vadd.f32 %v455_v12, %v2282_v6 }
 0x107   : > { %v787_v1 = vadd.f32 %v752_v2, %v597_v55 }
 0x108   : > { %1896 = vmatmul.msk.bf16.gmra.mxu1 %vm319_vm2, %v1011_v40 }
 0x109   : > { %1938 = vmatmul.msk.bf16.gmra.mxu2 %vm319_vm2, %v1201_v62  ;;  %v2487_v5 = vadd.f32 %v2427_v16, %v787_v1  ;;  %1949 = vmatmul.msk.bf16.gmra.mxu3 %vm319_vm2, %v1373_v32  ;;  %v1531_v16 = vsel %vm1518_vm5, %v1528_v31, %v1530_v60  ;;  %v1203_v31 = vsel %vm1002_vm7, %v1200_v50, %v1202_v56  ;;  %v1387_v50 = vshll.u32 %v2510_v21, 16 }
 0x10a   : > { %v2494_v4 = vpop.f32.mrf.mxu0  ;;  %v1386_v1 = vrot.slane %v1384_v44, 2  ;;  %v1016_v44 = vrot.slane %v2254_v49, 2 }
 0x10b   : > { %v1389_v32 = vrot.slane %v1387_v50, 3  ;;  %v1206_v50 = vrot.slane %v2510_v21, 2 }
 0x10c   : > { %v565_v2 = vpop.f32.mrf.mxu2  ;;  %v760_v42 = vpop.f32.mrf.mxu3 }
 0x10d   : > { %v598_v3 = vadd.f32 %v565_v2, %v456_v46  ;;  %v457_v26 = vpop.f32.mrf.mxu1  ;;  %1960 = vmatmul.msk.bf16.gmra.mxu0 %vm319_vm2, %v1531_v16 }
 0x10e   : > { %v458_v37 = vadd.f32 %v457_v26, %v2297_v20 }
 0x10f   : > { %v788_v43 = vadd.f32 %v755_v22, %v598_v3  ;;  %v1390_v3 = vor.u32 %v1389_v32, %v1386_v1 }
 0x111   : > { %v2498_v6 = vadd.f32 %v2439_v52, %v788_v43  ;;  %v1382_v52 = vsel %vm1320_vm6, %v1372_v0, %v1381_v11  ;;  %v1532_v0 = vrot.slane %v2510_v21, 3 }
 0x112   : > { %v2507_v58 = vpop.f32.mrf.mxu0 }
 0x114   : > { %v567_v22 = vpop.f32.mrf.mxu2  ;;  %v762_v28 = vpop.f32.mrf.mxu3 }
 0x115   : > { %v599_v57 = vadd.f32 %v567_v22, %v458_v37  ;;  %v460_v38 = vpop.f32.mrf.mxu1 }
 0x116   : > { %v461_v63 = vadd.f32 %v460_v38, %v2314_v9 }
 0x117   : > { %v789_v10 = vadd.f32 %v757_v35, %v599_v57 }
 0x118   : > { %1897 = vmatmul.msk.bf16.gmra.mxu1 %vm319_vm2, %v1013_v30 }
 0x119   : > { %1939 = vmatmul.msk.bf16.gmra.mxu2 %vm319_vm2, %v1203_v31  ;;  %v2515_v20 = vadd.f32 %v2455_v29, %v789_v10  ;;  %1950 = vmatmul.msk.bf16.gmra.mxu3 %vm319_vm2, %v1382_v52  ;;  %v1533_v29 = vsel %vm1518_vm5, %v1530_v60, %v1532_v0  ;;  %v1205_v60 = vsel %vm1002_vm7, %v1202_v56, %v1204_v14  ;;  %v1396_v56 = vshll.u32 %v2538_v33, 16 }
 0x11a   : > { %v2522_v46 = vpop.f32.mrf.mxu0  ;;  %v1395_v31 = vrot.slane %v1393_v15, 2 }
 0x11b   : > { %v1398_v10 = vrot.slane %v1396_v56, 3  ;;  %v1018_v56 = vrot.slane %v2269_v59, 2 }
 0x11c   : > { %v570_v55 = vpop.f32.mrf.mxu2  ;;  %v765_v12 = vpop.f32.mrf.mxu3 }
 0x11d   : > { %v600_v35 = vadd.f32 %v570_v55, %v461_v63  ;;  %v462_v40 = vpop.f32.mrf.mxu1  ;;  %1961 = vmatmul.msk.bf16.gmra.mxu0 %vm319_vm2, %v1533_v29  ;;  %v1314_v63 = vld [vmem:[%s2069_s25 + $0x58] sm:$0x7]  ;;  %v1207_v29 = vsel %vm1002_vm7, %v1204_v14, %v1206_v50 }
 0x11e   : > { %v463_v2 = vadd.f32 %v462_v40, %v2328_v53 }
 0x11f   : > { %v790_v62 = vadd.f32 %v760_v42, %v600_v35  ;;  %v1399_v35 = vor.u32 %v1398_v10, %v1395_v31  ;;  %v1019_v10 = vsel %vm1002_vm7, %v1016_v44, %v1018_v56 }
 0x121   : > { %v2526_v9 = vadd.f32 %v2467_v45, %v790_v62  ;;  %v1391_v45 = vsel %vm1320_vm6, %v1381_v11, %v1390_v3  ;;  %v1534_v11 = vrot.slane %v2538_v33, 3 }
 0x122   : > { %v2535_v37 = vpop.f32.mrf.mxu0 }
 0x124   : > { %v572_v42 = vpop.f32.mrf.mxu2  ;;  %v767_v43 = vpop.f32.mrf.mxu3 }
 0x125   : > { %v601_v26 = vadd.f32 %v572_v42, %v463_v2  ;;  %v465_v19 = vpop.f32.mrf.mxu1  ;;  %v1400_v2 = vsel %vm1320_vm6, %v1390_v3, %v1399_v35 }
 0x126   : > { %v466_v34 = vadd.f32 %v465_v19, %v2352_v17 }
 0x127   : > { %v791_v16 = vadd.f32 %v762_v28, %v601_v26 }
 0x128   : > { %1898 = vmatmul.msk.bf16.gmra.mxu1 %vm319_vm2, %v1015_v27 }
 0x129   : > { %1940 = vmatmul.msk.bf16.gmra.mxu2 %vm319_vm2, %v1205_v60  ;;  %v2543_v53 = vadd.f32 %v2479_v61, %v791_v16  ;;  %1951 = vmatmul.msk.bf16.gmra.mxu3 %vm319_vm2, %v1391_v45  ;;  %v1535_v61 = vsel %vm1518_vm5, %v1532_v0, %v1534_v11  ;;  %v1017_v0 = vsel %vm1002_vm7, %v1014_v48, %v1016_v44 }
 0x12a   : > { %v2550_v52 = vpop.f32.mrf.mxu0 }
 0x12c   : > { %v575_v22 = vpop.f32.mrf.mxu2  ;;  %v770_v28 = vpop.f32.mrf.mxu3 }
 0x12d   : > { %v602_v57 = vadd.f32 %v575_v22, %v466_v34  ;;  %v467_v38 = vpop.f32.mrf.mxu1  ;;  %1962 = vmatmul.msk.bf16.gmra.mxu0 %vm319_vm2, %v1535_v61 }
 0x12e   : > { %v468_v55 = vadd.f32 %v467_v38, %v2361_v36 }
 0x12f   : > { %v792_v30 = vadd.f32 %v765_v12, %v602_v57  ;;  %v1318_v12 = vunpack.c.l.b16 %v1314_v63  ;;  %v1142_v63 = vld [vmem:[%s2069_s25 + $0x58] sm:$0x3] }
 0x131   : > { %v2555_v17 = vadd.f32 %v2494_v4, %v792_v30  ;;  %v1319_v42 = vpack.c.b16 %v1318_v12, %v1318_v12 }
 0x132   : > { %v975_v49 = vpop.f32.mrf.mxu0 }
 0x133   : > { %v1402_v26 = vshrl.u32 %v1319_v42, 16  ;;  %v1405_v48 = vshll.u32 %v1319_v42, 16  ;;  %v1536_v19 = vrot.slane %v1319_v42, 3 }
 0x134   : > { %v577_v40 = vpop.f32.mrf.mxu2  ;;  %v772_v1 = vpop.f32.mrf.mxu3 }
 0x135   : > { %v603_v62 = vadd.f32 %v577_v40, %v468_v55  ;;  %v470_v32 = vpop.f32.mrf.mxu1  ;;  %v1404_v16 = vrot.slane %v1402_v26, 2  ;;  %v1407_v45 = vrot.slane %v1405_v48, 3  ;;  %v1537_v15 = vsel %vm1518_vm5, %v1534_v11, %v1536_v19 }
 0x136   : > { %v471_v21 = vadd.f32 %v470_v32, %v2284_v7  ;;  %v1208_v7 = vrot.slane %v2538_v33, 2  ;;  %v1182_v33 = vunpack.c.l.b16 %v1142_v63  ;;  %v1020_v32 = vrot.slane %v2294_v18, 2 }
 0x137   : > { %v793_v4 = vadd.f32 %v767_v43, %v603_v62  ;;  %v1408_v57 = vor.u32 %v1407_v45, %v1404_v16 }
 0x138   : > { %1899 = vmatmul.msk.bf16.gmra.mxu1 %vm319_vm2, %v1017_v0  ;;  %v1209_v11 = vsel %vm1002_vm7, %v1206_v50, %v1208_v7  ;;  %v1192_v62 = vpack.c.b16 %v1182_v33, %v1182_v33 }
 0x139   : > { %1941 = vmatmul.msk.bf16.gmra.mxu2 %vm319_vm2, %v1207_v29  ;;  %v2567_v36 = vadd.f32 %v2507_v58, %v793_v4  ;;  %1952 = vmatmul.msk.bf16.gmra.mxu3 %vm319_vm2, %v1400_v2 }
 0x13a   : > { %v1577_v34 = vpop.f32.mrf.mxu0  ;;  %v1210_v0 = vrot.slane %v1192_v62, 2 }
 0x13c   : > { %v580_v14 = vpop.f32.mrf.mxu2  ;;  %v775_v27 = vpop.f32.mrf.mxu3  ;;  %v1211_v26 = vsel %vm1002_vm7, %v1208_v7, %v1210_v0 }
 0x13d   : > { %v604_v43 = vadd.f32 %v580_v14, %v471_v21  ;;  %v472_v3 = vpop.f32.mrf.mxu1  ;;  %1963 = vmatmul.msk.bf16.gmra.mxu0 %vm319_vm2, %v1537_v15 }
 0x13e   : > { %v473_v22 = vadd.f32 %v472_v3, %v2301_v8 }
 0x13f   : > { %v794_v60 = vadd.f32 %v770_v28, %v604_v43 }
 0x141   : > { %v2573_v58 = vadd.f32 %v2522_v46, %v794_v60  ;;  %v1409_v46 = vsel %vm1320_vm6, %v1399_v35, %v1408_v57  ;;  %v2605_v60 = vld [vmem:[%s2689_s2] ss:$0 sm:$0xff] }
 0x142   : > { %v1579_v59 = vpop.f32.mrf.mxu0 }
 0x144   : > { %v582_v38 = vpop.f32.mrf.mxu2  ;;  %v777_v30 = vpop.f32.mrf.mxu3 }
 0x145   : > { %v605_v28 = vadd.f32 %v582_v38, %v473_v22  ;;  %v475_v31 = vpop.f32.mrf.mxu1 }
 0x146   : > { %v476_v55 = vadd.f32 %v475_v31, %v2316_v41  ;;  %v1021_v41 = vsel %vm1002_vm7, %v1018_v56, %v1020_v32 }
 0x147   : > { %v795_v61 = vadd.f32 %v772_v1, %v605_v28 }
 0x148   : > { %1900 = vmatmul.msk.bf16.gmra.mxu1 %vm319_vm2, %v1019_v10 }
 0x149   : > { %1942 = vmatmul.msk.bf16.gmra.mxu2 %vm319_vm2, %v1209_v11  ;;  %v2586_v8 = vadd.f32 %v2535_v37, %v795_v61  ;;  %1953 = vmatmul.msk.bf16.gmra.mxu3 %vm319_vm2, %v1409_v46 }
 0x14a   : > { %v1582_v29 = vpop.f32.mrf.mxu0 }
 0x14c   : > { %v585_v44 = vpop.f32.mrf.mxu2  ;;  %v1449_v50 = vpop.f32.mrf.mxu3 }
 0x14d   : > { %v606_v12 = vadd.f32 %v585_v44, %v476_v55  ;;  %v477_v40 = vpop.f32.mrf.mxu1 }
 0x14e   : > { %v478_v37 = vadd.f32 %v477_v40, %v2330_v24 }
 0x14f   : > { %v796_v35 = vadd.f32 %v775_v27, %v606_v12 }
 0x151   : > { %v2591_v1 = vadd.f32 %v2550_v52, %v796_v35 }
 0x152   : > { %v1584_v24 = vpop.f32.mrf.mxu0 }
 0x154   : > { %v587_v4 = vpop.f32.mrf.mxu2  ;;  %v1451_v42 = vpop.f32.mrf.mxu3 }
 0x155   : > { %v607_v2 = vadd.f32 %v587_v4, %v478_v37  ;;  %v1061_v21 = vpop.f32.mrf.mxu1 }
 0x156   : > { %v1106_v18 = vadd.f32 %v1061_v21, %v2386_v23 }
 0x157   : > { %v797_v48 = vadd.f32 %v777_v30, %v607_v2 }
 0x158   : > { %1901 = vmatmul.msk.bf16.gmra.mxu1 %vm319_vm2, %v1021_v41 }
 0x159   : > { %1943 = vmatmul.msk.bf16.gmra.mxu2 %vm319_vm2, %v1211_v26  ;;  %v2599_v52 = vadd.f32 %v975_v49, %v797_v48 }
 0x15a   : > { %v1587_v57 = vpop.f32.mrf.mxu0 }
 0x15c   : > { %v1251_v19 = vpop.f32.mrf.mxu2  ;;  %v1454_v43 = vpop.f32.mrf.mxu3 }
 0x15d   : > { %v1296_v14 = vadd.f32 %v1251_v19, %v1106_v18  ;;  %v1063_v27 = vpop.f32.mrf.mxu1 }
 0x15e   : > { %v1107_v49 = vadd.f32 %v1063_v27, %v2404_v51 }
 0x15f   : > { %v1494_v3 = vadd.f32 %v1449_v50, %v1296_v14 }
 0x161   : > { %v1622_v16 = vadd.f32 %v1577_v34, %v1494_v3 }
 0x162   : > { %v1589_v55 = vpop.f32.mrf.mxu0 }
 0x163   : > { %v1644_v45 = vadd.f32 %v2605_v60, %v1622_v16 }
 0x164   : > { %v1253_v15 = vpop.f32.mrf.mxu2  ;;  %v1456_v7 = vpop.f32.mrf.mxu3 }
 0x165   : > { %v1662_v56 = vmax.f32 %v1644_v45, 0.0  ;;  %v1297_v23 = vadd.f32 %v1253_v15, %v1107_v49  ;;  %v1066_v22 = vpop.f32.mrf.mxu1 }
 0x166   : > { %v1108_v30 = vadd.f32 %v1066_v22, %v2415_v13 }
 0x167   : > { %v1680_v34 = vpack.c.bf16 %v1662_v56, %v1662_v56  ;;  %v1495_v38 = vadd.f32 %v1451_v42, %v1297_v23 }
 0x169   : > { %1699 = vst.msk [vmem:[%s2613_s16] sm:$0xf] %vm1698_vm8, %v1680_v34  ;;  %v1623_v28 = vadd.f32 %v1579_v59, %v1495_v38 }
 0x16a   : > { %v1592_v4 = vpop.f32.mrf.mxu0 }
 0x16b   : > { %v1645_v51 = vadd.f32 %v2605_v60, %v1623_v28 }
 0x16c   : > { %v1256_v31 = vpop.f32.mrf.mxu2  ;;  %v1459_v61 = vpop.f32.mrf.mxu3 }
 0x16d   : > { %v1663_v10 = vmax.f32 %v1645_v51, 0.0  ;;  %v1298_v11 = vadd.f32 %v1256_v31, %v1108_v30  ;;  %v1068_v46 = vpop.f32.mrf.mxu1 }
 0x16e   : > { %v1109_v59 = vadd.f32 %v1068_v46, %v2432_v39 }
 0x16f   : > { %v1681_v63 = vpack.c.bf16 %v1663_v10, %v1663_v10  ;;  %v1496_v33 = vadd.f32 %v1454_v43, %v1298_v11 }
 0x171   : > { %1700 = vst.msk [vmem:[%s2613_s16 + $0x4] sm:$0xf] %vm1698_vm8, %v1681_v63  ;;  %v1624_v44 = vadd.f32 %v1582_v29, %v1496_v33 }
 0x172   : > { %v1594_v27 = vpop.f32.mrf.mxu0 }
 0x173   : > { %v1646_v12 = vadd.f32 %v2605_v60, %v1624_v44 }
 0x174   : > { %v1258_v50 = vpop.f32.mrf.mxu2  ;;  %v1461_v13 = vpop.f32.mrf.mxu3 }
 0x175   : > { %v1664_v40 = vmax.f32 %v1646_v12, 0.0  ;;  %v1299_v62 = vadd.f32 %v1258_v50, %v1109_v59  ;;  %v1071_v35 = vpop.f32.mrf.mxu1 }
 0x176   : > { %v1110_v29 = vadd.f32 %v1071_v35, %v2443_v54 }
 0x177   : > { %v1682_v32 = vpack.c.bf16 %v1664_v40, %v1664_v40  ;;  %v1497_v0 = vadd.f32 %v1456_v7, %v1299_v62 }
 0x179   : > { %1701 = vst.msk [vmem:[%s2613_s16 + $0x8] sm:$0xf] %vm1698_vm8, %v1682_v32  ;;  %v1625_v37 = vadd.f32 %v1584_v24, %v1497_v0 }
 0x17a   : > { %v1597_v28 = vpop.f32.mrf.mxu0 }
 0x17b   : > { %v1647_v2 = vadd.f32 %v2605_v60, %v1625_v37 }
 0x17c   : > { %v1261_v42 = vpop.f32.mrf.mxu2  ;;  %v1464_v39 = vpop.f32.mrf.mxu3 }
 0x17d   : > { %v1665_v21 = vmax.f32 %v1647_v2, 0.0  ;;  %v1300_v41 = vadd.f32 %v1261_v42, %v1110_v29  ;;  %v1073_v26 = vpop.f32.mrf.mxu1 }
 0x17e   : > { %v1111_v24 = vadd.f32 %v1073_v26, %v2460_v47 }
 0x17f   : > { %v1683_v48 = vpack.c.bf16 %v1665_v21, %v1665_v21  ;;  %v1498_v18 = vadd.f32 %v1459_v61, %v1300_v41 }
 0x181   : > { %1702 = vst.msk [vmem:[%s2613_s16 + $0xc] sm:$0xf] %vm1698_vm8, %v1683_v48  ;;  %v1626_v19 = vadd.f32 %v1587_v57, %v1498_v18 }
 0x182   : > { %v1599_v12 = vpop.f32.mrf.mxu0 }
 0x183   : > { %v1648_v14 = vadd.f32 %v2605_v60, %v1626_v19 }
 0x184   : > { %v1263_v43 = vpop.f32.mrf.mxu2  ;;  %v1466_v54 = vpop.f32.mrf.mxu3 }
 0x185   : > { %v1666_v3 = vmax.f32 %v1648_v14, 0.0  ;;  %v1301_v16 = vadd.f32 %v1263_v43, %v1111_v24  ;;  %v1076_v45 = vpop.f32.mrf.mxu1 }
 0x186   : > { %v1112_v7 = vadd.f32 %v1076_v45, %v2471_v25 }
 0x187   : > { %v1684_v49 = vpack.c.bf16 %v1666_v3, %v1666_v3  ;;  %v1499_v15 = vadd.f32 %v1461_v13, %v1301_v16 }
 0x189   : > { %1703 = vst.msk [vmem:[%s2613_s16 + $0x10] sm:$0xf] %vm1698_vm8, %v1684_v49  ;;  %v1627_v56 = vadd.f32 %v1589_v55, %v1499_v15 }
 0x18a   : > { %v1602_v2 = vpop.f32.mrf.mxu0 }
 0x18b   : > { %v1649_v23 = vadd.f32 %v2605_v60, %v1627_v56 }
 0x18c   : > { %v1266_v22 = vpop.f32.mrf.mxu2  ;;  %v1469_v47 = vpop.f32.mrf.mxu3 }
 0x18d   : > { %v1667_v57 = vmax.f32 %v1649_v23, 0.0  ;;  %v1302_v34 = vadd.f32 %v1266_v22, %v1112_v7  ;;  %v1078_v38 = vpop.f32.mrf.mxu1 }
 0x18e   : > { %v1113_v11 = vadd.f32 %v1078_v38, %v2487_v5 }
 0x18f   : > { %v1685_v51 = vpack.c.bf16 %v1667_v57, %v1667_v57  ;;  %v1500_v30 = vadd.f32 %v1464_v39, %v1302_v34 }
 0x191   : > { %1704 = vst.msk [vmem:[%s2613_s16 + $0x14] sm:$0xf] %vm1698_vm8, %v1685_v51  ;;  %v1628_v31 = vadd.f32 %v1592_v4, %v1500_v30 }
 0x193   : > { %v1650_v10 = vadd.f32 %v2605_v60, %v1628_v31 }
 0x194   : > { %v1268_v61 = vpop.f32.mrf.mxu2  ;;  %v1471_v33 = vpop.f32.mrf.mxu3 }
 0x195   : > { %v1668_v46 = vmax.f32 %v1650_v10, 0.0  ;;  %v1303_v63 = vadd.f32 %v1268_v61, %v1113_v11  ;;  %v1081_v25 = vpop.f32.mrf.mxu1 }
 0x196   : > { %v1114_v40 = vadd.f32 %v1081_v25, %v2498_v6 }
 0x197   : > { %v1686_v55 = vpack.c.bf16 %v1668_v46, %v1668_v46  ;;  %v1501_v44 = vadd.f32 %v1466_v54, %v1303_v63 }
 0x199   : > { %1705 = vst.msk [vmem:[%s2613_s16 + $0x18] sm:$0xf] %vm1698_vm8, %v1686_v55  ;;  %v1629_v59 = vadd.f32 %v1594_v27, %v1501_v44  ;;  %v1604_v27 = vpop.f32.mrf.mxu0 }
 0x19b   : > { %v1651_v50 = vadd.f32 %v2605_v60, %v1629_v59 }
 0x19c   : > { %v1271_v62 = vpop.f32.mrf.mxu2  ;;  %v1474_v37 = vpop.f32.mrf.mxu3 }
 0x19d   : > { %v1669_v13 = vmax.f32 %v1651_v50, 0.0  ;;  %v1304_v35 = vadd.f32 %v1271_v62, %v1114_v40  ;;  %v1083_v5 = vpop.f32.mrf.mxu1 }
 0x19e   : > { %v1115_v42 = vadd.f32 %v1083_v5, %v2515_v20 }
 0x19f   : > { %v1687_v32 = vpack.c.bf16 %v1669_v13, %v1669_v13  ;;  %v1502_v0 = vadd.f32 %v1469_v47, %v1304_v35 }
 0x1a1   : > { %1706 = vst.msk [vmem:[%s2613_s16 + $0x1c] sm:$0xf] %vm1698_vm8, %v1687_v32  ;;  %v1630_v4 = vadd.f32 %v1597_v28, %v1502_v0  ;;  %v1607_v34 = vpop.f32.mrf.mxu0 }
 0x1a3   : > { %v1652_v29 = vadd.f32 %v2605_v60, %v1630_v4 }
 0x1a4   : > { %v1273_v21 = vpop.f32.mrf.mxu2  ;;  %v1476_v19 = vpop.f32.mrf.mxu3 }
 0x1a5   : > { %v1670_v41 = vmax.f32 %v1652_v29, 0.0  ;;  %v1305_v39 = vadd.f32 %v1273_v21, %v1115_v42  ;;  %v1086_v6 = vpop.f32.mrf.mxu1 }
 0x1a6   : > { %v1116_v24 = vadd.f32 %v1086_v6, %v2526_v9 }
 0x1a7   : > { %v1688_v26 = vpack.c.bf16 %v1670_v41, %v1670_v41  ;;  %v1503_v48 = vadd.f32 %v1471_v33, %v1305_v39 }
 0x1a9   : > { %1707 = vst.msk [vmem:[%s2613_s16 + $0x20] sm:$0xf] %vm1698_vm8, %v1688_v26  ;;  %v1631_v18 = vadd.f32 %v1599_v12, %v1503_v48  ;;  %v1609_v25 = vpop.f32.mrf.mxu0 }
 0x1ab   : > { %v1653_v14 = vadd.f32 %v2605_v60, %v1631_v18 }
 0x1ac   : > { %v1276_v43 = vpop.f32.mrf.mxu2  ;;  %v1479_v7 = vpop.f32.mrf.mxu3 }
 0x1ad   : > { %v1671_v3 = vmax.f32 %v1653_v14, 0.0  ;;  %v1306_v16 = vadd.f32 %v1276_v43, %v1116_v24  ;;  %v1088_v20 = vpop.f32.mrf.mxu1 }
 0x1ae   : > { %v1117_v56 = vadd.f32 %v1088_v20, %v2543_v53 }
 0x1af   : > { %v1689_v54 = vpack.c.bf16 %v1671_v3, %v1671_v3  ;;  %v1504_v45 = vadd.f32 %v1474_v37, %v1306_v16 }
 0x1b1   : > { %1708 = vst.msk [vmem:[%s2613_s16 + $0x24] sm:$0xf] %vm1698_vm8, %v1689_v54  ;;  %v1632_v49 = vadd.f32 %v1602_v2, %v1504_v45  ;;  %v1612_v5 = vpop.f32.mrf.mxu0 }
 0x1b3   : > { %v1654_v15 = vadd.f32 %v2605_v60, %v1632_v49 }
 0x1b4   : > { %v1278_v23 = vpop.f32.mrf.mxu2  ;;  %v1481_v61 = vpop.f32.mrf.mxu3 }
 0x1b5   : > { %v1672_v22 = vmax.f32 %v1654_v15, 0.0  ;;  %v1307_v57 = vadd.f32 %v1278_v23, %v1117_v56  ;;  %v1091_v9 = vpop.f32.mrf.mxu1 }
 0x1b6   : > { %v1118_v30 = vadd.f32 %v1091_v9, %v2555_v17 }
 0x1b7   : > { %v1690_v47 = vpack.c.bf16 %v1672_v22, %v1672_v22  ;;  %v1505_v38 = vadd.f32 %v1476_v19, %v1307_v57 }
 0x1b9   : > { %1709 = vst.msk [vmem:[%s2613_s16 + $0x28] sm:$0xf] %vm1698_vm8, %v1690_v47  ;;  %v1633_v28 = vadd.f32 %v1604_v27, %v1505_v38  ;;  %v1614_v26 = vpop.f32.mrf.mxu0 }
 0x1bb   : > { %v1655_v51 = vadd.f32 %v2605_v60, %v1633_v28 }
 0x1bc   : > { %v1281_v31 = vpop.f32.mrf.mxu2  ;;  %v1484_v13 = vpop.f32.mrf.mxu3 }
 0x1bd   : > { %v1673_v10 = vmax.f32 %v1655_v51, 0.0  ;;  %v1308_v11 = vadd.f32 %v1281_v31, %v1118_v30  ;;  %v1093_v53 = vpop.f32.mrf.mxu1 }
 0x1be   : > { %v1119_v44 = vadd.f32 %v1093_v53, %v2567_v36 }
 0x1bf   : > { %v1691_v46 = vpack.c.bf16 %v1673_v10, %v1673_v10  ;;  %v1506_v63 = vadd.f32 %v1479_v7, %v1308_v11 }
 0x1c1   : > { %1710 = vst.msk [vmem:[%s2613_s16 + $0x2c] sm:$0xf] %vm1698_vm8, %v1691_v46  ;;  %v1634_v33 = vadd.f32 %v1607_v34, %v1506_v63 }
 0x1c3   : > { %v1656_v55 = vadd.f32 %v2605_v60, %v1634_v33 }
 0x1c4   : > { %v1283_v12 = vpop.f32.mrf.mxu2  ;;  %v1486_v41 = vpop.f32.mrf.mxu3 }
 0x1c5   : > { %v1674_v59 = vmax.f32 %v1656_v55, 0.0  ;;  %v1309_v50 = vadd.f32 %v1283_v12, %v1119_v44  ;;  %v1096_v17 = vpop.f32.mrf.mxu1 }
 0x1c6   : > { %v1120_v0 = vadd.f32 %v1096_v17, %v2573_v58 }
 0x1c7   : > { %v1692_v40 = vpack.c.bf16 %v1674_v59, %v1674_v59  ;;  %v1507_v62 = vadd.f32 %v1481_v61, %v1309_v50 }
 0x1c9   : > { %1711 = vst.msk [vmem:[%s2613_s16 + $0x30] sm:$0xf] %vm1698_vm8, %v1692_v40  ;;  %v1635_v35 = vadd.f32 %v1609_v25, %v1507_v62 }
 0x1cb   : > { %v1657_v32 = vadd.f32 %v2605_v60, %v1635_v35 }
 0x1cc   : > { %v1286_v37 = vpop.f32.mrf.mxu2  ;;  %v1489_v16 = vpop.f32.mrf.mxu3 }
 0x1cd   : > { %v1675_v4 = vmax.f32 %v1657_v32, 0.0  ;;  %v1310_v2 = vadd.f32 %v1286_v37, %v1120_v0  ;;  %v1098_v36 = vpop.f32.mrf.mxu1 }
 0x1ce   : > { %v1121_v6 = vadd.f32 %v1098_v36, %v2586_v8  ;;  %v1617_v8 = vpop.f32.mrf.mxu0 }
 0x1cf   : > { %v1693_v29 = vpack.c.bf16 %v1675_v4, %v1675_v4  ;;  %v1508_v42 = vadd.f32 %v1484_v13, %v1310_v2 }
 0x1d1   : > { %1712 = vst.msk [vmem:[%s2613_s16 + $0x34] sm:$0xf] %vm1698_vm8, %v1693_v29  ;;  %v1636_v21 = vadd.f32 %v1612_v5, %v1508_v42 }
 0x1d3   : > { %v1658_v39 = vadd.f32 %v2605_v60, %v1636_v21 }
 0x1d4   : > { %v1288_v48 = vpop.f32.mrf.mxu2  ;;  %v1491_v34 = vpop.f32.mrf.mxu3 }
 0x1d5   : > { %v1676_v18 = vmax.f32 %v1658_v39, 0.0  ;;  %v1311_v19 = vadd.f32 %v1288_v48, %v1121_v6  ;;  %v1101_v58 = vpop.f32.mrf.mxu1 }
 0x1d6   : > { %v1122_v3 = vadd.f32 %v1101_v58, %v2591_v1  ;;  %v1619_v28 = vpop.f32.mrf.mxu0 }
 0x1d7   : > { %v1694_v14 = vpack.c.bf16 %v1676_v18, %v1676_v18  ;;  %v1509_v24 = vadd.f32 %v1486_v41, %v1311_v19 }
 0x1d9   : > { %1713 = vst.msk [vmem:[%s2613_s16 + $0x38] sm:$0xf] %vm1698_vm8, %v1694_v14  ;;  %v1637_v43 = vadd.f32 %v1614_v26, %v1509_v24 }
 0x1db   : > { %v1659_v27 = vadd.f32 %v2605_v60, %v1637_v43 }
 0x1dc   : > { %v1291_v20 = vpop.f32.mrf.mxu2 }
 0x1dd   : > { %v1677_v54 = vmax.f32 %v1659_v27, 0.0  ;;  %v1312_v45 = vadd.f32 %v1291_v20, %v1122_v3  ;;  %v1103_v56 = vpop.f32.mrf.mxu1 }
 0x1de   : > { %v1123_v22 = vadd.f32 %v1103_v56, %v2599_v52 }
 0x1df   : > { %v1695_v49 = vpack.c.bf16 %v1677_v54, %v1677_v54  ;;  %v1510_v15 = vadd.f32 %v1489_v16, %v1312_v45 }
 0x1e1   : > { %1714 = vst.msk [vmem:[%s2613_s16 + $0x3c] sm:$0xf] %vm1698_vm8, %v1695_v49  ;;  %v1638_v23 = vadd.f32 %v1617_v8, %v1510_v15 }
 0x1e3   : > { %v1660_v7 = vadd.f32 %v2605_v60, %v1638_v23 }
 0x1e4   : > { %v1293_v57 = vpop.f32.mrf.mxu2 }
 0x1e5   : > { %v1678_v9 = vmax.f32 %v1660_v7, 0.0  ;;  %v1313_v1 = vadd.f32 %v1293_v57, %v1123_v22 }
 0x1e7   : > { %v1696_v47 = vpack.c.bf16 %v1678_v9, %v1678_v9  ;;  %v1511_v38 = vadd.f32 %v1491_v34, %v1313_v1 }
 0x1e9   : > { %1715 = vst.msk [vmem:[%s2613_s16 + $0x40] sm:$0xf] %vm1698_vm8, %v1696_v47  ;;  %v1639_v51 = vadd.f32 %v1619_v28, %v1511_v38 }
 0x1eb   : > { %v1661_v30 = vadd.f32 %v2605_v60, %v1639_v51 }
 0x1ed   : > { %v1679_v31 = vmax.f32 %v1661_v30, 0.0 }
 0x1ef   : > { %v1697_v10 = vpack.c.bf16 %v1679_v31, %v1679_v31 }
 0x1f1   : > { %1716 = vst.msk [vmem:[%s2613_s16 + $0x44] sm:$0xf] %vm1698_vm8, %v1697_v10 }
 0x1f2 PF: > { %s13_s12 = sadd.s32 1, %s2017_s12  }
 0x1f3   : > { %p10_p4 = scmp.ge.s32.totalorder %s13_s12, 4  }
 0x1f5   :  { %12 = sbr.rel (!%p10_p4) target bundleno = 1 (0x1), region = 70 }

// kernel: _lambda_.12
= control target key start
LH: loop header
LB: loop body
LE: loop exit
PB: predicated region body
PF: predicated region fallthrough
CT: control target
= control target key end

     0   :  { %s2263_s12 = smov 0   ;;  %s2929_s0 = inlined_call_operand.vmem [shape: bf16[2,182,32], index: 0, kind: input, shape index: {}]   ;;  %s2930_s1 = inlined_call_operand.vmem [shape: bf16[9,32,64], index: 1, kind: input, shape index: {}]   ;;  %s2931_s2 = inlined_call_operand.vmem [shape: f32[1,64], index: 2, kind: input, shape index: {}]   ;;  %s2932_s3 = inlined_call_operand.vmem [shape: bf16[2,144,64], index: 3, kind: output, shape index: {}]  }
   0x1 LB: > { %s1879_s13 = sadd.s32 4294967295, %s2241_s12   ;;  %p1883_p0 = scmp.ge.s32.totalorder %s2241_s12, 1  ;;  %s2241_s12 = sphi %s2263_s12, %s13_s12  }
   0x2   : > { %p137_p1 = scmp.lt.s32.totalorder %s2241_s12, 3 }
   0x4   : > { %p138_p2 = pnand %p1883_p0, %p137_p1 }
   0x5   : > { %p161_p3 = scmp.lt.s32.totalorder (!%p138_p2), %s1879_s13, 1 }
   0x6   : > { %141 = sbr.rel (%p138_p2) target bundleno = 498 (0x1f2), region = 32 }
   0xb   : > { %v2180_v0 = vld [vmem:[%s2930_s1 + $0x18] sm:$0xff]  ;;  %v2179_v1 = vld [vmem:[%s2930_s1 + $0x10] sm:$0xff]  ;;  %s2934_s13 = smov (!%p161_p3, %s1879_s13), 1  ;;  %v2182_v2 = vld [vmem:[%s2930_s1 + $0x28] sm:$0xff]  ;;  %vm248_vm0 = vsmask.f32 7424 }
   0xc   : > { %2218 = vmatpush.bf16.msra.mxu1 %v2180_v0  ;;  %2219 = vmatpush.bf16.msra.mxu2 %v2180_v0  ;;  %v2178_v3 = vld [vmem:[%s2930_s1 + $0x8] sm:$0xff]  ;;  %s2224_s22 = smul.u32 92, %s2934_s13  ;;  %v2192_v4 = vld [vmem:[%s2930_s1 + $0x38] sm:$0xff]  ;;  %v2181_v5 = vld [vmem:[%s2930_s1 + $0x20] sm:$0xff]  ;;  %vm337_vm1 = vcmask 261120   ;;  %vm512_vm3 = vcmask 1046528  }
   0xd   : > { %2220 = vmatpush.bf16.msra.mxu3 %v2180_v0  ;;  %371 = vmatpush.bf16.msra.mxu0 %v2180_v0  ;;  %v2177_v6 = vld [vmem:[%s2930_s1] sm:$0xff]  ;;  %v2191_v39 = vld [vmem:[%s2930_s1 + $0x30] sm:$0xff]  ;;  %v2194_v41 = vld [vmem:[%s2930_s1 + $0x48] sm:$0xff]  ;;  %vm854_vm2 = vsmask.f32 6400  ;;  %vm1616_vm4 = vcmask 1044480  }
   0xe   : > { %s2292_s27 = scalar_lea.vmem %s2929_s0, %s2224_s22  ;;  %v2193_v47 = vld [vmem:[%s2930_s1 + $0x40] sm:$0xff]  ;;  %vm1406_vm5 = vsmask.f32 5376  ;;  %vm1064_vm6 = vcmask 1045504   ;;  %s2225_s4 = smul.u32 72, %s2934_s13  ;;  %vm1805_vm7 = vcmask 519168  }
   0xf   : > { %v2301_v7 = vld [vmem:[%s2292_s27 + $0x8] sm:$0xff]  ;;  %v2304_v8 = vld [vmem:[%s2292_s27 + $0x10] sm:$0xff]  ;;  %v2307_v9 = vld [vmem:[%s2292_s27 + $0x20] sm:$0xff] }
  0x10   : > { %2221 = vmatpush.bf16.msra.mxu1 %v2179_v1  ;;  %2222 = vmatpush.bf16.msra.mxu2 %v2179_v1  ;;  %v2310_v10 = vld [vmem:[%s2292_s27 + $0x28] sm:$0xff]  ;;  %v2313_v11 = vld [vmem:[%s2292_s27 + $0x38] sm:$0xff]  ;;  %v2316_v12 = vld [vmem:[%s2292_s27 + $0x40] sm:$0xff]  ;;  %v257_v13 = vshll.u32 %v2301_v7, 16  ;;  %v261_v14 = vshrl.u32 %v2301_v7, 16  ;;  %v265_v15 = vshll.u32 %v2304_v8, 16  ;;  %s2855_s7 = scalar_lea.vmem %s2932_s3, %s2225_s4 }
  0x11   : > { %2223 = vmatpush.bf16.msra.mxu3 %v2179_v1  ;;  %372 = vmatpush.bf16.msra.mxu0 %v2179_v1  ;;  %v281_v16 = vshll.u32 %v2307_v9, 16  ;;  %v285_v17 = vshrl.u32 %v2307_v9, 16  ;;  %v289_v18 = vshll.u32 %v2310_v10, 16  ;;  %v305_v19 = vshll.u32 %v2313_v11, 16  ;;  %v194_v27 = vld [vmem:[%s2292_s27 + $0x48] sm:$0x1] }
  0x12   : > { %v309_v20 = vshrl.u32 %v2313_v11, 16  ;;  %v259_v21 = vrot.slane %v257_v13, 1  ;;  %v267_v22 = vrot.slane %v265_v15, 1  ;;  %v313_v24 = vshll.u32 %v2316_v12, 16  ;;  %v2337_v35 = vld [vmem:[%s2292_s27] sm:$0xff]   ;;  %v2343_v37 = vld [vmem:[%s2292_s27 + $0x18] sm:$0xff] }
  0x13   : > { %v2326_v23 = vrot.slane %v281_v16, 1  ;;  %v291_v25 = vrot.slane %v289_v18, 1  ;;  %v2329_v26 = vrot.slane %v305_v19, 1  ;;  %v237_v34 = vunpack.c.l.b16 %v194_v27  ;;  %v2346_v38 = vld [vmem:[%s2292_s27 + $0x30] sm:$0xff]  ;;  %v643_v44 = vld [vmem:[%s2292_s27 + $0x8] sm:$0xe] }
  0x14   : > { %577 = vmatpush.bf16.msrb.mxu2 %v2182_v2  ;;  %455 = vmatpush.bf16.msrb.mxu1 %v2178_v3  ;;  %v263_v28 = vor.u32 %v261_v14, %v259_v21  ;;  %v315_v30 = vrot.slane %v313_v24, 1  ;;  %v250_v42 = vshrl.u32 %v2337_v35, 16  ;;  %v252_v43 = vshll.u32 %v2337_v35, 16  ;;  %v2361_v45 = vld [vmem:[%s2292_s27 + $0xc] sm:$0xf]  ;;  %v2376_v0 = vld [vmem:[%s2292_s27 + $0x10] sm:$0xff] }
  0x15   : > { %779 = vmatpush.bf16.msrb.mxu3 %v2192_v4  ;;  %v287_v29 = vor.u32 %v285_v17, %v2326_v23  ;;  %v311_v31 = vor.u32 %v309_v20, %v2329_v26  ;;  %v2352_v40 = vpack.c.b16 %v237_v34, %v237_v34  ;;  %v269_v46 = vshrl.u32 %v2304_v8, 16  ;;  %989 = vmatpush.bf16.msrb.mxu0 %v2194_v41  ;;  %v2206_v19 = vld [vmem:[%s2930_s1 + $0x68] sm:$0xff]  ;;  %v2208_v20 = vld [vmem:[%s2930_s1 + $0x78] sm:$0xff] }
  0x16   : > { %v268_v32 = vsel %vm248_vm0, %v263_v28, %v267_v22  ;;  %v273_v48 = vshll.u32 %v2343_v37, 16  ;;  %v293_v49 = vshrl.u32 %v2310_v10, 16  ;;  %v297_v50 = vshll.u32 %v2346_v38, 16 }
  0x17   : > { %v292_v33 = vsel %vm248_vm0, %v287_v29, %v291_v25  ;;  %1931 = vmatmul.msk.bf16.vlgmr.msra.gmra.mxu1 %vm337_vm1, %v268_v32  ;;  %v316_v36 = vsel %vm248_vm0, %v311_v31, %v315_v30  ;;  %v254_v51 = vrot.slane %v252_v43, 1  ;;  %v317_v52 = vshrl.u32 %v2316_v12, 16  ;;  %v2405_v32 = vld [vmem:[%s2292_s27 + $0x18] sm:$0xff] }
  0x18   : > { %578 = vmatpush.bf16.msrb.mxu2 %v2181_v5  ;;  %456 = vmatpush.bf16.msrb.mxu1 %v2177_v6  ;;  %v321_v53 = vshll.u32 %v2352_v40, 16  ;;  %v686_v54 = vunpack.c.l.b16 %v643_v44  ;;  %v687_v55 = vunpack.c.l.b16 %v2361_v45  ;;  %v271_v57 = vor.u32 %v269_v46, %v267_v22  ;;  %v2210_v22 = vld [vmem:[%s2930_s1 + $0x88] sm:$0xff] }
  0x19   : > { %1934 = vmatmul.msk.bf16.vlgmr.msra.gmra.mxu2 %vm337_vm1, %v292_v33  ;;  %1937 = vmatmul.msk.bf16.vlgmr.msra.gmra.mxu3 %vm337_vm1, %v316_v36  ;;  %v255_v56 = vor.u32 %v254_v51, %v250_v42  ;;  %v275_v58 = vrot.slane %v273_v48, 1  ;;  %v295_v59 = vor.u32 %v293_v49, %v291_v25  ;;  %v299_v61 = vrot.slane %v297_v50, 1  ;;  %v2216_v48 = vld [vmem:[%s2292_s27] sm:$0xe] }
  0x1a   : > { %780 = vmatpush.bf16.msrb.mxu3 %v2191_v39  ;;  %990 = vmatpush.bf16.msrb.mxu0 %v2193_v47  ;;  %v319_v62 = vor.u32 %v317_v52, %v315_v30  ;;  %v323_v63 = vrot.slane %v321_v53, 1  ;;  %v705_v1 = vpack.c.b16 %v687_v55, %v686_v54  ;;  %v864_v4 = vshrl.u32 %v2376_v0, 16  ;;  %v2215_v47 = vld [vmem:[%s2292_s27] sm:$0xf0] }
  0x1b   : > { %v260_v60 = vsel %vm248_vm0, %v255_v56, %v259_v21  ;;  %v867_v5 = vshll.u32 %v2376_v0, 16  ;;  %v276_v6 = vsel %vm248_vm0, %v271_v57, %v275_v58  ;;  %v300_v13 = vsel %vm248_vm0, %v295_v59, %v299_v61  ;;  %v2196_v21 = vld [vmem:[%s2930_s1 + $0x58] sm:$0xff] }
  0x1c   : > { %1930 = vmatmul.msk.bf16.vlgmr.msra.gmra.mxu0 %vm337_vm1, %v260_v60  ;;  %v856_v2 = vshrl.u32 %v705_v1, 16  ;;  %v859_v3 = vshll.u32 %v705_v1, 16  ;;  %v324_v14 = vsel %vm248_vm0, %v319_v62, %v323_v63  ;;  %v866_v17 = vrot.slane %v864_v4, 1  ;;  %1331 = vmatpush.bf16.msra.mxu2 %v2206_v19 }
  0x1d   : > { %v869_v18 = vrot.slane %v867_v5, 2  ;;  %1129 = vmatpush.bf16.msra.mxu1 %v2196_v21  ;;  %v277_v27 = vshrl.u32 %v2343_v37, 16  ;;  %v301_v28 = vshrl.u32 %v2346_v38, 16  ;;  %v715_v33 = vrot.slane %v705_v1, 1  ;;  %v2439_v1 = vld [vmem:[%s2292_s27 + $0x28] sm:$0xff] }
  0x1e   : > { %v858_v15 = vrot.slane %v856_v2, 1  ;;  %v861_v16 = vrot.slane %v859_v3, 2  ;;  %1541 = vmatpush.bf16.msra.mxu3 %v2208_v20  ;;  %1681 = vmatpush.bf16.msra.mxu0 %v2210_v22  ;;  %v716_v34 = vrot.slane %v2376_v0, 1  ;;  %v873_v36 = vshrl.u32 %v2405_v32, 16 }
  0x1f   : > { %v870_v25 = vor.u32 %v869_v18, %v866_v17  ;;  %v279_v30 = vor.u32 %v277_v27, %v275_v58  ;;  %v303_v31 = vor.u32 %v301_v28, %v299_v61  ;;  %v876_v39 = vshll.u32 %v2405_v32, 16  ;;  %v2454_v17 = vld [vmem:[%s2292_s27 + $0x30] sm:$0xff] }
  0x20   : > { %v862_v24 = vor.u32 %v861_v16, %v858_v15  ;;  %v717_v43 = vsel %vm512_vm3, %v715_v33, %v716_v34  ;;  %v875_v44 = vrot.slane %v873_v36, 1  ;;  %v2217_v50 = vor.u32 %v2216_v48, %v2215_v47  ;;  %v2207_v27 = vld [vmem:[%s2930_s1 + $0x70] sm:$0xff] }
  0x21   : > { %v284_v41 = vsel %vm248_vm0, %v279_v30, %v2326_v23  ;;  %v308_v42 = vsel %vm248_vm0, %v303_v31, %v2329_v26  ;;  %v878_v46 = vrot.slane %v876_v39, 2  ;;  %v514_v52 = vrot.slane %v2301_v7, 1  ;;  %v2424_v26 = vld [vmem:[%s2292_s27 + $0x20] sm:$0xff]  ;;  %v2195_v28 = vld [vmem:[%s2930_s1 + $0x50] sm:$0xff]  ;;  %v2478_v31 = vld [vmem:[%s2292_s27 + $0x38] sm:$0xff] }
  0x22   : > { %v871_v29 = vsel %vm854_vm2, %v862_v24, %v870_v25  ;;  %v513_v51 = vrot.slane %v2217_v50, 1  ;;  %v718_v53 = vrot.slane %v2405_v32, 1  ;;  %v882_v54 = vshrl.u32 %v2424_v26, 16  ;;  %1542 = vmatpush.bf16.msra.mxu3 %v2207_v27  ;;  %1130 = vmatpush.bf16.msra.mxu1 %v2195_v28 }
  0x23   : > { %v879_v49 = vor.u32 %v878_v46, %v875_v44  ;;  %v885_v56 = vshll.u32 %v2424_v26, 16  ;;  %v516_v63 = vrot.slane %v2304_v8, 1  ;;  %v720_v2 = vrot.slane %v2424_v26, 1  ;;  %v2209_v44 = vld [vmem:[%s2930_s1 + $0x80] sm:$0xff] }
  0x24   : > { %v515_v57 = vsel %vm512_vm3, %v513_v51, %v514_v52  ;;  %v719_v58 = vsel %vm512_vm3, %v716_v34, %v718_v53  ;;  %v884_v59 = vrot.slane %v882_v54, 1  ;;  %v891_v3 = vshrl.u32 %v2439_v1, 16  ;;  %1682 = vmatpush.bf16.msra.mxu0 %v2209_v44 }
  0x25   : > { %v880_v23 = vsel %vm854_vm2, %v870_v25, %v879_v49  ;;  %v887_v60 = vrot.slane %v885_v56, 2  ;;  %v517_v4 = vsel %vm512_vm3, %v514_v52, %v516_v63  ;;  %v721_v5 = vsel %vm512_vm3, %v718_v53, %v720_v2  ;;  %v2205_v25 = vld [vmem:[%s2930_s1 + $0x60] sm:$0xff] }
  0x26   : > { %v518_v16 = vrot.slane %v2343_v37, 1  ;;  %v722_v18 = vrot.slane %v2439_v1, 1  ;;  %v900_v19 = vshrl.u32 %v2454_v17, 16  ;;  %v903_v20 = vshll.u32 %v2454_v17, 16  ;;  %1332 = vmatpush.bf16.msra.mxu2 %v2205_v25 }
  0x27   : > { %1932 = vmatmul.msk.bf16.gmra.mxu1 %vm337_vm1, %v276_v6  ;;  %v888_v61 = vor.u32 %v887_v60, %v884_v59  ;;  %v893_v6 = vrot.slane %v891_v3, 1  ;;  %v520_v30 = vrot.slane %v2307_v9, 1  ;;  %v724_v33 = vrot.slane %v2454_v17, 1  ;;  %v2511_v59 = vld [vmem:[%s2292_s27 + $0x48] sm:$0xff] }
  0x28   : > { %v723_v21 = vsel %vm512_vm3, %v720_v2, %v722_v18  ;;  %v902_v22 = vrot.slane %v900_v19, 1  ;;  %v905_v24 = vrot.slane %v903_v20, 2  ;;  %v909_v34 = vshrl.u32 %v2478_v31, 16 }
  0x29   : > { %1935 = vmatmul.msk.bf16.gmra.mxu2 %vm337_vm1, %v300_v13  ;;  %1938 = vmatmul.msk.bf16.gmra.mxu3 %vm337_vm1, %v324_v14  ;;  %v889_v62 = vsel %vm854_vm2, %v879_v49, %v888_v61  ;;  %v912_v36 = vshll.u32 %v2478_v31, 16  ;;  %v521_v39 = vsel %vm512_vm3, %v518_v16, %v520_v30  ;;  %v522_v48 = vrot.slane %v2310_v10, 1  ;;  %v2496_v49 = vld [vmem:[%s2292_s27 + $0x40] sm:$0xff] }
  0x2a   : > { %v918_v50 = vshrl.u32 %v2496_v49, 16  ;;  %v728_v60 = vrot.slane %v2496_v49, 1  ;;  %v730_v20 = vrot.slane %v2511_v59, 1 }
  0x2b   : > { %v523_v51 = vsel %vm512_vm3, %v520_v30, %v522_v48 }
  0x2c   : > { %2042 = vmatmul.msk.bf16.vlgmr.msrb.gmra.mxu0 %vm337_vm1, %v871_v29  ;;  %v906_v29 = vor.u32 %v905_v24, %v902_v22  ;;  %v920_v53 = vrot.slane %v918_v50, 1  ;;  %v731_v28 = vsel %vm512_vm3, %v728_v60, %v730_v20 }
  0x37   : > { %1933 = vmatmul.msk.bf16.gmra.mxu1 %vm337_vm1, %v284_v41  ;;  %v725_v41 = vsel %vm512_vm3, %v722_v18, %v724_v33 }
  0x39   : > { %1936 = vmatmul.msk.bf16.gmra.mxu2 %vm337_vm1, %v308_v42  ;;  %2021 = vmatmul.msk.bf16.vlgmr.msrb.gmra.mxu3 %vm337_vm1, %v717_v43  ;;  %v911_v42 = vrot.slane %v909_v34, 1  ;;  %v914_v43 = vrot.slane %v912_v36, 2 }
  0x3b   : > { %v915_v46 = vor.u32 %v914_v43, %v911_v42 }
  0x3c   : > { %2043 = vmatmul.msk.bf16.gmra.mxu0 %vm337_vm1, %v880_v23  ;;  %v921_v23 = vshll.u32 %v2496_v49, 16 }
  0x3d   : > { %v916_v47 = vsel %vm854_vm2, %v906_v29, %v915_v46 }
  0x3e   : > { %v923_v54 = vrot.slane %v921_v23, 2 }
  0x40   : > { %v924_v56 = vor.u32 %v923_v54, %v920_v53 }
  0x47   : > { %1947 = vmatmul.msk.bf16.vlgmr.msrb.gmra.mxu1 %vm337_vm1, %v2337_v35  ;;  %v894_v35 = vshll.u32 %v2439_v1, 16 }
  0x49   : > { %1968 = vmatmul.msk.bf16.vlgmr.msrb.gmra.mxu2 %vm337_vm1, %v515_v57  ;;  %2022 = vmatmul.msk.bf16.gmra.mxu3 %vm337_vm1, %v719_v58  ;;  %v896_v13 = vrot.slane %v894_v35, 2  ;;  %v925_v57 = vsel %vm854_vm2, %v915_v46, %v924_v56  ;;  %v524_v58 = vrot.slane %v2346_v38, 1 }
  0x4b   : > { %v897_v14 = vor.u32 %v896_v13, %v893_v6 }
  0x4c   : > { %2044 = vmatmul.msk.bf16.gmra.mxu0 %vm337_vm1, %v889_v62 }
  0x4d   : > { %v898_v15 = vsel %vm854_vm2, %v888_v61, %v897_v14  ;;  %v927_v61 = vshrl.u32 %v2511_v59, 16 }
  0x4f   : > { %v929_v3 = vrot.slane %v927_v61, 1 }
  0x57   : > { %1948 = vmatmul.msk.bf16.gmra.mxu1 %vm337_vm1, %v2301_v7  ;;  %v519_v7 = vsel %vm512_vm3, %v516_v63, %v518_v16  ;;  %v525_v63 = vsel %vm512_vm3, %v522_v48, %v524_v58  ;;  %v845_v16 = vld [vmem:[%s2292_s27 + $0x50] sm:$0x3]  ;;  %v528_v48 = vrot.slane %v2316_v12, 1 }
  0x58   : > { %v852_v18 = vunpack.c.l.b16 %v845_v16 }
  0x59   : > { %1969 = vmatmul.msk.bf16.gmra.mxu2 %vm337_vm1, %v517_v4  ;;  %2023 = vmatmul.msk.bf16.gmra.mxu3 %vm337_vm1, %v721_v5 }
  0x5a   : > { %v2536_v19 = vpack.c.b16 %v852_v18, %v852_v18 }
  0x5c   : > { %2045 = vmatmul.msk.bf16.gmra.mxu0 %vm337_vm1, %v898_v15  ;;  %v939_v22 = vshll.u32 %v2536_v19, 16 }
  0x5e   : > { %v941_v30 = vrot.slane %v939_v22, 2 }
  0x67   : > { %1949 = vmatmul.msk.bf16.gmra.mxu1 %vm337_vm1, %v2304_v8  ;;  %v907_v8 = vsel %vm854_vm2, %v897_v14, %v906_v29 }
  0x69   : > { %1970 = vmatmul.msk.bf16.gmra.mxu2 %vm337_vm1, %v519_v7  ;;  %2024 = vmatmul.msk.bf16.gmra.mxu3 %vm337_vm1, %v723_v21  ;;  %v936_v21 = vshrl.u32 %v2536_v19, 16 }
  0x6c   : > { %2046 = vmatmul.msk.bf16.gmra.mxu0 %vm337_vm1, %v907_v8  ;;  %v938_v8 = vrot.slane %v936_v21, 1 }
  0x6e   : > { %v942_v36 = vor.u32 %v941_v30, %v938_v8  ;;  %v530_v30 = vrot.slane %v2352_v40, 1 }
  0x77   : > { %1950 = vmatmul.msk.bf16.gmra.mxu1 %vm337_vm1, %v2343_v37  ;;  %v726_v37 = vrot.slane %v2478_v31, 1 }
  0x79   : > { %1971 = vmatmul.msk.bf16.gmra.mxu2 %vm337_vm1, %v521_v39  ;;  %2025 = vmatmul.msk.bf16.gmra.mxu3 %vm337_vm1, %v725_v41  ;;  %v727_v52 = vsel %vm512_vm3, %v724_v33, %v726_v37  ;;  %v729_v2 = vsel %vm512_vm3, %v726_v37, %v728_v60  ;;  %v661_v33 = vld [vmem:[%s2292_s27 + $0x50] sm:$0x1] }
  0x7a   : > { %v704_v34 = vunpack.c.l.b16 %v661_v33 }
  0x7c   : > { %2047 = vmatmul.msk.bf16.gmra.mxu0 %vm337_vm1, %v916_v47  ;;  %v714_v43 = vpack.c.b16 %v704_v34, %v704_v34  ;;  %v1195_v47 = vld [vmem:[%s2292_s27 + $0x10] sm:$0xc] }
  0x7d   : > { %v1238_v37 = vunpack.c.l.b16 %v1195_v47  ;;  %v531_v47 = vsel %vm512_vm3, %v528_v48, %v530_v30 }
  0x7e   : > { %v732_v23 = vrot.slane %v714_v43, 1 }
  0x80   : > { %v733_v60 = vsel %vm512_vm3, %v730_v20, %v732_v23  ;;  %v1055_v23 = vld [vmem:[%s2292_s27 + $0x8] sm:$0xc] }
  0x81   : > { %v1062_v40 = vunpack.c.l.b16 %v1055_v23 }
  0x87   : > { %1951 = vmatmul.msk.bf16.gmra.mxu1 %vm337_vm1, %v2307_v9  ;;  %v930_v9 = vshll.u32 %v2511_v59, 16 }
  0x89   : > { %1972 = vmatmul.msk.bf16.gmra.mxu2 %vm337_vm1, %v523_v51  ;;  %2026 = vmatmul.msk.bf16.gmra.mxu3 %vm337_vm1, %v727_v52  ;;  %v932_v35 = vrot.slane %v930_v9, 2  ;;  %v1607_v51 = vld [vmem:[%s2292_s27 + $0x10] sm:$0x8]  ;;  %v2583_v9 = vld [vmem:[%s2292_s27 + $0x18] sm:$0xff] }
  0x8a   : > { %v1614_v53 = vunpack.c.l.b16 %v1607_v51  ;;  %v1618_v16 = vrot.slane %v2583_v9, 3  ;;  %v1268_v45 = vrot.slane %v2583_v9, 2 }
  0x8b   : > { %v933_v4 = vor.u32 %v932_v35, %v929_v3  ;;  %v1416_v35 = vshrl.u32 %v2583_v9, 16 }
  0x8c   : > { %2048 = vmatmul.msk.bf16.gmra.mxu0 %vm337_vm1, %v925_v57 }
  0x8d   : > { %v934_v15 = vsel %vm854_vm2, %v924_v56, %v933_v4  ;;  %v943_v46 = vsel %vm854_vm2, %v933_v4, %v942_v36  ;;  %v1419_v4 = vshll.u32 %v2583_v9, 16  ;;  %v1418_v22 = vrot.slane %v1416_v35, 2 }
  0x94   : > { %v2516_v62 = vpop.f32.mrf.mxu1 }
  0x97   : > { %1952 = vmatmul.msk.bf16.gmra.mxu1 %vm337_vm1, %v2310_v10  ;;  %v526_v10 = vrot.slane %v2313_v11, 1 }
  0x99   : > { %1973 = vmatmul.msk.bf16.gmra.mxu2 %vm337_vm1, %v525_v63  ;;  %2027 = vmatmul.msk.bf16.gmra.mxu3 %vm337_vm1, %v729_v2  ;;  %v2530_v14 = vpop.f32.mrf.mxu0  ;;  %v527_v27 = vsel %vm512_vm3, %v524_v58, %v526_v10  ;;  %v529_v57 = vsel %vm512_vm3, %v526_v10, %v528_v48 }
  0x9c   : > { %v2524_v5 = vpop.f32.mrf.mxu2  ;;  %v2526_v6 = vpop.f32.mrf.mxu3  ;;  %2049 = vmatmul.msk.bf16.gmra.mxu0 %vm337_vm1, %v934_v15 }
  0x9d   : > { %v2528_v13 = vpop.f32.mrf.mxu1 }
  0xa1   : > { %v2549_v29 = vpop.f32.mrf.mxu0 }
  0xa4   : > { %v2539_v7 = vpop.f32.mrf.mxu2  ;;  %v2543_v24 = vpop.f32.mrf.mxu3 }
  0xa5   : > { %v2545_v25 = vpop.f32.mrf.mxu1 }
  0xa7   : > { %1953 = vmatmul.msk.bf16.gmra.mxu1 %vm337_vm1, %v2346_v38  ;;  %v1196_v38 = vld [vmem:[%s2292_s27 + $0x14] sm:$0xf] }
  0xa8   : > { %v1239_v50 = vunpack.c.l.b16 %v1196_v38  ;;  %v2607_v38 = vld [vmem:[%s2292_s27 + $0x20] sm:$0xff] }
  0xa9   : > { %1974 = vmatmul.msk.bf16.gmra.mxu2 %vm337_vm1, %v527_v27  ;;  %2028 = vmatmul.msk.bf16.gmra.mxu3 %vm337_vm1, %v731_v28  ;;  %v2562_v44 = vpop.f32.mrf.mxu0  ;;  %v1421_v27 = vrot.slane %v1419_v4, 3  ;;  %v1428_v48 = vshll.u32 %v2607_v38, 16 }
  0xaa   : > { %v2577_v58 = vpack.c.b16 %v1239_v50, %v1238_v37  ;;  %v1615_v63 = vpack.c.b16 %v1239_v50, %v1614_v53  ;;  %v1425_v53 = vshrl.u32 %v2607_v38, 16 }
  0xab   : > { %v1422_v34 = vor.u32 %v1421_v27, %v1418_v22 }
  0xac   : > { %v2556_v39 = vpop.f32.mrf.mxu2  ;;  %v2558_v41 = vpop.f32.mrf.mxu3  ;;  %2050 = vmatmul.msk.bf16.gmra.mxu0 %vm337_vm1, %v943_v46  ;;  %v1408_v2 = vshrl.u32 %v2577_v58, 16  ;;  %v1411_v3 = vshll.u32 %v2577_v58, 16  ;;  %v1617_v15 = vrot.slane %v1615_v63, 3  ;;  %v1427_v35 = vrot.slane %v1425_v53, 2 }
  0xad   : > { %v2560_v42 = vpop.f32.mrf.mxu1  ;;  %v1267_v30 = vrot.slane %v2577_v58, 2 }
  0xae   : > { %v1410_v20 = vrot.slane %v1408_v2, 2  ;;  %v1413_v21 = vrot.slane %v1411_v3, 3  ;;  %v1619_v8 = vsel %vm1616_vm4, %v1617_v15, %v1618_v16  ;;  %v1063_v3 = vpack.c.b16 %v687_v55, %v1062_v40 }
  0xaf   : > { %v1430_v15 = vrot.slane %v1428_v48, 3 }
  0xb0   : > { %v1414_v33 = vor.u32 %v1413_v21, %v1410_v20  ;;  %v1065_v27 = vrot.slane %v1063_v3, 2 }
  0xb1   : > { %v2580_v61 = vpop.f32.mrf.mxu0  ;;  %v1431_v55 = vor.u32 %v1430_v15, %v1427_v35  ;;  %v1270_v15 = vrot.slane %v2607_v38, 2 }
  0xb2   : > { %v1423_v50 = vsel %vm1406_vm5, %v1414_v33, %v1422_v34 }
  0xb3   : > { %v1432_v58 = vsel %vm1406_vm5, %v1422_v34, %v1431_v55 }
  0xb4   : > { %v2570_v52 = vpop.f32.mrf.mxu2  ;;  %v2572_v54 = vpop.f32.mrf.mxu3 }
  0xb5   : > { %v2574_v56 = vpop.f32.mrf.mxu1 }
  0xb7   : > { %1954 = vmatmul.msk.bf16.gmra.mxu1 %vm337_vm1, %v2313_v11 }
  0xb9   : > { %1975 = vmatmul.msk.bf16.gmra.mxu2 %vm337_vm1, %v529_v57  ;;  %2029 = vmatmul.msk.bf16.gmra.mxu3 %vm337_vm1, %v733_v60  ;;  %v2598_v28 = vpop.f32.mrf.mxu0  ;;  %v1620_v57 = vrot.slane %v2607_v38, 3 }
  0xbb   : > { %v1621_v21 = vsel %vm1616_vm4, %v1618_v16, %v1620_v57 }
  0xbc   : > { %v2594_v18 = vpop.f32.mrf.mxu2  ;;  %v782_v10 = vpop.f32.mrf.mxu3  ;;  %2158 = vmatmul.msk.bf16.vlgmr.msra.gmra.mxu0 %vm337_vm1, %v1619_v8  ;;  %v1066_v8 = vrot.slane %v2376_v0, 2 }
  0xbd   : > { %v2596_v11 = vpop.f32.mrf.mxu1 }
  0xbe   : > { %v1067_v16 = vsel %vm1064_vm6, %v1065_v27, %v1066_v8 }
  0xc1   : > { %v2612_v51 = vpop.f32.mrf.mxu0 }
  0xc4   : > { %v2603_v36 = vpop.f32.mrf.mxu2  ;;  %v784_v43 = vpop.f32.mrf.mxu3 }
  0xc5   : > { %v458_v46 = vpop.f32.mrf.mxu1 }
  0xc6   : > { %v459_v37 = vadd.f32 %v458_v46, %v2530_v14 }
  0xc7   : > { %1955 = vmatmul.msk.bf16.gmra.mxu1 %vm337_vm1, %v2316_v12 }
  0xc9   : > { %1976 = vmatmul.msk.bf16.gmra.mxu2 %vm337_vm1, %v531_v47  ;;  %2137 = vmatmul.msk.bf16.vlgmr.msra.gmra.mxu3 %vm337_vm1, %v1423_v50  ;;  %v2624_v20 = vpop.f32.mrf.mxu0  ;;  %v2637_v47 = vld [vmem:[%s2292_s27 + $0x28] sm:$0xff] }
  0xca   : > { %v1434_v23 = vshrl.u32 %v2637_v47, 16  ;;  %v1437_v40 = vshll.u32 %v2637_v47, 16 }
  0xcc   : > { %v580_v14 = vpop.f32.mrf.mxu2  ;;  %v787_v63 = vpop.f32.mrf.mxu3  ;;  %2159 = vmatmul.msk.bf16.gmra.mxu0 %vm337_vm1, %v1621_v21  ;;  %v1439_v3 = vrot.slane %v1437_v40, 3 }
  0xcd   : > { %v625_v60 = vadd.f32 %v580_v14, %v459_v37  ;;  %v460_v2 = vpop.f32.mrf.mxu1  ;;  %v1436_v14 = vrot.slane %v1434_v23, 2 }
  0xce   : > { %v461_v4 = vadd.f32 %v460_v2, %v2549_v29 }
  0xcf   : > { %v827_v12 = vadd.f32 %v782_v10, %v625_v60  ;;  %v1440_v21 = vor.u32 %v1439_v3, %v1436_v14  ;;  %v1272_v14 = vrot.slane %v2637_v47, 2 }
  0xd1   : > { %v2628_v22 = vadd.f32 %v2562_v44, %v827_v12  ;;  %v1269_v44 = vsel %vm1064_vm6, %v1267_v30, %v1268_v45  ;;  %v2641_v9 = vpop.f32.mrf.mxu0 }
  0xd4   : > { %v582_v29 = vpop.f32.mrf.mxu2  ;;  %v789_v33 = vpop.f32.mrf.mxu3 }
  0xd5   : > { %v626_v10 = vadd.f32 %v582_v29, %v461_v4  ;;  %v463_v46 = vpop.f32.mrf.mxu1  ;;  %v1068_v4 = vrot.slane %v2405_v32, 2  ;;  %v1441_v32 = vsel %vm1406_vm5, %v1431_v55, %v1440_v21 }
  0xd6   : > { %v464_v0 = vadd.f32 %v463_v46, %v2516_v62  ;;  %v2665_v46 = vld [vmem:[%s2292_s27 + $0x30] sm:$0xff] }
  0xd7   : > { %v828_v37 = vadd.f32 %v784_v43, %v626_v10  ;;  %2063 = vmatmul.msk.bf16.vlgmr.msra.gmra.mxu1 %vm337_vm1, %v1067_v16  ;;  %v1622_v43 = vrot.slane %v2637_v47, 3  ;;  %v1271_v10 = vsel %vm1064_vm6, %v1268_v45, %v1270_v15  ;;  %v1446_v45 = vshll.u32 %v2665_v46, 16 }
  0xd9   : > { %2116 = vmatmul.msk.bf16.vlgmr.msra.gmra.mxu2 %vm337_vm1, %v1269_v44  ;;  %v2646_v50 = vadd.f32 %v2580_v61, %v828_v37  ;;  %2138 = vmatmul.msk.bf16.gmra.mxu3 %vm337_vm1, %v1432_v58  ;;  %v2653_v61 = vpop.f32.mrf.mxu0  ;;  %v1623_v35 = vsel %vm1616_vm4, %v1620_v57, %v1622_v43  ;;  %v1448_v40 = vrot.slane %v1446_v45, 3 }
  0xdc   : > { %v585_v62 = vpop.f32.mrf.mxu2  ;;  %v792_v34 = vpop.f32.mrf.mxu3  ;;  %2160 = vmatmul.msk.bf16.gmra.mxu0 %vm337_vm1, %v1623_v35 }
  0xdd   : > { %v627_v53 = vadd.f32 %v585_v62, %v464_v0  ;;  %v465_v48 = vpop.f32.mrf.mxu1 }
  0xde   : > { %v466_v2 = vadd.f32 %v465_v48, %v2528_v13  ;;  %v1069_v13 = vsel %vm1064_vm6, %v1066_v8, %v1068_v4  ;;  %v1443_v8 = vshrl.u32 %v2665_v46, 16  ;;  %v1070_v48 = vrot.slane %v2424_v26, 2 }
  0xdf   : > { %v829_v60 = vadd.f32 %v787_v63, %v627_v53 }
  0xe0   : > { %v1445_v0 = vrot.slane %v1443_v8, 2 }
  0xe1   : > { %v2657_v12 = vadd.f32 %v2598_v28, %v829_v60  ;;  %v2669_v16 = vpop.f32.mrf.mxu0 }
  0xe2   : > { %v1449_v60 = vor.u32 %v1448_v40, %v1445_v0 }
  0xe4   : > { %v587_v27 = vpop.f32.mrf.mxu2  ;;  %v794_v30 = vpop.f32.mrf.mxu3  ;;  %v1450_v26 = vsel %vm1406_vm5, %v1440_v21, %v1449_v60 }
  0xe5   : > { %v628_v63 = vadd.f32 %v587_v27, %v466_v2  ;;  %v468_v29 = vpop.f32.mrf.mxu1  ;;  %v1273_v27 = vsel %vm1064_vm6, %v1270_v15, %v1272_v14 }
  0xe6   : > { %v469_v28 = vadd.f32 %v468_v29, %v2545_v25 }
  0xe7   : > { %v830_v57 = vadd.f32 %v789_v33, %v628_v63  ;;  %2064 = vmatmul.msk.bf16.gmra.mxu1 %vm337_vm1, %v1069_v13  ;;  %v1624_v33 = vrot.slane %v2665_v46, 3  ;;  %v2693_v63 = vld [vmem:[%s2292_s27 + $0x38] sm:$0xff] }
  0xe8   : > { %v1455_v15 = vshll.u32 %v2693_v63, 16 }
  0xe9   : > { %2117 = vmatmul.msk.bf16.gmra.mxu2 %vm337_vm1, %v1271_v10  ;;  %v2674_v38 = vadd.f32 %v2612_v51, %v830_v57  ;;  %2139 = vmatmul.msk.bf16.gmra.mxu3 %vm337_vm1, %v1441_v32  ;;  %v2681_v51 = vpop.f32.mrf.mxu0  ;;  %v1625_v62 = vsel %vm1616_vm4, %v1622_v43, %v1624_v33 }
  0xea   : > { %v1457_v8 = vrot.slane %v1455_v15, 3  ;;  %v1074_v15 = vrot.slane %v2454_v17, 2  ;;  %v2752_v17 = vld [vmem:[%s2292_s27 + $0x48] sm:$0xff] }
  0xec   : > { %v590_v25 = vpop.f32.mrf.mxu2  ;;  %v797_v55 = vpop.f32.mrf.mxu3  ;;  %2161 = vmatmul.msk.bf16.gmra.mxu0 %vm337_vm1, %v1625_v62 }
  0xed   : > { %v629_v44 = vadd.f32 %v590_v25, %v469_v28  ;;  %v470_v37 = vpop.f32.mrf.mxu1 }
  0xee   : > { %v471_v23 = vadd.f32 %v470_v37, %v2560_v42  ;;  %v1071_v42 = vsel %vm1064_vm6, %v1068_v4, %v1070_v48  ;;  %v1452_v4 = vshrl.u32 %v2693_v63, 16  ;;  %v1274_v37 = vrot.slane %v2665_v46, 2 }
  0xef   : > { %v831_v58 = vadd.f32 %v792_v34, %v629_v44  ;;  %v1072_v44 = vrot.slane %v2439_v1, 2 }
  0xf0   : > { %v1454_v57 = vrot.slane %v1452_v4, 2  ;;  %v1275_v62 = vsel %vm1064_vm6, %v1272_v14, %v1274_v37 }
  0xf1   : > { %v2685_v53 = vadd.f32 %v2624_v20, %v831_v58  ;;  %v2697_v29 = vpop.f32.mrf.mxu0  ;;  %v1073_v40 = vsel %vm1064_vm6, %v1070_v48, %v1072_v44 }
  0xf2   : > { %v1458_v0 = vor.u32 %v1457_v8, %v1454_v57  ;;  %v1075_v8 = vsel %vm1064_vm6, %v1072_v44, %v1074_v15  ;;  %v1470_v44 = vshrl.u32 %v2752_v17, 16 }
  0xf4   : > { %v592_v2 = vpop.f32.mrf.mxu2  ;;  %v799_v3 = vpop.f32.mrf.mxu3 }
  0xf5   : > { %v630_v34 = vadd.f32 %v592_v2, %v471_v23  ;;  %v473_v35 = vpop.f32.mrf.mxu1 }
  0xf6   : > { %v474_v20 = vadd.f32 %v473_v35, %v2574_v56 }
  0xf7   : > { %v832_v43 = vadd.f32 %v794_v30, %v630_v34  ;;  %2065 = vmatmul.msk.bf16.gmra.mxu1 %vm337_vm1, %v1071_v42  ;;  %v1626_v30 = vrot.slane %v2693_v63, 3  ;;  %v2724_v34 = vld [vmem:[%s2292_s27 + $0x40] sm:$0xff] }
  0xf8   : > { %v1461_v48 = vshrl.u32 %v2724_v34, 16  ;;  %v1464_v14 = vshll.u32 %v2724_v34, 16 }
  0xf9   : > { %2118 = vmatmul.msk.bf16.gmra.mxu2 %vm337_vm1, %v1273_v27  ;;  %v2702_v47 = vadd.f32 %v2641_v9, %v832_v43  ;;  %2140 = vmatmul.msk.bf16.gmra.mxu3 %vm337_vm1, %v1450_v26  ;;  %v2709_v45 = vpop.f32.mrf.mxu0  ;;  %v1627_v9 = vsel %vm1616_vm4, %v1624_v33, %v1626_v30  ;;  %v1459_v33 = vsel %vm1406_vm5, %v1449_v60, %v1458_v0  ;;  %v1628_v60 = vrot.slane %v2724_v34, 3 }
  0xfa   : > { %v1466_v26 = vrot.slane %v1464_v14, 3  ;;  %v1278_v14 = vrot.slane %v2724_v34, 2 }
  0xfc   : > { %v595_v56 = vpop.f32.mrf.mxu2  ;;  %v802_v21 = vpop.f32.mrf.mxu3  ;;  %2162 = vmatmul.msk.bf16.gmra.mxu0 %vm337_vm1, %v1627_v9 }
  0xfd   : > { %v631_v13 = vadd.f32 %v595_v56, %v474_v20  ;;  %v475_v10 = vpop.f32.mrf.mxu1  ;;  %v1463_v20 = vrot.slane %v1461_v48, 2  ;;  %v1276_v56 = vrot.slane %v2693_v63, 2  ;;  %v1076_v48 = vrot.slane %v2478_v31, 2  ;;  %v2780_v31 = vld [vmem:[%s2292_s27 + $0x50] sm:$0xff] }
  0xfe   : > { %v476_v32 = vadd.f32 %v475_v10, %v2596_v11 }
  0xff   : > { %v833_v28 = vadd.f32 %v797_v55, %v631_v13  ;;  %v1467_v10 = vor.u32 %v1466_v26, %v1463_v20  ;;  %v1077_v26 = vsel %vm1064_vm6, %v1074_v15, %v1076_v48  ;;  %v1479_v15 = vshrl.u32 %v2780_v31, 16 }
 0x101   : > { %v2713_v25 = vadd.f32 %v2653_v61, %v833_v28  ;;  %v2721_v61 = vpop.f32.mrf.mxu0 }
 0x104   : > { %v597_v58 = vpop.f32.mrf.mxu2  ;;  %v804_v23 = vpop.f32.mrf.mxu3 }
 0x105   : > { %v632_v55 = vadd.f32 %v597_v58, %v476_v32  ;;  %v478_v11 = vpop.f32.mrf.mxu1 }
 0x106   : > { %v479_v46 = vadd.f32 %v478_v11, %v2524_v5 }
 0x107   : > { %v834_v2 = vadd.f32 %v799_v3, %v632_v55  ;;  %2066 = vmatmul.msk.bf16.gmra.mxu1 %vm337_vm1, %v1073_v40 }
 0x109   : > { %2119 = vmatmul.msk.bf16.gmra.mxu2 %vm337_vm1, %v1275_v62  ;;  %v2729_v1 = vadd.f32 %v2669_v16, %v834_v2  ;;  %2141 = vmatmul.msk.bf16.gmra.mxu3 %vm337_vm1, %v1459_v33  ;;  %v2736_v4 = vpop.f32.mrf.mxu0  ;;  %v1629_v16 = vsel %vm1616_vm4, %v1626_v30, %v1628_v60  ;;  %v1277_v30 = vsel %vm1064_vm6, %v1274_v37, %v1276_v56  ;;  %v1473_v37 = vshll.u32 %v2752_v17, 16 }
 0x10a   : > { %v1472_v2 = vrot.slane %v1470_v44, 2  ;;  %v1078_v44 = vrot.slane %v2496_v49, 2 }
 0x10b   : > { %v1475_v33 = vrot.slane %v1473_v37, 3  ;;  %v1280_v37 = vrot.slane %v2752_v17, 2 }
 0x10c   : > { %v600_v3 = vpop.f32.mrf.mxu2  ;;  %v807_v42 = vpop.f32.mrf.mxu3  ;;  %2163 = vmatmul.msk.bf16.gmra.mxu0 %vm337_vm1, %v1629_v16 }
 0x10d   : > { %v633_v35 = vadd.f32 %v600_v3, %v479_v46  ;;  %v480_v27 = vpop.f32.mrf.mxu1 }
 0x10e   : > { %v481_v13 = vadd.f32 %v480_v27, %v2539_v7 }
 0x10f   : > { %v835_v43 = vadd.f32 %v802_v21, %v633_v35  ;;  %v1476_v35 = vor.u32 %v1475_v33, %v1472_v2 }
 0x111   : > { %v2740_v5 = vadd.f32 %v2681_v51, %v835_v43  ;;  %v1468_v51 = vsel %vm1406_vm5, %v1458_v0, %v1467_v10  ;;  %v2749_v58 = vpop.f32.mrf.mxu0  ;;  %v1630_v0 = vrot.slane %v2752_v17, 3 }
 0x114   : > { %v602_v21 = vpop.f32.mrf.mxu2  ;;  %v809_v28 = vpop.f32.mrf.mxu3 }
 0x115   : > { %v634_v57 = vadd.f32 %v602_v21, %v481_v13  ;;  %v483_v32 = vpop.f32.mrf.mxu1 }
 0x116   : > { %v484_v63 = vadd.f32 %v483_v32, %v2556_v39 }
 0x117   : > { %v836_v9 = vadd.f32 %v804_v23, %v634_v57  ;;  %2067 = vmatmul.msk.bf16.gmra.mxu1 %vm337_vm1, %v1075_v8 }
 0x119   : > { %2120 = vmatmul.msk.bf16.gmra.mxu2 %vm337_vm1, %v1277_v30  ;;  %v2757_v7 = vadd.f32 %v2697_v29, %v836_v9  ;;  %2142 = vmatmul.msk.bf16.gmra.mxu3 %vm337_vm1, %v1468_v51  ;;  %v2764_v46 = vpop.f32.mrf.mxu0  ;;  %v1631_v29 = vsel %vm1616_vm4, %v1628_v60, %v1630_v0  ;;  %v1279_v60 = vsel %vm1064_vm6, %v1276_v56, %v1278_v14  ;;  %v1482_v56 = vshll.u32 %v2780_v31, 16 }
 0x11a   : > { %v1481_v30 = vrot.slane %v1479_v15, 2 }
 0x11b   : > { %v1484_v9 = vrot.slane %v1482_v56, 3  ;;  %v1080_v56 = vrot.slane %v2511_v59, 2 }
 0x11c   : > { %v605_v55 = vpop.f32.mrf.mxu2  ;;  %v812_v11 = vpop.f32.mrf.mxu3  ;;  %2164 = vmatmul.msk.bf16.gmra.mxu0 %vm337_vm1, %v1631_v29  ;;  %v1281_v29 = vsel %vm1064_vm6, %v1278_v14, %v1280_v37 }
 0x11d   : > { %v635_v23 = vadd.f32 %v605_v55, %v484_v63  ;;  %v485_v40 = vpop.f32.mrf.mxu1  ;;  %v1397_v63 = vld [vmem:[%s2292_s27 + $0x58] sm:$0x7] }
 0x11e   : > { %v486_v3 = vadd.f32 %v485_v40, %v2570_v52 }
 0x11f   : > { %v837_v62 = vadd.f32 %v807_v42, %v635_v23  ;;  %v1485_v23 = vor.u32 %v1484_v9, %v1481_v30  ;;  %v1081_v9 = vsel %vm1064_vm6, %v1078_v44, %v1080_v56 }
 0x121   : > { %v2768_v39 = vadd.f32 %v2709_v45, %v837_v62  ;;  %v1477_v45 = vsel %vm1406_vm5, %v1467_v10, %v1476_v35  ;;  %v2777_v13 = vpop.f32.mrf.mxu0  ;;  %v1632_v10 = vrot.slane %v2780_v31, 3 }
 0x124   : > { %v607_v42 = vpop.f32.mrf.mxu2  ;;  %v814_v43 = vpop.f32.mrf.mxu3 }
 0x125   : > { %v636_v27 = vadd.f32 %v607_v42, %v486_v3  ;;  %v488_v20 = vpop.f32.mrf.mxu1  ;;  %v1486_v3 = vsel %vm1406_vm5, %v1476_v35, %v1485_v23 }
 0x126   : > { %v489_v34 = vadd.f32 %v488_v20, %v2594_v18 }
 0x127   : > { %v838_v16 = vadd.f32 %v809_v28, %v636_v27  ;;  %2068 = vmatmul.msk.bf16.gmra.mxu1 %vm337_vm1, %v1077_v26 }
 0x129   : > { %2121 = vmatmul.msk.bf16.gmra.mxu2 %vm337_vm1, %v1279_v60  ;;  %v2785_v52 = vadd.f32 %v2721_v61, %v838_v16  ;;  %2143 = vmatmul.msk.bf16.gmra.mxu3 %vm337_vm1, %v1477_v45  ;;  %v2792_v51 = vpop.f32.mrf.mxu0  ;;  %v1633_v61 = vsel %vm1616_vm4, %v1630_v0, %v1632_v10  ;;  %v1079_v0 = vsel %vm1064_vm6, %v1076_v48, %v1078_v44 }
 0x12c   : > { %v610_v21 = vpop.f32.mrf.mxu2  ;;  %v817_v28 = vpop.f32.mrf.mxu3  ;;  %2165 = vmatmul.msk.bf16.gmra.mxu0 %vm337_vm1, %v1633_v61 }
 0x12d   : > { %v637_v57 = vadd.f32 %v610_v21, %v489_v34  ;;  %v490_v32 = vpop.f32.mrf.mxu1 }
 0x12e   : > { %v491_v55 = vadd.f32 %v490_v32, %v2603_v36 }
 0x12f   : > { %v839_v8 = vadd.f32 %v812_v11, %v637_v57  ;;  %v1404_v11 = vunpack.c.l.b16 %v1397_v63  ;;  %v1213_v63 = vld [vmem:[%s2292_s27 + $0x58] sm:$0x3] }
 0x131   : > { %v2797_v18 = vadd.f32 %v2736_v4, %v839_v8  ;;  %v1034_v49 = vpop.f32.mrf.mxu0  ;;  %v1405_v42 = vpack.c.b16 %v1404_v11, %v1404_v11 }
 0x133   : > { %v1488_v27 = vshrl.u32 %v1405_v42, 16  ;;  %v1491_v48 = vshll.u32 %v1405_v42, 16  ;;  %v1634_v20 = vrot.slane %v1405_v42, 3 }
 0x134   : > { %v612_v40 = vpop.f32.mrf.mxu2  ;;  %v819_v2 = vpop.f32.mrf.mxu3 }
 0x135   : > { %v638_v62 = vadd.f32 %v612_v40, %v491_v55  ;;  %v493_v33 = vpop.f32.mrf.mxu1  ;;  %v1490_v16 = vrot.slane %v1488_v27, 2  ;;  %v1493_v45 = vrot.slane %v1491_v48, 3  ;;  %v1635_v15 = vsel %vm1616_vm4, %v1632_v10, %v1634_v20 }
 0x136   : > { %v494_v17 = vadd.f32 %v493_v33, %v2526_v6  ;;  %v1282_v6 = vrot.slane %v2780_v31, 2  ;;  %v1256_v31 = vunpack.c.l.b16 %v1213_v63  ;;  %v1082_v33 = vrot.slane %v2536_v19, 2 }
 0x137   : > { %v840_v4 = vadd.f32 %v814_v43, %v638_v62  ;;  %2069 = vmatmul.msk.bf16.gmra.mxu1 %vm337_vm1, %v1079_v0  ;;  %v1494_v57 = vor.u32 %v1493_v45, %v1490_v16 }
 0x138   : > { %v1283_v10 = vsel %vm1064_vm6, %v1280_v37, %v1282_v6  ;;  %v1266_v62 = vpack.c.b16 %v1256_v31, %v1256_v31 }
 0x139   : > { %2122 = vmatmul.msk.bf16.gmra.mxu2 %vm337_vm1, %v1281_v29  ;;  %v2809_v36 = vadd.f32 %v2749_v58, %v840_v4  ;;  %2144 = vmatmul.msk.bf16.gmra.mxu3 %vm337_vm1, %v1486_v3  ;;  %v1684_v34 = vpop.f32.mrf.mxu0 }
 0x13a   : > { %v1284_v0 = vrot.slane %v1266_v62, 2 }
 0x13c   : > { %v615_v14 = vpop.f32.mrf.mxu2  ;;  %v822_v26 = vpop.f32.mrf.mxu3  ;;  %2166 = vmatmul.msk.bf16.gmra.mxu0 %vm337_vm1, %v1635_v15  ;;  %v1285_v27 = vsel %vm1064_vm6, %v1282_v6, %v1284_v0 }
 0x13d   : > { %v639_v43 = vadd.f32 %v615_v14, %v494_v17  ;;  %v495_v35 = vpop.f32.mrf.mxu1 }
 0x13e   : > { %v496_v21 = vadd.f32 %v495_v35, %v2543_v24 }
 0x13f   : > { %v841_v60 = vadd.f32 %v817_v28, %v639_v43 }
 0x141   : > { %v2815_v58 = vadd.f32 %v2764_v46, %v841_v60  ;;  %v1495_v46 = vsel %vm1406_vm5, %v1485_v23, %v1494_v57  ;;  %v1686_v59 = vpop.f32.mrf.mxu0  ;;  %v2847_v60 = vld [vmem:[%s2931_s2] ss:$0 sm:$0xff] }
 0x144   : > { %v617_v32 = vpop.f32.mrf.mxu2  ;;  %v824_v8 = vpop.f32.mrf.mxu3 }
 0x145   : > { %v640_v28 = vadd.f32 %v617_v32, %v496_v21  ;;  %v498_v30 = vpop.f32.mrf.mxu1 }
 0x146   : > { %v499_v55 = vadd.f32 %v498_v30, %v2558_v41  ;;  %v1083_v41 = vsel %vm1064_vm6, %v1080_v56, %v1082_v33 }
 0x147   : > { %v842_v61 = vadd.f32 %v819_v2, %v640_v28  ;;  %2070 = vmatmul.msk.bf16.gmra.mxu1 %vm337_vm1, %v1081_v9 }
 0x149   : > { %2123 = vmatmul.msk.bf16.gmra.mxu2 %vm337_vm1, %v1283_v10  ;;  %v2828_v24 = vadd.f32 %v2777_v13, %v842_v61  ;;  %2145 = vmatmul.msk.bf16.gmra.mxu3 %vm337_vm1, %v1495_v46  ;;  %v1689_v29 = vpop.f32.mrf.mxu0 }
 0x14c   : > { %v620_v44 = vpop.f32.mrf.mxu2  ;;  %v1544_v37 = vpop.f32.mrf.mxu3 }
 0x14d   : > { %v641_v11 = vadd.f32 %v620_v44, %v499_v55  ;;  %v500_v40 = vpop.f32.mrf.mxu1 }
 0x14e   : > { %v501_v13 = vadd.f32 %v500_v40, %v2572_v54 }
 0x14f   : > { %v843_v23 = vadd.f32 %v822_v26, %v641_v11 }
 0x151   : > { %v2833_v2 = vadd.f32 %v2792_v51, %v843_v23  ;;  %v1691_v54 = vpop.f32.mrf.mxu0 }
 0x154   : > { %v622_v4 = vpop.f32.mrf.mxu2  ;;  %v1546_v42 = vpop.f32.mrf.mxu3 }
 0x155   : > { %v642_v3 = vadd.f32 %v622_v4, %v501_v13  ;;  %v1132_v17 = vpop.f32.mrf.mxu1 }
 0x156   : > { %v1177_v19 = vadd.f32 %v1132_v17, %v2628_v22 }
 0x157   : > { %v844_v48 = vadd.f32 %v824_v8, %v642_v3  ;;  %2071 = vmatmul.msk.bf16.gmra.mxu1 %vm337_vm1, %v1083_v41 }
 0x159   : > { %2124 = vmatmul.msk.bf16.gmra.mxu2 %vm337_vm1, %v1285_v27  ;;  %v2841_v51 = vadd.f32 %v1034_v49, %v844_v48  ;;  %v1694_v57 = vpop.f32.mrf.mxu0 }
 0x15c   : > { %v1334_v20 = vpop.f32.mrf.mxu2  ;;  %v1549_v43 = vpop.f32.mrf.mxu3 }
 0x15d   : > { %v1379_v14 = vadd.f32 %v1334_v20, %v1177_v19  ;;  %v1134_v26 = vpop.f32.mrf.mxu1 }
 0x15e   : > { %v1178_v49 = vadd.f32 %v1134_v26, %v2646_v50 }
 0x15f   : > { %v1589_v35 = vadd.f32 %v1544_v37, %v1379_v14 }
 0x161   : > { %v1729_v16 = vadd.f32 %v1684_v34, %v1589_v35  ;;  %v1696_v55 = vpop.f32.mrf.mxu0 }
 0x163   : > { %v1751_v45 = vadd.f32 %v2847_v60, %v1729_v16 }
 0x164   : > { %v1336_v15 = vpop.f32.mrf.mxu2  ;;  %v1551_v6 = vpop.f32.mrf.mxu3 }
 0x165   : > { %v1769_v56 = vmax.f32 %v1751_v45, 0.0  ;;  %v1380_v22 = vadd.f32 %v1336_v15, %v1178_v49  ;;  %v1137_v21 = vpop.f32.mrf.mxu1 }
 0x166   : > { %v1179_v8 = vadd.f32 %v1137_v21, %v2657_v12 }
 0x167   : > { %v1787_v34 = vpack.c.bf16 %v1769_v56, %v1769_v56  ;;  %v1590_v32 = vadd.f32 %v1546_v42, %v1380_v22 }
 0x169   : > { %1806 = vst.msk [vmem:[%s2855_s7] sm:$0xf] %vm1805_vm7, %v1787_v34  ;;  %v1730_v28 = vadd.f32 %v1686_v59, %v1590_v32  ;;  %v1699_v4 = vpop.f32.mrf.mxu0 }
 0x16b   : > { %v1752_v50 = vadd.f32 %v2847_v60, %v1730_v28 }
 0x16c   : > { %v1339_v30 = vpop.f32.mrf.mxu2  ;;  %v1554_v61 = vpop.f32.mrf.mxu3 }
 0x16d   : > { %v1770_v9 = vmax.f32 %v1752_v50, 0.0  ;;  %v1381_v10 = vadd.f32 %v1339_v30, %v1179_v8  ;;  %v1139_v46 = vpop.f32.mrf.mxu1 }
 0x16e   : > { %v1180_v59 = vadd.f32 %v1139_v46, %v2674_v38 }
 0x16f   : > { %v1788_v63 = vpack.c.bf16 %v1770_v9, %v1770_v9  ;;  %v1591_v31 = vadd.f32 %v1549_v43, %v1381_v10 }
 0x171   : > { %1807 = vst.msk [vmem:[%s2855_s7 + $0x4] sm:$0xf] %vm1805_vm7, %v1788_v63  ;;  %v1731_v44 = vadd.f32 %v1689_v29, %v1591_v31  ;;  %v1701_v26 = vpop.f32.mrf.mxu0 }
 0x173   : > { %v1753_v11 = vadd.f32 %v2847_v60, %v1731_v44 }
 0x174   : > { %v1341_v37 = vpop.f32.mrf.mxu2  ;;  %v1556_v12 = vpop.f32.mrf.mxu3 }
 0x175   : > { %v1771_v40 = vmax.f32 %v1753_v11, 0.0  ;;  %v1382_v62 = vadd.f32 %v1341_v37, %v1180_v59  ;;  %v1142_v23 = vpop.f32.mrf.mxu1 }
 0x176   : > { %v1181_v29 = vadd.f32 %v1142_v23, %v2685_v53 }
 0x177   : > { %v1789_v33 = vpack.c.bf16 %v1771_v40, %v1771_v40  ;;  %v1592_v0 = vadd.f32 %v1551_v6, %v1382_v62 }
 0x179   : > { %1808 = vst.msk [vmem:[%s2855_s7 + $0x8] sm:$0xf] %vm1805_vm7, %v1789_v33  ;;  %v1732_v13 = vadd.f32 %v1691_v54, %v1592_v0  ;;  %v1704_v28 = vpop.f32.mrf.mxu0 }
 0x17b   : > { %v1754_v3 = vadd.f32 %v2847_v60, %v1732_v13 }
 0x17c   : > { %v1344_v42 = vpop.f32.mrf.mxu2  ;;  %v1559_v38 = vpop.f32.mrf.mxu3 }
 0x17d   : > { %v1772_v17 = vmax.f32 %v1754_v3, 0.0  ;;  %v1383_v41 = vadd.f32 %v1344_v42, %v1181_v29  ;;  %v1144_v27 = vpop.f32.mrf.mxu1 }
 0x17e   : > { %v1182_v54 = vadd.f32 %v1144_v27, %v2702_v47 }
 0x17f   : > { %v1790_v48 = vpack.c.bf16 %v1772_v17, %v1772_v17  ;;  %v1593_v19 = vadd.f32 %v1554_v61, %v1383_v41 }
 0x181   : > { %1809 = vst.msk [vmem:[%s2855_s7 + $0xc] sm:$0xf] %vm1805_vm7, %v1790_v48  ;;  %v1733_v20 = vadd.f32 %v1694_v57, %v1593_v19  ;;  %v1706_v11 = vpop.f32.mrf.mxu0 }
 0x183   : > { %v1755_v14 = vadd.f32 %v2847_v60, %v1733_v20 }
 0x184   : > { %v1346_v43 = vpop.f32.mrf.mxu2  ;;  %v1561_v53 = vpop.f32.mrf.mxu3 }
 0x185   : > { %v1773_v35 = vmax.f32 %v1755_v14, 0.0  ;;  %v1384_v16 = vadd.f32 %v1346_v43, %v1182_v54  ;;  %v1147_v45 = vpop.f32.mrf.mxu1 }
 0x186   : > { %v1183_v6 = vadd.f32 %v1147_v45, %v2713_v25 }
 0x187   : > { %v1791_v49 = vpack.c.bf16 %v1773_v35, %v1773_v35  ;;  %v1594_v15 = vadd.f32 %v1556_v12, %v1384_v16 }
 0x189   : > { %1810 = vst.msk [vmem:[%s2855_s7 + $0x10] sm:$0xf] %vm1805_vm7, %v1791_v49  ;;  %v1734_v56 = vadd.f32 %v1696_v55, %v1594_v15  ;;  %v1709_v3 = vpop.f32.mrf.mxu0 }
 0x18b   : > { %v1756_v22 = vadd.f32 %v2847_v60, %v1734_v56 }
 0x18c   : > { %v1349_v21 = vpop.f32.mrf.mxu2  ;;  %v1564_v47 = vpop.f32.mrf.mxu3 }
 0x18d   : > { %v1774_v57 = vmax.f32 %v1756_v22, 0.0  ;;  %v1385_v34 = vadd.f32 %v1349_v21, %v1183_v6  ;;  %v1149_v32 = vpop.f32.mrf.mxu1 }
 0x18e   : > { %v1184_v10 = vadd.f32 %v1149_v32, %v2729_v1 }
 0x18f   : > { %v1792_v50 = vpack.c.bf16 %v1774_v57, %v1774_v57  ;;  %v1595_v8 = vadd.f32 %v1559_v38, %v1385_v34 }
 0x191   : > { %1811 = vst.msk [vmem:[%s2855_s7 + $0x14] sm:$0xf] %vm1805_vm7, %v1792_v50  ;;  %v1735_v30 = vadd.f32 %v1699_v4, %v1595_v8 }
 0x193   : > { %v1757_v9 = vadd.f32 %v2847_v60, %v1735_v30 }
 0x194   : > { %v1351_v61 = vpop.f32.mrf.mxu2  ;;  %v1566_v31 = vpop.f32.mrf.mxu3 }
 0x195   : > { %v1775_v46 = vmax.f32 %v1757_v9, 0.0  ;;  %v1386_v63 = vadd.f32 %v1351_v61, %v1184_v10  ;;  %v1152_v25 = vpop.f32.mrf.mxu1 }
 0x196   : > { %v1185_v40 = vadd.f32 %v1152_v25, %v2740_v5 }
 0x197   : > { %v1793_v55 = vpack.c.bf16 %v1775_v46, %v1775_v46  ;;  %v1596_v44 = vadd.f32 %v1561_v53, %v1386_v63 }
 0x199   : > { %1812 = vst.msk [vmem:[%s2855_s7 + $0x18] sm:$0xf] %vm1805_vm7, %v1793_v55  ;;  %v1736_v59 = vadd.f32 %v1701_v26, %v1596_v44  ;;  %v1711_v26 = vpop.f32.mrf.mxu0 }
 0x19b   : > { %v1758_v37 = vadd.f32 %v2847_v60, %v1736_v59 }
 0x19c   : > { %v1354_v62 = vpop.f32.mrf.mxu2  ;;  %v1569_v13 = vpop.f32.mrf.mxu3 }
 0x19d   : > { %v1776_v12 = vmax.f32 %v1758_v37, 0.0  ;;  %v1387_v23 = vadd.f32 %v1354_v62, %v1185_v40  ;;  %v1154_v1 = vpop.f32.mrf.mxu1 }
 0x19e   : > { %v1186_v42 = vadd.f32 %v1154_v1, %v2757_v7 }
 0x19f   : > { %v1794_v33 = vpack.c.bf16 %v1776_v12, %v1776_v12  ;;  %v1597_v0 = vadd.f32 %v1564_v47, %v1387_v23 }
 0x1a1   : > { %1813 = vst.msk [vmem:[%s2855_s7 + $0x1c] sm:$0xf] %vm1805_vm7, %v1794_v33  ;;  %v1737_v4 = vadd.f32 %v1704_v28, %v1597_v0  ;;  %v1714_v34 = vpop.f32.mrf.mxu0 }
 0x1a3   : > { %v1759_v29 = vadd.f32 %v2847_v60, %v1737_v4 }
 0x1a4   : > { %v1356_v17 = vpop.f32.mrf.mxu2  ;;  %v1571_v20 = vpop.f32.mrf.mxu3 }
 0x1a5   : > { %v1777_v41 = vmax.f32 %v1759_v29, 0.0  ;;  %v1388_v38 = vadd.f32 %v1356_v17, %v1186_v42  ;;  %v1157_v5 = vpop.f32.mrf.mxu1 }
 0x1a6   : > { %v1187_v54 = vadd.f32 %v1157_v5, %v2768_v39 }
 0x1a7   : > { %v1795_v27 = vpack.c.bf16 %v1777_v41, %v1777_v41  ;;  %v1598_v48 = vadd.f32 %v1566_v31, %v1388_v38 }
 0x1a9   : > { %1814 = vst.msk [vmem:[%s2855_s7 + $0x20] sm:$0xf] %vm1805_vm7, %v1795_v27  ;;  %v1738_v19 = vadd.f32 %v1706_v11, %v1598_v48  ;;  %v1716_v25 = vpop.f32.mrf.mxu0 }
 0x1ab   : > { %v1760_v14 = vadd.f32 %v2847_v60, %v1738_v19 }
 0x1ac   : > { %v1359_v43 = vpop.f32.mrf.mxu2  ;;  %v1574_v6 = vpop.f32.mrf.mxu3 }
 0x1ad   : > { %v1778_v35 = vmax.f32 %v1760_v14, 0.0  ;;  %v1389_v16 = vadd.f32 %v1359_v43, %v1187_v54  ;;  %v1159_v7 = vpop.f32.mrf.mxu1 }
 0x1ae   : > { %v1188_v56 = vadd.f32 %v1159_v7, %v2785_v52 }
 0x1af   : > { %v1796_v53 = vpack.c.bf16 %v1778_v35, %v1778_v35  ;;  %v1599_v45 = vadd.f32 %v1569_v13, %v1389_v16 }
 0x1b1   : > { %1815 = vst.msk [vmem:[%s2855_s7 + $0x24] sm:$0xf] %vm1805_vm7, %v1796_v53  ;;  %v1739_v49 = vadd.f32 %v1709_v3, %v1599_v45  ;;  %v1719_v1 = vpop.f32.mrf.mxu0 }
 0x1b3   : > { %v1761_v15 = vadd.f32 %v2847_v60, %v1739_v49 }
 0x1b4   : > { %v1361_v22 = vpop.f32.mrf.mxu2  ;;  %v1576_v61 = vpop.f32.mrf.mxu3 }
 0x1b5   : > { %v1779_v21 = vmax.f32 %v1761_v15, 0.0  ;;  %v1390_v57 = vadd.f32 %v1361_v22, %v1188_v56  ;;  %v1162_v39 = vpop.f32.mrf.mxu1 }
 0x1b6   : > { %v1189_v8 = vadd.f32 %v1162_v39, %v2797_v18 }
 0x1b7   : > { %v1797_v47 = vpack.c.bf16 %v1779_v21, %v1779_v21  ;;  %v1600_v32 = vadd.f32 %v1571_v20, %v1390_v57 }
 0x1b9   : > { %1816 = vst.msk [vmem:[%s2855_s7 + $0x28] sm:$0xf] %vm1805_vm7, %v1797_v47  ;;  %v1740_v28 = vadd.f32 %v1711_v26, %v1600_v32  ;;  %v1721_v27 = vpop.f32.mrf.mxu0 }
 0x1bb   : > { %v1762_v50 = vadd.f32 %v2847_v60, %v1740_v28 }
 0x1bc   : > { %v1364_v30 = vpop.f32.mrf.mxu2  ;;  %v1579_v12 = vpop.f32.mrf.mxu3 }
 0x1bd   : > { %v1780_v9 = vmax.f32 %v1762_v50, 0.0  ;;  %v1391_v10 = vadd.f32 %v1364_v30, %v1189_v8  ;;  %v1164_v52 = vpop.f32.mrf.mxu1 }
 0x1be   : > { %v1190_v44 = vadd.f32 %v1164_v52, %v2809_v36 }
 0x1bf   : > { %v1798_v46 = vpack.c.bf16 %v1780_v9, %v1780_v9  ;;  %v1601_v63 = vadd.f32 %v1574_v6, %v1391_v10 }
 0x1c1   : > { %1817 = vst.msk [vmem:[%s2855_s7 + $0x2c] sm:$0xf] %vm1805_vm7, %v1798_v46  ;;  %v1741_v31 = vadd.f32 %v1714_v34, %v1601_v63 }
 0x1c3   : > { %v1763_v55 = vadd.f32 %v2847_v60, %v1741_v31 }
 0x1c4   : > { %v1366_v11 = vpop.f32.mrf.mxu2  ;;  %v1581_v41 = vpop.f32.mrf.mxu3 }
 0x1c5   : > { %v1781_v59 = vmax.f32 %v1763_v55, 0.0  ;;  %v1392_v37 = vadd.f32 %v1366_v11, %v1190_v44  ;;  %v1167_v18 = vpop.f32.mrf.mxu1 }
 0x1c6   : > { %v1191_v0 = vadd.f32 %v1167_v18, %v2815_v58 }
 0x1c7   : > { %v1799_v40 = vpack.c.bf16 %v1781_v59, %v1781_v59  ;;  %v1602_v62 = vadd.f32 %v1576_v61, %v1392_v37 }
 0x1c9   : > { %1818 = vst.msk [vmem:[%s2855_s7 + $0x30] sm:$0xf] %vm1805_vm7, %v1799_v40  ;;  %v1742_v23 = vadd.f32 %v1716_v25, %v1602_v62 }
 0x1cb   : > { %v1764_v33 = vadd.f32 %v2847_v60, %v1742_v23 }
 0x1cc   : > { %v1369_v13 = vpop.f32.mrf.mxu2  ;;  %v1584_v16 = vpop.f32.mrf.mxu3 }
 0x1cd   : > { %v1782_v4 = vmax.f32 %v1764_v33, 0.0  ;;  %v1393_v3 = vadd.f32 %v1369_v13, %v1191_v0  ;;  %v1169_v36 = vpop.f32.mrf.mxu1 }
 0x1ce   : > { %v1192_v5 = vadd.f32 %v1169_v36, %v2828_v24  ;;  %v1724_v24 = vpop.f32.mrf.mxu0 }
 0x1cf   : > { %v1800_v29 = vpack.c.bf16 %v1782_v4, %v1782_v4  ;;  %v1603_v42 = vadd.f32 %v1579_v12, %v1393_v3 }
 0x1d1   : > { %1819 = vst.msk [vmem:[%s2855_s7 + $0x34] sm:$0xf] %vm1805_vm7, %v1800_v29  ;;  %v1743_v17 = vadd.f32 %v1719_v1, %v1603_v42 }
 0x1d3   : > { %v1765_v38 = vadd.f32 %v2847_v60, %v1743_v17 }
 0x1d4   : > { %v1371_v48 = vpop.f32.mrf.mxu2  ;;  %v1586_v34 = vpop.f32.mrf.mxu3 }
 0x1d5   : > { %v1783_v19 = vmax.f32 %v1765_v38, 0.0  ;;  %v1394_v20 = vadd.f32 %v1371_v48, %v1192_v5  ;;  %v1172_v58 = vpop.f32.mrf.mxu1 }
 0x1d6   : > { %v1193_v35 = vadd.f32 %v1172_v58, %v2833_v2  ;;  %v1726_v28 = vpop.f32.mrf.mxu0 }
 0x1d7   : > { %v1801_v14 = vpack.c.bf16 %v1783_v19, %v1783_v19  ;;  %v1604_v54 = vadd.f32 %v1581_v41, %v1394_v20 }
 0x1d9   : > { %1820 = vst.msk [vmem:[%s2855_s7 + $0x38] sm:$0xf] %vm1805_vm7, %v1801_v14  ;;  %v1744_v43 = vadd.f32 %v1721_v27, %v1604_v54 }
 0x1db   : > { %v1766_v26 = vadd.f32 %v2847_v60, %v1744_v43 }
 0x1dc   : > { %v1374_v7 = vpop.f32.mrf.mxu2 }
 0x1dd   : > { %v1784_v53 = vmax.f32 %v1766_v26, 0.0  ;;  %v1395_v45 = vadd.f32 %v1374_v7, %v1193_v35  ;;  %v1174_v56 = vpop.f32.mrf.mxu1 }
 0x1de   : > { %v1194_v21 = vadd.f32 %v1174_v56, %v2841_v51 }
 0x1df   : > { %v1802_v49 = vpack.c.bf16 %v1784_v53, %v1784_v53  ;;  %v1605_v15 = vadd.f32 %v1584_v16, %v1395_v45 }
 0x1e1   : > { %1821 = vst.msk [vmem:[%s2855_s7 + $0x3c] sm:$0xf] %vm1805_vm7, %v1802_v49  ;;  %v1745_v22 = vadd.f32 %v1724_v24, %v1605_v15 }
 0x1e3   : > { %v1767_v6 = vadd.f32 %v2847_v60, %v1745_v22 }
 0x1e4   : > { %v1376_v57 = vpop.f32.mrf.mxu2 }
 0x1e5   : > { %v1785_v39 = vmax.f32 %v1767_v6, 0.0  ;;  %v1396_v2 = vadd.f32 %v1376_v57, %v1194_v21 }
 0x1e7   : > { %v1803_v47 = vpack.c.bf16 %v1785_v39, %v1785_v39  ;;  %v1606_v32 = vadd.f32 %v1586_v34, %v1396_v2 }
 0x1e9   : > { %1822 = vst.msk [vmem:[%s2855_s7 + $0x40] sm:$0xf] %vm1805_vm7, %v1803_v47  ;;  %v1746_v50 = vadd.f32 %v1726_v28, %v1606_v32 }
 0x1eb   : > { %v1768_v8 = vadd.f32 %v2847_v60, %v1746_v50 }
 0x1ed   : > { %v1786_v30 = vmax.f32 %v1768_v8, 0.0 }
 0x1ef   : > { %v1804_v9 = vpack.c.bf16 %v1786_v30, %v1786_v30 }
 0x1f1   : > { %1823 = vst.msk [vmem:[%s2855_s7 + $0x44] sm:$0xf] %vm1805_vm7, %v1804_v9 }
 0x1f2 PF: > { %s13_s12 = sadd.s32 1, %s2241_s12  }
 0x1f3   : > { %p10_p4 = scmp.ge.s32.totalorder %s13_s12, 4  }
 0x1f5   :  { %12 = sbr.rel (!%p10_p4) target bundleno = 1 (0x1), region = 70 }

// kernel: _lambda_.14
= control target key start
LH: loop header
LB: loop body
LE: loop exit
PB: predicated region body
PF: predicated region fallthrough
CT: control target
= control target key end

     0   :  { %s2587_s12 = smov 0   ;;  %s3296_s0 = inlined_call_operand.vmem [shape: bf16[2,182,64], index: 0, kind: input, shape index: {}]   ;;  %s3297_s1 = inlined_call_operand.vmem [shape: bf16[9,64,128], index: 1, kind: input, shape index: {}]   ;;  %s3298_s2 = inlined_call_operand.vmem [shape: f32[1,128], index: 2, kind: input, shape index: {}]   ;;  %s3299_s3 = inlined_call_operand.vmem [shape: bf16[2,144,128], index: 3, kind: output, shape index: {}]  }
   0x1 LB: > { %s2022_s13 = sadd.s32 4294967295, %s2565_s12   ;;  %p2026_p0 = scmp.ge.s32.totalorder %s2565_s12, 1  ;;  %s2565_s12 = sphi %s2587_s12, %s13_s12  }
   0x2   : > { %p137_p1 = scmp.lt.s32.totalorder %s2565_s12, 3 }
   0x4   : > { %p138_p2 = pnand %p2026_p0, %p137_p1 }
   0x5   : > { %p161_p3 = scmp.lt.s32.totalorder (!%p138_p2), %s2022_s13, 1 }
   0x6   : > { %141 = sbr.rel (%p138_p2) target bundleno = 500 (0x1f4), region = 32 }
   0xb   : > { %v2431_v0 = vld [vmem:[%s3297_s1 + $0x38] sm:$0xff]  ;;  %v2430_v1 = vld [vmem:[%s3297_s1 + $0x30] sm:$0xff]  ;;  %s3301_s13 = smov (!%p161_p3, %s2022_s13), 1  ;;  %v2429_v2 = vld [vmem:[%s3297_s1 + $0x28] sm:$0xff]  ;;  %vm256_vm0 = vsmask.f32 7424 }
   0xc   : > { %2536 = vmatpush.bf16.msra.mxu1 %v2431_v0  ;;  %2537 = vmatpush.bf16.msra.mxu2 %v2431_v0  ;;  %s2548_s18 = smul.u32 92, %s3301_s13  ;;  %v2428_v13 = vld [vmem:[%s3297_s1 + $0x20] sm:$0xff]  ;;  %v2435_v21 = vld [vmem:[%s3297_s1 + $0x58] sm:$0xff]  ;;  %vm357_vm1 = vcmask 523264   ;;  %v2434_v34 = vld [vmem:[%s3297_s1 + $0x50] sm:$0xff]  ;;  %vm548_vm3 = vcmask 1046528  }
   0xd   : > { %2538 = vmatpush.bf16.msra.mxu3 %v2431_v0  ;;  %389 = vmatpush.bf16.msra.mxu0 %v2431_v0  ;;  %v2427_v22 = vld [vmem:[%s3297_s1 + $0x18] sm:$0xff]  ;;  %v2426_v37 = vld [vmem:[%s3297_s1 + $0x10] sm:$0xff]  ;;  %v2433_v45 = vld [vmem:[%s3297_s1 + $0x48] sm:$0xff]  ;;  %vm922_vm2 = vsmask.f32 6400  ;;  %vm1748_vm4 = vcmask 1044480  }
   0xe   : > { %s2610_s23 = scalar_lea.vmem %s3296_s0, %s2548_s18  ;;  %v2447_v31 = vld [vmem:[%s3297_s1 + $0x78] sm:$0xff]  ;;  %v2446_v42 = vld [vmem:[%s3297_s1 + $0x70] sm:$0xff]  ;;  %v2425_v49 = vld [vmem:[%s3297_s1 + $0x8] sm:$0xff]  ;;  %vm1522_vm5 = vsmask.f32 5376  ;;  %vm1148_vm6 = vcmask 1045504  }
   0xf   : > { %v2613_v3 = vld [vmem:[%s2610_s23 + $0x8] sm:$0xff]  ;;  %v2616_v4 = vld [vmem:[%s2610_s23 + $0x10] sm:$0xff]  ;;  %v2619_v5 = vld [vmem:[%s2610_s23 + $0x20] sm:$0xff]  ;;  %s2549_s18 = smul.u32 72, %s3301_s13 }
  0x10   : > { %2539 = vmatpush.bf16.msra.mxu1 %v2430_v1  ;;  %2540 = vmatpush.bf16.msra.mxu2 %v2430_v1  ;;  %v2622_v6 = vld [vmem:[%s2610_s23 + $0x28] sm:$0xff]  ;;  %v2625_v7 = vld [vmem:[%s2610_s23 + $0x38] sm:$0xff]  ;;  %v2628_v8 = vld [vmem:[%s2610_s23 + $0x40] sm:$0xff]  ;;  %v265_v9 = vshll.u32 %v2613_v3, 16  ;;  %v269_v10 = vshrl.u32 %v2613_v3, 16  ;;  %v273_v11 = vshll.u32 %v2616_v4, 16 }
  0x11   : > { %2541 = vmatpush.bf16.msra.mxu3 %v2430_v1  ;;  %390 = vmatpush.bf16.msra.mxu0 %v2430_v1  ;;  %v289_v12 = vshll.u32 %v2619_v5, 16  ;;  %v293_v14 = vshrl.u32 %v2619_v5, 16  ;;  %v297_v15 = vshll.u32 %v2622_v6, 16  ;;  %v313_v16 = vshll.u32 %v2625_v7, 16  ;;  %v198_v29 = vld [vmem:[%s2610_s23 + $0x48] sm:$0x1]  ;;  %s3251_s21 = scalar_lea.vmem %s3299_s3, %s2549_s18 }
  0x12   : > { %v317_v17 = vshrl.u32 %v2625_v7, 16  ;;  %v2641_v18 = vrot.slane %v265_v9, 1  ;;  %v2643_v19 = vrot.slane %v273_v11, 1  ;;  %v321_v23 = vshll.u32 %v2628_v8, 16  ;;  %v2675_v35 = vld [vmem:[%s2610_s23] sm:$0xff]   ;;  %v2685_v39 = vld [vmem:[%s2610_s23 + $0x18] sm:$0xff] }
  0x13   : > { %v2645_v20 = vrot.slane %v289_v12, 1  ;;  %v2654_v24 = vrot.slane %v297_v15, 1  ;;  %v2656_v25 = vrot.slane %v313_v16, 1  ;;  %v245_v38 = vunpack.c.l.b16 %v198_v29  ;;  %v2451_v40 = vld [vmem:[%s3297_s1 + $0x98] sm:$0xff]  ;;  %v2691_v41 = vld [vmem:[%s2610_s23 + $0x30] sm:$0xff]  ;;  %v2445_v57 = vld [vmem:[%s3297_s1 + $0x68] sm:$0xff] }
  0x14   : > { %2542 = vmatpush.bf16.msra.mxu1 %v2429_v2  ;;  %2543 = vmatpush.bf16.msra.mxu2 %v2429_v2  ;;  %v271_v26 = vor.u32 %v269_v10, %v2641_v18  ;;  %v2660_v28 = vrot.slane %v321_v23, 1  ;;  %v258_v43 = vshrl.u32 %v2675_v35, 16  ;;  %v260_v44 = vshll.u32 %v2675_v35, 16  ;;  %v691_v46 = vld [vmem:[%s2610_s23 + $0x8] sm:$0xe]  ;;  %v2450_v51 = vld [vmem:[%s3297_s1 + $0x90] sm:$0xff] }
  0x15   : > { %2544 = vmatpush.bf16.msra.mxu3 %v2429_v2  ;;  %391 = vmatpush.bf16.msra.mxu0 %v2429_v2  ;;  %v295_v27 = vor.u32 %v293_v14, %v2645_v20  ;;  %v319_v30 = vor.u32 %v317_v17, %v2656_v25  ;;  %v2704_v47 = vld [vmem:[%s2610_s23 + $0xc] sm:$0xf]  ;;  %v2706_v48 = vpack.c.b16 %v245_v38, %v245_v38  ;;  %v277_v52 = vshrl.u32 %v2616_v4, 16  ;;  %v2432_v61 = vld [vmem:[%s3297_s1 + $0x40] sm:$0xff] }
  0x16   : > { %v276_v32 = vsel %vm256_vm0, %v271_v26, %v2643_v19  ;;  %v262_v50 = vrot.slane %v260_v44, 1  ;;  %v281_v53 = vshll.u32 %v2685_v39, 16  ;;  %v301_v54 = vshrl.u32 %v2622_v6, 16  ;;  %v2424_v0 = vld [vmem:[%s3297_s1] sm:$0xff]  ;;  %v2449_v1 = vld [vmem:[%s3297_s1 + $0x88] sm:$0xff] }
  0x17   : > { %v300_v33 = vsel %vm256_vm0, %v295_v27, %v2654_v24  ;;  %v324_v36 = vsel %vm256_vm0, %v319_v30, %v2660_v28  ;;  %v305_v55 = vshll.u32 %v2691_v41, 16  ;;  %v738_v58 = vunpack.c.l.b16 %v691_v46  ;;  %v2444_v12 = vld [vmem:[%s3297_s1 + $0x60] sm:$0xff] }
  0x18   : > { %2545 = vmatpush.bf16.msra.mxu1 %v2428_v13  ;;  %2546 = vmatpush.bf16.msra.mxu2 %v2428_v13  ;;  %v263_v56 = vor.u32 %v262_v50, %v258_v43  ;;  %v739_v59 = vunpack.c.l.b16 %v2704_v47  ;;  %v325_v60 = vshrl.u32 %v2628_v8, 16  ;;  %v329_v62 = vshll.u32 %v2706_v48, 16  ;;  %v2448_v17 = vld [vmem:[%s3297_s1 + $0x80] sm:$0xff] }
  0x19   : > { %2547 = vmatpush.bf16.msra.mxu3 %v2428_v13  ;;  %392 = vmatpush.bf16.msra.mxu0 %v2428_v13  ;;  %v279_v2 = vor.u32 %v277_v52, %v2643_v19  ;;  %v283_v9 = vrot.slane %v281_v53, 1  ;;  %v303_v10 = vor.u32 %v301_v54, %v2654_v24  ;;  %v307_v11 = vrot.slane %v305_v55, 1  ;;  %v2742_v13 = vld [vmem:[%s2610_s23 + $0x10] sm:$0xff] }
  0x1a   : > { %v268_v63 = vsel %vm256_vm0, %v263_v56, %v2641_v18  ;;  %v757_v14 = vpack.c.b16 %v739_v59, %v738_v58  ;;  %v327_v15 = vor.u32 %v325_v60, %v2660_v28  ;;  %v331_v16 = vrot.slane %v329_v62, 1  ;;  %v2525_v58 = vld [vmem:[%s2610_s23] sm:$0xf0]  ;;  %v2526_v60 = vld [vmem:[%s2610_s23] sm:$0xe] }
  0x1b   : > { %2086 = vmatmul.msk.bf16.vlgmr.msra.gmra.mxu1 %vm357_vm1, %v276_v32  ;;  %2089 = vmatmul.msk.bf16.vlgmr.msra.gmra.mxu2 %vm357_vm1, %v300_v33  ;;  %v284_v23 = vsel %vm256_vm0, %v279_v2, %v283_v9  ;;  %v308_v24 = vsel %vm256_vm0, %v303_v10, %v307_v11  ;;  %v2471_v32 = vld [vmem:[%s3297_s1 + $0xf8] sm:$0xff]  ;;  %v285_v38 = vshrl.u32 %v2685_v39, 16 }
  0x1c   : > { %623 = vmatpush.bf16.msrb.mxu2 %v2435_v21  ;;  %485 = vmatpush.bf16.msrb.mxu1 %v2427_v22  ;;  %v924_v18 = vshrl.u32 %v757_v14, 16  ;;  %v927_v19 = vshll.u32 %v757_v14, 16  ;;  %v932_v21 = vshrl.u32 %v2742_v13, 16  ;;  %v935_v22 = vshll.u32 %v2742_v13, 16  ;;  %v2455_v33 = vld [vmem:[%s3297_s1 + $0xb8] sm:$0xff] }
  0x1d   : > { %841 = vmatpush.bf16.msrb.mxu3 %v2447_v31  ;;  %1067 = vmatpush.bf16.msrb.mxu0 %v2451_v40  ;;  %v332_v30 = vsel %vm256_vm0, %v327_v15, %v331_v16  ;;  %v2467_v31 = vld [vmem:[%s3297_s1 + $0xd8] sm:$0xff]  ;;  %v309_v40 = vshrl.u32 %v2691_v41, 16  ;;  %v287_v43 = vor.u32 %v285_v38, %v283_v9  ;;  %v767_v46 = vrot.slane %v757_v14, 1  ;;  %v2466_v14 = vld [vmem:[%s3297_s1 + $0xd0] sm:$0xff] }
  0x1e   : > { %2092 = vmatmul.msk.bf16.vlgmr.msra.gmra.mxu3 %vm357_vm1, %v324_v36  ;;  %2085 = vmatmul.msk.bf16.vlgmr.msra.gmra.mxu0 %vm357_vm1, %v268_v63  ;;  %v926_v26 = vrot.slane %v924_v18, 1  ;;  %v929_v27 = vrot.slane %v927_v19, 2  ;;  %v934_v28 = vrot.slane %v932_v21, 1  ;;  %v937_v29 = vrot.slane %v935_v22, 2  ;;  %v2794_v63 = vld [vmem:[%s2610_s23 + $0x20] sm:$0xff]  ;;  %v2470_v15 = vld [vmem:[%s3297_s1 + $0xf0] sm:$0xff] }
  0x1f   : > { %v311_v44 = vor.u32 %v309_v40, %v307_v11  ;;  %v292_v52 = vsel %vm256_vm0, %v287_v43, %v2645_v20  ;;  %v953_v2 = vshll.u32 %v2794_v63, 16  ;;  %v2454_v16 = vld [vmem:[%s3297_s1 + $0xb0] sm:$0xff]  ;;  %v552_v19 = vrot.slane %v2616_v4, 1  ;;  %v2821_v21 = vld [vmem:[%s2610_s23 + $0x28] sm:$0xff] }
  0x20   : > { %624 = vmatpush.bf16.msrb.mxu2 %v2434_v34  ;;  %486 = vmatpush.bf16.msrb.mxu1 %v2426_v37  ;;  %v930_v34 = vor.u32 %v929_v27, %v926_v26  ;;  %v938_v36 = vor.u32 %v937_v29, %v934_v28  ;;  %v2475_v37 = vld [vmem:[%s3297_s1 + $0x118] sm:$0xff]  ;;  %v772_v22 = vrot.slane %v2794_v63, 1  ;;  %v2465_v43 = vld [vmem:[%s3297_s1 + $0xc8] sm:$0xff] }
  0x21   : > { %842 = vmatpush.bf16.msrb.mxu3 %v2446_v42  ;;  %1068 = vmatpush.bf16.msrb.mxu0 %v2450_v51  ;;  %v316_v53 = vsel %vm256_vm0, %v311_v44, %v2656_v25  ;;  %v550_v25 = vrot.slane %v2613_v3, 1  ;;  %v955_v11 = vrot.slane %v953_v2, 2 }
  0x22   : > { %v939_v42 = vsel %vm922_vm2, %v930_v34, %v938_v36  ;;  %v774_v34 = vrot.slane %v2821_v21, 1 }
  0x23   : > { %v553_v26 = vsel %vm548_vm3, %v550_v25, %v552_v19 }
  0x24   : > { %625 = vmatpush.bf16.msrb.mxu2 %v2433_v45  ;;  %487 = vmatpush.bf16.msrb.mxu1 %v2425_v49  ;;  %v2775_v45 = vld [vmem:[%s2610_s23 + $0x18] sm:$0xff]  ;;  %v768_v49 = vrot.slane %v2742_v13, 1 }
  0x25   : > { %843 = vmatpush.bf16.msrb.mxu3 %v2445_v57  ;;  %1069 = vmatpush.bf16.msrb.mxu0 %v2449_v1  ;;  %v941_v50 = vshrl.u32 %v2775_v45, 16  ;;  %v944_v51 = vshll.u32 %v2775_v45, 16  ;;  %v950_v1 = vshrl.u32 %v2794_v63, 16 }
  0x26   : > { %v769_v56 = vsel %vm548_vm3, %v767_v46, %v768_v49  ;;  %v2469_v46 = vld [vmem:[%s3297_s1 + $0xe8] sm:$0xff] }
  0x27   : > { %v943_v54 = vrot.slane %v941_v50, 1  ;;  %v946_v55 = vrot.slane %v944_v51, 2  ;;  %v952_v10 = vrot.slane %v950_v1, 1  ;;  %v556_v50 = vrot.slane %v2619_v5, 1  ;;  %v2860_v51 = vld [vmem:[%s2610_s23 + $0x38] sm:$0xff] }
  0x28   : > { %626 = vmatpush.bf16.msrb.mxu2 %v2432_v61  ;;  %488 = vmatpush.bf16.msrb.mxu1 %v2424_v0  ;;  %v2527_v61 = vor.u32 %v2526_v60, %v2525_v58  ;;  %v770_v0 = vrot.slane %v2775_v45, 1  ;;  %v2473_v60 = vld [vmem:[%s3297_s1 + $0x108] sm:$0xff] }
  0x29   : > { %844 = vmatpush.bf16.msrb.mxu3 %v2444_v12  ;;  %1070 = vmatpush.bf16.msrb.mxu0 %v2448_v17  ;;  %v947_v57 = vor.u32 %v946_v55, %v943_v54  ;;  %v956_v17 = vor.u32 %v955_v11, %v952_v10  ;;  %v980_v54 = vshll.u32 %v2860_v51, 16 }
  0x2a   : > { %v549_v62 = vrot.slane %v2527_v61, 1  ;;  %v771_v12 = vsel %vm548_vm3, %v768_v49, %v770_v0  ;;  %v773_v29 = vsel %vm548_vm3, %v770_v0, %v772_v22  ;;  %v2453_v49 = vld [vmem:[%s3297_s1 + $0xa8] sm:$0xff] }
  0x2b   : > { %2087 = vmatmul.msk.bf16.gmra.mxu1 %vm357_vm1, %v284_v23  ;;  %2090 = vmatmul.msk.bf16.gmra.mxu2 %vm357_vm1, %v308_v24  ;;  %v948_v20 = vsel %vm922_vm2, %v938_v36, %v947_v57  ;;  %v957_v18 = vsel %vm922_vm2, %v947_v57, %v956_v17  ;;  %v959_v23 = vshrl.u32 %v2821_v21, 16  ;;  %v962_v24 = vshll.u32 %v2821_v21, 16 }
  0x2c   : > { %1441 = vmatpush.bf16.msra.mxu2 %v2467_v31  ;;  %1223 = vmatpush.bf16.msra.mxu1 %v2455_v33  ;;  %v551_v9 = vsel %vm548_vm3, %v549_v62, %v550_v25  ;;  %v2836_v33 = vld [vmem:[%s2610_s23 + $0x30] sm:$0xff]  ;;  %v982_v57 = vrot.slane %v980_v54, 2  ;;  %v558_v62 = vrot.slane %v2622_v6, 1  ;;  %v2878_v25 = vld [vmem:[%s2610_s23 + $0x40] sm:$0xff] }
  0x2d   : > { %1667 = vmatpush.bf16.msra.mxu3 %v2471_v32  ;;  %1823 = vmatpush.bf16.msra.mxu0 %v2475_v37  ;;  %v961_v27 = vrot.slane %v959_v23, 1  ;;  %v964_v28 = vrot.slane %v962_v24, 2  ;;  %v554_v32 = vrot.slane %v2685_v39, 1  ;;  %v968_v36 = vshrl.u32 %v2836_v33, 16  ;;  %v2468_v23 = vld [vmem:[%s3297_s1 + $0xe0] sm:$0xff] }
  0x2e   : > { %2093 = vmatmul.msk.bf16.gmra.mxu3 %vm357_vm1, %v332_v30  ;;  %2241 = vmatmul.msk.bf16.vlgmr.msrb.gmra.mxu0 %vm357_vm1, %v939_v42  ;;  %v971_v37 = vshll.u32 %v2836_v33, 16  ;;  %v775_v42 = vsel %vm548_vm3, %v772_v22, %v774_v34  ;;  %v986_v0 = vshrl.u32 %v2878_v25, 16  ;;  %v989_v1 = vshll.u32 %v2878_v25, 16 }
  0x2f   : > { %v965_v30 = vor.u32 %v964_v28, %v961_v27  ;;  %v970_v38 = vrot.slane %v968_v36, 1  ;;  %v557_v55 = vsel %vm548_vm3, %v554_v32, %v556_v50  ;;  %v559_v2 = vsel %vm548_vm3, %v556_v50, %v558_v62  ;;  %v2452_v28 = vld [vmem:[%s3297_s1 + $0xa0] sm:$0xff] }
  0x30   : > { %1442 = vmatpush.bf16.msra.mxu2 %v2466_v14  ;;  %1224 = vmatpush.bf16.msra.mxu1 %v2454_v16  ;;  %v973_v40 = vrot.slane %v971_v37, 2  ;;  %v991_v10 = vrot.slane %v989_v1, 2  ;;  %v2893_v16 = vld [vmem:[%s2610_s23 + $0x48] sm:$0xff]  ;;  %v909_v37 = vld [vmem:[%s2610_s23 + $0x50] sm:$0x3] }
  0x31   : > { %1668 = vmatpush.bf16.msra.mxu3 %v2470_v15  ;;  %v966_v31 = vsel %vm922_vm2, %v956_v17, %v965_v30  ;;  %v560_v15 = vrot.slane %v2691_v41, 1  ;;  %v780_v17 = vrot.slane %v2878_v25, 1  ;;  %v1292_v1 = vld [vmem:[%s2610_s23 + $0x14] sm:$0xf] }
  0x32   : > { %v974_v44 = vor.u32 %v973_v40, %v970_v38  ;;  %v562_v38 = vrot.slane %v2625_v7, 1 }
  0x33   : > { %v561_v22 = vsel %vm548_vm3, %v558_v62, %v560_v15 }
  0x34   : > { %1443 = vmatpush.bf16.msra.mxu2 %v2465_v43  ;;  %1225 = vmatpush.bf16.msra.mxu1 %v2453_v49  ;;  %v782_v43 = vrot.slane %v2893_v16, 1 }
  0x35   : > { %1669 = vmatpush.bf16.msra.mxu3 %v2469_v46 }
  0x38   : > { %1226 = vmatpush.bf16.msra.mxu1 %v2452_v28 }
  0x39   : > { %1670 = vmatpush.bf16.msra.mxu3 %v2468_v23 }
  0x3b   : > { %2088 = vmatmul.msk.bf16.gmra.mxu1 %vm357_vm1, %v292_v52  ;;  %2091 = vmatmul.msk.bf16.gmra.mxu2 %vm357_vm1, %v316_v53  ;;  %v776_v52 = vrot.slane %v2836_v33, 1  ;;  %v977_v53 = vshrl.u32 %v2860_v51, 16 }
  0x3d   : > { %v777_v58 = vsel %vm548_vm3, %v774_v34, %v776_v52 }
  0x3e   : > { %2208 = vmatmul.msk.bf16.vlgmr.msrb.gmra.mxu3 %vm357_vm1, %v769_v56  ;;  %2242 = vmatmul.msk.bf16.gmra.mxu0 %vm357_vm1, %v948_v20  ;;  %v979_v56 = vrot.slane %v977_v53, 1 }
  0x40   : > { %v983_v61 = vor.u32 %v982_v57, %v979_v56  ;;  %v709_v56 = vld [vmem:[%s2610_s23 + $0x50] sm:$0x1] }
  0x42   : > { %v984_v20 = vsel %vm922_vm2, %v974_v44, %v983_v61 }
  0x4b   : > { %2110 = vmatmul.msk.bf16.vlgmr.msrb.gmra.mxu1 %vm357_vm1, %v2675_v35  ;;  %2143 = vmatmul.msk.bf16.vlgmr.msrb.gmra.mxu2 %vm357_vm1, %v551_v9  ;;  %v2474_v35 = vld [vmem:[%s3297_s1 + $0x110] sm:$0xff]  ;;  %v988_v9 = vrot.slane %v986_v0, 1 }
  0x4c   : > { %1824 = vmatpush.bf16.msra.mxu0 %v2474_v35  ;;  %v2464_v35 = vld [vmem:[%s3297_s1 + $0xc0] sm:$0xff] }
  0x4d   : > { %1444 = vmatpush.bf16.msra.mxu2 %v2464_v35 }
  0x4e   : > { %2209 = vmatmul.msk.bf16.gmra.mxu3 %vm357_vm1, %v771_v12  ;;  %2243 = vmatmul.msk.bf16.gmra.mxu0 %vm357_vm1, %v957_v18  ;;  %v992_v12 = vor.u32 %v991_v10, %v988_v9  ;;  %v998_v18 = vshll.u32 %v2893_v16, 16  ;;  %v1735_v9 = vld [vmem:[%s2610_s23 + $0x10] sm:$0x8] }
  0x50   : > { %1825 = vmatpush.bf16.msra.mxu0 %v2473_v60  ;;  %v993_v14 = vsel %vm922_vm2, %v983_v61, %v992_v12  ;;  %v756_v60 = vunpack.c.l.b16 %v709_v56 }
  0x52   : > { %v766_v0 = vpack.c.b16 %v756_v60, %v756_v60 }
  0x5b   : > { %2111 = vmatmul.msk.bf16.gmra.mxu1 %vm357_vm1, %v2613_v3  ;;  %2144 = vmatmul.msk.bf16.gmra.mxu2 %vm357_vm1, %v553_v26  ;;  %v555_v3 = vsel %vm548_vm3, %v552_v19, %v554_v32  ;;  %v1000_v26 = vrot.slane %v998_v18, 2 }
  0x5e   : > { %2210 = vmatmul.msk.bf16.gmra.mxu3 %vm357_vm1, %v773_v29  ;;  %2244 = vmatmul.msk.bf16.gmra.mxu0 %vm357_vm1, %v966_v31 }
  0x6b   : > { %2112 = vmatmul.msk.bf16.gmra.mxu1 %vm357_vm1, %v2616_v4  ;;  %2145 = vmatmul.msk.bf16.gmra.mxu2 %vm357_vm1, %v555_v3  ;;  %v975_v4 = vsel %vm922_vm2, %v965_v30, %v974_v44  ;;  %v920_v3 = vunpack.c.l.b16 %v909_v37 }
  0x6d   : > { %v2930_v40 = vpack.c.b16 %v920_v3, %v920_v3 }
  0x6e   : > { %2211 = vmatmul.msk.bf16.gmra.mxu3 %vm357_vm1, %v775_v42  ;;  %2245 = vmatmul.msk.bf16.gmra.mxu0 %vm357_vm1, %v975_v4  ;;  %v563_v4 = vsel %vm548_vm3, %v560_v15, %v562_v38  ;;  %v1746_v15 = vunpack.c.l.b16 %v1735_v9  ;;  %v1135_v9 = vld [vmem:[%s2610_s23 + $0x8] sm:$0xc] }
  0x6f   : > { %v1004_v44 = vshrl.u32 %v2930_v40, 16  ;;  %v1007_v46 = vshll.u32 %v2930_v40, 16 }
  0x71   : > { %v1009_v53 = vrot.slane %v1007_v46, 2 }
  0x7b   : > { %2113 = vmatmul.msk.bf16.gmra.mxu1 %vm357_vm1, %v2685_v39  ;;  %2146 = vmatmul.msk.bf16.gmra.mxu2 %vm357_vm1, %v557_v55  ;;  %v778_v39 = vrot.slane %v2860_v51, 1  ;;  %v783_v55 = vsel %vm548_vm3, %v780_v17, %v782_v43 }
  0x7d   : > { %v779_v11 = vsel %vm548_vm3, %v776_v52, %v778_v39  ;;  %v781_v27 = vsel %vm548_vm3, %v778_v39, %v780_v17  ;;  %v1006_v52 = vrot.slane %v1004_v44, 1 }
  0x7e   : > { %2212 = vmatmul.msk.bf16.gmra.mxu3 %vm357_vm1, %v777_v58  ;;  %2246 = vmatmul.msk.bf16.gmra.mxu0 %vm357_vm1, %v984_v20 }
  0x7f   : > { %v1010_v57 = vor.u32 %v1009_v53, %v1006_v52 }
  0x8b   : > { %2114 = vmatmul.msk.bf16.gmra.mxu1 %vm357_vm1, %v2619_v5  ;;  %2147 = vmatmul.msk.bf16.gmra.mxu2 %vm357_vm1, %v559_v2  ;;  %v995_v5 = vshrl.u32 %v2893_v16, 16  ;;  %v564_v2 = vrot.slane %v2628_v8, 1 }
  0x8d   : > { %v997_v24 = vrot.slane %v995_v5, 1  ;;  %v565_v35 = vsel %vm548_vm3, %v562_v38, %v564_v2 }
  0x8e   : > { %2213 = vmatmul.msk.bf16.gmra.mxu3 %vm357_vm1, %v779_v11  ;;  %2247 = vmatmul.msk.bf16.gmra.mxu0 %vm357_vm1, %v993_v14  ;;  %v784_v11 = vrot.slane %v766_v0, 1  ;;  %v1339_v14 = vunpack.c.l.b16 %v1292_v1 }
  0x8f   : > { %v1001_v29 = vor.u32 %v1000_v26, %v997_v24  ;;  %v2975_v24 = vld [vmem:[%s2610_s23 + $0x18] sm:$0xff] }
  0x90   : > { %v785_v23 = vsel %vm548_vm3, %v782_v43, %v784_v11  ;;  %v1750_v28 = vrot.slane %v2975_v24, 3  ;;  %v1532_v37 = vshrl.u32 %v2975_v24, 16  ;;  %v1535_v3 = vshll.u32 %v2975_v24, 16 }
  0x91   : > { %v1002_v34 = vsel %vm922_vm2, %v992_v12, %v1001_v29  ;;  %v1011_v62 = vsel %vm922_vm2, %v1001_v29, %v1010_v57 }
  0x92   : > { %v1534_v52 = vrot.slane %v1532_v37, 2  ;;  %v1537_v53 = vrot.slane %v1535_v3, 3 }
  0x94   : > { %v1538_v60 = vor.u32 %v1537_v53, %v1534_v52  ;;  %v1150_v53 = vrot.slane %v2742_v13, 2 }
  0x98   : > { %v2901_v19 = vpop.f32.mrf.mxu1 }
  0x9b   : > { %2115 = vmatmul.msk.bf16.gmra.mxu1 %vm357_vm1, %v2622_v6  ;;  %2148 = vmatmul.msk.bf16.gmra.mxu2 %vm357_vm1, %v561_v22  ;;  %v2472_v6 = vld [vmem:[%s3297_s1 + $0x100] sm:$0xff]  ;;  %v2925_v36 = vpop.f32.mrf.mxu0  ;;  %v1747_v22 = vpack.c.b16 %v1339_v14, %v1746_v15 }
  0x9c   : > { %1826 = vmatpush.bf16.msra.mxu0 %v2472_v6 }
  0x9e   : > { %2214 = vmatmul.msk.bf16.gmra.mxu3 %vm357_vm1, %v781_v27  ;;  %v2915_v30 = vpop.f32.mrf.mxu2  ;;  %2248 = vmatmul.msk.bf16.gmra.mxu0 %vm357_vm1, %v1002_v34  ;;  %v1749_v27 = vrot.slane %v1747_v22, 3 }
  0xa0   : > { %v2917_v31 = vpop.f32.mrf.mxu1  ;;  %v1751_v43 = vsel %vm1748_vm4, %v1749_v27, %v1750_v28 }
  0xa1   : > { %v2919_v32 = vpop.f32.mrf.mxu3 }
  0xa3   : > { %v2942_v54 = vpop.f32.mrf.mxu0 }
  0xa6   : > { %v2932_v42 = vpop.f32.mrf.mxu2 }
  0xa8   : > { %v2937_v49 = vpop.f32.mrf.mxu1 }
  0xa9   : > { %v2940_v50 = vpop.f32.mrf.mxu3 }
  0xab   : > { %2116 = vmatmul.msk.bf16.gmra.mxu1 %vm357_vm1, %v2691_v41  ;;  %2149 = vmatmul.msk.bf16.gmra.mxu2 %vm357_vm1, %v563_v4  ;;  %v2957_v39 = vpop.f32.mrf.mxu0  ;;  %v1291_v41 = vld [vmem:[%s2610_s23 + $0x10] sm:$0xc] }
  0xac   : > { %v1338_v12 = vunpack.c.l.b16 %v1291_v41 }
  0xae   : > { %2215 = vmatmul.msk.bf16.gmra.mxu3 %vm357_vm1, %v783_v55  ;;  %v2950_v58 = vpop.f32.mrf.mxu2  ;;  %2249 = vmatmul.msk.bf16.gmra.mxu0 %vm357_vm1, %v1011_v62  ;;  %v2977_v26 = vpack.c.b16 %v1339_v14, %v1338_v12  ;;  %v566_v55 = vrot.slane %v2706_v48, 1  ;;  %v3006_v14 = vld [vmem:[%s2610_s23 + $0x20] sm:$0xff]  ;;  %v1146_v48 = vunpack.c.l.b16 %v1135_v9 }
  0xaf   : > { %v1752_v15 = vrot.slane %v3006_v14, 3 }
  0xb0   : > { %v2952_v61 = vpop.f32.mrf.mxu1  ;;  %v1524_v34 = vshrl.u32 %v2977_v26, 16  ;;  %v1527_v6 = vshll.u32 %v2977_v26, 16  ;;  %v567_v0 = vsel %vm548_vm3, %v564_v2, %v566_v55  ;;  %v1367_v47 = vrot.slane %v2977_v26, 2  ;;  %v3035_v26 = vld [vmem:[%s2610_s23 + $0x28] sm:$0xff] }
  0xb1   : > { %v2954_v20 = vpop.f32.mrf.mxu3 }
  0xb2   : > { %v1526_v46 = vrot.slane %v1524_v34, 2  ;;  %v1529_v4 = vrot.slane %v1527_v6, 3  ;;  %v1147_v34 = vpack.c.b16 %v739_v59, %v1146_v48  ;;  %v1368_v59 = vrot.slane %v2975_v24, 2 }
  0xb3   : > { %v2971_v18 = vpop.f32.mrf.mxu0  ;;  %v1553_v48 = vshll.u32 %v3035_v26, 16 }
  0xb4   : > { %v1530_v57 = vor.u32 %v1529_v4, %v1526_v46  ;;  %v1149_v52 = vrot.slane %v1147_v34, 2 }
  0xb6   : > { %v2964_v10 = vpop.f32.mrf.mxu2  ;;  %v1539_v12 = vsel %vm1522_vm5, %v1530_v57, %v1538_v60  ;;  %v1151_v57 = vsel %vm1148_vm6, %v1149_v52, %v1150_v53 }
  0xb8   : > { %v2966_v17 = vpop.f32.mrf.mxu1 }
  0xb9   : > { %v2969_v5 = vpop.f32.mrf.mxu3 }
  0xbb   : > { %2117 = vmatmul.msk.bf16.gmra.mxu1 %vm357_vm1, %v2625_v7  ;;  %2150 = vmatmul.msk.bf16.gmra.mxu2 %vm357_vm1, %v565_v35  ;;  %v2993_v44 = vpop.f32.mrf.mxu0  ;;  %v1544_v35 = vshll.u32 %v3006_v14, 16 }
  0xbd   : > { %v1546_v46 = vrot.slane %v1544_v35, 3 }
  0xbe   : > { %2216 = vmatmul.msk.bf16.gmra.mxu3 %vm357_vm1, %v785_v23  ;;  %v2984_v29 = vpop.f32.mrf.mxu2  ;;  %2405 = vmatmul.msk.bf16.vlgmr.msra.gmra.mxu0 %vm357_vm1, %v1751_v43 }
  0xc0   : > { %v2990_v38 = vpop.f32.mrf.mxu1 }
  0xc1   : > { %v846_v7 = vpop.f32.mrf.mxu3 }
  0xc3   : > { %v3002_v11 = vpop.f32.mrf.mxu0 }
  0xc6   : > { %v2997_v56 = vpop.f32.mrf.mxu2 }
  0xc8   : > { %v490_v62 = vpop.f32.mrf.mxu1 }
  0xc9   : > { %v848_v41 = vpop.f32.mrf.mxu3  ;;  %v491_v1 = vadd.f32 %v490_v62, %v2925_v36  ;;  %v1541_v36 = vshrl.u32 %v3006_v14, 16  ;;  %v1369_v62 = vsel %vm1148_vm6, %v1367_v47, %v1368_v59 }
  0xcb   : > { %2118 = vmatmul.msk.bf16.gmra.mxu1 %vm357_vm1, %v2628_v8  ;;  %2151 = vmatmul.msk.bf16.gmra.mxu2 %vm357_vm1, %v567_v0  ;;  %v1753_v8 = vsel %vm1748_vm4, %v1750_v28, %v1752_v15  ;;  %v3019_v3 = vpop.f32.mrf.mxu0  ;;  %v1543_v43 = vrot.slane %v1541_v36, 2 }
  0xce   : > { %2372 = vmatmul.msk.bf16.vlgmr.msra.gmra.mxu3 %vm357_vm1, %v1539_v12  ;;  %v628_v2 = vpop.f32.mrf.mxu2  ;;  %2406 = vmatmul.msk.bf16.gmra.mxu0 %vm357_vm1, %v1753_v8  ;;  %v1754_v12 = vrot.slane %v3035_v26, 3  ;;  %v1555_v8 = vrot.slane %v1553_v48, 3 }
  0xcf   : > { %v673_v22 = vadd.f32 %v628_v2, %v491_v1 }
  0xd0   : > { %v492_v23 = vpop.f32.mrf.mxu1  ;;  %v1755_v35 = vsel %vm1748_vm4, %v1752_v15, %v1754_v12 }
  0xd1   : > { %v851_v27 = vpop.f32.mrf.mxu3  ;;  %v891_v6 = vadd.f32 %v846_v7, %v673_v22  ;;  %v493_v37 = vadd.f32 %v492_v23, %v2942_v54  ;;  %v1547_v54 = vor.u32 %v1546_v46, %v1543_v43  ;;  %v1370_v43 = vrot.slane %v3006_v14, 2 }
  0xd3   : > { %v3023_v4 = vadd.f32 %v2957_v39, %v891_v6  ;;  %v3031_v9 = vpop.f32.mrf.mxu0  ;;  %v1548_v13 = vsel %vm1522_vm5, %v1538_v60, %v1547_v54  ;;  %v1371_v47 = vsel %vm1148_vm6, %v1368_v59, %v1370_v43 }
  0xd6   : > { %v630_v28 = vpop.f32.mrf.mxu2 }
  0xd7   : > { %v674_v7 = vadd.f32 %v630_v28, %v493_v37  ;;  %v1152_v37 = vrot.slane %v2775_v45, 2 }
  0xd8   : > { %v495_v55 = vpop.f32.mrf.mxu1 }
  0xd9   : > { %v853_v0 = vpop.f32.mrf.mxu3  ;;  %v892_v39 = vadd.f32 %v848_v41, %v674_v7  ;;  %v496_v1 = vadd.f32 %v495_v55, %v2901_v19  ;;  %v1550_v19 = vshrl.u32 %v3035_v26, 16 }
  0xdb   : > { %2274 = vmatmul.msk.bf16.vlgmr.msra.gmra.mxu1 %vm357_vm1, %v1151_v57  ;;  %2339 = vmatmul.msk.bf16.vlgmr.msra.gmra.mxu2 %vm357_vm1, %v1369_v62  ;;  %v3040_v24 = vadd.f32 %v2971_v18, %v892_v39  ;;  %v3048_v34 = vpop.f32.mrf.mxu0  ;;  %v1552_v18 = vrot.slane %v1550_v19, 2  ;;  %v3063_v62 = vld [vmem:[%s2610_s23 + $0x30] sm:$0xff] }
  0xdc   : > { %v1756_v14 = vrot.slane %v3063_v62, 3  ;;  %v1562_v59 = vshll.u32 %v3063_v62, 16 }
  0xdd   : > { %v1556_v52 = vor.u32 %v1555_v8, %v1552_v18 }
  0xde   : > { %2373 = vmatmul.msk.bf16.gmra.mxu3 %vm357_vm1, %v1548_v13  ;;  %v633_v41 = vpop.f32.mrf.mxu2  ;;  %2407 = vmatmul.msk.bf16.gmra.mxu0 %vm357_vm1, %v1755_v35  ;;  %v1564_v48 = vrot.slane %v1562_v59, 3  ;;  %v1372_v35 = vrot.slane %v3035_v26, 2 }
  0xdf   : > { %v675_v2 = vadd.f32 %v633_v41, %v496_v1  ;;  %v1757_v1 = vsel %vm1748_vm4, %v1754_v12, %v1756_v14 }
  0xe0   : > { %v497_v60 = vpop.f32.mrf.mxu1  ;;  %v1373_v18 = vsel %vm1148_vm6, %v1370_v43, %v1372_v35 }
  0xe1   : > { %v856_v36 = vpop.f32.mrf.mxu3  ;;  %v893_v22 = vadd.f32 %v851_v27, %v675_v2  ;;  %v498_v23 = vadd.f32 %v497_v60, %v2917_v31  ;;  %v1153_v31 = vsel %vm1148_vm6, %v1150_v53, %v1152_v37  ;;  %v1154_v60 = vrot.slane %v2794_v63, 2 }
  0xe3   : > { %v3052_v6 = vadd.f32 %v2993_v44, %v893_v22  ;;  %v3059_v57 = vpop.f32.mrf.mxu0  ;;  %v1557_v44 = vsel %vm1522_vm5, %v1547_v54, %v1556_v52 }
  0xe6   : > { %v635_v46 = vpop.f32.mrf.mxu2 }
  0xe7   : > { %v676_v15 = vadd.f32 %v635_v46, %v498_v23 }
  0xe8   : > { %v500_v27 = vpop.f32.mrf.mxu1 }
  0xe9   : > { %v858_v28 = vpop.f32.mrf.mxu3  ;;  %v894_v7 = vadd.f32 %v853_v0, %v676_v15  ;;  %v501_v55 = vadd.f32 %v500_v27, %v2937_v49  ;;  %v1559_v49 = vshrl.u32 %v3063_v62, 16 }
  0xeb   : > { %2275 = vmatmul.msk.bf16.gmra.mxu1 %vm357_vm1, %v1153_v31  ;;  %2340 = vmatmul.msk.bf16.gmra.mxu2 %vm357_vm1, %v1371_v47  ;;  %v3068_v45 = vadd.f32 %v3002_v11, %v894_v7  ;;  %v3076_v19 = vpop.f32.mrf.mxu0  ;;  %v1561_v11 = vrot.slane %v1559_v49, 2  ;;  %v3091_v31 = vld [vmem:[%s2610_s23 + $0x38] sm:$0xff] }
  0xec   : > { %v1758_v26 = vrot.slane %v3091_v31, 3  ;;  %v1571_v43 = vshll.u32 %v3091_v31, 16 }
  0xed   : > { %v1565_v23 = vor.u32 %v1564_v48, %v1561_v11 }
  0xee   : > { %2374 = vmatmul.msk.bf16.gmra.mxu3 %vm357_vm1, %v1557_v44  ;;  %v638_v53 = vpop.f32.mrf.mxu2  ;;  %2408 = vmatmul.msk.bf16.gmra.mxu0 %vm357_vm1, %v1757_v1  ;;  %v1759_v7 = vsel %vm1748_vm4, %v1756_v14, %v1758_v26  ;;  %v1573_v49 = vrot.slane %v1571_v43, 3  ;;  %v1376_v43 = vrot.slane %v3091_v31, 2 }
  0xef   : > { %v677_v0 = vadd.f32 %v638_v53, %v501_v55 }
  0xf0   : > { %v502_v54 = vpop.f32.mrf.mxu1 }
  0xf1   : > { %v861_v39 = vpop.f32.mrf.mxu3  ;;  %v895_v13 = vadd.f32 %v856_v36, %v677_v0  ;;  %v503_v41 = vadd.f32 %v502_v54, %v2952_v61  ;;  %v1155_v61 = vsel %vm1148_vm6, %v1152_v37, %v1154_v60  ;;  %v1156_v0 = vrot.slane %v2821_v21, 2 }
  0xf2   : > { %v1374_v54 = vrot.slane %v3063_v62, 2 }
  0xf3   : > { %v3080_v2 = vadd.f32 %v3019_v3, %v895_v13  ;;  %v3087_v27 = vpop.f32.mrf.mxu0  ;;  %v1566_v3 = vsel %vm1522_vm5, %v1556_v52, %v1565_v23 }
  0xf6   : > { %v640_v22 = vpop.f32.mrf.mxu2 }
  0xf7   : > { %v678_v12 = vadd.f32 %v640_v22, %v503_v41  ;;  %v1375_v41 = vsel %vm1148_vm6, %v1372_v35, %v1374_v54 }
  0xf8   : > { %v505_v36 = vpop.f32.mrf.mxu1 }
  0xf9   : > { %v863_v8 = vpop.f32.mrf.mxu3  ;;  %v896_v46 = vadd.f32 %v858_v28, %v678_v12  ;;  %v506_v15 = vadd.f32 %v505_v36, %v2966_v17  ;;  %v1568_v17 = vshrl.u32 %v3091_v31, 16 }
  0xfb   : > { %2276 = vmatmul.msk.bf16.gmra.mxu1 %vm357_vm1, %v1155_v61  ;;  %2341 = vmatmul.msk.bf16.gmra.mxu2 %vm357_vm1, %v1373_v18  ;;  %v3096_v63 = vadd.f32 %v3031_v9, %v896_v46  ;;  %v3104_v53 = vpop.f32.mrf.mxu0  ;;  %v1570_v9 = vrot.slane %v1568_v17, 2  ;;  %v1158_v17 = vrot.slane %v2836_v33, 2 }
  0xfd   : > { %v1574_v13 = vor.u32 %v1573_v49, %v1570_v9 }
  0xfe   : > { %2375 = vmatmul.msk.bf16.gmra.mxu3 %vm357_vm1, %v1566_v3  ;;  %v643_v37 = vpop.f32.mrf.mxu2  ;;  %2409 = vmatmul.msk.bf16.gmra.mxu0 %vm357_vm1, %v1759_v7 }
  0xff   : > { %v679_v47 = vadd.f32 %v643_v37, %v506_v15  ;;  %v1575_v12 = vsel %vm1522_vm5, %v1565_v23, %v1574_v13 }
 0x100   : > { %v507_v52 = vpop.f32.mrf.mxu1 }
 0x101   : > { %v866_v28 = vpop.f32.mrf.mxu3  ;;  %v897_v55 = vadd.f32 %v861_v39, %v679_v47  ;;  %v508_v44 = vadd.f32 %v507_v52, %v2990_v38  ;;  %v1157_v38 = vsel %vm1148_vm6, %v1154_v60, %v1156_v0 }
 0x103   : > { %v3108_v59 = vadd.f32 %v3048_v34, %v897_v55  ;;  %v3114_v22 = vpop.f32.mrf.mxu0  ;;  %v3118_v34 = vld [vmem:[%s2610_s23 + $0x40] sm:$0xff]  ;;  %v1159_v55 = vsel %vm1148_vm6, %v1156_v0, %v1158_v17 }
 0x104   : > { %v1760_v62 = vrot.slane %v3118_v34, 3  ;;  %v1577_v36 = vshrl.u32 %v3118_v34, 16  ;;  %v1580_v23 = vshll.u32 %v3118_v34, 16 }
 0x106   : > { %v645_v1 = vpop.f32.mrf.mxu2  ;;  %v1761_v46 = vsel %vm1748_vm4, %v1758_v26, %v1760_v62  ;;  %v1582_v37 = vrot.slane %v1580_v23, 3 }
 0x107   : > { %v680_v14 = vadd.f32 %v645_v1, %v508_v44  ;;  %v1377_v44 = vsel %vm1148_vm6, %v1374_v54, %v1376_v43 }
 0x108   : > { %v510_v39 = vpop.f32.mrf.mxu1 }
 0x109   : > { %v868_v11 = vpop.f32.mrf.mxu3  ;;  %v898_v48 = vadd.f32 %v863_v8, %v680_v14  ;;  %v511_v60 = vadd.f32 %v510_v39, %v2915_v30  ;;  %v3146_v14 = vld [vmem:[%s2610_s23 + $0x48] sm:$0xff] }
 0x10a   : > { %v1586_v54 = vshrl.u32 %v3146_v14, 16 }
 0x10b   : > { %2277 = vmatmul.msk.bf16.gmra.mxu1 %vm357_vm1, %v1157_v38  ;;  %2342 = vmatmul.msk.bf16.gmra.mxu2 %vm357_vm1, %v1375_v41  ;;  %v3123_v21 = vadd.f32 %v3059_v57, %v898_v48  ;;  %v3131_v3 = vpop.f32.mrf.mxu0  ;;  %v1579_v57 = vrot.slane %v1577_v36, 2  ;;  %v1378_v36 = vrot.slane %v3118_v34, 2 }
 0x10d   : > { %v1583_v7 = vor.u32 %v1582_v37, %v1579_v57 }
 0x10e   : > { %2376 = vmatmul.msk.bf16.gmra.mxu3 %vm357_vm1, %v1575_v12  ;;  %v648_v35 = vpop.f32.mrf.mxu2  ;;  %2410 = vmatmul.msk.bf16.gmra.mxu0 %vm357_vm1, %v1761_v46 }
 0x10f   : > { %v681_v61 = vadd.f32 %v648_v35, %v511_v60  ;;  %v1160_v35 = vrot.slane %v2860_v51, 2 }
 0x110   : > { %v512_v18 = vpop.f32.mrf.mxu1 }
 0x111   : > { %v871_v8 = vpop.f32.mrf.mxu3  ;;  %v899_v15 = vadd.f32 %v866_v28, %v681_v61  ;;  %v513_v47 = vadd.f32 %v512_v18, %v2932_v42  ;;  %v1762_v42 = vrot.slane %v3146_v14, 3  ;;  %v1161_v46 = vsel %vm1148_vm6, %v1158_v17, %v1160_v35 }
 0x113   : > { %v3135_v30 = vadd.f32 %v3076_v19, %v899_v15  ;;  %v3142_v1 = vpop.f32.mrf.mxu0  ;;  %v1584_v19 = vsel %vm1522_vm5, %v1574_v13, %v1583_v7  ;;  %v1589_v13 = vshll.u32 %v3146_v14, 16  ;;  %v1379_v15 = vsel %vm1148_vm6, %v1376_v43, %v1378_v36 }
 0x115   : > { %v1591_v60 = vrot.slane %v1589_v13, 3 }
 0x116   : > { %v650_v52 = vpop.f32.mrf.mxu2 }
 0x117   : > { %v682_v26 = vadd.f32 %v650_v52, %v513_v47  ;;  %v3174_v52 = vld [vmem:[%s2610_s23 + $0x50] sm:$0xff] }
 0x118   : > { %v515_v28 = vpop.f32.mrf.mxu1  ;;  %v1595_v43 = vshrl.u32 %v3174_v52, 16 }
 0x119   : > { %v873_v9 = vpop.f32.mrf.mxu3  ;;  %v900_v49 = vadd.f32 %v868_v11, %v682_v26  ;;  %v516_v31 = vadd.f32 %v515_v28, %v2950_v58  ;;  %v1763_v11 = vsel %vm1748_vm4, %v1760_v62, %v1762_v42 }
 0x11b   : > { %2278 = vmatmul.msk.bf16.gmra.mxu1 %vm357_vm1, %v1159_v55  ;;  %2343 = vmatmul.msk.bf16.gmra.mxu2 %vm357_vm1, %v1377_v44  ;;  %v3151_v33 = vadd.f32 %v3087_v27, %v900_v49  ;;  %v3159_v12 = vpop.f32.mrf.mxu0  ;;  %v1588_v27 = vrot.slane %v1586_v54, 2  ;;  %v1597_v49 = vrot.slane %v1595_v43, 2  ;;  %v1380_v54 = vrot.slane %v3146_v14, 2 }
 0x11c   : > { %v1382_v43 = vrot.slane %v3174_v52, 2 }
 0x11d   : > { %v1592_v18 = vor.u32 %v1591_v60, %v1588_v27  ;;  %v1381_v27 = vsel %vm1148_vm6, %v1378_v36, %v1380_v54 }
 0x11e   : > { %2377 = vmatmul.msk.bf16.gmra.mxu3 %vm357_vm1, %v1584_v19  ;;  %v653_v0 = vpop.f32.mrf.mxu2  ;;  %2411 = vmatmul.msk.bf16.gmra.mxu0 %vm357_vm1, %v1763_v11 }
 0x11f   : > { %v683_v39 = vadd.f32 %v653_v0, %v516_v31  ;;  %v1162_v0 = vrot.slane %v2878_v25, 2 }
 0x120   : > { %v517_v38 = vpop.f32.mrf.mxu1 }
 0x121   : > { %v876_v41 = vpop.f32.mrf.mxu3  ;;  %v901_v48 = vadd.f32 %v871_v8, %v683_v39  ;;  %v518_v23 = vadd.f32 %v517_v38, %v2964_v10  ;;  %v1764_v10 = vrot.slane %v3174_v52, 3 }
 0x123   : > { %v3163_v58 = vadd.f32 %v3104_v53, %v901_v48  ;;  %v3170_v47 = vpop.f32.mrf.mxu0  ;;  %v1593_v53 = vsel %vm1522_vm5, %v1583_v7, %v1592_v18  ;;  %v1598_v7 = vshll.u32 %v3174_v52, 16  ;;  %v1765_v44 = vsel %vm1748_vm4, %v1762_v42, %v1764_v10 }
 0x124   : > { %v1163_v48 = vsel %vm1148_vm6, %v1160_v35, %v1162_v0 }
 0x125   : > { %v1600_v19 = vrot.slane %v1598_v7, 3 }
 0x126   : > { %v655_v61 = vpop.f32.mrf.mxu2 }
 0x127   : > { %v684_v62 = vadd.f32 %v655_v61, %v518_v23  ;;  %v1601_v38 = vor.u32 %v1600_v19, %v1597_v49 }
 0x128   : > { %v520_v8 = vpop.f32.mrf.mxu1 }
 0x129   : > { %v878_v57 = vpop.f32.mrf.mxu3  ;;  %v902_v37 = vadd.f32 %v873_v9, %v684_v62  ;;  %v521_v34 = vadd.f32 %v520_v8, %v2984_v29  ;;  %v1509_v29 = vld [vmem:[%s2610_s23 + $0x58] sm:$0x7] }
 0x12a   : > { %v1520_v42 = vunpack.c.l.b16 %v1509_v29  ;;  %v1309_v29 = vld [vmem:[%s2610_s23 + $0x58] sm:$0x3] }
 0x12b   : > { %2279 = vmatmul.msk.bf16.gmra.mxu1 %vm357_vm1, %v1161_v46  ;;  %2344 = vmatmul.msk.bf16.gmra.mxu2 %vm357_vm1, %v1379_v15  ;;  %v3179_v51 = vadd.f32 %v3114_v22, %v902_v37  ;;  %v3187_v22 = vpop.f32.mrf.mxu0 }
 0x12c   : > { %v1521_v62 = vpack.c.b16 %v1520_v42, %v1520_v42 }
 0x12e   : > { %2378 = vmatmul.msk.bf16.gmra.mxu3 %vm357_vm1, %v1593_v53  ;;  %v658_v17 = vpop.f32.mrf.mxu2  ;;  %2412 = vmatmul.msk.bf16.gmra.mxu0 %vm357_vm1, %v1765_v44  ;;  %v1604_v36 = vshrl.u32 %v1521_v62, 16  ;;  %v1607_v8 = vshll.u32 %v1521_v62, 16 }
 0x12f   : > { %v685_v26 = vadd.f32 %v658_v17, %v521_v34 }
 0x130   : > { %v522_v28 = vpop.f32.mrf.mxu1  ;;  %v1606_v34 = vrot.slane %v1604_v36, 2  ;;  %v1609_v17 = vrot.slane %v1607_v8, 3 }
 0x131   : > { %v881_v55 = vpop.f32.mrf.mxu3  ;;  %v903_v9 = vadd.f32 %v876_v41, %v685_v26  ;;  %v523_v13 = vadd.f32 %v522_v28, %v2997_v56  ;;  %v1766_v56 = vrot.slane %v1521_v62, 3 }
 0x132   : > { %v1610_v28 = vor.u32 %v1609_v17, %v1606_v34  ;;  %v3242_v17 = vld [vmem:[%s3298_s2] ss:$0 sm:$0xff] }
 0x133   : > { %v3192_v31 = vadd.f32 %v3131_v3, %v903_v9  ;;  %v1114_v61 = vpop.f32.mrf.mxu0  ;;  %v1602_v3 = vsel %vm1522_vm5, %v1592_v18, %v1601_v38  ;;  %v1767_v18 = vsel %vm1748_vm4, %v1764_v10, %v1766_v56  ;;  %v1383_v9 = vsel %vm1148_vm6, %v1380_v54, %v1382_v43 }
 0x136   : > { %v660_v39 = vpop.f32.mrf.mxu2 }
 0x137   : > { %v686_v41 = vadd.f32 %v660_v39, %v523_v13 }
 0x138   : > { %v525_v11 = vpop.f32.mrf.mxu1 }
 0x139   : > { %v883_v60 = vpop.f32.mrf.mxu3  ;;  %v904_v23 = vadd.f32 %v878_v57, %v686_v41  ;;  %v526_v14 = vadd.f32 %v525_v11, %v2919_v32  ;;  %v1164_v32 = vrot.slane %v2893_v16, 2 }
 0x13b   : > { %2280 = vmatmul.msk.bf16.gmra.mxu1 %vm357_vm1, %v1163_v48  ;;  %2345 = vmatmul.msk.bf16.gmra.mxu2 %vm357_vm1, %v1381_v27  ;;  %v3203_v25 = vadd.f32 %v3142_v1, %v904_v23  ;;  %v1828_v53 = vpop.f32.mrf.mxu0  ;;  %v1166_v27 = vrot.slane %v2930_v40, 2 }
 0x13d   : > { %v1167_v62 = vsel %vm1148_vm6, %v1164_v32, %v1166_v27 }
 0x13e   : > { %2379 = vmatmul.msk.bf16.gmra.mxu3 %vm357_vm1, %v1602_v3  ;;  %v663_v35 = vpop.f32.mrf.mxu2  ;;  %2413 = vmatmul.msk.bf16.gmra.mxu0 %vm357_vm1, %v1767_v18 }
 0x13f   : > { %v687_v46 = vadd.f32 %v663_v35, %v526_v14 }
 0x140   : > { %v527_v15 = vpop.f32.mrf.mxu1 }
 0x141   : > { %v886_v57 = vpop.f32.mrf.mxu3  ;;  %v905_v37 = vadd.f32 %v881_v55, %v687_v46  ;;  %v528_v7 = vadd.f32 %v527_v15, %v2940_v50  ;;  %v1165_v55 = vsel %vm1148_vm6, %v1162_v0, %v1164_v32  ;;  %v1356_v50 = vunpack.c.l.b16 %v1309_v29 }
 0x143   : > { %v3210_v1 = vadd.f32 %v3159_v12, %v905_v37  ;;  %v1830_v13 = vpop.f32.mrf.mxu0  ;;  %v1611_v12 = vsel %vm1522_vm5, %v1601_v38, %v1610_v28  ;;  %v1366_v41 = vpack.c.b16 %v1356_v50, %v1356_v50 }
 0x146   : > { %v665_v26 = vpop.f32.mrf.mxu2 }
 0x147   : > { %v688_v44 = vadd.f32 %v665_v26, %v528_v7 }
 0x148   : > { %v530_v10 = vpop.f32.mrf.mxu1 }
 0x149   : > { %v888_v49 = vpop.f32.mrf.mxu3  ;;  %v906_v19 = vadd.f32 %v883_v60, %v688_v44  ;;  %v531_v52 = vadd.f32 %v530_v10, %v2954_v20  ;;  %v1384_v60 = vrot.slane %v1366_v41, 2 }
 0x14b   : > { %2281 = vmatmul.msk.bf16.gmra.mxu1 %vm357_vm1, %v1165_v55  ;;  %2346 = vmatmul.msk.bf16.gmra.mxu2 %vm357_vm1, %v1383_v9  ;;  %v3222_v16 = vadd.f32 %v3170_v47, %v906_v19  ;;  %v1833_v48 = vpop.f32.mrf.mxu0  ;;  %v1385_v56 = vsel %vm1148_vm6, %v1382_v43, %v1384_v60 }
 0x14e   : > { %2380 = vmatmul.msk.bf16.gmra.mxu3 %vm357_vm1, %v1611_v12  ;;  %v668_v0 = vpop.f32.mrf.mxu2 }
 0x14f   : > { %v689_v54 = vadd.f32 %v668_v0, %v531_v52 }
 0x150   : > { %v532_v39 = vpop.f32.mrf.mxu1 }
 0x151   : > { %v1672_v42 = vpop.f32.mrf.mxu3  ;;  %v907_v11 = vadd.f32 %v886_v57, %v689_v54  ;;  %v533_v47 = vadd.f32 %v532_v39, %v2969_v5 }
 0x153   : > { %v3227_v38 = vadd.f32 %v3187_v22, %v907_v11  ;;  %v1835_v36 = vpop.f32.mrf.mxu0 }
 0x156   : > { %v670_v23 = vpop.f32.mrf.mxu2 }
 0x157   : > { %v690_v3 = vadd.f32 %v670_v23, %v533_v47 }
 0x158   : > { %v1228_v20 = vpop.f32.mrf.mxu1 }
 0x159   : > { %v1674_v14 = vpop.f32.mrf.mxu3  ;;  %v908_v35 = vadd.f32 %v888_v49, %v690_v3  ;;  %v1273_v40 = vadd.f32 %v1228_v20, %v3023_v4 }
 0x15b   : > { %2282 = vmatmul.msk.bf16.gmra.mxu1 %vm357_vm1, %v1167_v62  ;;  %2347 = vmatmul.msk.bf16.gmra.mxu2 %vm357_vm1, %v1385_v56  ;;  %v3235_v22 = vadd.f32 %v1114_v61, %v908_v35  ;;  %v1838_v32 = vpop.f32.mrf.mxu0 }
 0x15e   : > { %v1446_v8 = vpop.f32.mrf.mxu2 }
 0x15f   : > { %v1491_v5 = vadd.f32 %v1446_v8, %v1273_v40 }
 0x160   : > { %v1230_v46 = vpop.f32.mrf.mxu1 }
 0x161   : > { %v1677_v15 = vpop.f32.mrf.mxu3  ;;  %v1717_v57 = vadd.f32 %v1672_v42, %v1491_v5  ;;  %v1274_v18 = vadd.f32 %v1230_v46, %v3040_v24 }
 0x163   : > { %v1873_v34 = vadd.f32 %v1828_v53, %v1717_v57  ;;  %v1840_v12 = vpop.f32.mrf.mxu0 }
 0x165   : > { %v1895_v26 = vadd.f32 %v3242_v17, %v1873_v34 }
 0x166   : > { %v1448_v37 = vpop.f32.mrf.mxu2 }
 0x167   : > { %v1492_v61 = vadd.f32 %v1448_v37, %v1274_v18  ;;  %v1913_v53 = vmax.f32 %v1895_v26, 0.0 }
 0x168   : > { %v1233_v43 = vpop.f32.mrf.mxu1 }
 0x169   : > { %v1679_v4 = vpop.f32.mrf.mxu3  ;;  %v1718_v7 = vadd.f32 %v1674_v14, %v1492_v61  ;;  %v1275_v24 = vadd.f32 %v1233_v43, %v3052_v6 }
 0x16b   : > { %v1874_v28 = vadd.f32 %v1830_v13, %v1718_v7  ;;  %v1843_v27 = vpop.f32.mrf.mxu0 }
 0x16d   : > { %v1896_v44 = vadd.f32 %v3242_v17, %v1874_v28 }
 0x16e   : > { %v1451_v10 = vpop.f32.mrf.mxu2 }
 0x16f   : > { %v1914_v55 = vmax.f32 %v1896_v44, 0.0  ;;  %v1493_v9 = vadd.f32 %v1451_v10, %v1275_v24 }
 0x170   : > { %v1235_v49 = vpop.f32.mrf.mxu1 }
 0x171   : > { %v1682_v19 = vpop.f32.mrf.mxu3  ;;  %v2483_v29 = vpack.c.bf16 %v1914_v55, %v1913_v53  ;;  %v1719_v13 = vadd.f32 %v1677_v15, %v1493_v9  ;;  %v1276_v50 = vadd.f32 %v1235_v49, %v3068_v45 }
 0x173   : > { %2484 = vst [vmem:[%s3251_s21] sm:$0xff] %v2483_v29   ;;  %v1875_v6 = vadd.f32 %v1833_v48, %v1719_v13  ;;  %v1845_v40 = vpop.f32.mrf.mxu0 }
 0x175   : > { %v1897_v41 = vadd.f32 %v3242_v17, %v1875_v6 }
 0x176   : > { %v1453_v52 = vpop.f32.mrf.mxu2 }
 0x177   : > { %v1494_v0 = vadd.f32 %v1453_v52, %v1276_v50  ;;  %v1915_v3 = vmax.f32 %v1897_v41, 0.0 }
 0x178   : > { %v1238_v54 = vpop.f32.mrf.mxu1 }
 0x179   : > { %v1684_v39 = vpop.f32.mrf.mxu3  ;;  %v1720_v42 = vadd.f32 %v1679_v4, %v1494_v0  ;;  %v1277_v47 = vadd.f32 %v1238_v54, %v3080_v2 }
 0x17b   : > { %v1876_v11 = vadd.f32 %v1835_v36, %v1720_v42 }
 0x17d   : > { %v1898_v60 = vadd.f32 %v3242_v17, %v1876_v11 }
 0x17e   : > { %v1456_v23 = vpop.f32.mrf.mxu2 }
 0x17f   : > { %v1916_v20 = vmax.f32 %v1898_v60, 0.0  ;;  %v1495_v62 = vadd.f32 %v1456_v23, %v1277_v47 }
 0x180   : > { %v1240_v45 = vpop.f32.mrf.mxu1 }
 0x181   : > { %v1687_v56 = vpop.f32.mrf.mxu3  ;;  %v2488_v48 = vpack.c.bf16 %v1916_v20, %v1915_v3  ;;  %v1721_v14 = vadd.f32 %v1682_v19, %v1495_v62  ;;  %v1278_v35 = vadd.f32 %v1240_v45, %v3096_v63  ;;  %v1848_v63 = vpop.f32.mrf.mxu0 }
 0x183   : > { %2528 = vst [vmem:[%s3251_s21 + $0x8] sm:$0xff] %v2488_v48   ;;  %v1877_v5 = vadd.f32 %v1838_v32, %v1721_v14 }
 0x185   : > { %v1899_v2 = vadd.f32 %v3242_v17, %v1877_v5 }
 0x186   : > { %v1458_v8 = vpop.f32.mrf.mxu2 }
 0x187   : > { %v1496_v36 = vadd.f32 %v1458_v8, %v1278_v35  ;;  %v1917_v43 = vmax.f32 %v1899_v2, 0.0 }
 0x188   : > { %v1243_v46 = vpop.f32.mrf.mxu1 }
 0x189   : > { %v1689_v15 = vpop.f32.mrf.mxu3  ;;  %v1722_v57 = vadd.f32 %v1684_v39, %v1496_v36  ;;  %v1279_v34 = vadd.f32 %v1243_v46, %v3108_v59  ;;  %v1850_v59 = vpop.f32.mrf.mxu0 }
 0x18b   : > { %v1878_v18 = vadd.f32 %v1840_v12, %v1722_v57 }
 0x18d   : > { %v1900_v37 = vadd.f32 %v3242_v17, %v1878_v18 }
 0x18e   : > { %v1461_v61 = vpop.f32.mrf.mxu2 }
 0x18f   : > { %v1918_v4 = vmax.f32 %v1900_v37, 0.0  ;;  %v1497_v7 = vadd.f32 %v1461_v61, %v1279_v34 }
 0x190   : > { %v1245_v26 = vpop.f32.mrf.mxu1 }
 0x191   : > { %v1692_v28 = vpop.f32.mrf.mxu3  ;;  %v2493_v32 = vpack.c.bf16 %v1918_v4, %v1917_v43  ;;  %v1723_v44 = vadd.f32 %v1687_v56, %v1497_v7  ;;  %v1280_v24 = vadd.f32 %v1245_v26, %v3123_v21  ;;  %v1853_v11 = vpop.f32.mrf.mxu0 }
 0x193   : > { %2529 = vst [vmem:[%s3251_s21 + $0x10] sm:$0xff] %v2493_v32   ;;  %v1879_v53 = vadd.f32 %v1843_v27, %v1723_v44 }
 0x195   : > { %v1901_v29 = vadd.f32 %v3242_v17, %v1879_v53 }
 0x196   : > { %v1463_v10 = vpop.f32.mrf.mxu2 }
 0x197   : > { %v1498_v55 = vadd.f32 %v1463_v10, %v1280_v24  ;;  %v1919_v6 = vmax.f32 %v1901_v29, 0.0 }
 0x198   : > { %v1248_v9 = vpop.f32.mrf.mxu1 }
 0x199   : > { %v1694_v49 = vpop.f32.mrf.mxu3  ;;  %v1724_v19 = vadd.f32 %v1689_v15, %v1498_v55  ;;  %v1281_v50 = vadd.f32 %v1248_v9, %v3135_v30  ;;  %v1855_v35 = vpop.f32.mrf.mxu0 }
 0x19b   : > { %v1880_v12 = vadd.f32 %v1845_v40, %v1724_v19 }
 0x19d   : > { %v1902_v13 = vadd.f32 %v3242_v17, %v1880_v12 }
 0x19e   : > { %v1466_v52 = vpop.f32.mrf.mxu2 }
 0x19f   : > { %v1920_v0 = vmax.f32 %v1902_v13, 0.0  ;;  %v1499_v54 = vadd.f32 %v1466_v52, %v1281_v50 }
 0x1a0   : > { %v1250_v21 = vpop.f32.mrf.mxu1 }
 0x1a1   : > { %v2498_v39 = vpack.c.bf16 %v1920_v0, %v1919_v6  ;;  %v1697_v42 = vpop.f32.mrf.mxu3  ;;  %v1725_v41 = vadd.f32 %v1692_v28, %v1499_v54  ;;  %v1282_v27 = vadd.f32 %v1250_v21, %v3151_v33  ;;  %v1858_v61 = vpop.f32.mrf.mxu0 }
 0x1a3   : > { %2530 = vst [vmem:[%s3251_s21 + $0x18] sm:$0xff] %v2498_v39   ;;  %v1881_v47 = vadd.f32 %v1848_v63, %v1725_v41 }
 0x1a5   : > { %v1903_v30 = vadd.f32 %v3242_v17, %v1881_v47 }
 0x1a6   : > { %v1468_v60 = vpop.f32.mrf.mxu2 }
 0x1a7   : > { %v1500_v23 = vadd.f32 %v1468_v60, %v1282_v27  ;;  %v1921_v40 = vmax.f32 %v1903_v30, 0.0 }
 0x1a8   : > { %v1253_v3 = vpop.f32.mrf.mxu1 }
 0x1a9   : > { %v1726_v20 = vadd.f32 %v1694_v49, %v1500_v23  ;;  %v1699_v45 = vpop.f32.mrf.mxu3  ;;  %v1283_v48 = vadd.f32 %v1253_v3, %v3163_v58  ;;  %v1860_v53 = vpop.f32.mrf.mxu0 }
 0x1ab   : > { %v1882_v62 = vadd.f32 %v1850_v59, %v1726_v20 }
 0x1ad   : > { %v1904_v56 = vadd.f32 %v3242_v17, %v1882_v62 }
 0x1ae   : > { %v1471_v14 = vpop.f32.mrf.mxu2 }
 0x1af   : > { %v1922_v8 = vmax.f32 %v1904_v56, 0.0  ;;  %v1501_v5 = vadd.f32 %v1471_v14, %v1283_v48 }
 0x1b0   : > { %v1255_v33 = vpop.f32.mrf.mxu1 }
 0x1b1   : > { %v2503_v36 = vpack.c.bf16 %v1922_v8, %v1921_v40  ;;  %v1727_v46 = vadd.f32 %v1697_v42, %v1501_v5  ;;  %v1284_v15 = vadd.f32 %v1255_v33, %v3179_v51  ;;  %v1702_v2 = vpop.f32.mrf.mxu3  ;;  %v1863_v52 = vpop.f32.mrf.mxu0 }
 0x1b3   : > { %2531 = vst [vmem:[%s3251_s21 + $0x20] sm:$0xff] %v2503_v36   ;;  %v1883_v18 = vadd.f32 %v1853_v11, %v1727_v46 }
 0x1b5   : > { %v1905_v58 = vadd.f32 %v3242_v17, %v1883_v18 }
 0x1b6   : > { %v1473_v57 = vpop.f32.mrf.mxu2 }
 0x1b7   : > { %v1502_v37 = vadd.f32 %v1473_v57, %v1284_v15  ;;  %v1923_v28 = vmax.f32 %v1905_v58, 0.0 }
 0x1b8   : > { %v1258_v34 = vpop.f32.mrf.mxu1 }
 0x1b9   : > { %v1728_v43 = vadd.f32 %v1699_v45, %v1502_v37  ;;  %v1285_v63 = vadd.f32 %v1258_v34, %v3192_v31  ;;  %v1704_v24 = vpop.f32.mrf.mxu3  ;;  %v1865_v47 = vpop.f32.mrf.mxu0 }
 0x1bb   : > { %v1884_v4 = vadd.f32 %v1855_v35, %v1728_v43 }
 0x1bd   : > { %v1906_v7 = vadd.f32 %v3242_v17, %v1884_v4 }
 0x1be   : > { %v1476_v26 = vpop.f32.mrf.mxu2 }
 0x1bf   : > { %v1924_v32 = vmax.f32 %v1906_v7, 0.0  ;;  %v1503_v44 = vadd.f32 %v1476_v26, %v1285_v63 }
 0x1c0   : > { %v1260_v51 = vpop.f32.mrf.mxu1 }
 0x1c1   : > { %v2508_v10 = vpack.c.bf16 %v1924_v32, %v1923_v28  ;;  %v1729_v55 = vadd.f32 %v1702_v2, %v1503_v44  ;;  %v1286_v9 = vadd.f32 %v1260_v51, %v3203_v25  ;;  %v1707_v13 = vpop.f32.mrf.mxu3 }
 0x1c3   : > { %2532 = vst [vmem:[%s3251_s21 + $0x28] sm:$0xff] %v2508_v10   ;;  %v1885_v19 = vadd.f32 %v1858_v61, %v1729_v55 }
 0x1c5   : > { %v1907_v31 = vadd.f32 %v3242_v17, %v1885_v19 }
 0x1c6   : > { %v1478_v49 = vpop.f32.mrf.mxu2 }
 0x1c7   : > { %v1504_v59 = vadd.f32 %v1478_v49, %v1286_v9  ;;  %v1925_v21 = vmax.f32 %v1907_v31, 0.0 }
 0x1c8   : > { %v1263_v29 = vpop.f32.mrf.mxu1 }
 0x1c9   : > { %v1730_v12 = vadd.f32 %v1704_v24, %v1504_v59  ;;  %v1287_v0 = vadd.f32 %v1263_v29, %v3210_v1  ;;  %v1709_v27 = vpop.f32.mrf.mxu3 }
 0x1cb   : > { %v1886_v50 = vadd.f32 %v1860_v53, %v1730_v12 }
 0x1cd   : > { %v1908_v6 = vadd.f32 %v3242_v17, %v1886_v50 }
 0x1ce   : > { %v1481_v54 = vpop.f32.mrf.mxu2 }
 0x1cf   : > { %v1926_v39 = vmax.f32 %v1908_v6, 0.0  ;;  %v1505_v42 = vadd.f32 %v1481_v54, %v1287_v0 }
 0x1d0   : > { %v1265_v25 = vpop.f32.mrf.mxu1 }
 0x1d1   : > { %v2513_v41 = vpack.c.bf16 %v1926_v39, %v1925_v21  ;;  %v1731_v11 = vadd.f32 %v1707_v13, %v1505_v42  ;;  %v1288_v60 = vadd.f32 %v1265_v25, %v3222_v16  ;;  %v1712_v14 = vpop.f32.mrf.mxu3  ;;  %v1868_v16 = vpop.f32.mrf.mxu0 }
 0x1d3   : > { %2533 = vst [vmem:[%s3251_s21 + $0x30] sm:$0xff] %v2513_v41   ;;  %v1887_v3 = vadd.f32 %v1863_v52, %v1731_v11 }
 0x1d5   : > { %v1909_v1 = vadd.f32 %v3242_v17, %v1887_v3 }
 0x1d6   : > { %v1483_v23 = vpop.f32.mrf.mxu2 }
 0x1d7   : > { %v1506_v20 = vadd.f32 %v1483_v23, %v1288_v60  ;;  %v1927_v40 = vmax.f32 %v1909_v1, 0.0 }
 0x1d8   : > { %v1268_v30 = vpop.f32.mrf.mxu1 }
 0x1d9   : > { %v1732_v62 = vadd.f32 %v1709_v27, %v1506_v20  ;;  %v1289_v48 = vadd.f32 %v1268_v30, %v3227_v38  ;;  %v1714_v37 = vpop.f32.mrf.mxu3  ;;  %v1870_v61 = vpop.f32.mrf.mxu0 }
 0x1db   : > { %v1888_v45 = vadd.f32 %v1865_v47, %v1732_v62 }
 0x1dd   : > { %v1910_v56 = vadd.f32 %v3242_v17, %v1888_v45 }
 0x1de   : > { %v1486_v35 = vpop.f32.mrf.mxu2 }
 0x1df   : > { %v1928_v8 = vmax.f32 %v1910_v56, 0.0  ;;  %v1507_v5 = vadd.f32 %v1486_v35, %v1289_v48 }
 0x1e0   : > { %v1270_v36 = vpop.f32.mrf.mxu1 }
 0x1e1   : > { %v2518_v33 = vpack.c.bf16 %v1928_v8, %v1927_v40  ;;  %v1733_v46 = vadd.f32 %v1712_v14, %v1507_v5  ;;  %v1290_v15 = vadd.f32 %v1270_v36, %v3235_v22 }
 0x1e3   : > { %2534 = vst [vmem:[%s3251_s21 + $0x38] sm:$0xff] %v2518_v33   ;;  %v1889_v2 = vadd.f32 %v1868_v16, %v1733_v46 }
 0x1e5   : > { %v1911_v38 = vadd.f32 %v3242_v17, %v1889_v2 }
 0x1e6   : > { %v1488_v57 = vpop.f32.mrf.mxu2 }
 0x1e7   : > { %v1508_v18 = vadd.f32 %v1488_v57, %v1290_v15  ;;  %v1929_v4 = vmax.f32 %v1911_v38, 0.0 }
 0x1e9   : > { %v1734_v34 = vadd.f32 %v1714_v37, %v1508_v18 }
 0x1eb   : > { %v1890_v43 = vadd.f32 %v1870_v61, %v1734_v34 }
 0x1ed   : > { %v1912_v58 = vadd.f32 %v3242_v17, %v1890_v43 }
 0x1ef   : > { %v1930_v7 = vmax.f32 %v1912_v58, 0.0 }
 0x1f1   : > { %v2523_v63 = vpack.c.bf16 %v1930_v7, %v1929_v4 }
 0x1f3   : > { %2535 = vst [vmem:[%s3251_s21 + $0x40] sm:$0xff] %v2523_v63  }
 0x1f4 PF: > { %s13_s12 = sadd.s32 1, %s2565_s12  }
 0x1f5   : > { %p10_p4 = scmp.ge.s32.totalorder %s13_s12, 4  }
 0x1f7   :  { %12 = sbr.rel (!%p10_p4) target bundleno = 1 (0x1), region = 70 }

// kernel: _lambda_.13
= control target key start
LH: loop header
LB: loop body
LE: loop exit
PB: predicated region body
PF: predicated region fallthrough
CT: control target
= control target key end

     0   :  { %s2535_s12 = smov 0   ;;  %s3271_s0 = inlined_call_operand.vmem [shape: bf16[2,182,64], index: 0, kind: input, shape index: {}]   ;;  %s3272_s1 = inlined_call_operand.vmem [shape: bf16[9,64,64], index: 1, kind: input, shape index: {}]   ;;  %s3273_s2 = inlined_call_operand.vmem [shape: f32[1,64], index: 2, kind: input, shape index: {}]   ;;  %s3274_s3 = inlined_call_operand.vmem [shape: bf16[2,144,64], index: 3, kind: output, shape index: {}]  }
   0x1 LB: > { %s2023_s13 = sadd.s32 4294967295, %s2513_s12   ;;  %p2027_p0 = scmp.ge.s32.totalorder %s2513_s12, 1  ;;  %s2513_s12 = sphi %s2535_s12, %s13_s12  }
   0x2   : > { %p137_p1 = scmp.lt.s32.totalorder %s2513_s12, 3 }
   0x4   : > { %p138_p2 = pnand %p2027_p0, %p137_p1 }
   0x5   : > { %p161_p3 = scmp.lt.s32.totalorder (!%p138_p2), %s2023_s13, 1 }
   0x6   : > { %141 = sbr.rel (%p138_p2) target bundleno = 500 (0x1f4), region = 32 }
   0xb   : > { %v2432_v0 = vld [vmem:[%s3272_s1 + $0x38] sm:$0xff]  ;;  %v2431_v1 = vld [vmem:[%s3272_s1 + $0x30] sm:$0xff]  ;;  %s3276_s13 = smov (!%p161_p3, %s2023_s13), 1  ;;  %v2430_v2 = vld [vmem:[%s3272_s1 + $0x28] sm:$0xff]  ;;  %vm256_vm0 = vsmask.f32 7424 }
   0xc   : > { %2484 = vmatpush.bf16.msra.mxu1 %v2432_v0  ;;  %2485 = vmatpush.bf16.msra.mxu2 %v2432_v0  ;;  %s2496_s18 = smul.u32 92, %s3276_s13  ;;  %v2429_v13 = vld [vmem:[%s3272_s1 + $0x20] sm:$0xff]  ;;  %v2436_v21 = vld [vmem:[%s3272_s1 + $0x58] sm:$0xff]  ;;  %vm357_vm1 = vcmask 523264   ;;  %v2435_v34 = vld [vmem:[%s3272_s1 + $0x50] sm:$0xff]  ;;  %vm548_vm3 = vcmask 1046528  }
   0xd   : > { %2486 = vmatpush.bf16.msra.mxu3 %v2432_v0  ;;  %389 = vmatpush.bf16.msra.mxu0 %v2432_v0  ;;  %v2428_v22 = vld [vmem:[%s3272_s1 + $0x18] sm:$0xff]  ;;  %v2427_v37 = vld [vmem:[%s3272_s1 + $0x10] sm:$0xff]  ;;  %v2434_v45 = vld [vmem:[%s3272_s1 + $0x48] sm:$0xff]  ;;  %vm922_vm2 = vsmask.f32 6400  ;;  %vm1748_vm4 = vcmask 1044480  }
   0xe   : > { %s2558_s23 = scalar_lea.vmem %s3271_s0, %s2496_s18  ;;  %v2448_v31 = vld [vmem:[%s3272_s1 + $0x78] sm:$0xff]  ;;  %v2447_v42 = vld [vmem:[%s3272_s1 + $0x70] sm:$0xff]  ;;  %v2426_v49 = vld [vmem:[%s3272_s1 + $0x8] sm:$0xff]  ;;  %vm1522_vm5 = vsmask.f32 5376  ;;  %vm1148_vm6 = vcmask 1045504  }
   0xf   : > { %v2561_v3 = vld [vmem:[%s2558_s23 + $0x8] sm:$0xff]  ;;  %v2564_v4 = vld [vmem:[%s2558_s23 + $0x10] sm:$0xff]  ;;  %v2567_v5 = vld [vmem:[%s2558_s23 + $0x20] sm:$0xff]  ;;  %s2497_s18 = smul.u32 72, %s3276_s13  ;;  %vm1949_vm7 = vcmask 519168  }
  0x10   : > { %2487 = vmatpush.bf16.msra.mxu1 %v2431_v1  ;;  %2488 = vmatpush.bf16.msra.mxu2 %v2431_v1  ;;  %v2570_v6 = vld [vmem:[%s2558_s23 + $0x28] sm:$0xff]  ;;  %v2573_v7 = vld [vmem:[%s2558_s23 + $0x38] sm:$0xff]  ;;  %v2576_v8 = vld [vmem:[%s2558_s23 + $0x40] sm:$0xff]  ;;  %v265_v9 = vshll.u32 %v2561_v3, 16  ;;  %v269_v10 = vshrl.u32 %v2561_v3, 16  ;;  %v273_v11 = vshll.u32 %v2564_v4, 16 }
  0x11   : > { %2489 = vmatpush.bf16.msra.mxu3 %v2431_v1  ;;  %390 = vmatpush.bf16.msra.mxu0 %v2431_v1  ;;  %v289_v12 = vshll.u32 %v2567_v5, 16  ;;  %v293_v14 = vshrl.u32 %v2567_v5, 16  ;;  %v297_v15 = vshll.u32 %v2570_v6, 16  ;;  %v313_v16 = vshll.u32 %v2573_v7, 16  ;;  %v198_v29 = vld [vmem:[%s2558_s23 + $0x48] sm:$0x1]  ;;  %s3197_s21 = scalar_lea.vmem %s3274_s3, %s2497_s18 }
  0x12   : > { %v317_v17 = vshrl.u32 %v2573_v7, 16  ;;  %v2589_v18 = vrot.slane %v265_v9, 1  ;;  %v2591_v19 = vrot.slane %v273_v11, 1  ;;  %v321_v23 = vshll.u32 %v2576_v8, 16  ;;  %v2623_v35 = vld [vmem:[%s2558_s23] sm:$0xff]   ;;  %v2633_v39 = vld [vmem:[%s2558_s23 + $0x18] sm:$0xff] }
  0x13   : > { %v2593_v20 = vrot.slane %v289_v12, 1  ;;  %v2602_v24 = vrot.slane %v297_v15, 1  ;;  %v2604_v25 = vrot.slane %v313_v16, 1  ;;  %v245_v38 = vunpack.c.l.b16 %v198_v29  ;;  %v2452_v40 = vld [vmem:[%s3272_s1 + $0x98] sm:$0xff]  ;;  %v2639_v41 = vld [vmem:[%s2558_s23 + $0x30] sm:$0xff]  ;;  %v2446_v57 = vld [vmem:[%s3272_s1 + $0x68] sm:$0xff] }
  0x14   : > { %2490 = vmatpush.bf16.msra.mxu1 %v2430_v2  ;;  %2491 = vmatpush.bf16.msra.mxu2 %v2430_v2  ;;  %v271_v26 = vor.u32 %v269_v10, %v2589_v18  ;;  %v2608_v28 = vrot.slane %v321_v23, 1  ;;  %v258_v43 = vshrl.u32 %v2623_v35, 16  ;;  %v260_v44 = vshll.u32 %v2623_v35, 16  ;;  %v691_v46 = vld [vmem:[%s2558_s23 + $0x8] sm:$0xe]  ;;  %v2451_v51 = vld [vmem:[%s3272_s1 + $0x90] sm:$0xff] }
  0x15   : > { %2492 = vmatpush.bf16.msra.mxu3 %v2430_v2  ;;  %391 = vmatpush.bf16.msra.mxu0 %v2430_v2  ;;  %v295_v27 = vor.u32 %v293_v14, %v2593_v20  ;;  %v319_v30 = vor.u32 %v317_v17, %v2604_v25  ;;  %v2652_v47 = vld [vmem:[%s2558_s23 + $0xc] sm:$0xf]  ;;  %v2654_v48 = vpack.c.b16 %v245_v38, %v245_v38  ;;  %v277_v52 = vshrl.u32 %v2564_v4, 16  ;;  %v2433_v61 = vld [vmem:[%s3272_s1 + $0x40] sm:$0xff] }
  0x16   : > { %v276_v32 = vsel %vm256_vm0, %v271_v26, %v2591_v19  ;;  %v262_v50 = vrot.slane %v260_v44, 1  ;;  %v281_v53 = vshll.u32 %v2633_v39, 16  ;;  %v301_v54 = vshrl.u32 %v2570_v6, 16  ;;  %v2425_v0 = vld [vmem:[%s3272_s1] sm:$0xff]  ;;  %v2450_v1 = vld [vmem:[%s3272_s1 + $0x88] sm:$0xff] }
  0x17   : > { %v300_v33 = vsel %vm256_vm0, %v295_v27, %v2602_v24  ;;  %v324_v36 = vsel %vm256_vm0, %v319_v30, %v2608_v28  ;;  %v305_v55 = vshll.u32 %v2639_v41, 16  ;;  %v738_v58 = vunpack.c.l.b16 %v691_v46  ;;  %v2445_v12 = vld [vmem:[%s3272_s1 + $0x60] sm:$0xff] }
  0x18   : > { %2493 = vmatpush.bf16.msra.mxu1 %v2429_v13  ;;  %2494 = vmatpush.bf16.msra.mxu2 %v2429_v13  ;;  %v263_v56 = vor.u32 %v262_v50, %v258_v43  ;;  %v739_v59 = vunpack.c.l.b16 %v2652_v47  ;;  %v325_v60 = vshrl.u32 %v2576_v8, 16  ;;  %v329_v62 = vshll.u32 %v2654_v48, 16  ;;  %v2449_v17 = vld [vmem:[%s3272_s1 + $0x80] sm:$0xff] }
  0x19   : > { %2495 = vmatpush.bf16.msra.mxu3 %v2429_v13  ;;  %392 = vmatpush.bf16.msra.mxu0 %v2429_v13  ;;  %v279_v2 = vor.u32 %v277_v52, %v2591_v19  ;;  %v283_v9 = vrot.slane %v281_v53, 1  ;;  %v303_v10 = vor.u32 %v301_v54, %v2602_v24  ;;  %v307_v11 = vrot.slane %v305_v55, 1  ;;  %v2690_v13 = vld [vmem:[%s2558_s23 + $0x10] sm:$0xff] }
  0x1a   : > { %v268_v63 = vsel %vm256_vm0, %v263_v56, %v2589_v18  ;;  %v757_v14 = vpack.c.b16 %v739_v59, %v738_v58  ;;  %v327_v15 = vor.u32 %v325_v60, %v2608_v28  ;;  %v331_v16 = vrot.slane %v329_v62, 1  ;;  %v2481_v58 = vld [vmem:[%s2558_s23] sm:$0xf0]  ;;  %v2482_v60 = vld [vmem:[%s2558_s23] sm:$0xe] }
  0x1b   : > { %2087 = vmatmul.msk.bf16.vlgmr.msra.gmra.mxu1 %vm357_vm1, %v276_v32  ;;  %2090 = vmatmul.msk.bf16.vlgmr.msra.gmra.mxu2 %vm357_vm1, %v300_v33  ;;  %v284_v23 = vsel %vm256_vm0, %v279_v2, %v283_v9  ;;  %v308_v24 = vsel %vm256_vm0, %v303_v10, %v307_v11  ;;  %v2472_v32 = vld [vmem:[%s3272_s1 + $0xf8] sm:$0xff]  ;;  %v285_v38 = vshrl.u32 %v2633_v39, 16 }
  0x1c   : > { %623 = vmatpush.bf16.msrb.mxu2 %v2436_v21  ;;  %485 = vmatpush.bf16.msrb.mxu1 %v2428_v22  ;;  %v924_v18 = vshrl.u32 %v757_v14, 16  ;;  %v927_v19 = vshll.u32 %v757_v14, 16  ;;  %v932_v21 = vshrl.u32 %v2690_v13, 16  ;;  %v935_v22 = vshll.u32 %v2690_v13, 16  ;;  %v2456_v33 = vld [vmem:[%s3272_s1 + $0xb8] sm:$0xff] }
  0x1d   : > { %841 = vmatpush.bf16.msrb.mxu3 %v2448_v31  ;;  %1067 = vmatpush.bf16.msrb.mxu0 %v2452_v40  ;;  %v332_v30 = vsel %vm256_vm0, %v327_v15, %v331_v16  ;;  %v2468_v31 = vld [vmem:[%s3272_s1 + $0xd8] sm:$0xff]  ;;  %v309_v40 = vshrl.u32 %v2639_v41, 16  ;;  %v287_v43 = vor.u32 %v285_v38, %v283_v9  ;;  %v767_v46 = vrot.slane %v757_v14, 1  ;;  %v2467_v14 = vld [vmem:[%s3272_s1 + $0xd0] sm:$0xff] }
  0x1e   : > { %2093 = vmatmul.msk.bf16.vlgmr.msra.gmra.mxu3 %vm357_vm1, %v324_v36  ;;  %2086 = vmatmul.msk.bf16.vlgmr.msra.gmra.mxu0 %vm357_vm1, %v268_v63  ;;  %v926_v26 = vrot.slane %v924_v18, 1  ;;  %v929_v27 = vrot.slane %v927_v19, 2  ;;  %v934_v28 = vrot.slane %v932_v21, 1  ;;  %v937_v29 = vrot.slane %v935_v22, 2  ;;  %v2742_v63 = vld [vmem:[%s2558_s23 + $0x20] sm:$0xff]  ;;  %v2471_v15 = vld [vmem:[%s3272_s1 + $0xf0] sm:$0xff] }
  0x1f   : > { %v311_v44 = vor.u32 %v309_v40, %v307_v11  ;;  %v292_v52 = vsel %vm256_vm0, %v287_v43, %v2593_v20  ;;  %v953_v2 = vshll.u32 %v2742_v63, 16  ;;  %v2455_v16 = vld [vmem:[%s3272_s1 + $0xb0] sm:$0xff]  ;;  %v552_v19 = vrot.slane %v2564_v4, 1  ;;  %v2769_v21 = vld [vmem:[%s2558_s23 + $0x28] sm:$0xff] }
  0x20   : > { %624 = vmatpush.bf16.msrb.mxu2 %v2435_v34  ;;  %486 = vmatpush.bf16.msrb.mxu1 %v2427_v37  ;;  %v930_v34 = vor.u32 %v929_v27, %v926_v26  ;;  %v938_v36 = vor.u32 %v937_v29, %v934_v28  ;;  %v2476_v37 = vld [vmem:[%s3272_s1 + $0x118] sm:$0xff]  ;;  %v772_v22 = vrot.slane %v2742_v63, 1  ;;  %v2466_v43 = vld [vmem:[%s3272_s1 + $0xc8] sm:$0xff] }
  0x21   : > { %842 = vmatpush.bf16.msrb.mxu3 %v2447_v42  ;;  %1068 = vmatpush.bf16.msrb.mxu0 %v2451_v51  ;;  %v316_v53 = vsel %vm256_vm0, %v311_v44, %v2604_v25  ;;  %v550_v25 = vrot.slane %v2561_v3, 1  ;;  %v955_v11 = vrot.slane %v953_v2, 2 }
  0x22   : > { %v939_v42 = vsel %vm922_vm2, %v930_v34, %v938_v36  ;;  %v774_v34 = vrot.slane %v2769_v21, 1 }
  0x23   : > { %v553_v26 = vsel %vm548_vm3, %v550_v25, %v552_v19 }
  0x24   : > { %625 = vmatpush.bf16.msrb.mxu2 %v2434_v45  ;;  %487 = vmatpush.bf16.msrb.mxu1 %v2426_v49  ;;  %v2723_v45 = vld [vmem:[%s2558_s23 + $0x18] sm:$0xff]  ;;  %v768_v49 = vrot.slane %v2690_v13, 1 }
  0x25   : > { %843 = vmatpush.bf16.msrb.mxu3 %v2446_v57  ;;  %1069 = vmatpush.bf16.msrb.mxu0 %v2450_v1  ;;  %v941_v50 = vshrl.u32 %v2723_v45, 16  ;;  %v944_v51 = vshll.u32 %v2723_v45, 16  ;;  %v950_v1 = vshrl.u32 %v2742_v63, 16 }
  0x26   : > { %v769_v56 = vsel %vm548_vm3, %v767_v46, %v768_v49  ;;  %v2470_v46 = vld [vmem:[%s3272_s1 + $0xe8] sm:$0xff] }
  0x27   : > { %v943_v54 = vrot.slane %v941_v50, 1  ;;  %v946_v55 = vrot.slane %v944_v51, 2  ;;  %v952_v10 = vrot.slane %v950_v1, 1  ;;  %v556_v50 = vrot.slane %v2567_v5, 1  ;;  %v2808_v51 = vld [vmem:[%s2558_s23 + $0x38] sm:$0xff] }
  0x28   : > { %626 = vmatpush.bf16.msrb.mxu2 %v2433_v61  ;;  %488 = vmatpush.bf16.msrb.mxu1 %v2425_v0  ;;  %v2483_v61 = vor.u32 %v2482_v60, %v2481_v58  ;;  %v770_v0 = vrot.slane %v2723_v45, 1  ;;  %v2474_v60 = vld [vmem:[%s3272_s1 + $0x108] sm:$0xff] }
  0x29   : > { %844 = vmatpush.bf16.msrb.mxu3 %v2445_v12  ;;  %1070 = vmatpush.bf16.msrb.mxu0 %v2449_v17  ;;  %v947_v57 = vor.u32 %v946_v55, %v943_v54  ;;  %v956_v17 = vor.u32 %v955_v11, %v952_v10  ;;  %v980_v54 = vshll.u32 %v2808_v51, 16 }
  0x2a   : > { %v549_v62 = vrot.slane %v2483_v61, 1  ;;  %v771_v12 = vsel %vm548_vm3, %v768_v49, %v770_v0  ;;  %v773_v29 = vsel %vm548_vm3, %v770_v0, %v772_v22  ;;  %v2454_v49 = vld [vmem:[%s3272_s1 + $0xa8] sm:$0xff] }
  0x2b   : > { %2088 = vmatmul.msk.bf16.gmra.mxu1 %vm357_vm1, %v284_v23  ;;  %2091 = vmatmul.msk.bf16.gmra.mxu2 %vm357_vm1, %v308_v24  ;;  %v948_v20 = vsel %vm922_vm2, %v938_v36, %v947_v57  ;;  %v957_v18 = vsel %vm922_vm2, %v947_v57, %v956_v17  ;;  %v959_v23 = vshrl.u32 %v2769_v21, 16  ;;  %v962_v24 = vshll.u32 %v2769_v21, 16 }
  0x2c   : > { %1441 = vmatpush.bf16.msra.mxu2 %v2468_v31  ;;  %1223 = vmatpush.bf16.msra.mxu1 %v2456_v33  ;;  %v551_v9 = vsel %vm548_vm3, %v549_v62, %v550_v25  ;;  %v2784_v33 = vld [vmem:[%s2558_s23 + $0x30] sm:$0xff]  ;;  %v982_v57 = vrot.slane %v980_v54, 2  ;;  %v558_v62 = vrot.slane %v2570_v6, 1  ;;  %v2826_v25 = vld [vmem:[%s2558_s23 + $0x40] sm:$0xff] }
  0x2d   : > { %1667 = vmatpush.bf16.msra.mxu3 %v2472_v32  ;;  %1823 = vmatpush.bf16.msra.mxu0 %v2476_v37  ;;  %v961_v27 = vrot.slane %v959_v23, 1  ;;  %v964_v28 = vrot.slane %v962_v24, 2  ;;  %v554_v32 = vrot.slane %v2633_v39, 1  ;;  %v968_v36 = vshrl.u32 %v2784_v33, 16  ;;  %v2469_v23 = vld [vmem:[%s3272_s1 + $0xe0] sm:$0xff] }
  0x2e   : > { %2094 = vmatmul.msk.bf16.gmra.mxu3 %vm357_vm1, %v332_v30  ;;  %2242 = vmatmul.msk.bf16.vlgmr.msrb.gmra.mxu0 %vm357_vm1, %v939_v42  ;;  %v971_v37 = vshll.u32 %v2784_v33, 16  ;;  %v775_v42 = vsel %vm548_vm3, %v772_v22, %v774_v34  ;;  %v986_v0 = vshrl.u32 %v2826_v25, 16  ;;  %v989_v1 = vshll.u32 %v2826_v25, 16 }
  0x2f   : > { %v965_v30 = vor.u32 %v964_v28, %v961_v27  ;;  %v970_v38 = vrot.slane %v968_v36, 1  ;;  %v557_v55 = vsel %vm548_vm3, %v554_v32, %v556_v50  ;;  %v559_v2 = vsel %vm548_vm3, %v556_v50, %v558_v62  ;;  %v2453_v28 = vld [vmem:[%s3272_s1 + $0xa0] sm:$0xff] }
  0x30   : > { %1442 = vmatpush.bf16.msra.mxu2 %v2467_v14  ;;  %1224 = vmatpush.bf16.msra.mxu1 %v2455_v16  ;;  %v973_v40 = vrot.slane %v971_v37, 2  ;;  %v991_v10 = vrot.slane %v989_v1, 2  ;;  %v2841_v16 = vld [vmem:[%s2558_s23 + $0x48] sm:$0xff]  ;;  %v909_v37 = vld [vmem:[%s2558_s23 + $0x50] sm:$0x3] }
  0x31   : > { %1668 = vmatpush.bf16.msra.mxu3 %v2471_v15  ;;  %v966_v31 = vsel %vm922_vm2, %v956_v17, %v965_v30  ;;  %v560_v15 = vrot.slane %v2639_v41, 1  ;;  %v780_v17 = vrot.slane %v2826_v25, 1  ;;  %v1292_v1 = vld [vmem:[%s2558_s23 + $0x14] sm:$0xf] }
  0x32   : > { %v974_v44 = vor.u32 %v973_v40, %v970_v38  ;;  %v562_v38 = vrot.slane %v2573_v7, 1 }
  0x33   : > { %v561_v22 = vsel %vm548_vm3, %v558_v62, %v560_v15 }
  0x34   : > { %1443 = vmatpush.bf16.msra.mxu2 %v2466_v43  ;;  %1225 = vmatpush.bf16.msra.mxu1 %v2454_v49  ;;  %v782_v43 = vrot.slane %v2841_v16, 1 }
  0x35   : > { %1669 = vmatpush.bf16.msra.mxu3 %v2470_v46 }
  0x38   : > { %1226 = vmatpush.bf16.msra.mxu1 %v2453_v28 }
  0x39   : > { %1670 = vmatpush.bf16.msra.mxu3 %v2469_v23 }
  0x3b   : > { %2089 = vmatmul.msk.bf16.gmra.mxu1 %vm357_vm1, %v292_v52  ;;  %2092 = vmatmul.msk.bf16.gmra.mxu2 %vm357_vm1, %v316_v53  ;;  %v776_v52 = vrot.slane %v2784_v33, 1  ;;  %v977_v53 = vshrl.u32 %v2808_v51, 16 }
  0x3d   : > { %v777_v58 = vsel %vm548_vm3, %v774_v34, %v776_v52 }
  0x3e   : > { %2209 = vmatmul.msk.bf16.vlgmr.msrb.gmra.mxu3 %vm357_vm1, %v769_v56  ;;  %2243 = vmatmul.msk.bf16.gmra.mxu0 %vm357_vm1, %v948_v20  ;;  %v979_v56 = vrot.slane %v977_v53, 1 }
  0x40   : > { %v983_v61 = vor.u32 %v982_v57, %v979_v56  ;;  %v709_v56 = vld [vmem:[%s2558_s23 + $0x50] sm:$0x1] }
  0x42   : > { %v984_v20 = vsel %vm922_vm2, %v974_v44, %v983_v61 }
  0x4b   : > { %2111 = vmatmul.msk.bf16.vlgmr.msrb.gmra.mxu1 %vm357_vm1, %v2623_v35  ;;  %2144 = vmatmul.msk.bf16.vlgmr.msrb.gmra.mxu2 %vm357_vm1, %v551_v9  ;;  %v2475_v35 = vld [vmem:[%s3272_s1 + $0x110] sm:$0xff]  ;;  %v988_v9 = vrot.slane %v986_v0, 1 }
  0x4c   : > { %1824 = vmatpush.bf16.msra.mxu0 %v2475_v35  ;;  %v2465_v35 = vld [vmem:[%s3272_s1 + $0xc0] sm:$0xff] }
  0x4d   : > { %1444 = vmatpush.bf16.msra.mxu2 %v2465_v35 }
  0x4e   : > { %2210 = vmatmul.msk.bf16.gmra.mxu3 %vm357_vm1, %v771_v12  ;;  %2244 = vmatmul.msk.bf16.gmra.mxu0 %vm357_vm1, %v957_v18  ;;  %v992_v12 = vor.u32 %v991_v10, %v988_v9  ;;  %v998_v18 = vshll.u32 %v2841_v16, 16  ;;  %v1735_v9 = vld [vmem:[%s2558_s23 + $0x10] sm:$0x8] }
  0x50   : > { %1825 = vmatpush.bf16.msra.mxu0 %v2474_v60  ;;  %v993_v14 = vsel %vm922_vm2, %v983_v61, %v992_v12  ;;  %v756_v60 = vunpack.c.l.b16 %v709_v56 }
  0x52   : > { %v766_v0 = vpack.c.b16 %v756_v60, %v756_v60 }
  0x5b   : > { %2112 = vmatmul.msk.bf16.gmra.mxu1 %vm357_vm1, %v2561_v3  ;;  %2145 = vmatmul.msk.bf16.gmra.mxu2 %vm357_vm1, %v553_v26  ;;  %v555_v3 = vsel %vm548_vm3, %v552_v19, %v554_v32  ;;  %v1000_v26 = vrot.slane %v998_v18, 2 }
  0x5e   : > { %2211 = vmatmul.msk.bf16.gmra.mxu3 %vm357_vm1, %v773_v29  ;;  %2245 = vmatmul.msk.bf16.gmra.mxu0 %vm357_vm1, %v966_v31 }
  0x6b   : > { %2113 = vmatmul.msk.bf16.gmra.mxu1 %vm357_vm1, %v2564_v4  ;;  %2146 = vmatmul.msk.bf16.gmra.mxu2 %vm357_vm1, %v555_v3  ;;  %v975_v4 = vsel %vm922_vm2, %v965_v30, %v974_v44  ;;  %v920_v3 = vunpack.c.l.b16 %v909_v37 }
  0x6d   : > { %v2878_v40 = vpack.c.b16 %v920_v3, %v920_v3 }
  0x6e   : > { %2212 = vmatmul.msk.bf16.gmra.mxu3 %vm357_vm1, %v775_v42  ;;  %2246 = vmatmul.msk.bf16.gmra.mxu0 %vm357_vm1, %v975_v4  ;;  %v563_v4 = vsel %vm548_vm3, %v560_v15, %v562_v38  ;;  %v1746_v15 = vunpack.c.l.b16 %v1735_v9  ;;  %v1135_v9 = vld [vmem:[%s2558_s23 + $0x8] sm:$0xc] }
  0x6f   : > { %v1004_v44 = vshrl.u32 %v2878_v40, 16  ;;  %v1007_v46 = vshll.u32 %v2878_v40, 16 }
  0x71   : > { %v1009_v53 = vrot.slane %v1007_v46, 2 }
  0x7b   : > { %2114 = vmatmul.msk.bf16.gmra.mxu1 %vm357_vm1, %v2633_v39  ;;  %2147 = vmatmul.msk.bf16.gmra.mxu2 %vm357_vm1, %v557_v55  ;;  %v778_v39 = vrot.slane %v2808_v51, 1  ;;  %v783_v55 = vsel %vm548_vm3, %v780_v17, %v782_v43 }
  0x7d   : > { %v779_v11 = vsel %vm548_vm3, %v776_v52, %v778_v39  ;;  %v781_v27 = vsel %vm548_vm3, %v778_v39, %v780_v17  ;;  %v1006_v52 = vrot.slane %v1004_v44, 1 }
  0x7e   : > { %2213 = vmatmul.msk.bf16.gmra.mxu3 %vm357_vm1, %v777_v58  ;;  %2247 = vmatmul.msk.bf16.gmra.mxu0 %vm357_vm1, %v984_v20 }
  0x7f   : > { %v1010_v57 = vor.u32 %v1009_v53, %v1006_v52 }
  0x8b   : > { %2115 = vmatmul.msk.bf16.gmra.mxu1 %vm357_vm1, %v2567_v5  ;;  %2148 = vmatmul.msk.bf16.gmra.mxu2 %vm357_vm1, %v559_v2  ;;  %v995_v5 = vshrl.u32 %v2841_v16, 16  ;;  %v564_v2 = vrot.slane %v2576_v8, 1 }
  0x8d   : > { %v997_v24 = vrot.slane %v995_v5, 1  ;;  %v565_v35 = vsel %vm548_vm3, %v562_v38, %v564_v2 }
  0x8e   : > { %2214 = vmatmul.msk.bf16.gmra.mxu3 %vm357_vm1, %v779_v11  ;;  %2248 = vmatmul.msk.bf16.gmra.mxu0 %vm357_vm1, %v993_v14  ;;  %v784_v11 = vrot.slane %v766_v0, 1  ;;  %v1339_v14 = vunpack.c.l.b16 %v1292_v1 }
  0x8f   : > { %v1001_v29 = vor.u32 %v1000_v26, %v997_v24  ;;  %v2923_v24 = vld [vmem:[%s2558_s23 + $0x18] sm:$0xff] }
  0x90   : > { %v785_v23 = vsel %vm548_vm3, %v782_v43, %v784_v11  ;;  %v1750_v28 = vrot.slane %v2923_v24, 3  ;;  %v1532_v37 = vshrl.u32 %v2923_v24, 16  ;;  %v1535_v3 = vshll.u32 %v2923_v24, 16 }
  0x91   : > { %v1002_v34 = vsel %vm922_vm2, %v992_v12, %v1001_v29  ;;  %v1011_v62 = vsel %vm922_vm2, %v1001_v29, %v1010_v57 }
  0x92   : > { %v1534_v52 = vrot.slane %v1532_v37, 2  ;;  %v1537_v53 = vrot.slane %v1535_v3, 3 }
  0x94   : > { %v1538_v60 = vor.u32 %v1537_v53, %v1534_v52  ;;  %v1150_v53 = vrot.slane %v2690_v13, 2 }
  0x98   : > { %v2849_v19 = vpop.f32.mrf.mxu1 }
  0x9b   : > { %2116 = vmatmul.msk.bf16.gmra.mxu1 %vm357_vm1, %v2570_v6  ;;  %2149 = vmatmul.msk.bf16.gmra.mxu2 %vm357_vm1, %v561_v22  ;;  %v2473_v6 = vld [vmem:[%s3272_s1 + $0x100] sm:$0xff]  ;;  %v2873_v36 = vpop.f32.mrf.mxu0  ;;  %v1747_v22 = vpack.c.b16 %v1339_v14, %v1746_v15 }
  0x9c   : > { %1826 = vmatpush.bf16.msra.mxu0 %v2473_v6 }
  0x9e   : > { %2215 = vmatmul.msk.bf16.gmra.mxu3 %vm357_vm1, %v781_v27  ;;  %v2863_v30 = vpop.f32.mrf.mxu2  ;;  %2249 = vmatmul.msk.bf16.gmra.mxu0 %vm357_vm1, %v1002_v34  ;;  %v1749_v27 = vrot.slane %v1747_v22, 3 }
  0xa0   : > { %v2865_v31 = vpop.f32.mrf.mxu1  ;;  %v1751_v43 = vsel %vm1748_vm4, %v1749_v27, %v1750_v28 }
  0xa1   : > { %v2867_v32 = vpop.f32.mrf.mxu3 }
  0xa3   : > { %v2890_v54 = vpop.f32.mrf.mxu0 }
  0xa6   : > { %v2880_v42 = vpop.f32.mrf.mxu2 }
  0xa8   : > { %v2885_v49 = vpop.f32.mrf.mxu1 }
  0xa9   : > { %v2888_v50 = vpop.f32.mrf.mxu3 }
  0xab   : > { %2117 = vmatmul.msk.bf16.gmra.mxu1 %vm357_vm1, %v2639_v41  ;;  %2150 = vmatmul.msk.bf16.gmra.mxu2 %vm357_vm1, %v563_v4  ;;  %v2905_v39 = vpop.f32.mrf.mxu0  ;;  %v1291_v41 = vld [vmem:[%s2558_s23 + $0x10] sm:$0xc] }
  0xac   : > { %v1338_v12 = vunpack.c.l.b16 %v1291_v41 }
  0xae   : > { %2216 = vmatmul.msk.bf16.gmra.mxu3 %vm357_vm1, %v783_v55  ;;  %v2898_v58 = vpop.f32.mrf.mxu2  ;;  %2250 = vmatmul.msk.bf16.gmra.mxu0 %vm357_vm1, %v1011_v62  ;;  %v2925_v26 = vpack.c.b16 %v1339_v14, %v1338_v12  ;;  %v566_v55 = vrot.slane %v2654_v48, 1  ;;  %v2954_v14 = vld [vmem:[%s2558_s23 + $0x20] sm:$0xff]  ;;  %v1146_v48 = vunpack.c.l.b16 %v1135_v9 }
  0xaf   : > { %v1752_v15 = vrot.slane %v2954_v14, 3 }
  0xb0   : > { %v2900_v61 = vpop.f32.mrf.mxu1  ;;  %v1524_v34 = vshrl.u32 %v2925_v26, 16  ;;  %v1527_v6 = vshll.u32 %v2925_v26, 16  ;;  %v567_v0 = vsel %vm548_vm3, %v564_v2, %v566_v55  ;;  %v1367_v47 = vrot.slane %v2925_v26, 2  ;;  %v2983_v26 = vld [vmem:[%s2558_s23 + $0x28] sm:$0xff] }
  0xb1   : > { %v2902_v20 = vpop.f32.mrf.mxu3 }
  0xb2   : > { %v1526_v46 = vrot.slane %v1524_v34, 2  ;;  %v1529_v4 = vrot.slane %v1527_v6, 3  ;;  %v1147_v34 = vpack.c.b16 %v739_v59, %v1146_v48  ;;  %v1368_v59 = vrot.slane %v2923_v24, 2 }
  0xb3   : > { %v2919_v18 = vpop.f32.mrf.mxu0  ;;  %v1553_v48 = vshll.u32 %v2983_v26, 16 }
  0xb4   : > { %v1530_v57 = vor.u32 %v1529_v4, %v1526_v46  ;;  %v1149_v52 = vrot.slane %v1147_v34, 2 }
  0xb6   : > { %v2912_v10 = vpop.f32.mrf.mxu2  ;;  %v1539_v12 = vsel %vm1522_vm5, %v1530_v57, %v1538_v60  ;;  %v1151_v57 = vsel %vm1148_vm6, %v1149_v52, %v1150_v53 }
  0xb8   : > { %v2914_v17 = vpop.f32.mrf.mxu1 }
  0xb9   : > { %v2917_v5 = vpop.f32.mrf.mxu3 }
  0xbb   : > { %2118 = vmatmul.msk.bf16.gmra.mxu1 %vm357_vm1, %v2573_v7  ;;  %2151 = vmatmul.msk.bf16.gmra.mxu2 %vm357_vm1, %v565_v35  ;;  %v2941_v44 = vpop.f32.mrf.mxu0  ;;  %v1544_v35 = vshll.u32 %v2954_v14, 16 }
  0xbd   : > { %v1546_v46 = vrot.slane %v1544_v35, 3 }
  0xbe   : > { %2217 = vmatmul.msk.bf16.gmra.mxu3 %vm357_vm1, %v785_v23  ;;  %v2932_v29 = vpop.f32.mrf.mxu2  ;;  %2406 = vmatmul.msk.bf16.vlgmr.msra.gmra.mxu0 %vm357_vm1, %v1751_v43 }
  0xc0   : > { %v2938_v38 = vpop.f32.mrf.mxu1 }
  0xc1   : > { %v846_v7 = vpop.f32.mrf.mxu3 }
  0xc3   : > { %v2950_v11 = vpop.f32.mrf.mxu0 }
  0xc6   : > { %v2945_v56 = vpop.f32.mrf.mxu2 }
  0xc8   : > { %v490_v62 = vpop.f32.mrf.mxu1 }
  0xc9   : > { %v848_v41 = vpop.f32.mrf.mxu3  ;;  %v491_v1 = vadd.f32 %v490_v62, %v2873_v36  ;;  %v1541_v36 = vshrl.u32 %v2954_v14, 16  ;;  %v1369_v62 = vsel %vm1148_vm6, %v1367_v47, %v1368_v59 }
  0xcb   : > { %2119 = vmatmul.msk.bf16.gmra.mxu1 %vm357_vm1, %v2576_v8  ;;  %2152 = vmatmul.msk.bf16.gmra.mxu2 %vm357_vm1, %v567_v0  ;;  %v1753_v8 = vsel %vm1748_vm4, %v1750_v28, %v1752_v15  ;;  %v2967_v3 = vpop.f32.mrf.mxu0  ;;  %v1543_v43 = vrot.slane %v1541_v36, 2 }
  0xce   : > { %2373 = vmatmul.msk.bf16.vlgmr.msra.gmra.mxu3 %vm357_vm1, %v1539_v12  ;;  %v628_v2 = vpop.f32.mrf.mxu2  ;;  %2407 = vmatmul.msk.bf16.gmra.mxu0 %vm357_vm1, %v1753_v8  ;;  %v1754_v12 = vrot.slane %v2983_v26, 3  ;;  %v1555_v8 = vrot.slane %v1553_v48, 3 }
  0xcf   : > { %v673_v22 = vadd.f32 %v628_v2, %v491_v1 }
  0xd0   : > { %v492_v23 = vpop.f32.mrf.mxu1  ;;  %v1755_v35 = vsel %vm1748_vm4, %v1752_v15, %v1754_v12 }
  0xd1   : > { %v851_v27 = vpop.f32.mrf.mxu3  ;;  %v891_v6 = vadd.f32 %v846_v7, %v673_v22  ;;  %v493_v37 = vadd.f32 %v492_v23, %v2890_v54  ;;  %v1547_v54 = vor.u32 %v1546_v46, %v1543_v43  ;;  %v1370_v43 = vrot.slane %v2954_v14, 2 }
  0xd3   : > { %v2971_v4 = vadd.f32 %v2905_v39, %v891_v6  ;;  %v2979_v9 = vpop.f32.mrf.mxu0  ;;  %v1548_v13 = vsel %vm1522_vm5, %v1538_v60, %v1547_v54  ;;  %v1371_v47 = vsel %vm1148_vm6, %v1368_v59, %v1370_v43 }
  0xd6   : > { %v630_v28 = vpop.f32.mrf.mxu2 }
  0xd7   : > { %v674_v7 = vadd.f32 %v630_v28, %v493_v37  ;;  %v1152_v37 = vrot.slane %v2723_v45, 2 }
  0xd8   : > { %v495_v55 = vpop.f32.mrf.mxu1 }
  0xd9   : > { %v853_v0 = vpop.f32.mrf.mxu3  ;;  %v892_v39 = vadd.f32 %v848_v41, %v674_v7  ;;  %v496_v1 = vadd.f32 %v495_v55, %v2849_v19  ;;  %v1550_v19 = vshrl.u32 %v2983_v26, 16 }
  0xdb   : > { %2275 = vmatmul.msk.bf16.vlgmr.msra.gmra.mxu1 %vm357_vm1, %v1151_v57  ;;  %2340 = vmatmul.msk.bf16.vlgmr.msra.gmra.mxu2 %vm357_vm1, %v1369_v62  ;;  %v2988_v24 = vadd.f32 %v2919_v18, %v892_v39  ;;  %v2996_v34 = vpop.f32.mrf.mxu0  ;;  %v1552_v18 = vrot.slane %v1550_v19, 2  ;;  %v3011_v62 = vld [vmem:[%s2558_s23 + $0x30] sm:$0xff] }
  0xdc   : > { %v1756_v14 = vrot.slane %v3011_v62, 3  ;;  %v1562_v59 = vshll.u32 %v3011_v62, 16 }
  0xdd   : > { %v1556_v52 = vor.u32 %v1555_v8, %v1552_v18 }
  0xde   : > { %2374 = vmatmul.msk.bf16.gmra.mxu3 %vm357_vm1, %v1548_v13  ;;  %v633_v41 = vpop.f32.mrf.mxu2  ;;  %2408 = vmatmul.msk.bf16.gmra.mxu0 %vm357_vm1, %v1755_v35  ;;  %v1564_v48 = vrot.slane %v1562_v59, 3  ;;  %v1372_v35 = vrot.slane %v2983_v26, 2 }
  0xdf   : > { %v675_v2 = vadd.f32 %v633_v41, %v496_v1  ;;  %v1757_v1 = vsel %vm1748_vm4, %v1754_v12, %v1756_v14 }
  0xe0   : > { %v497_v60 = vpop.f32.mrf.mxu1  ;;  %v1373_v18 = vsel %vm1148_vm6, %v1370_v43, %v1372_v35 }
  0xe1   : > { %v856_v36 = vpop.f32.mrf.mxu3  ;;  %v893_v22 = vadd.f32 %v851_v27, %v675_v2  ;;  %v498_v23 = vadd.f32 %v497_v60, %v2865_v31  ;;  %v1153_v31 = vsel %vm1148_vm6, %v1150_v53, %v1152_v37  ;;  %v1154_v60 = vrot.slane %v2742_v63, 2 }
  0xe3   : > { %v3000_v6 = vadd.f32 %v2941_v44, %v893_v22  ;;  %v3007_v57 = vpop.f32.mrf.mxu0  ;;  %v1557_v44 = vsel %vm1522_vm5, %v1547_v54, %v1556_v52 }
  0xe6   : > { %v635_v46 = vpop.f32.mrf.mxu2 }
  0xe7   : > { %v676_v15 = vadd.f32 %v635_v46, %v498_v23 }
  0xe8   : > { %v500_v27 = vpop.f32.mrf.mxu1 }
  0xe9   : > { %v858_v28 = vpop.f32.mrf.mxu3  ;;  %v894_v7 = vadd.f32 %v853_v0, %v676_v15  ;;  %v501_v55 = vadd.f32 %v500_v27, %v2885_v49  ;;  %v1559_v49 = vshrl.u32 %v3011_v62, 16 }
  0xeb   : > { %2276 = vmatmul.msk.bf16.gmra.mxu1 %vm357_vm1, %v1153_v31  ;;  %2341 = vmatmul.msk.bf16.gmra.mxu2 %vm357_vm1, %v1371_v47  ;;  %v3016_v45 = vadd.f32 %v2950_v11, %v894_v7  ;;  %v3024_v19 = vpop.f32.mrf.mxu0  ;;  %v1561_v11 = vrot.slane %v1559_v49, 2  ;;  %v3039_v31 = vld [vmem:[%s2558_s23 + $0x38] sm:$0xff] }
  0xec   : > { %v1758_v26 = vrot.slane %v3039_v31, 3  ;;  %v1571_v43 = vshll.u32 %v3039_v31, 16 }
  0xed   : > { %v1565_v23 = vor.u32 %v1564_v48, %v1561_v11 }
  0xee   : > { %2375 = vmatmul.msk.bf16.gmra.mxu3 %vm357_vm1, %v1557_v44  ;;  %v638_v53 = vpop.f32.mrf.mxu2  ;;  %2409 = vmatmul.msk.bf16.gmra.mxu0 %vm357_vm1, %v1757_v1  ;;  %v1759_v7 = vsel %vm1748_vm4, %v1756_v14, %v1758_v26  ;;  %v1573_v49 = vrot.slane %v1571_v43, 3  ;;  %v1376_v43 = vrot.slane %v3039_v31, 2 }
  0xef   : > { %v677_v0 = vadd.f32 %v638_v53, %v501_v55 }
  0xf0   : > { %v502_v54 = vpop.f32.mrf.mxu1 }
  0xf1   : > { %v861_v39 = vpop.f32.mrf.mxu3  ;;  %v895_v13 = vadd.f32 %v856_v36, %v677_v0  ;;  %v503_v41 = vadd.f32 %v502_v54, %v2900_v61  ;;  %v1155_v61 = vsel %vm1148_vm6, %v1152_v37, %v1154_v60  ;;  %v1156_v0 = vrot.slane %v2769_v21, 2 }
  0xf2   : > { %v1374_v54 = vrot.slane %v3011_v62, 2 }
  0xf3   : > { %v3028_v2 = vadd.f32 %v2967_v3, %v895_v13  ;;  %v3035_v27 = vpop.f32.mrf.mxu0  ;;  %v1566_v3 = vsel %vm1522_vm5, %v1556_v52, %v1565_v23 }
  0xf6   : > { %v640_v22 = vpop.f32.mrf.mxu2 }
  0xf7   : > { %v678_v12 = vadd.f32 %v640_v22, %v503_v41  ;;  %v1375_v41 = vsel %vm1148_vm6, %v1372_v35, %v1374_v54 }
  0xf8   : > { %v505_v36 = vpop.f32.mrf.mxu1 }
  0xf9   : > { %v863_v8 = vpop.f32.mrf.mxu3  ;;  %v896_v46 = vadd.f32 %v858_v28, %v678_v12  ;;  %v506_v15 = vadd.f32 %v505_v36, %v2914_v17  ;;  %v1568_v17 = vshrl.u32 %v3039_v31, 16 }
  0xfb   : > { %2277 = vmatmul.msk.bf16.gmra.mxu1 %vm357_vm1, %v1155_v61  ;;  %2342 = vmatmul.msk.bf16.gmra.mxu2 %vm357_vm1, %v1373_v18  ;;  %v3044_v63 = vadd.f32 %v2979_v9, %v896_v46  ;;  %v3052_v53 = vpop.f32.mrf.mxu0  ;;  %v1570_v9 = vrot.slane %v1568_v17, 2  ;;  %v1158_v17 = vrot.slane %v2784_v33, 2 }
  0xfd   : > { %v1574_v13 = vor.u32 %v1573_v49, %v1570_v9 }
  0xfe   : > { %2376 = vmatmul.msk.bf16.gmra.mxu3 %vm357_vm1, %v1566_v3  ;;  %v643_v37 = vpop.f32.mrf.mxu2  ;;  %2410 = vmatmul.msk.bf16.gmra.mxu0 %vm357_vm1, %v1759_v7 }
  0xff   : > { %v679_v47 = vadd.f32 %v643_v37, %v506_v15  ;;  %v1575_v12 = vsel %vm1522_vm5, %v1565_v23, %v1574_v13 }
 0x100   : > { %v507_v52 = vpop.f32.mrf.mxu1 }
 0x101   : > { %v866_v28 = vpop.f32.mrf.mxu3  ;;  %v897_v55 = vadd.f32 %v861_v39, %v679_v47  ;;  %v508_v44 = vadd.f32 %v507_v52, %v2938_v38  ;;  %v1157_v38 = vsel %vm1148_vm6, %v1154_v60, %v1156_v0 }
 0x103   : > { %v3056_v59 = vadd.f32 %v2996_v34, %v897_v55  ;;  %v3062_v22 = vpop.f32.mrf.mxu0  ;;  %v3066_v34 = vld [vmem:[%s2558_s23 + $0x40] sm:$0xff]  ;;  %v1159_v55 = vsel %vm1148_vm6, %v1156_v0, %v1158_v17 }
 0x104   : > { %v1760_v62 = vrot.slane %v3066_v34, 3  ;;  %v1577_v36 = vshrl.u32 %v3066_v34, 16  ;;  %v1580_v23 = vshll.u32 %v3066_v34, 16 }
 0x106   : > { %v645_v1 = vpop.f32.mrf.mxu2  ;;  %v1761_v46 = vsel %vm1748_vm4, %v1758_v26, %v1760_v62  ;;  %v1582_v37 = vrot.slane %v1580_v23, 3 }
 0x107   : > { %v680_v14 = vadd.f32 %v645_v1, %v508_v44  ;;  %v1377_v44 = vsel %vm1148_vm6, %v1374_v54, %v1376_v43 }
 0x108   : > { %v510_v39 = vpop.f32.mrf.mxu1 }
 0x109   : > { %v868_v11 = vpop.f32.mrf.mxu3  ;;  %v898_v48 = vadd.f32 %v863_v8, %v680_v14  ;;  %v511_v60 = vadd.f32 %v510_v39, %v2863_v30  ;;  %v3094_v14 = vld [vmem:[%s2558_s23 + $0x48] sm:$0xff] }
 0x10a   : > { %v1586_v54 = vshrl.u32 %v3094_v14, 16 }
 0x10b   : > { %2278 = vmatmul.msk.bf16.gmra.mxu1 %vm357_vm1, %v1157_v38  ;;  %2343 = vmatmul.msk.bf16.gmra.mxu2 %vm357_vm1, %v1375_v41  ;;  %v3071_v21 = vadd.f32 %v3007_v57, %v898_v48  ;;  %v3079_v3 = vpop.f32.mrf.mxu0  ;;  %v1579_v57 = vrot.slane %v1577_v36, 2  ;;  %v1378_v36 = vrot.slane %v3066_v34, 2 }
 0x10d   : > { %v1583_v7 = vor.u32 %v1582_v37, %v1579_v57 }
 0x10e   : > { %2377 = vmatmul.msk.bf16.gmra.mxu3 %vm357_vm1, %v1575_v12  ;;  %v648_v35 = vpop.f32.mrf.mxu2  ;;  %2411 = vmatmul.msk.bf16.gmra.mxu0 %vm357_vm1, %v1761_v46 }
 0x10f   : > { %v681_v61 = vadd.f32 %v648_v35, %v511_v60  ;;  %v1160_v35 = vrot.slane %v2808_v51, 2 }
 0x110   : > { %v512_v18 = vpop.f32.mrf.mxu1 }
 0x111   : > { %v871_v8 = vpop.f32.mrf.mxu3  ;;  %v899_v15 = vadd.f32 %v866_v28, %v681_v61  ;;  %v513_v47 = vadd.f32 %v512_v18, %v2880_v42  ;;  %v1762_v42 = vrot.slane %v3094_v14, 3  ;;  %v1161_v46 = vsel %vm1148_vm6, %v1158_v17, %v1160_v35 }
 0x113   : > { %v3083_v30 = vadd.f32 %v3024_v19, %v899_v15  ;;  %v3090_v1 = vpop.f32.mrf.mxu0  ;;  %v1584_v19 = vsel %vm1522_vm5, %v1574_v13, %v1583_v7  ;;  %v1589_v13 = vshll.u32 %v3094_v14, 16  ;;  %v1379_v15 = vsel %vm1148_vm6, %v1376_v43, %v1378_v36 }
 0x115   : > { %v1591_v60 = vrot.slane %v1589_v13, 3 }
 0x116   : > { %v650_v52 = vpop.f32.mrf.mxu2 }
 0x117   : > { %v682_v26 = vadd.f32 %v650_v52, %v513_v47  ;;  %v3122_v52 = vld [vmem:[%s2558_s23 + $0x50] sm:$0xff] }
 0x118   : > { %v515_v28 = vpop.f32.mrf.mxu1  ;;  %v1595_v43 = vshrl.u32 %v3122_v52, 16 }
 0x119   : > { %v873_v9 = vpop.f32.mrf.mxu3  ;;  %v900_v49 = vadd.f32 %v868_v11, %v682_v26  ;;  %v516_v31 = vadd.f32 %v515_v28, %v2898_v58  ;;  %v1763_v11 = vsel %vm1748_vm4, %v1760_v62, %v1762_v42 }
 0x11b   : > { %2279 = vmatmul.msk.bf16.gmra.mxu1 %vm357_vm1, %v1159_v55  ;;  %2344 = vmatmul.msk.bf16.gmra.mxu2 %vm357_vm1, %v1377_v44  ;;  %v3099_v33 = vadd.f32 %v3035_v27, %v900_v49  ;;  %v3107_v12 = vpop.f32.mrf.mxu0  ;;  %v1588_v27 = vrot.slane %v1586_v54, 2  ;;  %v1597_v49 = vrot.slane %v1595_v43, 2  ;;  %v1380_v54 = vrot.slane %v3094_v14, 2 }
 0x11c   : > { %v1382_v43 = vrot.slane %v3122_v52, 2 }
 0x11d   : > { %v1592_v18 = vor.u32 %v1591_v60, %v1588_v27  ;;  %v1381_v27 = vsel %vm1148_vm6, %v1378_v36, %v1380_v54 }
 0x11e   : > { %2378 = vmatmul.msk.bf16.gmra.mxu3 %vm357_vm1, %v1584_v19  ;;  %v653_v0 = vpop.f32.mrf.mxu2  ;;  %2412 = vmatmul.msk.bf16.gmra.mxu0 %vm357_vm1, %v1763_v11 }
 0x11f   : > { %v683_v39 = vadd.f32 %v653_v0, %v516_v31  ;;  %v1162_v0 = vrot.slane %v2826_v25, 2 }
 0x120   : > { %v517_v38 = vpop.f32.mrf.mxu1 }
 0x121   : > { %v876_v41 = vpop.f32.mrf.mxu3  ;;  %v901_v48 = vadd.f32 %v871_v8, %v683_v39  ;;  %v518_v23 = vadd.f32 %v517_v38, %v2912_v10  ;;  %v1764_v10 = vrot.slane %v3122_v52, 3 }
 0x123   : > { %v3111_v58 = vadd.f32 %v3052_v53, %v901_v48  ;;  %v3118_v47 = vpop.f32.mrf.mxu0  ;;  %v1593_v53 = vsel %vm1522_vm5, %v1583_v7, %v1592_v18  ;;  %v1598_v7 = vshll.u32 %v3122_v52, 16  ;;  %v1765_v44 = vsel %vm1748_vm4, %v1762_v42, %v1764_v10 }
 0x124   : > { %v1163_v48 = vsel %vm1148_vm6, %v1160_v35, %v1162_v0 }
 0x125   : > { %v1600_v19 = vrot.slane %v1598_v7, 3 }
 0x126   : > { %v655_v61 = vpop.f32.mrf.mxu2 }
 0x127   : > { %v684_v62 = vadd.f32 %v655_v61, %v518_v23  ;;  %v1601_v38 = vor.u32 %v1600_v19, %v1597_v49 }
 0x128   : > { %v520_v8 = vpop.f32.mrf.mxu1 }
 0x129   : > { %v878_v57 = vpop.f32.mrf.mxu3  ;;  %v902_v37 = vadd.f32 %v873_v9, %v684_v62  ;;  %v521_v34 = vadd.f32 %v520_v8, %v2932_v29  ;;  %v1509_v29 = vld [vmem:[%s2558_s23 + $0x58] sm:$0x7] }
 0x12a   : > { %v1520_v42 = vunpack.c.l.b16 %v1509_v29  ;;  %v1309_v29 = vld [vmem:[%s2558_s23 + $0x58] sm:$0x3] }
 0x12b   : > { %2280 = vmatmul.msk.bf16.gmra.mxu1 %vm357_vm1, %v1161_v46  ;;  %2345 = vmatmul.msk.bf16.gmra.mxu2 %vm357_vm1, %v1379_v15  ;;  %v3127_v51 = vadd.f32 %v3062_v22, %v902_v37  ;;  %v3135_v22 = vpop.f32.mrf.mxu0 }
 0x12c   : > { %v1521_v62 = vpack.c.b16 %v1520_v42, %v1520_v42 }
 0x12e   : > { %2379 = vmatmul.msk.bf16.gmra.mxu3 %vm357_vm1, %v1593_v53  ;;  %v658_v17 = vpop.f32.mrf.mxu2  ;;  %2413 = vmatmul.msk.bf16.gmra.mxu0 %vm357_vm1, %v1765_v44  ;;  %v1604_v36 = vshrl.u32 %v1521_v62, 16  ;;  %v1607_v8 = vshll.u32 %v1521_v62, 16 }
 0x12f   : > { %v685_v26 = vadd.f32 %v658_v17, %v521_v34 }
 0x130   : > { %v522_v28 = vpop.f32.mrf.mxu1  ;;  %v1606_v34 = vrot.slane %v1604_v36, 2  ;;  %v1609_v17 = vrot.slane %v1607_v8, 3 }
 0x131   : > { %v881_v55 = vpop.f32.mrf.mxu3  ;;  %v903_v9 = vadd.f32 %v876_v41, %v685_v26  ;;  %v523_v13 = vadd.f32 %v522_v28, %v2945_v56  ;;  %v1766_v56 = vrot.slane %v1521_v62, 3 }
 0x132   : > { %v1610_v28 = vor.u32 %v1609_v17, %v1606_v34 }
 0x133   : > { %v3140_v31 = vadd.f32 %v3079_v3, %v903_v9  ;;  %v1114_v61 = vpop.f32.mrf.mxu0  ;;  %v1602_v3 = vsel %vm1522_vm5, %v1592_v18, %v1601_v38  ;;  %v1767_v18 = vsel %vm1748_vm4, %v1764_v10, %v1766_v56  ;;  %v1383_v9 = vsel %vm1148_vm6, %v1380_v54, %v1382_v43 }
 0x136   : > { %v660_v39 = vpop.f32.mrf.mxu2 }
 0x137   : > { %v686_v41 = vadd.f32 %v660_v39, %v523_v13 }
 0x138   : > { %v525_v11 = vpop.f32.mrf.mxu1 }
 0x139   : > { %v883_v60 = vpop.f32.mrf.mxu3  ;;  %v904_v23 = vadd.f32 %v878_v57, %v686_v41  ;;  %v526_v14 = vadd.f32 %v525_v11, %v2867_v32  ;;  %v1164_v32 = vrot.slane %v2841_v16, 2 }
 0x13b   : > { %2281 = vmatmul.msk.bf16.gmra.mxu1 %vm357_vm1, %v1163_v48  ;;  %2346 = vmatmul.msk.bf16.gmra.mxu2 %vm357_vm1, %v1381_v27  ;;  %v3151_v25 = vadd.f32 %v3090_v1, %v904_v23  ;;  %v1828_v53 = vpop.f32.mrf.mxu0  ;;  %v1166_v27 = vrot.slane %v2878_v40, 2 }
 0x13d   : > { %v1167_v62 = vsel %vm1148_vm6, %v1164_v32, %v1166_v27 }
 0x13e   : > { %2380 = vmatmul.msk.bf16.gmra.mxu3 %vm357_vm1, %v1602_v3  ;;  %v663_v35 = vpop.f32.mrf.mxu2  ;;  %2414 = vmatmul.msk.bf16.gmra.mxu0 %vm357_vm1, %v1767_v18  ;;  %v3189_v18 = vld [vmem:[%s3273_s2] ss:$0 sm:$0xff] }
 0x13f   : > { %v687_v46 = vadd.f32 %v663_v35, %v526_v14 }
 0x140   : > { %v527_v15 = vpop.f32.mrf.mxu1 }
 0x141   : > { %v886_v57 = vpop.f32.mrf.mxu3  ;;  %v905_v37 = vadd.f32 %v881_v55, %v687_v46  ;;  %v528_v7 = vadd.f32 %v527_v15, %v2888_v50  ;;  %v1165_v55 = vsel %vm1148_vm6, %v1162_v0, %v1164_v32  ;;  %v1356_v50 = vunpack.c.l.b16 %v1309_v29 }
 0x143   : > { %v3158_v1 = vadd.f32 %v3107_v12, %v905_v37  ;;  %v1830_v13 = vpop.f32.mrf.mxu0  ;;  %v1611_v12 = vsel %vm1522_vm5, %v1601_v38, %v1610_v28  ;;  %v1366_v41 = vpack.c.b16 %v1356_v50, %v1356_v50 }
 0x146   : > { %v665_v26 = vpop.f32.mrf.mxu2 }
 0x147   : > { %v688_v44 = vadd.f32 %v665_v26, %v528_v7 }
 0x148   : > { %v530_v10 = vpop.f32.mrf.mxu1 }
 0x149   : > { %v888_v49 = vpop.f32.mrf.mxu3  ;;  %v906_v19 = vadd.f32 %v883_v60, %v688_v44  ;;  %v531_v52 = vadd.f32 %v530_v10, %v2902_v20  ;;  %v1384_v60 = vrot.slane %v1366_v41, 2 }
 0x14b   : > { %2282 = vmatmul.msk.bf16.gmra.mxu1 %vm357_vm1, %v1165_v55  ;;  %2347 = vmatmul.msk.bf16.gmra.mxu2 %vm357_vm1, %v1383_v9  ;;  %v3170_v16 = vadd.f32 %v3118_v47, %v906_v19  ;;  %v1833_v48 = vpop.f32.mrf.mxu0  ;;  %v1385_v56 = vsel %vm1148_vm6, %v1382_v43, %v1384_v60 }
 0x14e   : > { %2381 = vmatmul.msk.bf16.gmra.mxu3 %vm357_vm1, %v1611_v12  ;;  %v668_v0 = vpop.f32.mrf.mxu2 }
 0x14f   : > { %v689_v54 = vadd.f32 %v668_v0, %v531_v52 }
 0x150   : > { %v532_v39 = vpop.f32.mrf.mxu1 }
 0x151   : > { %v1672_v42 = vpop.f32.mrf.mxu3  ;;  %v907_v11 = vadd.f32 %v886_v57, %v689_v54  ;;  %v533_v47 = vadd.f32 %v532_v39, %v2917_v5 }
 0x153   : > { %v3175_v38 = vadd.f32 %v3135_v22, %v907_v11  ;;  %v1835_v36 = vpop.f32.mrf.mxu0 }
 0x156   : > { %v670_v23 = vpop.f32.mrf.mxu2 }
 0x157   : > { %v690_v3 = vadd.f32 %v670_v23, %v533_v47 }
 0x158   : > { %v1228_v20 = vpop.f32.mrf.mxu1 }
 0x159   : > { %v1674_v14 = vpop.f32.mrf.mxu3  ;;  %v908_v35 = vadd.f32 %v888_v49, %v690_v3  ;;  %v1273_v40 = vadd.f32 %v1228_v20, %v2971_v4 }
 0x15b   : > { %2283 = vmatmul.msk.bf16.gmra.mxu1 %vm357_vm1, %v1167_v62  ;;  %2348 = vmatmul.msk.bf16.gmra.mxu2 %vm357_vm1, %v1385_v56  ;;  %v3183_v22 = vadd.f32 %v1114_v61, %v908_v35  ;;  %v1838_v43 = vpop.f32.mrf.mxu0 }
 0x15e   : > { %v1446_v5 = vpop.f32.mrf.mxu2 }
 0x15f   : > { %v1491_v8 = vadd.f32 %v1446_v5, %v1273_v40 }
 0x160   : > { %v1230_v46 = vpop.f32.mrf.mxu1 }
 0x161   : > { %v1677_v15 = vpop.f32.mrf.mxu3  ;;  %v1717_v57 = vadd.f32 %v1672_v42, %v1491_v8  ;;  %v1274_v61 = vadd.f32 %v1230_v46, %v2988_v24 }
 0x163   : > { %v1873_v37 = vadd.f32 %v1828_v53, %v1717_v57  ;;  %v1840_v52 = vpop.f32.mrf.mxu0 }
 0x165   : > { %v1895_v34 = vadd.f32 %v3189_v18, %v1873_v37 }
 0x166   : > { %v1448_v17 = vpop.f32.mrf.mxu2 }
 0x167   : > { %v1913_v32 = vmax.f32 %v1895_v34, 0.0  ;;  %v1492_v4 = vadd.f32 %v1448_v17, %v1274_v61 }
 0x168   : > { %v1233_v7 = vpop.f32.mrf.mxu1 }
 0x169   : > { %v1679_v26 = vpop.f32.mrf.mxu3  ;;  %v1931_v53 = vpack.c.bf16 %v1913_v32, %v1913_v32  ;;  %v1718_v28 = vadd.f32 %v1674_v14, %v1492_v4  ;;  %v1275_v10 = vadd.f32 %v1233_v7, %v3000_v6 }
 0x16b   : > { %1950 = vst.msk [vmem:[%s3197_s21] sm:$0xf] %vm1949_vm7, %v1931_v53  ;;  %v1874_v44 = vadd.f32 %v1830_v13, %v1718_v28  ;;  %v1843_v23 = vpop.f32.mrf.mxu0 }
 0x16d   : > { %v1896_v24 = vadd.f32 %v3189_v18, %v1874_v44 }
 0x16e   : > { %v1451_v55 = vpop.f32.mrf.mxu2 }
 0x16f   : > { %v1914_v9 = vmax.f32 %v1896_v24, 0.0  ;;  %v1493_v49 = vadd.f32 %v1451_v55, %v1275_v10 }
 0x170   : > { %v1235_v19 = vpop.f32.mrf.mxu1 }
 0x171   : > { %v1682_v29 = vpop.f32.mrf.mxu3  ;;  %v1932_v12 = vpack.c.bf16 %v1914_v9, %v1914_v9  ;;  %v1719_v50 = vadd.f32 %v1677_v15, %v1493_v49  ;;  %v1276_v13 = vadd.f32 %v1235_v19, %v3016_v45 }
 0x173   : > { %1951 = vst.msk [vmem:[%s3197_s21 + $0x4] sm:$0xf] %vm1949_vm7, %v1932_v12  ;;  %v1875_v0 = vadd.f32 %v1833_v48, %v1719_v50  ;;  %v1845_v46 = vpop.f32.mrf.mxu0 }
 0x175   : > { %v1897_v54 = vadd.f32 %v3189_v18, %v1875_v0 }
 0x176   : > { %v1453_v39 = vpop.f32.mrf.mxu2 }
 0x177   : > { %v1915_v42 = vmax.f32 %v1897_v54, 0.0  ;;  %v1494_v41 = vadd.f32 %v1453_v39, %v1276_v13 }
 0x178   : > { %v1238_v6 = vpop.f32.mrf.mxu1 }
 0x179   : > { %v1684_v11 = vpop.f32.mrf.mxu3  ;;  %v1933_v27 = vpack.c.bf16 %v1915_v42, %v1915_v42  ;;  %v1720_v60 = vadd.f32 %v1679_v26, %v1494_v41  ;;  %v1277_v48 = vadd.f32 %v1238_v6, %v3028_v2 }
 0x17b   : > { %1952 = vst.msk [vmem:[%s3197_s21 + $0x8] sm:$0xf] %vm1949_vm7, %v1933_v27  ;;  %v1876_v47 = vadd.f32 %v1835_v36, %v1720_v60 }
 0x17d   : > { %v1898_v3 = vadd.f32 %v3189_v18, %v1876_v47 }
 0x17e   : > { %v1456_v20 = vpop.f32.mrf.mxu2 }
 0x17f   : > { %v1916_v62 = vmax.f32 %v1898_v3, 0.0  ;;  %v1495_v56 = vadd.f32 %v1456_v20, %v1277_v48 }
 0x180   : > { %v1240_v45 = vpop.f32.mrf.mxu1 }
 0x181   : > { %v1687_v14 = vpop.f32.mrf.mxu3  ;;  %v1934_v35 = vpack.c.bf16 %v1916_v62, %v1916_v62  ;;  %v1721_v40 = vadd.f32 %v1682_v29, %v1495_v56  ;;  %v1278_v36 = vadd.f32 %v1240_v45, %v3044_v63  ;;  %v1848_v63 = vpop.f32.mrf.mxu0 }
 0x183   : > { %1953 = vst.msk [vmem:[%s3197_s21 + $0xc] sm:$0xf] %vm1949_vm7, %v1934_v35  ;;  %v1877_v5 = vadd.f32 %v1838_v43, %v1721_v40 }
 0x185   : > { %v1899_v8 = vadd.f32 %v3189_v18, %v1877_v5 }
 0x186   : > { %v1458_v15 = vpop.f32.mrf.mxu2 }
 0x187   : > { %v1917_v57 = vmax.f32 %v1899_v8, 0.0  ;;  %v1496_v37 = vadd.f32 %v1458_v15, %v1278_v36 }
 0x188   : > { %v1243_v2 = vpop.f32.mrf.mxu1 }
 0x189   : > { %v1689_v34 = vpop.f32.mrf.mxu3  ;;  %v1935_v61 = vpack.c.bf16 %v1917_v57, %v1917_v57  ;;  %v1722_v17 = vadd.f32 %v1684_v11, %v1496_v37  ;;  %v1279_v43 = vadd.f32 %v1243_v2, %v3056_v59  ;;  %v1850_v54 = vpop.f32.mrf.mxu0 }
 0x18b   : > { %1954 = vst.msk [vmem:[%s3197_s21 + $0x10] sm:$0xf] %vm1949_vm7, %v1935_v61  ;;  %v1878_v32 = vadd.f32 %v1840_v52, %v1722_v17 }
 0x18d   : > { %v1900_v4 = vadd.f32 %v3189_v18, %v1878_v32 }
 0x18e   : > { %v1461_v7 = vpop.f32.mrf.mxu2 }
 0x18f   : > { %v1918_v26 = vmax.f32 %v1900_v4, 0.0  ;;  %v1497_v53 = vadd.f32 %v1461_v7, %v1279_v43 }
 0x190   : > { %v1245_v28 = vpop.f32.mrf.mxu1 }
 0x191   : > { %v1692_v44 = vpop.f32.mrf.mxu3  ;;  %v1936_v24 = vpack.c.bf16 %v1918_v26, %v1918_v26  ;;  %v1723_v10 = vadd.f32 %v1687_v14, %v1497_v53  ;;  %v1280_v49 = vadd.f32 %v1245_v28, %v3071_v21  ;;  %v1853_v3 = vpop.f32.mrf.mxu0 }
 0x193   : > { %1955 = vst.msk [vmem:[%s3197_s21 + $0x14] sm:$0xf] %vm1949_vm7, %v1936_v24  ;;  %v1879_v55 = vadd.f32 %v1843_v23, %v1723_v10 }
 0x195   : > { %v1901_v9 = vadd.f32 %v3189_v18, %v1879_v55 }
 0x196   : > { %v1463_v19 = vpop.f32.mrf.mxu2 }
 0x197   : > { %v1919_v29 = vmax.f32 %v1901_v9, 0.0  ;;  %v1498_v12 = vadd.f32 %v1463_v19, %v1280_v49 }
 0x198   : > { %v1248_v59 = vpop.f32.mrf.mxu1 }
 0x199   : > { %v1694_v50 = vpop.f32.mrf.mxu3  ;;  %v1937_v52 = vpack.c.bf16 %v1919_v29, %v1919_v29  ;;  %v1724_v0 = vadd.f32 %v1689_v34, %v1498_v12  ;;  %v1281_v42 = vadd.f32 %v1248_v59, %v3083_v30  ;;  %v1855_v15 = vpop.f32.mrf.mxu0 }
 0x19b   : > { %1956 = vst.msk [vmem:[%s3197_s21 + $0x18] sm:$0xf] %vm1949_vm7, %v1937_v52  ;;  %v1880_v13 = vadd.f32 %v1845_v46, %v1724_v0 }
 0x19d   : > { %v1902_v39 = vadd.f32 %v3189_v18, %v1880_v13 }
 0x19e   : > { %v1466_v41 = vpop.f32.mrf.mxu2 }
 0x19f   : > { %v1920_v6 = vmax.f32 %v1902_v39, 0.0  ;;  %v1499_v11 = vadd.f32 %v1466_v41, %v1281_v42 }
 0x1a0   : > { %v1250_v21 = vpop.f32.mrf.mxu1 }
 0x1a1   : > { %v1938_v27 = vpack.c.bf16 %v1920_v6, %v1920_v6  ;;  %v1725_v60 = vadd.f32 %v1692_v44, %v1499_v11  ;;  %v1697_v47 = vpop.f32.mrf.mxu3  ;;  %v1282_v20 = vadd.f32 %v1250_v21, %v3099_v33  ;;  %v1858_v53 = vpop.f32.mrf.mxu0 }
 0x1a3   : > { %1957 = vst.msk [vmem:[%s3197_s21 + $0x1c] sm:$0xf] %vm1949_vm7, %v1938_v27  ;;  %v1881_v23 = vadd.f32 %v1848_v63, %v1725_v60 }
 0x1a5   : > { %v1903_v48 = vadd.f32 %v3189_v18, %v1881_v23 }
 0x1a6   : > { %v1468_v62 = vpop.f32.mrf.mxu2 }
 0x1a7   : > { %v1921_v56 = vmax.f32 %v1903_v48, 0.0  ;;  %v1500_v45 = vadd.f32 %v1468_v62, %v1282_v20 }
 0x1a8   : > { %v1253_v30 = vpop.f32.mrf.mxu1 }
 0x1a9   : > { %v1939_v14 = vpack.c.bf16 %v1921_v56, %v1921_v56  ;;  %v1726_v35 = vadd.f32 %v1694_v50, %v1500_v45  ;;  %v1699_v5 = vpop.f32.mrf.mxu3  ;;  %v1283_v36 = vadd.f32 %v1253_v30, %v3111_v58  ;;  %v1860_v59 = vpop.f32.mrf.mxu0 }
 0x1ab   : > { %1958 = vst.msk [vmem:[%s3197_s21 + $0x20] sm:$0xf] %vm1949_vm7, %v1939_v14  ;;  %v1882_v40 = vadd.f32 %v1850_v54, %v1726_v35 }
 0x1ad   : > { %v1904_v8 = vadd.f32 %v3189_v18, %v1882_v40 }
 0x1ae   : > { %v1471_v46 = vpop.f32.mrf.mxu2 }
 0x1af   : > { %v1922_v57 = vmax.f32 %v1904_v8, 0.0  ;;  %v1501_v37 = vadd.f32 %v1471_v46, %v1283_v36 }
 0x1b0   : > { %v1255_v33 = vpop.f32.mrf.mxu1 }
 0x1b1   : > { %v1940_v2 = vpack.c.bf16 %v1922_v57, %v1922_v57  ;;  %v1727_v34 = vadd.f32 %v1697_v47, %v1501_v37  ;;  %v1284_v32 = vadd.f32 %v1255_v33, %v3127_v51  ;;  %v1702_v43 = vpop.f32.mrf.mxu3  ;;  %v1863_v21 = vpop.f32.mrf.mxu0 }
 0x1b3   : > { %1959 = vst.msk [vmem:[%s3197_s21 + $0x24] sm:$0xf] %vm1949_vm7, %v1940_v2  ;;  %v1883_v61 = vadd.f32 %v1853_v3, %v1727_v34 }
 0x1b5   : > { %v1905_v17 = vadd.f32 %v3189_v18, %v1883_v61 }
 0x1b6   : > { %v1473_v4 = vpop.f32.mrf.mxu2 }
 0x1b7   : > { %v1923_v7 = vmax.f32 %v1905_v17, 0.0  ;;  %v1502_v26 = vadd.f32 %v1473_v4, %v1284_v32 }
 0x1b8   : > { %v1258_v58 = vpop.f32.mrf.mxu1 }
 0x1b9   : > { %v1941_v63 = vpack.c.bf16 %v1923_v7, %v1923_v7  ;;  %v1728_v28 = vadd.f32 %v1699_v5, %v1502_v26  ;;  %v1285_v10 = vadd.f32 %v1258_v58, %v3140_v31  ;;  %v1704_v19 = vpop.f32.mrf.mxu3  ;;  %v1865_v14 = vpop.f32.mrf.mxu0 }
 0x1bb   : > { %1960 = vst.msk [vmem:[%s3197_s21 + $0x28] sm:$0xf] %vm1949_vm7, %v1941_v63  ;;  %v1884_v44 = vadd.f32 %v1855_v15, %v1728_v28 }
 0x1bd   : > { %v1906_v24 = vadd.f32 %v3189_v18, %v1884_v44 }
 0x1be   : > { %v1476_v55 = vpop.f32.mrf.mxu2 }
 0x1bf   : > { %v1924_v9 = vmax.f32 %v1906_v24, 0.0  ;;  %v1503_v49 = vadd.f32 %v1476_v55, %v1285_v10 }
 0x1c0   : > { %v1260_v51 = vpop.f32.mrf.mxu1 }
 0x1c1   : > { %v1942_v29 = vpack.c.bf16 %v1924_v9, %v1924_v9  ;;  %v1729_v12 = vadd.f32 %v1702_v43, %v1503_v49  ;;  %v1286_v0 = vadd.f32 %v1260_v51, %v3151_v25  ;;  %v1707_v6 = vpop.f32.mrf.mxu3 }
 0x1c3   : > { %1961 = vst.msk [vmem:[%s3197_s21 + $0x2c] sm:$0xf] %vm1949_vm7, %v1942_v29  ;;  %v1885_v50 = vadd.f32 %v1858_v53, %v1729_v12 }
 0x1c5   : > { %v1907_v52 = vadd.f32 %v3189_v18, %v1885_v50 }
 0x1c6   : > { %v1478_v54 = vpop.f32.mrf.mxu2 }
 0x1c7   : > { %v1925_v13 = vmax.f32 %v1907_v52, 0.0  ;;  %v1504_v39 = vadd.f32 %v1478_v54, %v1286_v0 }
 0x1c8   : > { %v1263_v31 = vpop.f32.mrf.mxu1 }
 0x1c9   : > { %v1943_v42 = vpack.c.bf16 %v1925_v13, %v1925_v13  ;;  %v1730_v41 = vadd.f32 %v1704_v19, %v1504_v39  ;;  %v1287_v60 = vadd.f32 %v1263_v31, %v3158_v1  ;;  %v1709_v56 = vpop.f32.mrf.mxu3 }
 0x1cb   : > { %1962 = vst.msk [vmem:[%s3197_s21 + $0x30] sm:$0xf] %vm1949_vm7, %v1943_v42  ;;  %v1886_v11 = vadd.f32 %v1860_v59, %v1730_v41 }
 0x1cd   : > { %v1908_v27 = vadd.f32 %v3189_v18, %v1886_v11 }
 0x1ce   : > { %v1481_v47 = vpop.f32.mrf.mxu2 }
 0x1cf   : > { %v1926_v23 = vmax.f32 %v1908_v27, 0.0  ;;  %v1505_v3 = vadd.f32 %v1481_v47, %v1287_v60 }
 0x1d0   : > { %v1265_v25 = vpop.f32.mrf.mxu1 }
 0x1d1   : > { %v1944_v48 = vpack.c.bf16 %v1926_v23, %v1926_v23  ;;  %v1731_v20 = vadd.f32 %v1707_v6, %v1505_v3  ;;  %v1288_v30 = vadd.f32 %v1265_v25, %v3170_v16  ;;  %v1712_v37 = vpop.f32.mrf.mxu3  ;;  %v1868_v16 = vpop.f32.mrf.mxu0 }
 0x1d3   : > { %1963 = vst.msk [vmem:[%s3197_s21 + $0x34] sm:$0xf] %vm1949_vm7, %v1944_v48  ;;  %v1887_v62 = vadd.f32 %v1863_v21, %v1731_v20 }
 0x1d5   : > { %v1909_v45 = vadd.f32 %v3189_v18, %v1887_v62 }
 0x1d6   : > { %v1483_v35 = vpop.f32.mrf.mxu2 }
 0x1d7   : > { %v1927_v40 = vmax.f32 %v1909_v45, 0.0  ;;  %v1506_v5 = vadd.f32 %v1483_v35, %v1288_v30 }
 0x1d8   : > { %v1268_v1 = vpop.f32.mrf.mxu1 }
 0x1d9   : > { %v1945_v8 = vpack.c.bf16 %v1927_v40, %v1927_v40  ;;  %v1732_v36 = vadd.f32 %v1709_v56, %v1506_v5  ;;  %v1289_v57 = vadd.f32 %v1268_v1, %v3175_v38  ;;  %v1714_v53 = vpop.f32.mrf.mxu3  ;;  %v1870_v44 = vpop.f32.mrf.mxu0 }
 0x1db   : > { %1964 = vst.msk [vmem:[%s3197_s21 + $0x38] sm:$0xf] %vm1949_vm7, %v1945_v8  ;;  %v1888_v46 = vadd.f32 %v1865_v14, %v1732_v36 }
 0x1dd   : > { %v1910_v15 = vadd.f32 %v3189_v18, %v1888_v46 }
 0x1de   : > { %v1486_v33 = vpop.f32.mrf.mxu2 }
 0x1df   : > { %v1928_v2 = vmax.f32 %v1910_v15, 0.0  ;;  %v1507_v34 = vadd.f32 %v1486_v33, %v1289_v57 }
 0x1e0   : > { %v1270_v32 = vpop.f32.mrf.mxu1 }
 0x1e1   : > { %v1946_v61 = vpack.c.bf16 %v1928_v2, %v1928_v2  ;;  %v1733_v17 = vadd.f32 %v1712_v37, %v1507_v34  ;;  %v1290_v7 = vadd.f32 %v1270_v32, %v3183_v22 }
 0x1e3   : > { %1965 = vst.msk [vmem:[%s3197_s21 + $0x3c] sm:$0xf] %vm1949_vm7, %v1946_v61  ;;  %v1889_v4 = vadd.f32 %v1868_v16, %v1733_v17 }
 0x1e5   : > { %v1911_v43 = vadd.f32 %v3189_v18, %v1889_v4 }
 0x1e6   : > { %v1488_v26 = vpop.f32.mrf.mxu2 }
 0x1e7   : > { %v1929_v58 = vmax.f32 %v1911_v43, 0.0  ;;  %v1508_v38 = vadd.f32 %v1488_v26, %v1290_v7 }
 0x1e9   : > { %v1947_v63 = vpack.c.bf16 %v1929_v58, %v1929_v58  ;;  %v1734_v28 = vadd.f32 %v1714_v53, %v1508_v38 }
 0x1eb   : > { %1966 = vst.msk [vmem:[%s3197_s21 + $0x40] sm:$0xf] %vm1949_vm7, %v1947_v63  ;;  %v1890_v24 = vadd.f32 %v1870_v44, %v1734_v28 }
 0x1ed   : > { %v1912_v10 = vadd.f32 %v3189_v18, %v1890_v24 }
 0x1ef   : > { %v1930_v55 = vmax.f32 %v1912_v10, 0.0 }
 0x1f1   : > { %v1948_v9 = vpack.c.bf16 %v1930_v55, %v1930_v55 }
 0x1f3   : > { %1967 = vst.msk [vmem:[%s3197_s21 + $0x44] sm:$0xf] %vm1949_vm7, %v1948_v9 }
 0x1f4 PF: > { %s13_s12 = sadd.s32 1, %s2513_s12  }
 0x1f5   : > { %p10_p4 = scmp.ge.s32.totalorder %s13_s12, 4  }
 0x1f7   :  { %12 = sbr.rel (!%p10_p4) target bundleno = 1 (0x1), region = 70 }

// kernel: neg.2
= control target key start
LH: loop header
LB: loop body
LE: loop exit
PB: predicated region body
PF: predicated region fallthrough
CT: control target
= control target key end

     0   :  { %s40_s0 = inlined_call_operand.vmem [shape: f32[2,4,128], index: 0, kind: input, shape index: {}]   ;;  %s41_s1 = inlined_call_operand.vmem [shape: f32[2,4,128], index: 1, kind: output, shape index: {}]  }
   0x1   :  { %v2_v0 = vld [vmem:[%s40_s0] sm:$0xf]  ;;  %v16_v1 = vld [vmem:[%s40_s0 + $0x4] sm:$0xf] }
   0x2   :  { %v5_v2 = vxor.u32 2147483648, %v2_v0  ;;  %v12_v3 = vxor.u32 2147483648, %v16_v1 }
   0x4   :  { %7 = vst [vmem:[%s41_s1] sm:$0xf] %v5_v2 }
   0x5   :  { %17 = vst [vmem:[%s41_s1 + $0x4] sm:$0xf] %v12_v3 }

// kernel: _lambda_.18
= control target key start
LH: loop header
LB: loop body
LE: loop exit
PB: predicated region body
PF: predicated region fallthrough
CT: control target
= control target key end

     0   :  { %s395_s12 = smov 0   ;;  %s432_s0 = inlined_call_operand.vmem [shape: bf16[2,128,128], index: 0, kind: input, shape index: {}]   ;;  %s433_s1 = inlined_call_operand.vmem [shape: f32[4,128], index: 1, kind: input, shape index: {}]   ;;  %s434_s2 = inlined_call_operand.vmem [shape: f32[4,1], index: 2, kind: input, shape index: {}]   ;;  %s435_s3 = inlined_call_operand.vmem [shape: f32[2,4,128], index: 3, kind: output, shape index: {}]  }
   0x1 LB: > { %s301_s13 = sadd.s32 4294967295, %s372_s12   ;;  %p305_p0 = scmp.ge.s32.totalorder %s372_s12, 1  ;;  %s372_s12 = sphi %s395_s12, %s13_s12  }
   0x2   : > { %p137_p1 = scmp.lt.s32.totalorder %s372_s12, 3 }
   0x4   : > { %p138_p2 = pnand %p305_p0, %p137_p1 }
   0x5   : > { %p160_p3 = scmp.lt.s32.totalorder (!%p138_p2), %s301_s13, 1 }
   0x6   : > { %141 = sbr.rel (%p138_p2) target bundleno = 237 (0xed), region = 32 }
   0xb   : > { %s437_s13 = smov (!%p160_p3, %s301_s13), 1  ;;  %v202_v14 = vld [vmem:[%s434_s2] sm:$0xf]  ;;  %v374_v16 = vmov 0  }
   0xc   : > { %s312_s14 = sshll.u32 %s437_s13, 6  ;;  %361 = vset.pattern.permute.xlu0 %v374_v16  ;;  %v201_v26 = vld [vmem:[%s433_s1] sm:$0xf]  ;;  %s308_s22 = sshll.u32 %s437_s13, 2 }
   0xd   : > { %s409_s17 = scalar_lea.vmem %s432_s0, %s312_s14  ;;  %205 = vperm.xlu0 %361, %v202_v14   ;;  %s168_s25 = scalar_lea.vmem %s435_s3, %s308_s22 }
   0xe   : > { %v351_v0 = vld [vmem:[%s409_s17 + $0x38] sm:$0xff]   ;;  %v350_v3 = vld [vmem:[%s409_s17 + $0x30] sm:$0xff]   ;;  %v349_v6 = vld [vmem:[%s409_s17 + $0x28] sm:$0xff]  }
   0xf   : > { %v344_v1 = vunpack.c.h.bf16 %v351_v0  ;;  %v343_v2 = vunpack.c.l.bf16 %v351_v0  ;;  %v340_v4 = vunpack.c.h.bf16 %v350_v3  ;;  %v339_v5 = vunpack.c.l.bf16 %v350_v3  ;;  %v348_v9 = vld [vmem:[%s409_s17 + $0x20] sm:$0xff]   ;;  %v347_v12 = vld [vmem:[%s409_s17 + $0x18] sm:$0xff]   ;;  %v346_v17 = vld [vmem:[%s409_s17 + $0x10] sm:$0xff]  }
  0x10   : > { %v336_v7 = vunpack.c.h.bf16 %v349_v6  ;;  %v335_v8 = vunpack.c.l.bf16 %v349_v6  ;;  %v332_v10 = vunpack.c.h.bf16 %v348_v9  ;;  %v331_v11 = vunpack.c.l.bf16 %v348_v9  ;;  %v345_v20 = vld [vmem:[%s409_s17 + $0x8] sm:$0xff]   ;;  %v314_v23 = vld [vmem:[%s409_s17] sm:$0xff]  }
  0x11   : > { %208 = vmatpush.xpose.msra.mxu0 %v344_v1  ;;  %v328_v13 = vunpack.c.h.bf16 %v347_v12  ;;  %v327_v15 = vunpack.c.l.bf16 %v347_v12  ;;  %v324_v18 = vunpack.c.h.bf16 %v346_v17  ;;  %v323_v19 = vunpack.c.l.bf16 %v346_v17 }
  0x12   : > { %v320_v21 = vunpack.c.h.bf16 %v345_v20  ;;  %v319_v22 = vunpack.c.l.bf16 %v345_v20  ;;  %v316_v24 = vunpack.c.h.bf16 %v314_v23  ;;  %v315_v25 = vunpack.c.l.bf16 %v314_v23 }
  0x15   : > { %209 = vmatpush.xpose.msra.mxu0 %v343_v2 }
  0x19   : > { %210 = vmatpush.xpose.msra.mxu0 %v340_v4 }
  0x1d   : > { %211 = vmatpush.xpose.msra.mxu0 %v339_v5 }
  0x21   : > { %212 = vmatpush.xpose.msra.mxu0 %v336_v7 }
  0x25   : > { %213 = vmatpush.xpose.msra.mxu0 %v335_v8 }
  0x29   : > { %214 = vmatpush.xpose.msra.mxu0 %v332_v10 }
  0x2d   : > { %215 = vmatpush.xpose.msra.mxu0 %v331_v11 }
  0x31   : > { %216 = vmatpush.xpose.msra.mxu0 %v328_v13 }
  0x35   : > { %217 = vmatpush.xpose.msra.mxu0 %v327_v15 }
  0x39   : > { %218 = vmatpush.xpose.msra.mxu0 %v324_v18 }
  0x3d   : > { %219 = vmatpush.xpose.msra.mxu0 %v323_v19 }
  0x41   : > { %220 = vmatpush.xpose.msra.mxu0 %v320_v21 }
  0x45   : > { %221 = vmatpush.xpose.msra.mxu0 %v319_v22 }
  0x49   : > { %222 = vmatpush.xpose.msra.mxu0 %v316_v24 }
  0x4d   : > { %223 = vmatpush.xpose.msra.mxu0 %v315_v25 }
  0x50   : > { %224 = vmatmul.f32.vlgmr.msra.gmra.mxu0 %v201_v26 }
  0x7f   : > { %v206_v27 = vpop.permute.xlu0 %205 }
  0xcd   : > { %v225_v28 = vpop.f32.mrf.mxu0 }
  0xce   : > { %v226_v29 = vadd.f32 %v225_v28, %v206_v27 }
  0xd0   : > { %v309_v30 = vmul.f32 -1.442695, %v226_v29 }
  0xd2   : > { %362 = vpow2.f32 %v309_v30 }
  0xd8   : > { %v363_v31 = vpop.eup %362 }
  0xd9   : > { %v231_v32 = vadd.f32 1.0, %v363_v31 }
  0xdb   : > { %364 = vrcp.f32 %v231_v32  ;;  %v243_v36 = vand.u32 2147483648, %v231_v32  ;;  %v241_v38 = vand.u32 2147483647, %v231_v32  ;;  %vm237_vm1 = vweird.f32 %v231_v32 }
  0xdd   : > { %v244_v40 = vor.u32 1.1754944e-38, %v243_v36  ;;  %vm242_vm3 = vcmp.eq.f32.partialorder %v241_v38, 8.507059e+37 }
  0xe1   : > { %v365_v33 = vpop.eup %364 }
  0xe2   : > { %v233_v34 = vmul.f32 %v365_v33, %v231_v32  ;;  %vm238_vm0 = vweird.f32 %v365_v33 }
  0xe3   : > { %vm239_vm2 = vmor %vm237_vm1, %vm238_vm0 }
  0xe4   : > { %v234_v35 = vsub.f32 1.0, %v233_v34 }
  0xe6   : > { %v235_v37 = vmul.f32 %v365_v33, %v234_v35 }
  0xe8   : > { %v236_v39 = vadd.f32 %v365_v33, %v235_v37 }
  0xea   : > { %v240_v41 = vsel %vm239_vm2, %v365_v33, %v236_v39 }
  0xeb   : > { %v245_v42 = vsel %vm242_vm3, %v244_v40, %v240_v41 }
  0xec   : > { %247 = vst [vmem:[%s168_s25] sm:$0xf] %v245_v42 }
  0xed PF: > { %s13_s12 = sadd.s32 1, %s372_s12  }
  0xee   : > { %p10_p4 = scmp.ge.s32.totalorder %s13_s12, 4  }
  0xf0   :  { %12 = sbr.rel (!%p10_p4) target bundleno = 1 (0x1), region = 62 }

// kernel: _lambda_.19
= control target key start
LH: loop header
LB: loop body
LE: loop exit
PB: predicated region body
PF: predicated region fallthrough
CT: control target
= control target key end

     0   :  { %vm27_vm0 = vcmask 1043456   ;;  %s122_s0 = inlined_call_operand.vmem [shape: f32[2,4,128], index: 0, kind: input, shape index: {}]   ;;  %s123_s1 = inlined_call_operand.vmem [shape: f32[1,1,128], index: 1, kind: input, shape index: {}]   ;;  %s124_s2 = inlined_call_operand.hbm [shape: f32[2,4], index: 2, kind: output, shape index: {}]  }
   0x1   :  { %v19_v0 = vld [vmem:[%s122_s0] sm:$0xf] }
   0x2   :  { %v64_v1 = vld [vmem:[%s123_s1] ss:$0 sm:$0xff] }
   0x3   :  { %7 = vsyncpa [#allocation3], 0  ;;  %v25_v2 = vmul.f32 %v64_v1, %v19_v0  ;;  %v20_v3 = vld [vmem:[%s122_s0 + $0x4] sm:$0xf]  ;;  %vm16_vm1 = vcmask 25600   ;;  %v91_v7 = vmov 0.0   ;;  %v36_v9 = vlaneseq }
   0x4   :  { %v26_v5 = vmul.f32 %v64_v1, %v20_v3  ;;  %17 = vst.msk [vmem:[#allocation2] sm:$0x3] %vm16_vm1, %v91_v7  ;;  %vm40_vm2 = vcmask 1041409   ;;  %s92_s1 = smov [#allocation2]   ;;  %s53_s17 = sshll.u32 %s124_s2, 4  ;;  %s54_s17 = int_to_ptr.hbm [resolvable:$true] %s53_s17 }
   0x5   :  { %v28_v4 = vsel %vm27_vm0, %v25_v2, 0.0  ;;  %v37_v10 = vand.u32 127, %v36_v9  ;;  %s51_s15 = sshll.u32 %s92_s1, 4  ;;  %s52_s15 = int_to_ptr.vmem [resolvable:$true] %s51_s15 }
   0x6   :  { %29 = vadd.xlane.f32.xlu0 %v28_v4  ;;  %v31_v6 = vsel %vm27_vm0, %v26_v5, 0.0 }
   0xb   :  { %v18_v13 = vld [vmem:[#allocation2] sm:$0x3] }
   0xe   :  { %32 = vadd.xlane.f32.xlu0 %v31_v6 }
  0x79   :  { %v30_v8 = vpop.xlane.xlu0 %29 }
  0x7a   :  { %v38_v12 = vperm.slane %v30_v8, %v37_v10 }
  0x81   :  { %v33_v11 = vpop.xlane.xlu0 %32 }
  0x82   :  { %v39_v14 = vperm.slane %v33_v11, %v37_v10 }
  0x84   :  { %v41_v15 = vsel %vm40_vm2, %v39_v14, %v38_v12 }
  0x85   :  { %v43_v16 = vadd.f32 %v41_v15, %v18_v13 }
  0x87   :  { %45 = vst.msk [vmem:[#allocation2] sm:$0x3] %vm16_vm1, %v43_v16 }
  0x88   :  { %56 = dma.vmem_to_hbm [thread:$0]  %s52_s15, 32, %s54_s17, [#allocation3]  }
  0x89   :  { %89 = dma.done.wait [#allocation3], 32  }
  0x8a   :  { %90 = vsyncadd [#allocation3], 4294967264 }
  0x8b   :  { %61 = vsyncpa [#allocation3], 1 }

// kernel: _lambda_.15
= control target key start
LH: loop header
LB: loop body
LE: loop exit
PB: predicated region body
PF: predicated region fallthrough
CT: control target
= control target key end

     0   :  { %s2895_s12 = smov 0   ;;  %s3568_s0 = inlined_call_operand.vmem [shape: bf16[2,182,128], index: 0, kind: input, shape index: {}]   ;;  %s3569_s1 = inlined_call_operand.vmem [shape: bf16[9,128,128], index: 1, kind: input, shape index: {}]   ;;  %s3570_s2 = inlined_call_operand.vmem [shape: f32[1,128], index: 2, kind: input, shape index: {}]   ;;  %s3571_s3 = inlined_call_operand.vmem [shape: bf16[2,144,128], index: 3, kind: output, shape index: {}]  }
   0x1 LB: > { %s2155_s13 = sadd.s32 4294967295, %s2873_s12   ;;  %p2159_p0 = scmp.ge.s32.totalorder %s2873_s12, 1  ;;  %s2873_s12 = sphi %s2895_s12, %s13_s12  }
   0x2   : > { %p137_p1 = scmp.lt.s32.totalorder %s2873_s12, 3 }
   0x4   : > { %p138_p2 = pnand %p2159_p0, %p137_p1 }
   0x5   : > { %p161_p3 = scmp.lt.s32.totalorder (!%p138_p2), %s2155_s13, 1 }
   0x6   : > { %141 = sbr.rel (%p138_p2) target bundleno = 516 (0x204), region = 32 }
   0xb   : > { %v2699_v0 = vld [vmem:[%s3569_s1 + $0x78] sm:$0xff]  ;;  %v2698_v1 = vld [vmem:[%s3569_s1 + $0x70] sm:$0xff]  ;;  %s3573_s13 = smov (!%p161_p3, %s2155_s13), 1  ;;  %v2697_v2 = vld [vmem:[%s3569_s1 + $0x68] sm:$0xff]  ;;  %vm271_vm0 = vsmask.f32 7424 }
   0xc   : > { %2832 = vmatpush.bf16.msra.mxu1 %v2699_v0  ;;  %2833 = vmatpush.bf16.msra.mxu2 %v2699_v0  ;;  %s2856_s20 = smul.u32 92, %s3573_s13  ;;  %v2696_v3 = vld [vmem:[%s3569_s1 + $0x60] sm:$0xff]  ;;  %v2695_v4 = vld [vmem:[%s3569_s1 + $0x58] sm:$0xff]  ;;  %v2694_v8 = vld [vmem:[%s3569_s1 + $0x50] sm:$0xff]  ;;  %vm591_vm1 = vcmask 1046528   ;;  %vm1875_vm4 = vcmask 1044480  }
   0xd   : > { %2834 = vmatpush.bf16.msra.mxu3 %v2699_v0  ;;  %405 = vmatpush.bf16.msra.mxu0 %v2699_v0  ;;  %v2693_v21 = vld [vmem:[%s3569_s1 + $0x48] sm:$0xff]  ;;  %v2692_v33 = vld [vmem:[%s3569_s1 + $0x40] sm:$0xff]  ;;  %v2707_v38 = vld [vmem:[%s3569_s1 + $0xb8] sm:$0xff]  ;;  %vm993_vm2 = vsmask.f32 6400  ;;  %vm1233_vm5 = vcmask 1045504  }
   0xe   : > { %s2921_s25 = scalar_lea.vmem %s3568_s0, %s2856_s20  ;;  %v2691_v39 = vld [vmem:[%s3569_s1 + $0x38] sm:$0xff]  ;;  %v2706_v48 = vld [vmem:[%s3569_s1 + $0xb0] sm:$0xff]  ;;  %v2705_v56 = vld [vmem:[%s3569_s1 + $0xa8] sm:$0xff]  ;;  %vm1635_vm3 = vsmask.f32 5376  ;;  %s2857_s18 = smul.u32 72, %s3573_s13 }
   0xf   : > { %v2927_v5 = vld [vmem:[%s2921_s25 + $0x10] sm:$0xff]  ;;  %v2930_v6 = vld [vmem:[%s2921_s25 + $0x28] sm:$0xff]  ;;  %v2933_v7 = vld [vmem:[%s2921_s25 + $0x18] sm:$0xff] }
  0x10   : > { %2835 = vmatpush.bf16.msra.mxu1 %v2698_v1  ;;  %2836 = vmatpush.bf16.msra.mxu2 %v2698_v1  ;;  %v288_v9 = vshll.u32 %v2927_v5, 16  ;;  %v2940_v10 = vld [vmem:[%s2921_s25 + $0x30] sm:$0xff]  ;;  %v312_v11 = vshll.u32 %v2930_v6, 16  ;;  %v2944_v12 = vld [vmem:[%s2921_s25] sm:$0xff]   ;;  %v292_v14 = vshrl.u32 %v2927_v5, 16  ;;  %v2951_v15 = vld [vmem:[%s2921_s25 + $0x8] sm:$0xff]  ;;  %s3523_s21 = scalar_lea.vmem %s3571_s3, %s2857_s18 }
  0x11   : > { %2837 = vmatpush.bf16.msra.mxu3 %v2698_v1  ;;  %406 = vmatpush.bf16.msra.mxu0 %v2698_v1  ;;  %v2947_v13 = vld [vmem:[%s2921_s25 + $0x40] sm:$0xff]  ;;  %v205_v16 = vld [vmem:[%s2921_s25 + $0x48] sm:$0x1]  ;;  %v296_v17 = vshll.u32 %v2933_v7, 16  ;;  %v275_v18 = vshll.u32 %v2944_v12, 16  ;;  %v316_v24 = vshrl.u32 %v2930_v6, 16 }
  0x12   : > { %v260_v19 = vunpack.c.l.b16 %v205_v16  ;;  %v336_v20 = vshll.u32 %v2947_v13, 16  ;;  %v2960_v22 = vrot.slane %v288_v9, 1  ;;  %v2962_v23 = vrot.slane %v312_v11, 1  ;;  %v2723_v46 = vld [vmem:[%s3569_s1 + $0xf8] sm:$0xff]  ;;  %v2690_v49 = vld [vmem:[%s3569_s1 + $0x30] sm:$0xff]  ;;  %v3006_v53 = vld [vmem:[%s2921_s25 + $0x20] sm:$0xff] }
  0x13   : > { %v320_v25 = vshll.u32 %v2940_v10, 16  ;;  %v273_v27 = vshrl.u32 %v2944_v12, 16  ;;  %v280_v28 = vshll.u32 %v2951_v15, 16  ;;  %v277_v29 = vrot.slane %v275_v18, 1  ;;  %v2731_v47 = vld [vmem:[%s3569_s1 + $0x138] sm:$0xff]  ;;  %v2722_v50 = vld [vmem:[%s3569_s1 + $0xf0] sm:$0xff] }
  0x14   : > { %2838 = vmatpush.bf16.msra.mxu1 %v2697_v2  ;;  %2839 = vmatpush.bf16.msra.mxu2 %v2697_v2  ;;  %v2966_v26 = vpack.c.b16 %v260_v19, %v260_v19  ;;  %v2970_v30 = vrot.slane %v336_v20, 1  ;;  %v340_v31 = vshrl.u32 %v2947_v13, 16  ;;  %v294_v34 = vor.u32 %v292_v14, %v2960_v22  ;;  %v3009_v54 = vld [vmem:[%s2921_s25 + $0x38] sm:$0xff]  ;;  %v2730_v55 = vld [vmem:[%s3569_s1 + $0x130] sm:$0xff]  ;;  %v2689_v57 = vld [vmem:[%s3569_s1 + $0x28] sm:$0xff] }
  0x15   : > { %2840 = vmatpush.bf16.msra.mxu3 %v2697_v2  ;;  %407 = vmatpush.bf16.msra.mxu0 %v2697_v2  ;;  %v298_v35 = vrot.slane %v296_v17, 1  ;;  %v318_v36 = vor.u32 %v316_v24, %v2962_v23  ;;  %v322_v37 = vrot.slane %v320_v25, 1  ;;  %v278_v40 = vor.u32 %v277_v29, %v273_v27  ;;  %v2721_v62 = vld [vmem:[%s3569_s1 + $0xe8] sm:$0xff]  ;;  %v2704_v0 = vld [vmem:[%s3569_s1 + $0xa0] sm:$0xff]  ;;  %v2703_v16 = vld [vmem:[%s3569_s1 + $0x98] sm:$0xff] }
  0x16   : > { %v344_v32 = vshll.u32 %v2966_v26, 16  ;;  %v282_v41 = vrot.slane %v280_v28, 1  ;;  %v342_v42 = vor.u32 %v340_v31, %v2970_v30  ;;  %v300_v58 = vshrl.u32 %v2933_v7, 16  ;;  %v2729_v63 = vld [vmem:[%s3569_s1 + $0x128] sm:$0xff]  ;;  %v2688_v1 = vld [vmem:[%s3569_s1 + $0x20] sm:$0xff]  ;;  %v2687_v17 = vld [vmem:[%s3569_s1 + $0x18] sm:$0xff] }
  0x17   : > { %v299_v44 = vsel %vm271_vm0, %v294_v34, %v298_v35  ;;  %v323_v45 = vsel %vm271_vm0, %v318_v36, %v322_v37  ;;  %v304_v59 = vshll.u32 %v3006_v53, 16  ;;  %v324_v60 = vshrl.u32 %v2940_v10, 16  ;;  %v2720_v11 = vld [vmem:[%s3569_s1 + $0xe0] sm:$0xff]  ;;  %v740_v18 = vld [vmem:[%s2921_s25 + $0x8] sm:$0xe]  ;;  %v2719_v25 = vld [vmem:[%s3569_s1 + $0xd8] sm:$0xff] }
  0x18   : > { %2841 = vmatpush.bf16.msra.mxu1 %v2696_v3  ;;  %2842 = vmatpush.bf16.msra.mxu2 %v2696_v3  ;;  %v346_v43 = vrot.slane %v344_v32, 1  ;;  %v283_v51 = vsel %vm271_vm0, %v278_v40, %v282_v41  ;;  %v328_v61 = vshll.u32 %v3009_v54, 16  ;;  %v284_v2 = vshrl.u32 %v2951_v15, 16  ;;  %v2728_v14 = vld [vmem:[%s3569_s1 + $0x120] sm:$0xff]  ;;  %v3051_v19 = vld [vmem:[%s2921_s25 + $0xc] sm:$0xf] }
  0x19   : > { %2843 = vmatpush.bf16.msra.mxu3 %v2696_v3  ;;  %408 = vmatpush.bf16.msra.mxu0 %v2696_v3  ;;  %v302_v3 = vor.u32 %v300_v58, %v298_v35  ;;  %v2727_v27 = vld [vmem:[%s3569_s1 + $0x118] sm:$0xff]  ;;  %v2702_v28 = vld [vmem:[%s3569_s1 + $0x90] sm:$0xff]  ;;  %v795_v31 = vunpack.c.l.b16 %v740_v18  ;;  %v796_v32 = vunpack.c.l.b16 %v3051_v19  ;;  %v2701_v36 = vld [vmem:[%s3569_s1 + $0x88] sm:$0xff] }
  0x1a   : > { %v347_v52 = vsel %vm271_vm0, %v342_v42, %v346_v43  ;;  %v330_v9 = vrot.slane %v328_v61, 1  ;;  %v286_v20 = vor.u32 %v284_v2, %v282_v41  ;;  %v2686_v29 = vld [vmem:[%s3569_s1 + $0x10] sm:$0xff]  ;;  %v308_v43 = vshrl.u32 %v3006_v53, 16  ;;  %v3143_v18 = vld [vmem:[%s2921_s25 + $0x18] sm:$0xff] }
  0x1b   : > { %v2718_v34 = vld [vmem:[%s3569_s1 + $0xd0] sm:$0xff] }
  0x1c   : > { %2844 = vmatpush.bf16.msra.mxu1 %v2695_v4  ;;  %2845 = vmatpush.bf16.msra.mxu2 %v2695_v4  ;;  %v2726_v35 = vld [vmem:[%s3569_s1 + $0x110] sm:$0xff] }
  0x1d   : > { %2846 = vmatpush.bf16.msra.mxu3 %v2695_v4  ;;  %409 = vmatpush.bf16.msra.mxu0 %v2695_v4  ;;  %v306_v4 = vrot.slane %v304_v59, 1  ;;  %v2716_v59 = vld [vmem:[%s3569_s1 + $0xc0] sm:$0xff] }
  0x20   : > { %2847 = vmatpush.bf16.msra.mxu1 %v2694_v8  ;;  %2848 = vmatpush.bf16.msra.mxu2 %v2694_v8 }
  0x21   : > { %2849 = vmatpush.bf16.msra.mxu3 %v2694_v8  ;;  %410 = vmatpush.bf16.msra.mxu0 %v2694_v8  ;;  %v326_v8 = vor.u32 %v324_v60, %v322_v37  ;;  %v3083_v37 = vld [vmem:[%s2921_s25 + $0x10] sm:$0xff]  ;;  %v2724_v60 = vld [vmem:[%s3569_s1 + $0x100] sm:$0xff] }
  0x22   : > { %v1003_v41 = vshrl.u32 %v3083_v37, 16  ;;  %v1006_v42 = vshll.u32 %v3083_v37, 16 }
  0x23   : > { %v331_v24 = vsel %vm271_vm0, %v326_v8, %v330_v9 }
  0x24   : > { %2850 = vmatpush.bf16.msra.mxu1 %v2693_v21  ;;  %2851 = vmatpush.bf16.msra.mxu2 %v2693_v21 }
  0x25   : > { %2852 = vmatpush.bf16.msra.mxu3 %v2693_v21  ;;  %411 = vmatpush.bf16.msra.mxu0 %v2693_v21  ;;  %v307_v21 = vsel %vm271_vm0, %v302_v3, %v306_v4 }
  0x28   : > { %2853 = vmatpush.bf16.msra.mxu1 %v2692_v33  ;;  %2854 = vmatpush.bf16.msra.mxu2 %v2692_v33 }
  0x29   : > { %2855 = vmatpush.bf16.msra.mxu3 %v2692_v33  ;;  %412 = vmatpush.bf16.msra.mxu0 %v2692_v33  ;;  %v291_v33 = vsel %vm271_vm0, %v286_v20, %v2960_v22  ;;  %v2685_v22 = vld [vmem:[%s3569_s1 + $0x8] sm:$0xff]  ;;  %v1012_v20 = vshrl.u32 %v3143_v18, 16 }
  0x2b   : > { %423 = vmatmul.bf16.vlgmr.msra.gmra.mxu1 %v299_v44  ;;  %438 = vmatmul.bf16.vlgmr.msra.gmra.mxu2 %v323_v45  ;;  %v332_v44 = vshrl.u32 %v3009_v54, 16  ;;  %v2717_v45 = vld [vmem:[%s3569_s1 + $0xc8] sm:$0xff] }
  0x2c   : > { %668 = vmatpush.bf16.msrb.mxu2 %v2707_v38  ;;  %516 = vmatpush.bf16.msrb.mxu1 %v2691_v39  ;;  %v814_v38 = vpack.c.b16 %v796_v32, %v795_v31  ;;  %v827_v31 = vrot.slane %v3143_v18, 1 }
  0x2d   : > { %900 = vmatpush.bf16.msrb.mxu3 %v2723_v46  ;;  %1140 = vmatpush.bf16.msrb.mxu0 %v2731_v47  ;;  %v2725_v46 = vld [vmem:[%s3569_s1 + $0x108] sm:$0xff]  ;;  %v2700_v47 = vld [vmem:[%s3569_s1 + $0x80] sm:$0xff]  ;;  %v334_v58 = vor.u32 %v332_v44, %v330_v9 }
  0x2e   : > { %413 = vmatmul.bf16.vlgmr.msra.gmra.mxu0 %v283_v51  ;;  %453 = vmatmul.bf16.vlgmr.msra.gmra.mxu3 %v347_v52  ;;  %v995_v39 = vshrl.u32 %v814_v38, 16  ;;  %v998_v40 = vshll.u32 %v814_v38, 16  ;;  %v824_v61 = vrot.slane %v814_v38, 1  ;;  %v2761_v38 = vld [vmem:[%s3569_s1 + $0x1e8] sm:$0xff] }
  0x30   : > { %669 = vmatpush.bf16.msrb.mxu2 %v2706_v48  ;;  %517 = vmatpush.bf16.msrb.mxu1 %v2690_v49  ;;  %v2684_v48 = vld [vmem:[%s3569_s1] sm:$0xff]  ;;  %v2755_v49 = vld [vmem:[%s3569_s1 + $0x1b8] sm:$0xff]  ;;  %v997_v51 = vrot.slane %v995_v39, 1  ;;  %v1000_v52 = vrot.slane %v998_v40, 2  ;;  %v2737_v39 = vld [vmem:[%s3569_s1 + $0x168] sm:$0xff] }
  0x31   : > { %901 = vmatpush.bf16.msrb.mxu3 %v2722_v50  ;;  %1141 = vmatpush.bf16.msrb.mxu0 %v2730_v55  ;;  %v2739_v50 = vld [vmem:[%s3569_s1 + $0x178] sm:$0xff]  ;;  %v1005_v55 = vrot.slane %v1003_v41, 1  ;;  %v3166_v40 = vld [vmem:[%s2921_s25 + $0x20] sm:$0xff] }
  0x32   : > { %v1021_v41 = vshrl.u32 %v3166_v40, 16 }
  0x34   : > { %670 = vmatpush.bf16.msrb.mxu2 %v2705_v56  ;;  %518 = vmatpush.bf16.msrb.mxu1 %v2689_v57  ;;  %v1008_v56 = vrot.slane %v1006_v42, 2  ;;  %v310_v57 = vor.u32 %v308_v43, %v306_v4  ;;  %v339_v4 = vsel %vm271_vm0, %v334_v58, %v2970_v30  ;;  %v2762_v30 = vld [vmem:[%s3569_s1 + $0x1f0] sm:$0xff]  ;;  %v1024_v42 = vshll.u32 %v3166_v40, 16 }
  0x35   : > { %902 = vmatpush.bf16.msrb.mxu3 %v2721_v62  ;;  %1142 = vmatpush.bf16.msrb.mxu0 %v2729_v63  ;;  %v825_v62 = vrot.slane %v3083_v37, 1  ;;  %v2763_v63 = vld [vmem:[%s3569_s1 + $0x1f8] sm:$0xff]  ;;  %v1023_v43 = vrot.slane %v1021_v41, 1 }
  0x36   : > { %v1009_v2 = vor.u32 %v1008_v56, %v1005_v55  ;;  %v315_v3 = vsel %vm271_vm0, %v310_v57, %v2962_v23  ;;  %v2754_v23 = vld [vmem:[%s3569_s1 + $0x1b0] sm:$0xff]  ;;  %v1026_v44 = vrot.slane %v1024_v42, 2  ;;  %v2736_v55 = vld [vmem:[%s3569_s1 + $0x160] sm:$0xff]  ;;  %v3186_v56 = vld [vmem:[%s2921_s25 + $0x28] sm:$0xff] }
  0x37   : > { %v826_v8 = vsel %vm591_vm1, %v824_v61, %v825_v62  ;;  %v1033_v57 = vshll.u32 %v3186_v56, 16  ;;  %v831_v61 = vrot.slane %v3186_v56, 1  ;;  %v3243_v42 = vld [vmem:[%s2921_s25 + $0x40] sm:$0xff] }
  0x38   : > { %671 = vmatpush.bf16.msrb.mxu2 %v2704_v0  ;;  %519 = vmatpush.bf16.msrb.mxu1 %v2688_v1  ;;  %v2771_v0 = vld [vmem:[%s3569_s1 + $0x238] sm:$0xff]  ;;  %v1001_v1 = vor.u32 %v1000_v52, %v997_v51  ;;  %v2752_v51 = vld [vmem:[%s3569_s1 + $0x1a0] sm:$0xff] }
  0x39   : > { %903 = vmatpush.bf16.msrb.mxu3 %v2720_v11  ;;  %1143 = vmatpush.bf16.msrb.mxu0 %v2728_v14  ;;  %v2738_v11 = vld [vmem:[%s3569_s1 + $0x170] sm:$0xff]  ;;  %v2760_v52 = vld [vmem:[%s3569_s1 + $0x1e0] sm:$0xff] }
  0x3a   : > { %v1010_v9 = vsel %vm993_vm2, %v1001_v1, %v1009_v2  ;;  %v2770_v14 = vld [vmem:[%s3569_s1 + $0x230] sm:$0xff] }
  0x3b   : > { %428 = vmatmul.bf16.gmra.mxu1 %v307_v21  ;;  %443 = vmatmul.bf16.gmra.mxu2 %v331_v24  ;;  %v1015_v21 = vshll.u32 %v3143_v18, 16 }
  0x3c   : > { %672 = vmatpush.bf16.msrb.mxu2 %v2703_v16  ;;  %520 = vmatpush.bf16.msrb.mxu1 %v2687_v17  ;;  %v2821_v16 = vld [vmem:[%s2921_s25] sm:$0xf0]  ;;  %v2822_v17 = vld [vmem:[%s2921_s25] sm:$0xe] }
  0x3d   : > { %904 = vmatpush.bf16.msrb.mxu3 %v2719_v25  ;;  %1144 = vmatpush.bf16.msrb.mxu0 %v2727_v27  ;;  %v2823_v24 = vor.u32 %v2822_v17, %v2821_v16  ;;  %v1014_v25 = vrot.slane %v1012_v20, 1  ;;  %v1017_v27 = vrot.slane %v1015_v21, 2 }
  0x3e   : > { %418 = vmatmul.bf16.gmra.mxu0 %v291_v33 }
  0x3f   : > { %v1018_v33 = vor.u32 %v1017_v27, %v1014_v25  ;;  %v2767_v25 = vld [vmem:[%s3569_s1 + $0x218] sm:$0xff] }
  0x40   : > { %673 = vmatpush.bf16.msrb.mxu2 %v2702_v28  ;;  %521 = vmatpush.bf16.msrb.mxu1 %v2686_v29  ;;  %v592_v28 = vrot.slane %v2823_v24, 1  ;;  %v593_v29 = vrot.slane %v2951_v15, 1  ;;  %v3223_v27 = vld [vmem:[%s2921_s25 + $0x38] sm:$0xff] }
  0x41   : > { %905 = vmatpush.bf16.msrb.mxu3 %v2718_v34  ;;  %1145 = vmatpush.bf16.msrb.mxu0 %v2726_v35  ;;  %v828_v35 = vsel %vm591_vm1, %v825_v62, %v827_v31 }
  0x42   : > { %v594_v34 = vsel %vm591_vm1, %v592_v28, %v593_v29  ;;  %v1048_v28 = vshrl.u32 %v3223_v27, 16 }
  0x44   : > { %674 = vmatpush.bf16.msrb.mxu2 %v2701_v36  ;;  %522 = vmatpush.bf16.msrb.mxu1 %v2685_v22  ;;  %v1019_v36 = vsel %vm993_vm2, %v1009_v2, %v1018_v33  ;;  %v2753_v22 = vld [vmem:[%s3569_s1 + $0x1a8] sm:$0xff]  ;;  %v2768_v2 = vld [vmem:[%s3569_s1 + $0x220] sm:$0xff] }
  0x45   : > { %906 = vmatpush.bf16.msrb.mxu3 %v2717_v45  ;;  %1146 = vmatpush.bf16.msrb.mxu0 %v2725_v46  ;;  %v595_v45 = vrot.slane %v2927_v5, 1  ;;  %v829_v46 = vrot.slane %v3166_v40, 1 }
  0x48   : > { %675 = vmatpush.bf16.msrb.mxu2 %v2700_v47  ;;  %523 = vmatpush.bf16.msrb.mxu1 %v2684_v48  ;;  %v1027_v47 = vor.u32 %v1026_v44, %v1023_v43  ;;  %v596_v48 = vsel %vm591_vm1, %v593_v29, %v595_v45  ;;  %v1051_v29 = vshll.u32 %v3223_v27, 16  ;;  %v2766_v43 = vld [vmem:[%s3569_s1 + $0x210] sm:$0xff]  ;;  %v1057_v44 = vshrl.u32 %v3243_v42, 16 }
  0x49   : > { %907 = vmatpush.bf16.msrb.mxu3 %v2716_v59  ;;  %1147 = vmatpush.bf16.msrb.mxu0 %v2724_v60  ;;  %v1035_v59 = vrot.slane %v1033_v57, 2  ;;  %v597_v60 = vrot.slane %v2933_v7, 1 }
  0x4b   : > { %433 = vmatmul.bf16.gmra.mxu1 %v315_v3  ;;  %448 = vmatmul.bf16.gmra.mxu2 %v339_v4  ;;  %v2751_v3 = vld [vmem:[%s3569_s1 + $0x198] sm:$0xff] }
  0x4c   : > { %1542 = vmatpush.bf16.msra.mxu2 %v2755_v49  ;;  %1310 = vmatpush.bf16.msra.mxu1 %v2739_v50  ;;  %v830_v49 = vsel %vm591_vm1, %v827_v31, %v829_v46  ;;  %v1028_v50 = vsel %vm993_vm2, %v1018_v33, %v1027_v47  ;;  %v2759_v4 = vld [vmem:[%s3569_s1 + $0x1d8] sm:$0xff]  ;;  %v1050_v31 = vrot.slane %v1048_v28, 1  ;;  %v1053_v33 = vrot.slane %v1051_v29, 2  ;;  %v2756_v29 = vld [vmem:[%s3569_s1 + $0x1c0] sm:$0xff] }
  0x4d   : > { %1782 = vmatpush.bf16.msra.mxu3 %v2763_v63  ;;  %1952 = vmatpush.bf16.msra.mxu0 %v2771_v0  ;;  %v598_v63 = vsel %vm591_vm1, %v595_v45, %v597_v60  ;;  %v832_v0 = vsel %vm591_vm1, %v829_v46, %v831_v61  ;;  %v1060_v45 = vshll.u32 %v3243_v42, 16  ;;  %v1059_v46 = vrot.slane %v1057_v44, 1 }
  0x4e   : > { %908 = vmatmul.bf16.vlgmr.msrb.gmra.mxu3 %v826_v8  ;;  %1148 = vmatmul.bf16.vlgmr.msrb.gmra.mxu0 %v1010_v9  ;;  %v3209_v8 = vld [vmem:[%s2921_s25 + $0x30] sm:$0xff] }
  0x4f   : > { %v1039_v9 = vshrl.u32 %v3209_v8, 16  ;;  %v833_v16 = vrot.slane %v3209_v8, 1 }
  0x50   : > { %1543 = vmatpush.bf16.msra.mxu2 %v2754_v23  ;;  %1311 = vmatpush.bf16.msra.mxu1 %v2738_v11  ;;  %v1042_v23 = vshll.u32 %v3209_v8, 16 }
  0x51   : > { %1783 = vmatpush.bf16.msra.mxu3 %v2762_v30  ;;  %1953 = vmatpush.bf16.msra.mxu0 %v2770_v14  ;;  %v1041_v30 = vrot.slane %v1039_v9, 1  ;;  %v599_v14 = vrot.slane %v3006_v53, 1  ;;  %v834_v21 = vsel %vm591_vm1, %v831_v61, %v833_v16 }
  0x52   : > { %v1044_v11 = vrot.slane %v1042_v23, 2 }
  0x53   : > { %v600_v20 = vsel %vm591_vm1, %v597_v60, %v599_v14  ;;  %v3270_v60 = vld [vmem:[%s2921_s25 + $0x48] sm:$0xff] }
  0x54   : > { %1544 = vmatpush.bf16.msra.mxu2 %v2753_v22  ;;  %1312 = vmatpush.bf16.msra.mxu1 %v2737_v39  ;;  %v1045_v17 = vor.u32 %v1044_v11, %v1041_v30  ;;  %v1054_v22 = vor.u32 %v1053_v33, %v1050_v31  ;;  %v2734_v39 = vld [vmem:[%s3569_s1 + $0x150] sm:$0xff]  ;;  %v839_v9 = vrot.slane %v3270_v60, 1  ;;  %v2732_v31 = vld [vmem:[%s3569_s1 + $0x140] sm:$0xff] }
  0x55   : > { %1784 = vmatpush.bf16.msra.mxu3 %v2761_v38 }
  0x56   : > { %v1055_v41 = vsel %vm993_vm2, %v1045_v17, %v1054_v22 }
  0x58   : > { %1545 = vmatpush.bf16.msra.mxu2 %v2752_v51  ;;  %1313 = vmatpush.bf16.msra.mxu1 %v2736_v55  ;;  %v2757_v55 = vld [vmem:[%s3569_s1 + $0x1c8] sm:$0xff] }
  0x59   : > { %1785 = vmatpush.bf16.msra.mxu3 %v2760_v52 }
  0x5b   : > { %524 = vmatmul.bf16.vlgmr.msrb.gmra.mxu1 %v2944_v12  ;;  %676 = vmatmul.bf16.vlgmr.msrb.gmra.mxu2 %v594_v34  ;;  %v2769_v12 = vld [vmem:[%s3569_s1 + $0x228] sm:$0xff]  ;;  %v601_v34 = vrot.slane %v2930_v6, 1 }
  0x5c   : > { %1954 = vmatpush.bf16.msra.mxu0 %v2769_v12  ;;  %1546 = vmatpush.bf16.msra.mxu2 %v2751_v3 }
  0x5d   : > { %1786 = vmatpush.bf16.msra.mxu3 %v2759_v4  ;;  %v602_v38 = vsel %vm591_vm1, %v599_v14, %v601_v34  ;;  %v605_v4 = vrot.slane %v3009_v54, 1 }
  0x5e   : > { %913 = vmatmul.bf16.gmra.mxu3 %v828_v35  ;;  %1153 = vmatmul.bf16.gmra.mxu0 %v1019_v36  ;;  %v835_v35 = vrot.slane %v3223_v27, 1  ;;  %v2758_v36 = vld [vmem:[%s3569_s1 + $0x1d0] sm:$0xff] }
  0x60   : > { %1955 = vmatpush.bf16.msra.mxu0 %v2768_v2  ;;  %v836_v12 = vsel %vm591_vm1, %v833_v16, %v835_v35 }
  0x61   : > { %1787 = vmatpush.bf16.msra.mxu3 %v2758_v36 }
  0x64   : > { %1956 = vmatpush.bf16.msra.mxu0 %v2767_v25 }
  0x65   : > { %1788 = vmatpush.bf16.msra.mxu3 %v2757_v55 }
  0x68   : > { %1957 = vmatpush.bf16.msra.mxu0 %v2766_v43 }
  0x69   : > { %1789 = vmatpush.bf16.msra.mxu3 %v2756_v29 }
  0x6b   : > { %529 = vmatmul.bf16.gmra.mxu1 %v2951_v15  ;;  %681 = vmatmul.bf16.gmra.mxu2 %v596_v48  ;;  %v1030_v15 = vshrl.u32 %v3186_v56, 16  ;;  %v837_v48 = vrot.slane %v3243_v42, 1 }
  0x6d   : > { %v1032_v58 = vrot.slane %v1030_v15, 1  ;;  %v838_v15 = vsel %vm591_vm1, %v835_v35, %v837_v48 }
  0x6e   : > { %918 = vmatmul.bf16.gmra.mxu3 %v830_v49  ;;  %1158 = vmatmul.bf16.gmra.mxu0 %v1028_v50  ;;  %v2749_v49 = vld [vmem:[%s3569_s1 + $0x188] sm:$0xff] }
  0x6f   : > { %v1036_v62 = vor.u32 %v1035_v59, %v1032_v58  ;;  %v2733_v59 = vld [vmem:[%s3569_s1 + $0x148] sm:$0xff] }
  0x71   : > { %v1037_v1 = vsel %vm993_vm2, %v1027_v47, %v1036_v62  ;;  %v1046_v24 = vsel %vm993_vm2, %v1036_v62, %v1045_v17  ;;  %v1062_v47 = vrot.slane %v1060_v45, 2  ;;  %v1066_v62 = vshrl.u32 %v3270_v60, 16 }
  0x72   : > { %v840_v17 = vsel %vm591_vm1, %v837_v48, %v839_v9  ;;  %v607_v45 = vrot.slane %v2947_v13, 1 }
  0x73   : > { %v1063_v50 = vor.u32 %v1062_v47, %v1059_v46  ;;  %v1068_v2 = vrot.slane %v1066_v62, 1 }
  0x74   : > { %v608_v55 = vsel %vm591_vm1, %v605_v4, %v607_v45 }
  0x75   : > { %v1064_v58 = vsel %vm993_vm2, %v1054_v22, %v1063_v50 }
  0x7b   : > { %534 = vmatmul.bf16.gmra.mxu1 %v2927_v5  ;;  %686 = vmatmul.bf16.gmra.mxu2 %v598_v63  ;;  %v2735_v5 = vld [vmem:[%s3569_s1 + $0x158] sm:$0xff] }
  0x7c   : > { %1314 = vmatpush.bf16.msra.mxu1 %v2735_v5  ;;  %v972_v5 = vld [vmem:[%s2921_s25 + $0x50] sm:$0x3] }
  0x7d   : > { %v991_v11 = vunpack.c.l.b16 %v972_v5 }
  0x7e   : > { %923 = vmatmul.bf16.gmra.mxu3 %v832_v0  ;;  %1163 = vmatmul.bf16.gmra.mxu0 %v1037_v1  ;;  %v2765_v0 = vld [vmem:[%s3569_s1 + $0x208] sm:$0xff] }
  0x7f   : > { %1958 = vmatpush.bf16.msra.mxu0 %v2765_v0  ;;  %v1854_v0 = vld [vmem:[%s2921_s25 + $0x10] sm:$0x8] }
  0x80   : > { %1315 = vmatpush.bf16.msra.mxu1 %v2734_v39  ;;  %v1382_v39 = vld [vmem:[%s2921_s25 + $0x10] sm:$0xc] }
  0x84   : > { %1316 = vmatpush.bf16.msra.mxu1 %v2733_v59 }
  0x88   : > { %1317 = vmatpush.bf16.msra.mxu1 %v2732_v31  ;;  %v609_v31 = vrot.slane %v2966_v26, 1 }
  0x8b   : > { %539 = vmatmul.bf16.gmra.mxu1 %v2933_v7  ;;  %691 = vmatmul.bf16.gmra.mxu2 %v600_v20  ;;  %v2750_v7 = vld [vmem:[%s3569_s1 + $0x190] sm:$0xff]  ;;  %v2748_v20 = vld [vmem:[%s3569_s1 + $0x180] sm:$0xff] }
  0x8c   : > { %1547 = vmatpush.bf16.msra.mxu2 %v2750_v7  ;;  %v3305_v7 = vpack.c.b16 %v991_v11, %v991_v11 }
  0x8e   : > { %928 = vmatmul.bf16.gmra.mxu3 %v834_v21  ;;  %1168 = vmatmul.bf16.gmra.mxu0 %v1046_v24  ;;  %v758_v21 = vld [vmem:[%s2921_s25 + $0x50] sm:$0x1]  ;;  %v1078_v35 = vshll.u32 %v3305_v7, 16 }
  0x90   : > { %1548 = vmatpush.bf16.msra.mxu2 %v2749_v49  ;;  %v1080_v44 = vrot.slane %v1078_v35, 2 }
  0x94   : > { %1549 = vmatpush.bf16.msra.mxu2 %v2748_v20 }
  0x9b   : > { %544 = vmatmul.bf16.gmra.mxu1 %v3006_v53  ;;  %696 = vmatmul.bf16.gmra.mxu2 %v602_v38  ;;  %v603_v53 = vrot.slane %v2940_v10, 1  ;;  %v2764_v38 = vld [vmem:[%s3569_s1 + $0x200] sm:$0xff] }
  0x9c   : > { %1959 = vmatpush.bf16.msra.mxu0 %v2764_v38 }
  0x9d   : > { %v604_v52 = vsel %vm591_vm1, %v601_v34, %v603_v53  ;;  %v606_v16 = vsel %vm591_vm1, %v603_v53, %v605_v4  ;;  %v1075_v34 = vshrl.u32 %v3305_v7, 16  ;;  %v1437_v53 = vunpack.c.l.b16 %v1382_v39 }
  0x9e   : > { %933 = vmatmul.bf16.gmra.mxu3 %v836_v12  ;;  %1173 = vmatmul.bf16.gmra.mxu0 %v1055_v41  ;;  %v1383_v12 = vld [vmem:[%s2921_s25 + $0x14] sm:$0xf] }
  0x9f   : > { %v1077_v43 = vrot.slane %v1075_v34, 1  ;;  %v1438_v48 = vunpack.c.l.b16 %v1383_v12 }
  0xa1   : > { %v3335_v59 = vpack.c.b16 %v1438_v48, %v1437_v53  ;;  %v1212_v53 = vld [vmem:[%s2921_s25 + $0x8] sm:$0xc] }
  0xa8   : > { %v3255_v51 = vpop.f32.mrf.mxu1 }
  0xab   : > { %549 = vmatmul.bf16.gmra.mxu1 %v2930_v6  ;;  %701 = vmatmul.bf16.gmra.mxu2 %v604_v52  ;;  %v3263_v57 = vpop.f32.mrf.mxu0  ;;  %v1069_v6 = vshll.u32 %v3270_v60, 16 }
  0xad   : > { %v1071_v3 = vrot.slane %v1069_v6, 2 }
  0xae   : > { %938 = vmatmul.bf16.gmra.mxu3 %v838_v15  ;;  %v3272_v61 = vpop.f32.mrf.mxu2  ;;  %1178 = vmatmul.bf16.gmra.mxu0 %v1064_v58  ;;  %v3333_v58 = vld [vmem:[%s2921_s25 + $0x18] sm:$0xff] }
  0xaf   : > { %v1072_v30 = vor.u32 %v1071_v3, %v1068_v2  ;;  %v1637_v2 = vshrl.u32 %v3335_v59, 16  ;;  %v1640_v3 = vshll.u32 %v3335_v59, 16  ;;  %v1645_v4 = vshrl.u32 %v3333_v58, 16 }
  0xb0   : > { %v3276_v63 = vpop.f32.mrf.mxu1  ;;  %v1648_v5 = vshll.u32 %v3333_v58, 16  ;;  %v1877_v39 = vrot.slane %v3333_v58, 3 }
  0xb1   : > { %v3297_v24 = vpop.f32.mrf.mxu3  ;;  %v1073_v28 = vsel %vm993_vm2, %v1063_v50, %v1072_v30  ;;  %v1081_v50 = vor.u32 %v1080_v44, %v1077_v43  ;;  %v1642_v20 = vrot.slane %v1640_v3, 3  ;;  %v610_v43 = vsel %vm591_vm1, %v607_v45, %v609_v31 }
  0xb2   : > { %v1467_v31 = vrot.slane %v3333_v58, 2 }
  0xb3   : > { %v3281_v1 = vpop.f32.mrf.mxu0  ;;  %v1082_v6 = vsel %vm993_vm2, %v1072_v30, %v1081_v50  ;;  %v1647_v30 = vrot.slane %v1645_v4, 2 }
  0xb6   : > { %v3286_v23 = vpop.f32.mrf.mxu2 }
  0xb8   : > { %v3288_v14 = vpop.f32.mrf.mxu1 }
  0xb9   : > { %v3324_v46 = vpop.f32.mrf.mxu3 }
  0xbb   : > { %554 = vmatmul.bf16.gmra.mxu1 %v2940_v10  ;;  %706 = vmatmul.bf16.gmra.mxu2 %v606_v16  ;;  %v3299_v25 = vpop.f32.mrf.mxu0  ;;  %v813_v10 = vunpack.c.l.b16 %v758_v21  ;;  %v1873_v16 = vunpack.c.l.b16 %v1854_v0  ;;  %v1650_v21 = vrot.slane %v1648_v5, 3 }
  0xbd   : > { %v823_v22 = vpack.c.b16 %v813_v10, %v813_v10  ;;  %v1874_v29 = vpack.c.b16 %v1438_v48, %v1873_v16  ;;  %v1651_v34 = vor.u32 %v1650_v21, %v1647_v30  ;;  %v3357_v48 = vld [vmem:[%s2921_s25 + $0x20] sm:$0xff]  ;;  %v1235_v21 = vrot.slane %v3083_v37, 2 }
  0xbe   : > { %943 = vmatmul.bf16.gmra.mxu3 %v840_v17  ;;  %v3310_v33 = vpop.f32.mrf.mxu2  ;;  %1183 = vmatmul.bf16.gmra.mxu0 %v1073_v28  ;;  %v1639_v17 = vrot.slane %v1637_v2, 2  ;;  %v1657_v45 = vshll.u32 %v3357_v48, 16 }
  0xbf   : > { %v841_v47 = vrot.slane %v823_v22, 1  ;;  %v1876_v38 = vrot.slane %v1874_v29, 3  ;;  %v1466_v29 = vrot.slane %v3335_v59, 2  ;;  %v3377_v59 = vld [vmem:[%s2921_s25 + $0x28] sm:$0xff] }
  0xc0   : > { %v3314_v36 = vpop.f32.mrf.mxu1  ;;  %v1643_v10 = vor.u32 %v1642_v20, %v1639_v17  ;;  %v1659_v16 = vrot.slane %v1657_v45, 3 }
  0xc1   : > { %v842_v15 = vsel %vm591_vm1, %v839_v9, %v841_v47  ;;  %v1878_v50 = vsel %vm1875_vm4, %v1876_v38, %v1877_v39 }
  0xc2   : > { %v1652_v47 = vsel %vm1635_vm3, %v1643_v10, %v1651_v34 }
  0xc3   : > { %v3321_v41 = vpop.f32.mrf.mxu0 }
  0xc6   : > { %v3326_v49 = vpop.f32.mrf.mxu2 }
  0xc8   : > { %v3328_v52 = vpop.f32.mrf.mxu1 }
  0xcb   : > { %559 = vmatmul.bf16.gmra.mxu1 %v3009_v54  ;;  %711 = vmatmul.bf16.gmra.mxu2 %v608_v55  ;;  %v1149_v62 = vpop.f32.mrf.mxu0  ;;  %v1231_v55 = vunpack.c.l.b16 %v1212_v53 }
  0xcd   : > { %v1232_v3 = vpack.c.b16 %v796_v32, %v1231_v55  ;;  %v1666_v55 = vshll.u32 %v3377_v59, 16 }
  0xce   : > { %948 = vmatmul.bf16.gmra.mxu3 %v842_v15  ;;  %v3344_v9 = vpop.f32.mrf.mxu2  ;;  %1188 = vmatmul.bf16.gmra.mxu0 %v1082_v6  ;;  %v1654_v15 = vshrl.u32 %v3357_v48, 16 }
  0xcf   : > { %v1234_v30 = vrot.slane %v1232_v3, 2 }
  0xd0   : > { %v3346_v54 = vpop.f32.mrf.mxu1  ;;  %v1656_v5 = vrot.slane %v1654_v15, 2 }
  0xd1   : > { %v909_v11 = vpop.f32.mrf.mxu3 }
  0xd2   : > { %v1660_v10 = vor.u32 %v1659_v16, %v1656_v5 }
  0xd3   : > { %v1151_v28 = vpop.f32.mrf.mxu0 }
  0xd4   : > { %v1661_v37 = vsel %vm1635_vm3, %v1651_v34, %v1660_v10 }
  0xd6   : > { %v3349_v35 = vpop.f32.mrf.mxu2 }
  0xd8   : > { %v525_v12 = vpop.f32.mrf.mxu1 }
  0xd9   : > { %v911_v22 = vpop.f32.mrf.mxu3  ;;  %v526_v44 = vadd.f32 %v525_v12, %v3263_v57  ;;  %v1236_v12 = vsel %vm1233_vm5, %v1234_v30, %v1235_v21 }
  0xdb   : > { %564 = vmatmul.bf16.gmra.mxu1 %v2947_v13  ;;  %716 = vmatmul.bf16.gmra.mxu2 %v610_v43  ;;  %v1154_v26 = vpop.f32.mrf.mxu0 }
  0xde   : > { %1790 = vmatmul.bf16.vlgmr.msra.gmra.mxu3 %v1652_v47  ;;  %v677_v6 = vpop.f32.mrf.mxu2  ;;  %1960 = vmatmul.bf16.vlgmr.msra.gmra.mxu0 %v1878_v50  ;;  %v1663_v50 = vshrl.u32 %v3377_v59, 16 }
  0xdf   : > { %v722_v57 = vadd.f32 %v677_v6, %v526_v44 }
  0xe0   : > { %v527_v2 = vpop.f32.mrf.mxu1 }
  0xe1   : > { %v914_v0 = vpop.f32.mrf.mxu3  ;;  %v954_v4 = vadd.f32 %v909_v11, %v722_v57  ;;  %v528_v13 = vadd.f32 %v527_v2, %v3281_v1  ;;  %v1879_v1 = vrot.slane %v3357_v48, 3  ;;  %v1665_v57 = vrot.slane %v1663_v50, 2 }
  0xe2   : > { %v1668_v2 = vrot.slane %v1666_v55, 3 }
  0xe3   : > { %v1156_v17 = vpop.f32.mrf.mxu0  ;;  %v3366_v20 = vadd.f32 %v1149_v62, %v954_v4  ;;  %v1468_v62 = vsel %vm1233_vm5, %v1466_v29, %v1467_v31  ;;  %v1880_v47 = vsel %vm1875_vm4, %v1877_v39, %v1879_v1  ;;  %v1469_v4 = vrot.slane %v3357_v48, 2 }
  0xe4   : > { %v1881_v29 = vrot.slane %v3377_v59, 3 }
  0xe6   : > { %v679_v19 = vpop.f32.mrf.mxu2  ;;  %v1882_v48 = vsel %vm1875_vm4, %v1879_v1, %v1881_v29 }
  0xe7   : > { %v723_v32 = vadd.f32 %v679_v19, %v528_v13  ;;  %v1669_v13 = vor.u32 %v1668_v2, %v1665_v57 }
  0xe8   : > { %v530_v38 = vpop.f32.mrf.mxu1 }
  0xe9   : > { %v916_v11 = vpop.f32.mrf.mxu3  ;;  %v955_v43 = vadd.f32 %v911_v22, %v723_v32  ;;  %v531_v44 = vadd.f32 %v530_v38, %v3299_v25  ;;  %v1670_v38 = vsel %vm1635_vm3, %v1660_v10, %v1669_v13 }
  0xeb   : > { %1318 = vmatmul.bf16.vlgmr.msra.gmra.mxu1 %v1236_v12  ;;  %1550 = vmatmul.bf16.vlgmr.msra.gmra.mxu2 %v1468_v62  ;;  %v1159_v58 = vpop.f32.mrf.mxu0  ;;  %v3380_v53 = vadd.f32 %v1151_v28, %v955_v43  ;;  %v1237_v28 = vrot.slane %v3143_v18, 2 }
  0xee   : > { %1795 = vmatmul.bf16.gmra.mxu3 %v1661_v37  ;;  %v682_v15 = vpop.f32.mrf.mxu2  ;;  %1965 = vmatmul.bf16.gmra.mxu0 %v1880_v47 }
  0xef   : > { %v724_v22 = vadd.f32 %v682_v15, %v531_v44 }
  0xf0   : > { %v532_v45 = vpop.f32.mrf.mxu1 }
  0xf1   : > { %v919_v25 = vpop.f32.mrf.mxu3  ;;  %v956_v34 = vadd.f32 %v914_v0, %v724_v22  ;;  %v533_v6 = vadd.f32 %v532_v45, %v3321_v41  ;;  %v1238_v0 = vsel %vm1233_vm5, %v1235_v21, %v1237_v28  ;;  %v1470_v41 = vsel %vm1233_vm5, %v1467_v31, %v1469_v4 }
  0xf3   : > { %v1161_v3 = vpop.f32.mrf.mxu0  ;;  %v3385_v39 = vadd.f32 %v1154_v26, %v956_v34  ;;  %v3394_v26 = vld [vmem:[%s2921_s25 + $0x30] sm:$0xff] }
  0xf4   : > { %v1672_v43 = vshrl.u32 %v3394_v26, 16  ;;  %v1675_v21 = vshll.u32 %v3394_v26, 16  ;;  %v1883_v57 = vrot.slane %v3394_v26, 3 }
  0xf6   : > { %v684_v5 = vpop.f32.mrf.mxu2  ;;  %v1674_v47 = vrot.slane %v1672_v43, 2  ;;  %v1677_v50 = vrot.slane %v1675_v21, 3 }
  0xf7   : > { %v725_v16 = vadd.f32 %v684_v5, %v533_v6 }
  0xf8   : > { %v535_v19 = vpop.f32.mrf.mxu1  ;;  %v1678_v22 = vor.u32 %v1677_v50, %v1674_v47 }
  0xf9   : > { %v921_v30 = vpop.f32.mrf.mxu3  ;;  %v957_v32 = vadd.f32 %v916_v11, %v725_v16  ;;  %v536_v62 = vadd.f32 %v535_v19, %v3255_v51  ;;  %v1471_v51 = vrot.slane %v3377_v59, 2  ;;  %v3412_v19 = vld [vmem:[%s2921_s25 + $0x38] sm:$0xff] }
  0xfa   : > { %v1885_v47 = vrot.slane %v3412_v19, 3 }
  0xfb   : > { %1323 = vmatmul.bf16.gmra.mxu1 %v1238_v0  ;;  %1555 = vmatmul.bf16.gmra.mxu2 %v1470_v41  ;;  %v1164_v18 = vpop.f32.mrf.mxu0  ;;  %v3397_v12 = vadd.f32 %v1156_v17, %v957_v32  ;;  %v1239_v17 = vrot.slane %v3166_v40, 2  ;;  %v1472_v5 = vsel %vm1233_vm5, %v1469_v4, %v1471_v51  ;;  %v1681_v41 = vshrl.u32 %v3412_v19, 16 }
  0xfe   : > { %1800 = vmatmul.bf16.gmra.mxu3 %v1670_v38  ;;  %v687_v31 = vpop.f32.mrf.mxu2  ;;  %1970 = vmatmul.bf16.gmra.mxu0 %v1882_v48  ;;  %v1683_v48 = vrot.slane %v1681_v41, 2 }
  0xff   : > { %v726_v11 = vadd.f32 %v687_v31, %v536_v62 }
 0x100   : > { %v537_v44 = vpop.f32.mrf.mxu1 }
 0x101   : > { %v924_v10 = vpop.f32.mrf.mxu3  ;;  %v958_v37 = vadd.f32 %v919_v25, %v726_v11  ;;  %v538_v15 = vadd.f32 %v537_v44, %v3276_v63  ;;  %v1240_v25 = vsel %vm1233_vm5, %v1237_v28, %v1239_v17  ;;  %v1884_v63 = vsel %vm1875_vm4, %v1881_v29, %v1883_v57 }
 0x102   : > { %v1684_v28 = vshll.u32 %v3412_v19, 16 }
 0x103   : > { %v1166_v55 = vpop.f32.mrf.mxu0  ;;  %v3402_v1 = vadd.f32 %v1159_v58, %v958_v37  ;;  %v1679_v58 = vsel %vm1635_vm3, %v1669_v13, %v1678_v22 }
 0x104   : > { %v1686_v62 = vrot.slane %v1684_v28, 3 }
 0x106   : > { %v689_v45 = vpop.f32.mrf.mxu2  ;;  %v1687_v31 = vor.u32 %v1686_v62, %v1683_v48 }
 0x107   : > { %v727_v34 = vadd.f32 %v689_v45, %v538_v15 }
 0x108   : > { %v540_v2 = vpop.f32.mrf.mxu1 }
 0x109   : > { %v926_v6 = vpop.f32.mrf.mxu3  ;;  %v959_v16 = vadd.f32 %v921_v30, %v727_v34  ;;  %v541_v0 = vadd.f32 %v540_v2, %v3288_v14  ;;  %v1473_v14 = vrot.slane %v3394_v26, 2  ;;  %v3430_v34 = vld [vmem:[%s2921_s25 + $0x40] sm:$0xff] }
 0x10b   : > { %1328 = vmatmul.bf16.gmra.mxu1 %v1240_v25  ;;  %1560 = vmatmul.bf16.gmra.mxu2 %v1472_v5  ;;  %v1169_v40 = vpop.f32.mrf.mxu0  ;;  %v3415_v59 = vadd.f32 %v1161_v3, %v959_v16  ;;  %v1241_v3 = vrot.slane %v3186_v56, 2  ;;  %v1474_v15 = vsel %vm1233_vm5, %v1471_v51, %v1473_v14  ;;  %v1690_v25 = vshrl.u32 %v3430_v34, 16 }
 0x10e   : > { %1805 = vmatmul.bf16.gmra.mxu3 %v1679_v58  ;;  %v692_v4 = vpop.f32.mrf.mxu2  ;;  %1975 = vmatmul.bf16.gmra.mxu0 %v1884_v63  ;;  %v1692_v58 = vrot.slane %v1690_v25, 2 }
 0x10f   : > { %v728_v30 = vadd.f32 %v692_v4, %v541_v0 }
 0x110   : > { %v542_v32 = vpop.f32.mrf.mxu1 }
 0x111   : > { %v929_v13 = vpop.f32.mrf.mxu3  ;;  %v960_v38 = vadd.f32 %v924_v10, %v728_v30  ;;  %v543_v21 = vadd.f32 %v542_v32, %v3314_v36  ;;  %v1242_v10 = vsel %vm1233_vm5, %v1239_v17, %v1241_v3  ;;  %v1886_v36 = vsel %vm1875_vm4, %v1883_v57, %v1885_v47 }
 0x112   : > { %v1693_v17 = vshll.u32 %v3430_v34, 16 }
 0x113   : > { %v1171_v43 = vpop.f32.mrf.mxu0  ;;  %v3420_v29 = vadd.f32 %v1164_v18, %v960_v38  ;;  %v1688_v18 = vsel %vm1635_vm3, %v1678_v22, %v1687_v31  ;;  %v1887_v38 = vrot.slane %v3430_v34, 3 }
 0x114   : > { %v1695_v63 = vrot.slane %v1693_v17, 3 }
 0x116   : > { %v694_v11 = vpop.f32.mrf.mxu2  ;;  %v1696_v28 = vor.u32 %v1695_v63, %v1692_v58 }
 0x117   : > { %v729_v44 = vadd.f32 %v694_v11, %v543_v21  ;;  %v3448_v11 = vld [vmem:[%s2921_s25 + $0x48] sm:$0xff] }
 0x118   : > { %v545_v50 = vpop.f32.mrf.mxu1 }
 0x119   : > { %v931_v37 = vpop.f32.mrf.mxu3  ;;  %v961_v45 = vadd.f32 %v926_v6, %v729_v44  ;;  %v546_v2 = vadd.f32 %v545_v50, %v3328_v52  ;;  %v1475_v52 = vrot.slane %v3412_v19, 2  ;;  %v1699_v50 = vshrl.u32 %v3448_v11, 16 }
 0x11b   : > { %1333 = vmatmul.bf16.gmra.mxu1 %v1242_v10  ;;  %1565 = vmatmul.bf16.gmra.mxu2 %v1474_v15  ;;  %v1174_v56 = vpop.f32.mrf.mxu0  ;;  %v3433_v26 = vadd.f32 %v1166_v55, %v961_v45  ;;  %v1243_v55 = vrot.slane %v3209_v8, 2  ;;  %v1476_v62 = vsel %vm1233_vm5, %v1473_v14, %v1475_v52  ;;  %v1701_v45 = vrot.slane %v1699_v50, 2 }
 0x11e   : > { %1810 = vmatmul.bf16.gmra.mxu3 %v1688_v18  ;;  %v697_v51 = vpop.f32.mrf.mxu2  ;;  %1980 = vmatmul.bf16.gmra.mxu0 %v1886_v36 }
 0x11f   : > { %v730_v6 = vadd.f32 %v697_v51, %v546_v2 }
 0x120   : > { %v547_v5 = vpop.f32.mrf.mxu1 }
 0x121   : > { %v934_v22 = vpop.f32.mrf.mxu3  ;;  %v962_v16 = vadd.f32 %v929_v13, %v730_v6  ;;  %v548_v41 = vadd.f32 %v547_v5, %v3346_v54  ;;  %v1244_v13 = vsel %vm1233_vm5, %v1241_v3, %v1243_v55  ;;  %v1888_v54 = vsel %vm1875_vm4, %v1885_v47, %v1887_v38 }
 0x122   : > { %v1702_v3 = vshll.u32 %v3448_v11, 16  ;;  %v1889_v5 = vrot.slane %v3448_v11, 3 }
 0x123   : > { %v1176_v0 = vpop.f32.mrf.mxu0  ;;  %v3438_v57 = vadd.f32 %v1169_v40, %v962_v16  ;;  %v1697_v40 = vsel %vm1635_vm3, %v1687_v31, %v1696_v28 }
 0x124   : > { %v1704_v18 = vrot.slane %v1702_v3, 3 }
 0x126   : > { %v699_v4 = vpop.f32.mrf.mxu2  ;;  %v1705_v25 = vor.u32 %v1704_v18, %v1701_v45 }
 0x127   : > { %v731_v30 = vadd.f32 %v699_v4, %v548_v41  ;;  %v3466_v41 = vld [vmem:[%s2921_s25 + $0x50] sm:$0xff] }
 0x128   : > { %v550_v48 = vpop.f32.mrf.mxu1 }
 0x129   : > { %v936_v32 = vpop.f32.mrf.mxu3  ;;  %v963_v21 = vadd.f32 %v931_v37, %v731_v30  ;;  %v551_v44 = vadd.f32 %v550_v48, %v3272_v61  ;;  %v1477_v61 = vrot.slane %v3430_v34, 2 }
 0x12b   : > { %1338 = vmatmul.bf16.gmra.mxu1 %v1244_v13  ;;  %1570 = vmatmul.bf16.gmra.mxu2 %v1476_v62  ;;  %v1179_v8 = vpop.f32.mrf.mxu0  ;;  %v3451_v19 = vadd.f32 %v1171_v43, %v963_v21  ;;  %v1245_v43 = vrot.slane %v3223_v27, 2  ;;  %v1478_v58 = vsel %vm1233_vm5, %v1475_v52, %v1477_v61  ;;  %v1711_v52 = vshll.u32 %v3466_v41, 16 }
 0x12d   : > { %v1713_v21 = vrot.slane %v1711_v52, 3 }
 0x12e   : > { %1815 = vmatmul.bf16.gmra.mxu3 %v1697_v40  ;;  %v702_v14 = vpop.f32.mrf.mxu2  ;;  %1985 = vmatmul.bf16.gmra.mxu0 %v1888_v54  ;;  %v1614_v40 = vld [vmem:[%s2921_s25 + $0x58] sm:$0x7] }
 0x12f   : > { %v732_v37 = vadd.f32 %v702_v14, %v551_v44  ;;  %v1633_v3 = vunpack.c.l.b16 %v1614_v40  ;;  %v1400_v40 = vld [vmem:[%s2921_s25 + $0x58] sm:$0x3] }
 0x130   : > { %v552_v10 = vpop.f32.mrf.mxu1 }
 0x131   : > { %v939_v31 = vpop.f32.mrf.mxu3  ;;  %v964_v15 = vadd.f32 %v934_v22, %v732_v37  ;;  %v553_v2 = vadd.f32 %v552_v10, %v3286_v23  ;;  %v1246_v22 = vsel %vm1233_vm5, %v1243_v55, %v1245_v43  ;;  %v1890_v23 = vsel %vm1875_vm4, %v1887_v38, %v1889_v5 }
 0x132   : > { %v1708_v55 = vshrl.u32 %v3466_v41, 16 }
 0x133   : > { %v1181_v36 = vpop.f32.mrf.mxu0  ;;  %v3456_v47 = vadd.f32 %v1174_v56, %v964_v15  ;;  %v1706_v56 = vsel %vm1635_vm3, %v1696_v28, %v1705_v25  ;;  %v1891_v15 = vrot.slane %v3466_v41, 3 }
 0x134   : > { %v1710_v62 = vrot.slane %v1708_v55, 2 }
 0x136   : > { %v704_v17 = vpop.f32.mrf.mxu2  ;;  %v1714_v50 = vor.u32 %v1713_v21, %v1710_v62 }
 0x137   : > { %v733_v51 = vadd.f32 %v704_v17, %v553_v2 }
 0x138   : > { %v555_v16 = vpop.f32.mrf.mxu1  ;;  %v1715_v2 = vsel %vm1635_vm3, %v1705_v25, %v1714_v50 }
 0x139   : > { %v941_v6 = vpop.f32.mrf.mxu3  ;;  %v965_v63 = vadd.f32 %v936_v32, %v733_v51  ;;  %v556_v4 = vadd.f32 %v555_v16, %v3310_v33  ;;  %v1479_v33 = vrot.slane %v3448_v11, 2 }
 0x13b   : > { %1343 = vmatmul.bf16.gmra.mxu1 %v1246_v22  ;;  %1575 = vmatmul.bf16.gmra.mxu2 %v1478_v58  ;;  %v1184_v27 = vpop.f32.mrf.mxu0  ;;  %v3469_v34 = vadd.f32 %v1176_v0, %v965_v63  ;;  %v1247_v0 = vrot.slane %v3243_v42, 2  ;;  %v1480_v18 = vsel %vm1233_vm5, %v1477_v61, %v1479_v33  ;;  %v1634_v42 = vpack.c.b16 %v1633_v3, %v1633_v3 }
 0x13d   : > { %v1248_v45 = vsel %vm1233_vm5, %v1245_v43, %v1247_v0  ;;  %v1717_v16 = vshrl.u32 %v1634_v42, 16  ;;  %v1720_v22 = vshll.u32 %v1634_v42, 16 }
 0x13e   : > { %1820 = vmatmul.bf16.gmra.mxu3 %v1706_v56  ;;  %v707_v30 = vpop.f32.mrf.mxu2  ;;  %1990 = vmatmul.bf16.gmra.mxu0 %v1890_v23 }
 0x13f   : > { %v734_v28 = vadd.f32 %v707_v30, %v556_v4  ;;  %v1719_v25 = vrot.slane %v1717_v16, 2  ;;  %v1722_v56 = vrot.slane %v1720_v22, 3 }
 0x140   : > { %v557_v48 = vpop.f32.mrf.mxu1 }
 0x141   : > { %v944_v32 = vpop.f32.mrf.mxu3  ;;  %v966_v13 = vadd.f32 %v939_v31, %v734_v28  ;;  %v558_v44 = vadd.f32 %v557_v48, %v3326_v49  ;;  %v1892_v49 = vsel %vm1875_vm4, %v1889_v5, %v1891_v15  ;;  %v1481_v5 = vrot.slane %v3466_v41, 2 }
 0x142   : > { %v1723_v55 = vor.u32 %v1722_v56, %v1719_v25  ;;  %v1893_v48 = vrot.slane %v1634_v42, 3 }
 0x143   : > { %v1186_v54 = vpop.f32.mrf.mxu0  ;;  %v3475_v38 = vadd.f32 %v1179_v8, %v966_v13  ;;  %v1482_v62 = vsel %vm1233_vm5, %v1479_v33, %v1481_v5 }
 0x144   : > { %v1894_v41 = vsel %vm1875_vm4, %v1891_v15, %v1893_v48 }
 0x146   : > { %v709_v14 = vpop.f32.mrf.mxu2 }
 0x147   : > { %v735_v37 = vadd.f32 %v709_v14, %v558_v44  ;;  %v1455_v44 = vunpack.c.l.b16 %v1400_v40 }
 0x148   : > { %v560_v31 = vpop.f32.mrf.mxu1 }
 0x149   : > { %v946_v10 = vpop.f32.mrf.mxu3  ;;  %v967_v8 = vadd.f32 %v941_v6, %v735_v37  ;;  %v561_v51 = vadd.f32 %v560_v31, %v3344_v9 }
 0x14b   : > { %1348 = vmatmul.bf16.gmra.mxu1 %v1248_v45  ;;  %1580 = vmatmul.bf16.gmra.mxu2 %v1480_v18  ;;  %v1189_v11 = vpop.f32.mrf.mxu0  ;;  %v3485_v17 = vadd.f32 %v1181_v36, %v967_v8  ;;  %v1249_v36 = vrot.slane %v3270_v60, 2  ;;  %v1251_v18 = vrot.slane %v3305_v7, 2 }
 0x14e   : > { %1825 = vmatmul.bf16.gmra.mxu3 %v1715_v2  ;;  %v712_v58 = vpop.f32.mrf.mxu2  ;;  %1995 = vmatmul.bf16.gmra.mxu0 %v1892_v49 }
 0x14f   : > { %v736_v43 = vadd.f32 %v712_v58, %v561_v51 }
 0x150   : > { %v562_v6 = vpop.f32.mrf.mxu1 }
 0x151   : > { %v949_v61 = vpop.f32.mrf.mxu3  ;;  %v968_v63 = vadd.f32 %v944_v32, %v736_v43  ;;  %v563_v9 = vadd.f32 %v562_v6, %v3349_v35  ;;  %v1250_v32 = vsel %vm1233_vm5, %v1247_v0, %v1249_v36 }
 0x153   : > { %v1191_v23 = vpop.f32.mrf.mxu0  ;;  %v3488_v4 = vadd.f32 %v1184_v27, %v968_v63  ;;  %v1724_v27 = vsel %vm1635_vm3, %v1714_v50, %v1723_v55 }
 0x156   : > { %v714_v52 = vpop.f32.mrf.mxu2 }
 0x157   : > { %v737_v30 = vadd.f32 %v714_v52, %v563_v9 }
 0x158   : > { %v565_v13 = vpop.f32.mrf.mxu1 }
 0x159   : > { %v951_v28 = vpop.f32.mrf.mxu3  ;;  %v969_v21 = vadd.f32 %v946_v10, %v737_v30  ;;  %v566_v3 = vadd.f32 %v565_v13, %v3297_v24  ;;  %v1465_v10 = vpack.c.b16 %v1455_v44, %v1455_v44  ;;  %v1252_v24 = vsel %vm1233_vm5, %v1249_v36, %v1251_v18 }
 0x15b   : > { %1353 = vmatmul.bf16.gmra.mxu1 %v1250_v32  ;;  %1585 = vmatmul.bf16.gmra.mxu2 %v1482_v62  ;;  %v1961_v60 = vpop.f32.mrf.mxu0  ;;  %v3498_v35 = vadd.f32 %v1186_v54, %v969_v21  ;;  %v1483_v8 = vrot.slane %v1465_v10, 2 }
 0x15d   : > { %v1484_v51 = vsel %vm1233_vm5, %v1481_v5, %v1483_v8  ;;  %v3514_v5 = vld [vmem:[%s3570_s2] ss:$0 sm:$0xff] }
 0x15e   : > { %1830 = vmatmul.bf16.gmra.mxu3 %v1724_v27  ;;  %v717_v14 = vpop.f32.mrf.mxu2  ;;  %2000 = vmatmul.bf16.gmra.mxu0 %v1894_v41 }
 0x15f   : > { %v738_v0 = vadd.f32 %v717_v14, %v566_v3 }
 0x160   : > { %v567_v33 = vpop.f32.mrf.mxu1 }
 0x161   : > { %v1791_v37 = vpop.f32.mrf.mxu3  ;;  %v970_v31 = vadd.f32 %v949_v61, %v738_v0  ;;  %v568_v54 = vadd.f32 %v567_v33, %v3324_v46 }
 0x163   : > { %v1963_v50 = vpop.f32.mrf.mxu0  ;;  %v3501_v45 = vadd.f32 %v1189_v11, %v970_v31 }
 0x166   : > { %v719_v15 = vpop.f32.mrf.mxu2 }
 0x167   : > { %v739_v2 = vadd.f32 %v719_v15, %v568_v54 }
 0x168   : > { %v1319_v49 = vpop.f32.mrf.mxu1 }
 0x169   : > { %v1793_v42 = vpop.f32.mrf.mxu3  ;;  %v971_v16 = vadd.f32 %v951_v28, %v739_v2  ;;  %v1364_v11 = vadd.f32 %v1319_v49, %v3366_v20 }
 0x16b   : > { %1358 = vmatmul.bf16.gmra.mxu1 %v1252_v24  ;;  %1590 = vmatmul.bf16.gmra.mxu2 %v1484_v51  ;;  %v1966_v22 = vpop.f32.mrf.mxu0  ;;  %v3507_v58 = vadd.f32 %v1191_v23, %v971_v16 }
 0x16e   : > { %v1551_v7 = vpop.f32.mrf.mxu2 }
 0x16f   : > { %v1596_v43 = vadd.f32 %v1551_v7, %v1364_v11 }
 0x170   : > { %v1321_v61 = vpop.f32.mrf.mxu1 }
 0x171   : > { %v1796_v46 = vpop.f32.mrf.mxu3  ;;  %v1836_v6 = vadd.f32 %v1791_v37, %v1596_v43  ;;  %v1365_v25 = vadd.f32 %v1321_v61, %v3380_v53 }
 0x173   : > { %v1968_v63 = vpop.f32.mrf.mxu0  ;;  %v2006_v36 = vadd.f32 %v1961_v60, %v1836_v6 }
 0x175   : > { %v2028_v52 = vadd.f32 %v3514_v5, %v2006_v36 }
 0x176   : > { %v1553_v56 = vpop.f32.mrf.mxu2 }
 0x177   : > { %v1597_v23 = vadd.f32 %v1553_v56, %v1365_v25  ;;  %v2046_v32 = vmax.f32 %v2028_v52, 0.0 }
 0x178   : > { %v1324_v55 = vpop.f32.mrf.mxu1 }
 0x179   : > { %v1798_v9 = vpop.f32.mrf.mxu3  ;;  %v1837_v20 = vadd.f32 %v1793_v42, %v1597_v23  ;;  %v1366_v53 = vadd.f32 %v1324_v55, %v3385_v39 }
 0x17b   : > { %v2007_v30 = vadd.f32 %v1963_v50, %v1837_v20  ;;  %v1971_v28 = vpop.f32.mrf.mxu0 }
 0x17d   : > { %v2029_v48 = vadd.f32 %v3514_v5, %v2007_v30 }
 0x17e   : > { %v1556_v13 = vpop.f32.mrf.mxu2 }
 0x17f   : > { %v2047_v62 = vmax.f32 %v2029_v48, 0.0  ;;  %v1598_v21 = vadd.f32 %v1556_v13, %v1366_v53 }
 0x180   : > { %v1326_v40 = vpop.f32.mrf.mxu1 }
 0x181   : > { %v1801_v27 = vpop.f32.mrf.mxu3  ;;  %v2779_v60 = vpack.c.bf16 %v2047_v62, %v2046_v32  ;;  %v1838_v41 = vadd.f32 %v1796_v46, %v1598_v21  ;;  %v1367_v3 = vadd.f32 %v1326_v40, %v3397_v12 }
 0x183   : > { %2780 = vst [vmem:[%s3523_s21] sm:$0xff] %v2779_v60   ;;  %v1973_v44 = vpop.f32.mrf.mxu0  ;;  %v2008_v39 = vadd.f32 %v1966_v22, %v1838_v41 }
 0x185   : > { %v2030_v31 = vadd.f32 %v3514_v5, %v2008_v39 }
 0x186   : > { %v1558_v14 = vpop.f32.mrf.mxu2 }
 0x187   : > { %v1599_v0 = vadd.f32 %v1558_v14, %v1367_v3  ;;  %v2048_v2 = vmax.f32 %v2030_v31, 0.0 }
 0x188   : > { %v1329_v33 = vpop.f32.mrf.mxu1 }
 0x189   : > { %v1803_v37 = vpop.f32.mrf.mxu3  ;;  %v1839_v10 = vadd.f32 %v1798_v9, %v1599_v0  ;;  %v1368_v54 = vadd.f32 %v1329_v33, %v3402_v1 }
 0x18b   : > { %v2009_v50 = vadd.f32 %v1968_v63, %v1839_v10  ;;  %v1976_v18 = vpop.f32.mrf.mxu0 }
 0x18d   : > { %v2031_v8 = vadd.f32 %v3514_v5, %v2009_v50 }
 0x18e   : > { %v1561_v15 = vpop.f32.mrf.mxu2 }
 0x18f   : > { %v2049_v42 = vmax.f32 %v2031_v8, 0.0  ;;  %v1600_v49 = vadd.f32 %v1561_v15, %v1368_v54 }
 0x190   : > { %v1331_v24 = vpop.f32.mrf.mxu1 }
 0x191   : > { %v1806_v12 = vpop.f32.mrf.mxu3  ;;  %v2784_v51 = vpack.c.bf16 %v2049_v42, %v2048_v2  ;;  %v1840_v16 = vadd.f32 %v1801_v27, %v1600_v49  ;;  %v1369_v22 = vadd.f32 %v1331_v24, %v3415_v59 }
 0x193   : > { %2824 = vst [vmem:[%s3523_s21 + $0x8] sm:$0xff] %v2784_v51   ;;  %v1978_v7 = vpop.f32.mrf.mxu0  ;;  %v2010_v43 = vadd.f32 %v1971_v28, %v1840_v16 }
 0x195   : > { %v2032_v1 = vadd.f32 %v3514_v5, %v2010_v43 }
 0x196   : > { %v1563_v11 = vpop.f32.mrf.mxu2 }
 0x197   : > { %v1601_v46 = vadd.f32 %v1563_v11, %v1369_v22  ;;  %v2050_v9 = vmax.f32 %v2032_v1, 0.0 }
 0x198   : > { %v1334_v6 = vpop.f32.mrf.mxu1 }
 0x199   : > { %v1808_v61 = vpop.f32.mrf.mxu3  ;;  %v1841_v63 = vadd.f32 %v1803_v37, %v1601_v46  ;;  %v1370_v36 = vadd.f32 %v1334_v6, %v3420_v29 }
 0x19b   : > { %v2011_v25 = vadd.f32 %v1973_v44, %v1841_v63  ;;  %v1981_v30 = vpop.f32.mrf.mxu0 }
 0x19d   : > { %v2033_v56 = vadd.f32 %v3514_v5, %v2011_v25 }
 0x19e   : > { %v1566_v23 = vpop.f32.mrf.mxu2 }
 0x19f   : > { %v2051_v55 = vmax.f32 %v2033_v56, 0.0  ;;  %v1602_v20 = vadd.f32 %v1566_v23, %v1370_v36 }
 0x1a0   : > { %v1336_v52 = vpop.f32.mrf.mxu1 }
 0x1a1   : > { %v1811_v59 = vpop.f32.mrf.mxu3  ;;  %v2789_v28 = vpack.c.bf16 %v2051_v55, %v2050_v9  ;;  %v1842_v48 = vadd.f32 %v1806_v12, %v1602_v20  ;;  %v1371_v53 = vadd.f32 %v1336_v52, %v3433_v26 }
 0x1a3   : > { %2825 = vst [vmem:[%s3523_s21 + $0x10] sm:$0xff] %v2789_v28   ;;  %v2012_v32 = vadd.f32 %v1976_v18, %v1842_v48  ;;  %v1983_v29 = vpop.f32.mrf.mxu0 }
 0x1a5   : > { %v2034_v60 = vadd.f32 %v3514_v5, %v2012_v32 }
 0x1a6   : > { %v1568_v13 = vpop.f32.mrf.mxu2 }
 0x1a7   : > { %v1603_v62 = vadd.f32 %v1568_v13, %v1371_v53  ;;  %v2052_v39 = vmax.f32 %v2034_v60, 0.0 }
 0x1a8   : > { %v1339_v21 = vpop.f32.mrf.mxu1 }
 0x1a9   : > { %v1813_v27 = vpop.f32.mrf.mxu3  ;;  %v1843_v40 = vadd.f32 %v1808_v61, %v1603_v62  ;;  %v1372_v3 = vadd.f32 %v1339_v21, %v3438_v57 }
 0x1ab   : > { %v2013_v41 = vadd.f32 %v1978_v7, %v1843_v40  ;;  %v1986_v50 = vpop.f32.mrf.mxu0 }
 0x1ad   : > { %v2035_v44 = vadd.f32 %v3514_v5, %v2013_v41 }
 0x1ae   : > { %v1571_v14 = vpop.f32.mrf.mxu2 }
 0x1af   : > { %v2053_v0 = vmax.f32 %v2035_v44, 0.0  ;;  %v1604_v37 = vadd.f32 %v1571_v14, %v1372_v3 }
 0x1b0   : > { %v1341_v26 = vpop.f32.mrf.mxu1 }
 0x1b1   : > { %v2794_v33 = vpack.c.bf16 %v2053_v0, %v2052_v39  ;;  %v1816_v10 = vpop.f32.mrf.mxu3  ;;  %v1844_v31 = vadd.f32 %v1811_v59, %v1604_v37  ;;  %v1373_v18 = vadd.f32 %v1341_v26, %v3451_v19 }
 0x1b3   : > { %2826 = vst [vmem:[%s3523_s21 + $0x18] sm:$0xff] %v2794_v33   ;;  %v2014_v54 = vadd.f32 %v1981_v30, %v1844_v31  ;;  %v1988_v22 = vpop.f32.mrf.mxu0 }
 0x1b5   : > { %v2036_v57 = vadd.f32 %v3514_v5, %v2014_v54 }
 0x1b6   : > { %v1573_v8 = vpop.f32.mrf.mxu2 }
 0x1b7   : > { %v1605_v15 = vadd.f32 %v1573_v8, %v1373_v18  ;;  %v2054_v11 = vmax.f32 %v2036_v57, 0.0 }
 0x1b8   : > { %v1344_v2 = vpop.f32.mrf.mxu1 }
 0x1b9   : > { %v1845_v42 = vadd.f32 %v1813_v27, %v1605_v15  ;;  %v1818_v12 = vpop.f32.mrf.mxu3  ;;  %v1374_v51 = vadd.f32 %v1344_v2, %v3456_v47 }
 0x1bb   : > { %v2015_v49 = vadd.f32 %v1983_v29, %v1845_v42  ;;  %v1991_v23 = vpop.f32.mrf.mxu0 }
 0x1bd   : > { %v2037_v24 = vadd.f32 %v3514_v5, %v2015_v49 }
 0x1be   : > { %v1576_v16 = vpop.f32.mrf.mxu2 }
 0x1bf   : > { %v2055_v7 = vmax.f32 %v2037_v24, 0.0  ;;  %v1606_v43 = vadd.f32 %v1576_v16, %v1374_v51 }
 0x1c0   : > { %v1346_v19 = vpop.f32.mrf.mxu1 }
 0x1c1   : > { %v2799_v46 = vpack.c.bf16 %v2055_v7, %v2054_v11  ;;  %v1846_v61 = vadd.f32 %v1816_v10, %v1606_v43  ;;  %v1375_v6 = vadd.f32 %v1346_v19, %v3469_v34  ;;  %v1821_v1 = vpop.f32.mrf.mxu3 }
 0x1c3   : > { %2827 = vst [vmem:[%s3523_s21 + $0x20] sm:$0xff] %v2799_v46   ;;  %v2016_v25 = vadd.f32 %v1986_v50, %v1846_v61  ;;  %v1993_v32 = vpop.f32.mrf.mxu0 }
 0x1c5   : > { %v2038_v47 = vadd.f32 %v3514_v5, %v2016_v25 }
 0x1c6   : > { %v1578_v63 = vpop.f32.mrf.mxu2 }
 0x1c7   : > { %v1607_v56 = vadd.f32 %v1578_v63, %v1375_v6  ;;  %v2056_v30 = vmax.f32 %v2038_v47, 0.0 }
 0x1c8   : > { %v1349_v36 = vpop.f32.mrf.mxu1 }
 0x1c9   : > { %v1847_v9 = vadd.f32 %v1818_v12, %v1607_v56  ;;  %v1376_v59 = vadd.f32 %v1349_v36, %v3475_v38  ;;  %v1823_v53 = vpop.f32.mrf.mxu3 }
 0x1cb   : > { %v2017_v55 = vadd.f32 %v1988_v22, %v1847_v9  ;;  %v1996_v14 = vpop.f32.mrf.mxu0 }
 0x1cd   : > { %v2039_v20 = vadd.f32 %v3514_v5, %v2017_v55 }
 0x1ce   : > { %v1581_v52 = vpop.f32.mrf.mxu2 }
 0x1cf   : > { %v2057_v28 = vmax.f32 %v2039_v20, 0.0  ;;  %v1608_v48 = vadd.f32 %v1581_v52, %v1376_v59 }
 0x1d0   : > { %v1351_v34 = vpop.f32.mrf.mxu1 }
 0x1d1   : > { %v2804_v13 = vpack.c.bf16 %v2057_v28, %v2056_v30  ;;  %v1848_v62 = vadd.f32 %v1821_v1, %v1608_v48  ;;  %v1377_v21 = vadd.f32 %v1351_v34, %v3485_v17  ;;  %v1826_v44 = vpop.f32.mrf.mxu3 }
 0x1d3   : > { %2828 = vst [vmem:[%s3523_s21 + $0x28] sm:$0xff] %v2804_v13   ;;  %v2018_v40 = vadd.f32 %v1991_v23, %v1848_v62  ;;  %v1998_v54 = vpop.f32.mrf.mxu0 }
 0x1d5   : > { %v2040_v38 = vadd.f32 %v3514_v5, %v2018_v40 }
 0x1d6   : > { %v1583_v27 = vpop.f32.mrf.mxu2 }
 0x1d7   : > { %v1609_v29 = vadd.f32 %v1583_v27, %v1377_v21  ;;  %v2058_v26 = vmax.f32 %v2040_v38, 0.0 }
 0x1d8   : > { %v1354_v60 = vpop.f32.mrf.mxu1 }
 0x1d9   : > { %v1849_v41 = vadd.f32 %v1823_v53, %v1609_v29  ;;  %v1378_v0 = vadd.f32 %v1354_v60, %v3488_v4  ;;  %v1828_v18 = vpop.f32.mrf.mxu3 }
 0x1db   : > { %v2019_v3 = vadd.f32 %v1993_v32, %v1849_v41 }
 0x1dd   : > { %v2041_v39 = vadd.f32 %v3514_v5, %v2019_v3 }
 0x1de   : > { %v1586_v37 = vpop.f32.mrf.mxu2 }
 0x1df   : > { %v2059_v33 = vmax.f32 %v2041_v39, 0.0  ;;  %v1610_v10 = vadd.f32 %v1586_v37, %v1378_v0 }
 0x1e0   : > { %v1356_v17 = vpop.f32.mrf.mxu1 }
 0x1e1   : > { %v2809_v31 = vpack.c.bf16 %v2059_v33, %v2058_v26  ;;  %v1850_v50 = vadd.f32 %v1826_v44, %v1610_v10  ;;  %v1379_v8 = vadd.f32 %v1356_v17, %v3498_v35  ;;  %v1831_v16 = vpop.f32.mrf.mxu3  ;;  %v2001_v35 = vpop.f32.mrf.mxu0 }
 0x1e3   : > { %2829 = vst [vmem:[%s3523_s21 + $0x30] sm:$0xff] %v2809_v31   ;;  %v2020_v2 = vadd.f32 %v1996_v14, %v1850_v50 }
 0x1e5   : > { %v2042_v4 = vadd.f32 %v3514_v5, %v2020_v2 }
 0x1e6   : > { %v1588_v15 = vpop.f32.mrf.mxu2 }
 0x1e7   : > { %v1611_v42 = vadd.f32 %v1588_v15, %v1379_v8  ;;  %v2060_v11 = vmax.f32 %v2042_v4, 0.0 }
 0x1e8   : > { %v1359_v57 = vpop.f32.mrf.mxu1 }
 0x1e9   : > { %v1851_v49 = vadd.f32 %v1828_v18, %v1611_v42  ;;  %v1380_v51 = vadd.f32 %v1359_v57, %v3501_v45  ;;  %v1833_v56 = vpop.f32.mrf.mxu3  ;;  %v2003_v23 = vpop.f32.mrf.mxu0 }
 0x1eb   : > { %v2021_v12 = vadd.f32 %v1998_v54, %v1851_v49 }
 0x1ed   : > { %v2043_v24 = vadd.f32 %v3514_v5, %v2021_v12 }
 0x1ee   : > { %v1591_v22 = vpop.f32.mrf.mxu2 }
 0x1ef   : > { %v2061_v7 = vmax.f32 %v2043_v24, 0.0  ;;  %v1612_v43 = vadd.f32 %v1591_v22, %v1380_v51 }
 0x1f0   : > { %v1361_v46 = vpop.f32.mrf.mxu1 }
 0x1f1   : > { %v2814_v19 = vpack.c.bf16 %v2061_v7, %v2060_v11  ;;  %v1852_v61 = vadd.f32 %v1831_v16, %v1612_v43  ;;  %v1381_v6 = vadd.f32 %v1361_v46, %v3507_v58 }
 0x1f3   : > { %2830 = vst [vmem:[%s3523_s21 + $0x38] sm:$0xff] %v2814_v19   ;;  %v2022_v1 = vadd.f32 %v2001_v35, %v1852_v61 }
 0x1f5   : > { %v2044_v45 = vadd.f32 %v3514_v5, %v2022_v1 }
 0x1f6   : > { %v1593_v63 = vpop.f32.mrf.mxu2 }
 0x1f7   : > { %v1613_v25 = vadd.f32 %v1593_v63, %v1381_v6  ;;  %v2062_v55 = vmax.f32 %v2044_v45, 0.0 }
 0x1f9   : > { %v1853_v36 = vadd.f32 %v1833_v56, %v1613_v25 }
 0x1fb   : > { %v2023_v9 = vadd.f32 %v2003_v23, %v1853_v36 }
 0x1fd   : > { %v2045_v47 = vadd.f32 %v3514_v5, %v2023_v9 }
 0x1ff   : > { %v2063_v20 = vmax.f32 %v2045_v47, 0.0 }
 0x201   : > { %v2819_v59 = vpack.c.bf16 %v2063_v20, %v2062_v55 }
 0x203   : > { %2831 = vst [vmem:[%s3523_s21 + $0x40] sm:$0xff] %v2819_v59  }
 0x204 PF: > { %s13_s12 = sadd.s32 1, %s2873_s12  }
 0x205   : > { %p10_p4 = scmp.ge.s32.totalorder %s13_s12, 4  }
 0x207   :  { %12 = sbr.rel (!%p10_p4) target bundleno = 1 (0x1), region = 70 }

</bundles_post_ra>
